<compile_context>
chip_gen: v5e
topology: v5e:2x2
jax: 0.10.0
libtpu: 0.0.40
codegen_flags: <defaults>
</compile_context>

<pallas_src>
import functools

import jax
import jax.numpy as jnp
from jax.experimental import pallas as pl
from jax.experimental.pallas import tpu as pltpu

NEG_SLOPE = 0.2
OUT_CHANNELS = 8          # number of classes
IN_CHANNELS = 6           # pos(3) + x(3)  -> cat((pos, x), dim=1)
K_NEIGHBORS = 8


# --------------------------------------------------------------------------
# Tiling helper
# --------------------------------------------------------------------------
def _pick_tm(n, target=256):
    """Largest divisor of n that is <=target, a multiple of 16 (bf16 sublane
    tiling) and keeps the grid length >= 2 (megacore sharding on v7x).
    Falls back to a single full tile (always layout-legal)."""
    for d in range(min(n, target), 15, -1):
        if n % d == 0 and d % 16 == 0 and n // d >= 2:
            return d
    return n


# --------------------------------------------------------------------------
# Pallas kernels
# --------------------------------------------------------------------------
def _edge_conv_kernel(xi_ref, xnf_ref, wc_ref, wb_ref, b_ref, o_ref, *, k):
    """One node-tile of DynamicEdgeConv.

    max_j LeakyReLU([x_i, x_j - x_i] @ W + b)
      = LeakyReLU( x_i @ (Wa - Wb) + b + max_j (x_j @ Wb) )
    (LeakyReLU is monotone, the x_i term is constant over j.)
    """
    # small GEMM on the node features (M = tm)
    hi = jnp.dot(xi_ref[...], wc_ref[...],
                 preferred_element_type=jnp.float32) + b_ref[...]      # [tm, Cout] f32
    # single big GEMM over all neighbor rows (M = tm * k) -> full MXU occupancy
    hj = jnp.dot(xnf_ref[...], wb_ref[...],
                 preferred_element_type=jnp.float32)                   # [tm*k, Cout] f32
    tm, cout = hi.shape
    h = hi + jnp.max(hj.reshape(tm, k, cout), axis=1)                  # max aggregation
    o_ref[...] = jnp.where(h > 0.0, h, NEG_SLOPE * h)                  # LeakyReLU(0.2)


def _fc1_kernel(x1_ref, x2_ref, x3_ref, x4_ref,
                w1_ref, w2_ref, w3_ref, w4_ref, b_ref, o_ref):
    """fc1 with the concat([x1,x2,x3,x4]) fused as 4 partial GEMMs."""
    h = jnp.dot(x1_ref[...], w1_ref[...], preferred_element_type=jnp.float32)
    h = h + jnp.dot(x2_ref[...], w2_ref[...], preferred_element_type=jnp.float32)
    h = h + jnp.dot(x3_ref[...], w3_ref[...], preferred_element_type=jnp.float32)
    h = h + jnp.dot(x4_ref[...], w4_ref[...], preferred_element_type=jnp.float32)
    h = h + b_ref[...]
    o_ref[...] = jnp.where(h > 0.0, h, NEG_SLOPE * h)                  # LeakyReLU(0.2)


def _tail_kernel(x_ref, w0_ref, b0_ref, w1_ref, b1_ref, w2_ref, b2_ref, o_ref):
    """global_max_pool + fc2 (Linear-ReLU, Linear-ReLU, Linear) + log_softmax."""
    h = jnp.max(x_ref[...], axis=1)                                    # [B, 1024] pool
    h = jnp.dot(h, w0_ref[...], preferred_element_type=jnp.float32) + b0_ref[...]
    h = jnp.maximum(h, 0.0)
    h = jnp.dot(h, w1_ref[...], preferred_element_type=jnp.float32) + b1_ref[...]
    h = jnp.maximum(h, 0.0)
    logits = jnp.dot(h, w2_ref[...], preferred_element_type=jnp.float32) + b2_ref[...]
    m = jnp.max(logits, axis=1, keepdims=True)
    lse = jnp.log(jnp.sum(jnp.exp(logits - m), axis=1, keepdims=True)) + m
    o_ref[...] = logits - lse                                          # log_softmax


# --------------------------------------------------------------------------
# Pallas wrappers
# --------------------------------------------------------------------------
def edge_conv(x, idx, w, b, *, tm):
    """DynamicEdgeConv layer.  x: [N, C] f32, idx: [N, k] int32, w: [2C, Cout]."""
    N, C = x.shape
    k = idx.shape[1]
    Cout = w.shape[1]
    assert N % tm == 0

    wa = w[:C]                                   # acts on x_i
    wb = w[C:]                                   # acts on (x_j - x_i)
    wc = (wa - wb).astype(jnp.bfloat16)          # folded:  x_i @ (Wa - Wb)
    wbb = wb.astype(jnp.bfloat16)
    b2 = b.reshape(1, Cout).astype(jnp.float32)

    xb = x.astype(jnp.bfloat16)                  # bf16 MXU operands
    xnf = xb[idx.reshape(-1)]                    # [N*k, C] flat neighbor gather (glue)

    kern = functools.partial(_edge_conv_kernel, k=k)
    return pl.pallas_call(
        kern,
        out_shape=jax.ShapeDtypeStruct((N, Cout), jnp.float32),
        grid=(N // tm,),
        in_specs=[
            pl.BlockSpec((tm, C), lambda i: (i, 0)),
            pl.BlockSpec((tm * k, C), lambda i: (i, 0)),
            pl.BlockSpec((C, Cout), lambda i: (0, 0)),
            pl.BlockSpec((C, Cout), lambda i: (0, 0)),
            pl.BlockSpec((1, Cout), lambda i: (0, 0)),
        ],
        out_specs=pl.BlockSpec((tm, Cout), lambda i: (i, 0)),
        compiler_params=pltpu.CompilerParams(dimension_semantics=("parallel",)),
    )(xb, xnf, wc, wbb, b2)


def fc1_fused(xs, w, b, *, tm):
    """fc1: LeakyReLU(concat(xs) @ w + b) with the concat fused into the kernel."""
    N = xs[0].shape[0]
    Cout = w.shape[1]
    assert N % tm == 0

    xbs, ws, off = [], [], 0
    for xi in xs:
        c = xi.shape[1]
        xbs.append(xi.astype(jnp.bfloat16))
        ws.append(w[off:off + c].astype(jnp.bfloat16))
        off += c
    assert off == w.shape[0]
    b2 = b.reshape(1, Cout).astype(jnp.float32)

    in_specs = [pl.BlockSpec((tm, xi.shape[1]), lambda i: (i, 0)) for xi in xbs]
    in_specs += [pl.BlockSpec(wi.shape, lambda i: (0, 0)) for wi in ws]
    in_specs += [pl.BlockSpec((1, Cout), lambda i: (0, 0))]

    return pl.pallas_call(
        _fc1_kernel,
        out_shape=jax.ShapeDtypeStruct((N, Cout), jnp.float32),
        grid=(N // tm,),
        in_specs=in_specs,
        out_specs=pl.BlockSpec((tm, Cout), lambda i: (i, 0)),
        compiler_params=pltpu.CompilerParams(dimension_semantics=("parallel",)),
    )(*xbs, *ws, b2)


def tail_fused(x, params, *, batch_size, n_per_graph):
    """global_max_pool + fc2 chain + log_softmax in a single kernel launch."""
    N, F = x.shape
    assert N == batch_size * n_per_graph
    xr = x.reshape(batch_size, n_per_graph, F)

    w0, b0 = params["fc2_0"]
    w1, b1 = params["fc2_1"]
    w2, b2 = params["fc2_2"]
    nclass = w2.shape[1]

    in_specs = [pl.BlockSpec(xr.shape, lambda i: (0, 0, 0))]
    for wi, bi in ((w0, b0), (w1, b1), (w2, b2)):
        in_specs.append(pl.BlockSpec(wi.shape, lambda i: (0, 0)))
        in_specs.append(pl.BlockSpec((1, bi.shape[0]), lambda i: (0, 0)))

    return pl.pallas_call(
        _tail_kernel,
        out_shape=jax.ShapeDtypeStruct((batch_size, nclass), jnp.float32),
        grid=(1,),
        in_specs=in_specs,
        out_specs=pl.BlockSpec((batch_size, nclass), lambda i: (0, 0)),
    )(xr, w0, b0.reshape(1, -1), w1, b1.reshape(1, -1), w2, b2.reshape(1, -1))


# --------------------------------------------------------------------------
# Glue: dynamic kNN graph (per-graph block-diagonal, self excluded)
# Assumes `batch` is contiguous-sorted with equal graph sizes:
#   batch == repeat(arange(batch_size), n_per_graph).
# --------------------------------------------------------------------------
def knn_idx(x, batch_size, n_per_graph, k):
    B, n = batch_size, n_per_graph
    xr = x.reshape(B, n, -1)
    sq = jnp.sum(xr * xr, axis=-1)                                   # [B, n]
    d = sq[:, :, None] + sq[:, None, :] - 2.0 * jnp.einsum("bic,bjc->bij", xr, xr)
    d = jnp.where(jnp.eye(n, dtype=bool)[None], jnp.inf, d)          # exclude self
    _, idx = jax.lax.top_k(-d, k)                                    # [B, n, k] local
    idx = idx + (jnp.arange(B, dtype=idx.dtype) * n)[:, None, None]  # -> global ids
    return idx.reshape(B * n, k).astype(jnp.int32)


# --------------------------------------------------------------------------
# Parameter init (deterministic, PyTorch-Linear-style uniform)
# --------------------------------------------------------------------------
def init_linear_params(key, cin, cout):
    kw, kb = jax.random.split(key)
    bound = 1.0 / jnp.sqrt(jnp.float32(cin))
    w = jax.random.uniform(kw, (cin, cout), jnp.float32, -bound, bound)
    b = jax.random.uniform(kb, (cout,), jnp.float32, -bound, bound)
    return w, b


def init_params(key):
    ks = jax.random.split(key, 8)
    return {
        "conv1": init_linear_params(ks[0], 2 * IN_CHANNELS, 64),
        "conv2": init_linear_params(ks[1], 2 * 64, 64),
        "conv3": init_linear_params(ks[2], 2 * 64, 128),
        "conv4": init_linear_params(ks[3], 2 * 128, 256),
        "fc1":   init_linear_params(ks[4], 64 + 64 + 128 + 256, 1024),
        "fc2_0": init_linear_params(ks[5], 1024, 512),
        "fc2_1": init_linear_params(ks[6], 512, 256),
        "fc2_2": init_linear_params(ks[7], 256, OUT_CHANNELS),
    }


# --------------------------------------------------------------------------
# Full forward pass (mirrors Net.forward)
# --------------------------------------------------------------------------
def net_forward(params, pos, x, *, k, n_per_graph, batch_size, tm=None):
    N = batch_size * n_per_graph
    assert pos.shape[0] == N and n_per_graph > k
    if tm is None:
        tm = _pick_tm(N)

    x0 = jnp.concatenate([pos, x], axis=1).astype(jnp.float32)       # [N, 6]

    idx = knn_idx(x0, batch_size, n_per_graph, k)
    x1 = edge_conv(x0, idx, *params["conv1"], tm=tm)                 # [N, 64]
    idx = knn_idx(x1, batch_size, n_per_graph, k)
    x2 = edge_conv(x1, idx, *params["conv2"], tm=tm)                 # [N, 64]
    idx = knn_idx(x2, batch_size, n_per_graph, k)
    x3 = edge_conv(x2, idx, *params["conv3"], tm=tm)                 # [N, 128]
    idx = knn_idx(x3, batch_size, n_per_graph, k)
    x4 = edge_conv(x3, idx, *params["conv4"], tm=tm)                 # [N, 256]

    out = fc1_fused([x1, x2, x3, x4], *params["fc1"], tm=tm)         # [N, 1024]
    # pool + fc2 (ReLU hidden, plain last) + log_softmax, single launch
    return tail_fused(out, params, batch_size=batch_size,
                      n_per_graph=n_per_graph)                       # [B, out]


# --------------------------------------------------------------------------
if __name__ == "__main__":
    key = jax.random.PRNGKey(0)
    kp, kpos, kfeat = jax.random.split(key, 3)

    batch_size = 2
    n_per_graph = 32
    n_total = batch_size * n_per_graph

    pos = jax.random.normal(kpos, (n_total, 3), jnp.float32)
    feat = jax.random.normal(kfeat, (n_total, 3), jnp.float32)
    batch = jnp.repeat(jnp.arange(batch_size, dtype=jnp.int32), n_per_graph)
    # the block-diagonal kNN assumes a contiguous, sorted batch vector
    assert bool(jnp.all(batch == jnp.repeat(
        jnp.arange(batch_size, dtype=jnp.int32), n_per_graph)))

    params = init_params(kp)

    fwd = jax.jit(functools.partial(
        net_forward, k=K_NEIGHBORS, n_per_graph=n_per_graph,
        batch_size=batch_size))
    out = fwd(params, pos, feat)
    out = jax.block_until_ready(out)

    assert out.shape == (batch_size, OUT_CHANNELS)
    assert bool(jnp.all(jnp.isfinite(out)))
    # rows of log_softmax must sum to ~1 in prob space
    assert bool(jnp.allclose(jnp.sum(jnp.exp(out), axis=1), 1.0, atol=1e-4))
    print("KERNEL_OK")
</pallas_src>

<mosaic_0001>
module attributes {stable_mosaic.version = 11 : i64} {
  func.func @_edge_conv_kernel(%arg0: i32, %arg1: memref<32x6xbf16, #tpu.memory_space<vmem>>, %arg2: memref<256x6xbf16, #tpu.memory_space<vmem>>, %arg3: memref<6x64xbf16, #tpu.memory_space<vmem>>, %arg4: memref<6x64xbf16, #tpu.memory_space<vmem>>, %arg5: memref<1x64xf32, #tpu.memory_space<vmem>>, %arg6: memref<32x64xf32, #tpu.memory_space<vmem>>) attributes {dimension_semantics = [#tpu.dimension_semantics<parallel>], iteration_bounds = array<i64: 2>, scalar_prefetch = 0 : i64, scratch_operands = 0 : i64, tpu.core_type = #tpu.core_type<tc>, window_params = [{transform_indices = @transform_0, window_bounds = array<i64: 32, 6>}, {transform_indices = @transform_1, window_bounds = array<i64: 256, 6>}, {pipeline_mode = #tpu.pipeline_mode<synchronous>, transform_indices = @transform_2, window_bounds = array<i64: 6, 64>}, {pipeline_mode = #tpu.pipeline_mode<synchronous>, transform_indices = @transform_3, window_bounds = array<i64: 6, 64>}, {pipeline_mode = #tpu.pipeline_mode<synchronous>, transform_indices = @transform_4, window_bounds = array<i64: 1, 64>}, {transform_indices = @transform_5, window_bounds = array<i64: 32, 64>}]} {
    %c0 = arith.constant 0 : index
    %c0_0 = arith.constant 0 : index
    %0 = vector.load %arg1[%c0, %c0_0] : memref<32x6xbf16, #tpu.memory_space<vmem>>, vector<32x6xbf16>
    %c0_1 = arith.constant 0 : index
    %c0_2 = arith.constant 0 : index
    %1 = vector.load %arg3[%c0_1, %c0_2] : memref<6x64xbf16, #tpu.memory_space<vmem>>, vector<6x64xbf16>
    %cst = arith.constant dense<0.000000e+00> : vector<32x64xf32>
    %2 = tpu.matmul %0, %1, %cst {dimension_numbers = #tpu.dot_dimension_numbers<[1], [0], [0], [1], [0, 0, 1, 1], [], []>} : vector<32x6xbf16>, vector<6x64xbf16>, vector<32x64xf32> -> vector<32x64xf32>
    %c0_3 = arith.constant 0 : index
    %c0_4 = arith.constant 0 : index
    %3 = vector.load %arg5[%c0_3, %c0_4] : memref<1x64xf32, #tpu.memory_space<vmem>>, vector<1x64xf32>
    %4 = vector.broadcast %3 : vector<1x64xf32> to vector<32x64xf32>
    %5 = arith.addf %2, %4 : vector<32x64xf32>
    %c0_5 = arith.constant 0 : index
    %c0_6 = arith.constant 0 : index
    %6 = vector.load %arg2[%c0_5, %c0_6] : memref<256x6xbf16, #tpu.memory_space<vmem>>, vector<256x6xbf16>
    %c0_7 = arith.constant 0 : index
    %c0_8 = arith.constant 0 : index
    %7 = vector.load %arg4[%c0_7, %c0_8] : memref<6x64xbf16, #tpu.memory_space<vmem>>, vector<6x64xbf16>
    %cst_9 = arith.constant dense<0.000000e+00> : vector<256x64xf32>
    %8 = tpu.matmul %6, %7, %cst_9 {dimension_numbers = #tpu.dot_dimension_numbers<[1], [0], [0], [1], [0, 0, 1, 1], [], []>} : vector<256x6xbf16>, vector<6x64xbf16>, vector<256x64xf32> -> vector<256x64xf32>
    %9 = vector.shape_cast %8 : vector<256x64xf32> to vector<32x8x64xf32>
    %cst_10 = arith.constant dense<0xFF800000> : vector<32x64xf32>
    %10 = vector.multi_reduction <maximumf>, %9, %cst_10 [1] : vector<32x8x64xf32> to vector<32x64xf32>
    %11 = arith.addf %5, %10 : vector<32x64xf32>
    %cst_11 = arith.constant 0.000000e+00 : f32
    %12 = vector.broadcast %cst_11 : f32 to vector<32x64xf32>
    %13 = arith.cmpf ogt, %11, %12 : vector<32x64xf32>
    %cst_12 = arith.constant 2.000000e-01 : f32
    %14 = vector.broadcast %cst_12 : f32 to vector<32x64xf32>
    %15 = arith.mulf %14, %11 : vector<32x64xf32>
    %16 = arith.select %13, %11, %15 : vector<32x64xi1>, vector<32x64xf32>
    %c0_13 = arith.constant 0 : index
    %c0_14 = arith.constant 0 : index
    %17 = vector.load %arg6[%c0_13, %c0_14] : memref<32x64xf32, #tpu.memory_space<vmem>>, vector<32x64xf32>
    tpu.vector_store %arg6[%c0_13, %c0_14], %16 {strides = array<i32>} : memref<32x64xf32, #tpu.memory_space<vmem>>, vector<32x64xf32>,
    return
  }
  func.func @transform_0(%arg0: i32) -> (i32, i32) {
    %c0_i32 = arith.constant 0 : i32
    %c0_i32_0 = arith.constant 0 : i32
    return %arg0, %c0_i32 : i32, i32
  }
  func.func @transform_1(%arg0: i32) -> (i32, i32) {
    %c0_i32 = arith.constant 0 : i32
    %c0_i32_0 = arith.constant 0 : i32
    return %arg0, %c0_i32 : i32, i32
  }
  func.func @transform_2(%arg0: i32) -> (i32, i32) {
    %c0_i32 = arith.constant 0 : i32
    %c0_i32_0 = arith.constant 0 : i32
    %c0_i32_1 = arith.constant 0 : i32
    return %c0_i32, %c0_i32_0 : i32, i32
  }
  func.func @transform_3(%arg0: i32) -> (i32, i32) {
    %c0_i32 = arith.constant 0 : i32
    %c0_i32_0 = arith.constant 0 : i32
    %c0_i32_1 = arith.constant 0 : i32
    return %c0_i32, %c0_i32_0 : i32, i32
  }
  func.func @transform_4(%arg0: i32) -> (i32, i32) {
    %c0_i32 = arith.constant 0 : i32
    %c0_i32_0 = arith.constant 0 : i32
    %c0_i32_1 = arith.constant 0 : i32
    return %c0_i32, %c0_i32_0 : i32, i32
  }
  func.func @transform_5(%arg0: i32) -> (i32, i32) {
    %c0_i32 = arith.constant 0 : i32
    %c0_i32_0 = arith.constant 0 : i32
    return %arg0, %c0_i32 : i32, i32
  }
}

module attributes {stable_mosaic.version = 11 : i64} {
  func.func @_edge_conv_kernel(%arg0: i32, %arg1: memref<32x64xbf16, #tpu.memory_space<vmem>>, %arg2: memref<256x64xbf16, #tpu.memory_space<vmem>>, %arg3: memref<64x64xbf16, #tpu.memory_space<vmem>>, %arg4: memref<64x64xbf16, #tpu.memory_space<vmem>>, %arg5: memref<1x64xf32, #tpu.memory_space<vmem>>, %arg6: memref<32x64xf32, #tpu.memory_space<vmem>>) attributes {dimension_semantics = [#tpu.dimension_semantics<parallel>], iteration_bounds = array<i64: 2>, scalar_prefetch = 0 : i64, scratch_operands = 0 : i64, tpu.core_type = #tpu.core_type<tc>, window_params = [{transform_indices = @transform_0, window_bounds = array<i64: 32, 64>}, {transform_indices = @transform_1, window_bounds = array<i64: 256, 64>}, {pipeline_mode = #tpu.pipeline_mode<synchronous>, transform_indices = @transform_2, window_bounds = array<i64: 64, 64>}, {pipeline_mode = #tpu.pipeline_mode<synchronous>, transform_indices = @transform_3, window_bounds = array<i64: 64, 64>}, {pipeline_mode = #tpu.pipeline_mode<synchronous>, transform_indices = @transform_4, window_bounds = array<i64: 1, 64>}, {transform_indices = @transform_5, window_bounds = array<i64: 32, 64>}]} {
    %c0 = arith.constant 0 : index
    %c0_0 = arith.constant 0 : index
    %0 = vector.load %arg1[%c0, %c0_0] : memref<32x64xbf16, #tpu.memory_space<vmem>>, vector<32x64xbf16>
    %c0_1 = arith.constant 0 : index
    %c0_2 = arith.constant 0 : index
    %1 = vector.load %arg3[%c0_1, %c0_2] : memref<64x64xbf16, #tpu.memory_space<vmem>>, vector<64x64xbf16>
    %cst = arith.constant dense<0.000000e+00> : vector<32x64xf32>
    %2 = tpu.matmul %0, %1, %cst {dimension_numbers = #tpu.dot_dimension_numbers<[1], [0], [0], [1], [0, 0, 1, 1], [], []>} : vector<32x64xbf16>, vector<64x64xbf16>, vector<32x64xf32> -> vector<32x64xf32>
    %c0_3 = arith.constant 0 : index
    %c0_4 = arith.constant 0 : index
    %3 = vector.load %arg5[%c0_3, %c0_4] : memref<1x64xf32, #tpu.memory_space<vmem>>, vector<1x64xf32>
    %4 = vector.broadcast %3 : vector<1x64xf32> to vector<32x64xf32>
    %5 = arith.addf %2, %4 : vector<32x64xf32>
    %c0_5 = arith.constant 0 : index
    %c0_6 = arith.constant 0 : index
    %6 = vector.load %arg2[%c0_5, %c0_6] : memref<256x64xbf16, #tpu.memory_space<vmem>>, vector<256x64xbf16>
    %c0_7 = arith.constant 0 : index
    %c0_8 = arith.constant 0 : index
    %7 = vector.load %arg4[%c0_7, %c0_8] : memref<64x64xbf16, #tpu.memory_space<vmem>>, vector<64x64xbf16>
    %cst_9 = arith.constant dense<0.000000e+00> : vector<256x64xf32>
    %8 = tpu.matmul %6, %7, %cst_9 {dimension_numbers = #tpu.dot_dimension_numbers<[1], [0], [0], [1], [0, 0, 1, 1], [], []>} : vector<256x64xbf16>, vector<64x64xbf16>, vector<256x64xf32> -> vector<256x64xf32>
    %9 = vector.shape_cast %8 : vector<256x64xf32> to vector<32x8x64xf32>
    %cst_10 = arith.constant dense<0xFF800000> : vector<32x64xf32>
    %10 = vector.multi_reduction <maximumf>, %9, %cst_10 [1] : vector<32x8x64xf32> to vector<32x64xf32>
    %11 = arith.addf %5, %10 : vector<32x64xf32>
    %cst_11 = arith.constant 0.000000e+00 : f32
    %12 = vector.broadcast %cst_11 : f32 to vector<32x64xf32>
    %13 = arith.cmpf ogt, %11, %12 : vector<32x64xf32>
    %cst_12 = arith.constant 2.000000e-01 : f32
    %14 = vector.broadcast %cst_12 : f32 to vector<32x64xf32>
    %15 = arith.mulf %14, %11 : vector<32x64xf32>
    %16 = arith.select %13, %11, %15 : vector<32x64xi1>, vector<32x64xf32>
    %c0_13 = arith.constant 0 : index
    %c0_14 = arith.constant 0 : index
    %17 = vector.load %arg6[%c0_13, %c0_14] : memref<32x64xf32, #tpu.memory_space<vmem>>, vector<32x64xf32>
    tpu.vector_store %arg6[%c0_13, %c0_14], %16 {strides = array<i32>} : memref<32x64xf32, #tpu.memory_space<vmem>>, vector<32x64xf32>,
    return
  }
  func.func @transform_0(%arg0: i32) -> (i32, i32) {
    %c0_i32 = arith.constant 0 : i32
    %c0_i32_0 = arith.constant 0 : i32
    return %arg0, %c0_i32 : i32, i32
  }
  func.func @transform_1(%arg0: i32) -> (i32, i32) {
    %c0_i32 = arith.constant 0 : i32
    %c0_i32_0 = arith.constant 0 : i32
    return %arg0, %c0_i32 : i32, i32
  }
  func.func @transform_2(%arg0: i32) -> (i32, i32) {
    %c0_i32 = arith.constant 0 : i32
    %c0_i32_0 = arith.constant 0 : i32
    %c0_i32_1 = arith.constant 0 : i32
    return %c0_i32, %c0_i32_0 : i32, i32
  }
  func.func @transform_3(%arg0: i32) -> (i32, i32) {
    %c0_i32 = arith.constant 0 : i32
    %c0_i32_0 = arith.constant 0 : i32
    %c0_i32_1 = arith.constant 0 : i32
    return %c0_i32, %c0_i32_0 : i32, i32
  }
  func.func @transform_4(%arg0: i32) -> (i32, i32) {
    %c0_i32 = arith.constant 0 : i32
    %c0_i32_0 = arith.constant 0 : i32
    %c0_i32_1 = arith.constant 0 : i32
    return %c0_i32, %c0_i32_0 : i32, i32
  }
  func.func @transform_5(%arg0: i32) -> (i32, i32) {
    %c0_i32 = arith.constant 0 : i32
    %c0_i32_0 = arith.constant 0 : i32
    return %arg0, %c0_i32 : i32, i32
  }
}

module attributes {stable_mosaic.version = 11 : i64} {
  func.func @_edge_conv_kernel(%arg0: i32, %arg1: memref<32x64xbf16, #tpu.memory_space<vmem>>, %arg2: memref<256x64xbf16, #tpu.memory_space<vmem>>, %arg3: memref<64x128xbf16, #tpu.memory_space<vmem>>, %arg4: memref<64x128xbf16, #tpu.memory_space<vmem>>, %arg5: memref<1x128xf32, #tpu.memory_space<vmem>>, %arg6: memref<32x128xf32, #tpu.memory_space<vmem>>) attributes {dimension_semantics = [#tpu.dimension_semantics<parallel>], iteration_bounds = array<i64: 2>, scalar_prefetch = 0 : i64, scratch_operands = 0 : i64, tpu.core_type = #tpu.core_type<tc>, window_params = [{transform_indices = @transform_0, window_bounds = array<i64: 32, 64>}, {transform_indices = @transform_1, window_bounds = array<i64: 256, 64>}, {pipeline_mode = #tpu.pipeline_mode<synchronous>, transform_indices = @transform_2, window_bounds = array<i64: 64, 128>}, {pipeline_mode = #tpu.pipeline_mode<synchronous>, transform_indices = @transform_3, window_bounds = array<i64: 64, 128>}, {pipeline_mode = #tpu.pipeline_mode<synchronous>, transform_indices = @transform_4, window_bounds = array<i64: 1, 128>}, {transform_indices = @transform_5, window_bounds = array<i64: 32, 128>}]} {
    %c0 = arith.constant 0 : index
    %c0_0 = arith.constant 0 : index
    %0 = vector.load %arg1[%c0, %c0_0] : memref<32x64xbf16, #tpu.memory_space<vmem>>, vector<32x64xbf16>
    %c0_1 = arith.constant 0 : index
    %c0_2 = arith.constant 0 : index
    %1 = vector.load %arg3[%c0_1, %c0_2] : memref<64x128xbf16, #tpu.memory_space<vmem>>, vector<64x128xbf16>
    %cst = arith.constant dense<0.000000e+00> : vector<32x128xf32>
    %2 = tpu.matmul %0, %1, %cst {dimension_numbers = #tpu.dot_dimension_numbers<[1], [0], [0], [1], [0, 0, 1, 1], [], []>} : vector<32x64xbf16>, vector<64x128xbf16>, vector<32x128xf32> -> vector<32x128xf32>
    %c0_3 = arith.constant 0 : index
    %c0_4 = arith.constant 0 : index
    %3 = vector.load %arg5[%c0_3, %c0_4] : memref<1x128xf32, #tpu.memory_space<vmem>>, vector<1x128xf32>
    %4 = vector.broadcast %3 : vector<1x128xf32> to vector<32x128xf32>
    %5 = arith.addf %2, %4 : vector<32x128xf32>
    %c0_5 = arith.constant 0 : index
    %c0_6 = arith.constant 0 : index
    %6 = vector.load %arg2[%c0_5, %c0_6] : memref<256x64xbf16, #tpu.memory_space<vmem>>, vector<256x64xbf16>
    %c0_7 = arith.constant 0 : index
    %c0_8 = arith.constant 0 : index
    %7 = vector.load %arg4[%c0_7, %c0_8] : memref<64x128xbf16, #tpu.memory_space<vmem>>, vector<64x128xbf16>
    %cst_9 = arith.constant dense<0.000000e+00> : vector<256x128xf32>
    %8 = tpu.matmul %6, %7, %cst_9 {dimension_numbers = #tpu.dot_dimension_numbers<[1], [0], [0], [1], [0, 0, 1, 1], [], []>} : vector<256x64xbf16>, vector<64x128xbf16>, vector<256x128xf32> -> vector<256x128xf32>
    %9 = vector.shape_cast %8 : vector<256x128xf32> to vector<32x8x128xf32>
    %cst_10 = arith.constant dense<0xFF800000> : vector<32x128xf32>
    %10 = vector.multi_reduction <maximumf>, %9, %cst_10 [1] : vector<32x8x128xf32> to vector<32x128xf32>
    %11 = arith.addf %5, %10 : vector<32x128xf32>
    %cst_11 = arith.constant 0.000000e+00 : f32
    %12 = vector.broadcast %cst_11 : f32 to vector<32x128xf32>
    %13 = arith.cmpf ogt, %11, %12 : vector<32x128xf32>
    %cst_12 = arith.constant 2.000000e-01 : f32
    %14 = vector.broadcast %cst_12 : f32 to vector<32x128xf32>
    %15 = arith.mulf %14, %11 : vector<32x128xf32>
    %16 = arith.select %13, %11, %15 : vector<32x128xi1>, vector<32x128xf32>
    %c0_13 = arith.constant 0 : index
    %c0_14 = arith.constant 0 : index
    %17 = vector.load %arg6[%c0_13, %c0_14] : memref<32x128xf32, #tpu.memory_space<vmem>>, vector<32x128xf32>
    tpu.vector_store %arg6[%c0_13, %c0_14], %16 {strides = array<i32>} : memref<32x128xf32, #tpu.memory_space<vmem>>, vector<32x128xf32>,
    return
  }
  func.func @transform_0(%arg0: i32) -> (i32, i32) {
    %c0_i32 = arith.constant 0 : i32
    %c0_i32_0 = arith.constant 0 : i32
    return %arg0, %c0_i32 : i32, i32
  }
  func.func @transform_1(%arg0: i32) -> (i32, i32) {
    %c0_i32 = arith.constant 0 : i32
    %c0_i32_0 = arith.constant 0 : i32
    return %arg0, %c0_i32 : i32, i32
  }
  func.func @transform_2(%arg0: i32) -> (i32, i32) {
    %c0_i32 = arith.constant 0 : i32
    %c0_i32_0 = arith.constant 0 : i32
    %c0_i32_1 = arith.constant 0 : i32
    return %c0_i32, %c0_i32_0 : i32, i32
  }
  func.func @transform_3(%arg0: i32) -> (i32, i32) {
    %c0_i32 = arith.constant 0 : i32
    %c0_i32_0 = arith.constant 0 : i32
    %c0_i32_1 = arith.constant 0 : i32
    return %c0_i32, %c0_i32_0 : i32, i32
  }
  func.func @transform_4(%arg0: i32) -> (i32, i32) {
    %c0_i32 = arith.constant 0 : i32
    %c0_i32_0 = arith.constant 0 : i32
    %c0_i32_1 = arith.constant 0 : i32
    return %c0_i32, %c0_i32_0 : i32, i32
  }
  func.func @transform_5(%arg0: i32) -> (i32, i32) {
    %c0_i32 = arith.constant 0 : i32
    %c0_i32_0 = arith.constant 0 : i32
    return %arg0, %c0_i32 : i32, i32
  }
}

module attributes {stable_mosaic.version = 11 : i64} {
  func.func @_edge_conv_kernel(%arg0: i32, %arg1: memref<32x128xbf16, #tpu.memory_space<vmem>>, %arg2: memref<256x128xbf16, #tpu.memory_space<vmem>>, %arg3: memref<128x256xbf16, #tpu.memory_space<vmem>>, %arg4: memref<128x256xbf16, #tpu.memory_space<vmem>>, %arg5: memref<1x256xf32, #tpu.memory_space<vmem>>, %arg6: memref<32x256xf32, #tpu.memory_space<vmem>>) attributes {dimension_semantics = [#tpu.dimension_semantics<parallel>], iteration_bounds = array<i64: 2>, scalar_prefetch = 0 : i64, scratch_operands = 0 : i64, tpu.core_type = #tpu.core_type<tc>, window_params = [{transform_indices = @transform_0, window_bounds = array<i64: 32, 128>}, {transform_indices = @transform_1, window_bounds = array<i64: 256, 128>}, {pipeline_mode = #tpu.pipeline_mode<synchronous>, transform_indices = @transform_2, window_bounds = array<i64: 128, 256>}, {pipeline_mode = #tpu.pipeline_mode<synchronous>, transform_indices = @transform_3, window_bounds = array<i64: 128, 256>}, {pipeline_mode = #tpu.pipeline_mode<synchronous>, transform_indices = @transform_4, window_bounds = array<i64: 1, 256>}, {transform_indices = @transform_5, window_bounds = array<i64: 32, 256>}]} {
    %c0 = arith.constant 0 : index
    %c0_0 = arith.constant 0 : index
    %0 = vector.load %arg1[%c0, %c0_0] : memref<32x128xbf16, #tpu.memory_space<vmem>>, vector<32x128xbf16>
    %c0_1 = arith.constant 0 : index
    %c0_2 = arith.constant 0 : index
    %1 = vector.load %arg3[%c0_1, %c0_2] : memref<128x256xbf16, #tpu.memory_space<vmem>>, vector<128x256xbf16>
    %cst = arith.constant dense<0.000000e+00> : vector<32x256xf32>
    %2 = tpu.matmul %0, %1, %cst {dimension_numbers = #tpu.dot_dimension_numbers<[1], [0], [0], [1], [0, 0, 1, 1], [], []>} : vector<32x128xbf16>, vector<128x256xbf16>, vector<32x256xf32> -> vector<32x256xf32>
    %c0_3 = arith.constant 0 : index
    %c0_4 = arith.constant 0 : index
    %3 = vector.load %arg5[%c0_3, %c0_4] : memref<1x256xf32, #tpu.memory_space<vmem>>, vector<1x256xf32>
    %4 = vector.broadcast %3 : vector<1x256xf32> to vector<32x256xf32>
    %5 = arith.addf %2, %4 : vector<32x256xf32>
    %c0_5 = arith.constant 0 : index
    %c0_6 = arith.constant 0 : index
    %6 = vector.load %arg2[%c0_5, %c0_6] : memref<256x128xbf16, #tpu.memory_space<vmem>>, vector<256x128xbf16>
    %c0_7 = arith.constant 0 : index
    %c0_8 = arith.constant 0 : index
    %7 = vector.load %arg4[%c0_7, %c0_8] : memref<128x256xbf16, #tpu.memory_space<vmem>>, vector<128x256xbf16>
    %cst_9 = arith.constant dense<0.000000e+00> : vector<256x256xf32>
    %8 = tpu.matmul %6, %7, %cst_9 {dimension_numbers = #tpu.dot_dimension_numbers<[1], [0], [0], [1], [0, 0, 1, 1], [], []>} : vector<256x128xbf16>, vector<128x256xbf16>, vector<256x256xf32> -> vector<256x256xf32>
    %9 = vector.shape_cast %8 : vector<256x256xf32> to vector<32x8x256xf32>
    %cst_10 = arith.constant dense<0xFF800000> : vector<32x256xf32>
    %10 = vector.multi_reduction <maximumf>, %9, %cst_10 [1] : vector<32x8x256xf32> to vector<32x256xf32>
    %11 = arith.addf %5, %10 : vector<32x256xf32>
    %cst_11 = arith.constant 0.000000e+00 : f32
    %12 = vector.broadcast %cst_11 : f32 to vector<32x256xf32>
    %13 = arith.cmpf ogt, %11, %12 : vector<32x256xf32>
    %cst_12 = arith.constant 2.000000e-01 : f32
    %14 = vector.broadcast %cst_12 : f32 to vector<32x256xf32>
    %15 = arith.mulf %14, %11 : vector<32x256xf32>
    %16 = arith.select %13, %11, %15 : vector<32x256xi1>, vector<32x256xf32>
    %c0_13 = arith.constant 0 : index
    %c0_14 = arith.constant 0 : index
    %17 = vector.load %arg6[%c0_13, %c0_14] : memref<32x256xf32, #tpu.memory_space<vmem>>, vector<32x256xf32>
    tpu.vector_store %arg6[%c0_13, %c0_14], %16 {strides = array<i32>} : memref<32x256xf32, #tpu.memory_space<vmem>>, vector<32x256xf32>,
    return
  }
  func.func @transform_0(%arg0: i32) -> (i32, i32) {
    %c0_i32 = arith.constant 0 : i32
    %c0_i32_0 = arith.constant 0 : i32
    return %arg0, %c0_i32 : i32, i32
  }
  func.func @transform_1(%arg0: i32) -> (i32, i32) {
    %c0_i32 = arith.constant 0 : i32
    %c0_i32_0 = arith.constant 0 : i32
    return %arg0, %c0_i32 : i32, i32
  }
  func.func @transform_2(%arg0: i32) -> (i32, i32) {
    %c0_i32 = arith.constant 0 : i32
    %c0_i32_0 = arith.constant 0 : i32
    %c0_i32_1 = arith.constant 0 : i32
    return %c0_i32, %c0_i32_0 : i32, i32
  }
  func.func @transform_3(%arg0: i32) -> (i32, i32) {
    %c0_i32 = arith.constant 0 : i32
    %c0_i32_0 = arith.constant 0 : i32
    %c0_i32_1 = arith.constant 0 : i32
    return %c0_i32, %c0_i32_0 : i32, i32
  }
  func.func @transform_4(%arg0: i32) -> (i32, i32) {
    %c0_i32 = arith.constant 0 : i32
    %c0_i32_0 = arith.constant 0 : i32
    %c0_i32_1 = arith.constant 0 : i32
    return %c0_i32, %c0_i32_0 : i32, i32
  }
  func.func @transform_5(%arg0: i32) -> (i32, i32) {
    %c0_i32 = arith.constant 0 : i32
    %c0_i32_0 = arith.constant 0 : i32
    return %arg0, %c0_i32 : i32, i32
  }
}

module attributes {stable_mosaic.version = 11 : i64} {
  func.func @_fc1_kernel(%arg0: i32, %arg1: memref<32x64xbf16, #tpu.memory_space<vmem>>, %arg2: memref<32x64xbf16, #tpu.memory_space<vmem>>, %arg3: memref<32x128xbf16, #tpu.memory_space<vmem>>, %arg4: memref<32x256xbf16, #tpu.memory_space<vmem>>, %arg5: memref<64x1024xbf16, #tpu.memory_space<vmem>>, %arg6: memref<64x1024xbf16, #tpu.memory_space<vmem>>, %arg7: memref<128x1024xbf16, #tpu.memory_space<vmem>>, %arg8: memref<256x1024xbf16, #tpu.memory_space<vmem>>, %arg9: memref<1x1024xf32, #tpu.memory_space<vmem>>, %arg10: memref<32x1024xf32, #tpu.memory_space<vmem>>) attributes {dimension_semantics = [#tpu.dimension_semantics<parallel>], iteration_bounds = array<i64: 2>, scalar_prefetch = 0 : i64, scratch_operands = 0 : i64, tpu.core_type = #tpu.core_type<tc>, window_params = [{transform_indices = @transform_0, window_bounds = array<i64: 32, 64>}, {transform_indices = @transform_1, window_bounds = array<i64: 32, 64>}, {transform_indices = @transform_2, window_bounds = array<i64: 32, 128>}, {transform_indices = @transform_3, window_bounds = array<i64: 32, 256>}, {pipeline_mode = #tpu.pipeline_mode<synchronous>, transform_indices = @transform_4, window_bounds = array<i64: 64, 1024>}, {pipeline_mode = #tpu.pipeline_mode<synchronous>, transform_indices = @transform_5, window_bounds = array<i64: 64, 1024>}, {pipeline_mode = #tpu.pipeline_mode<synchronous>, transform_indices = @transform_6, window_bounds = array<i64: 128, 1024>}, {pipeline_mode = #tpu.pipeline_mode<synchronous>, transform_indices = @transform_7, window_bounds = array<i64: 256, 1024>}, {pipeline_mode = #tpu.pipeline_mode<synchronous>, transform_indices = @transform_8, window_bounds = array<i64: 1, 1024>}, {transform_indices = @transform_9, window_bounds = array<i64: 32, 1024>}]} {
    %c0 = arith.constant 0 : index
    %c0_0 = arith.constant 0 : index
    %0 = vector.load %arg1[%c0, %c0_0] : memref<32x64xbf16, #tpu.memory_space<vmem>>, vector<32x64xbf16>
    %c0_1 = arith.constant 0 : index
    %c0_2 = arith.constant 0 : index
    %1 = vector.load %arg5[%c0_1, %c0_2] : memref<64x1024xbf16, #tpu.memory_space<vmem>>, vector<64x1024xbf16>
    %cst = arith.constant dense<0.000000e+00> : vector<32x1024xf32>
    %2 = tpu.matmul %0, %1, %cst {dimension_numbers = #tpu.dot_dimension_numbers<[1], [0], [0], [1], [0, 0, 1, 1], [], []>} : vector<32x64xbf16>, vector<64x1024xbf16>, vector<32x1024xf32> -> vector<32x1024xf32>
    %c0_3 = arith.constant 0 : index
    %c0_4 = arith.constant 0 : index
    %3 = vector.load %arg2[%c0_3, %c0_4] : memref<32x64xbf16, #tpu.memory_space<vmem>>, vector<32x64xbf16>
    %c0_5 = arith.constant 0 : index
    %c0_6 = arith.constant 0 : index
    %4 = vector.load %arg6[%c0_5, %c0_6] : memref<64x1024xbf16, #tpu.memory_space<vmem>>, vector<64x1024xbf16>
    %cst_7 = arith.constant dense<0.000000e+00> : vector<32x1024xf32>
    %5 = tpu.matmul %3, %4, %cst_7 {dimension_numbers = #tpu.dot_dimension_numbers<[1], [0], [0], [1], [0, 0, 1, 1], [], []>} : vector<32x64xbf16>, vector<64x1024xbf16>, vector<32x1024xf32> -> vector<32x1024xf32>
    %6 = arith.addf %2, %5 : vector<32x1024xf32>
    %c0_8 = arith.constant 0 : index
    %c0_9 = arith.constant 0 : index
    %7 = vector.load %arg3[%c0_8, %c0_9] : memref<32x128xbf16, #tpu.memory_space<vmem>>, vector<32x128xbf16>
    %c0_10 = arith.constant 0 : index
    %c0_11 = arith.constant 0 : index
    %8 = vector.load %arg7[%c0_10, %c0_11] : memref<128x1024xbf16, #tpu.memory_space<vmem>>, vector<128x1024xbf16>
    %cst_12 = arith.constant dense<0.000000e+00> : vector<32x1024xf32>
    %9 = tpu.matmul %7, %8, %cst_12 {dimension_numbers = #tpu.dot_dimension_numbers<[1], [0], [0], [1], [0, 0, 1, 1], [], []>} : vector<32x128xbf16>, vector<128x1024xbf16>, vector<32x1024xf32> -> vector<32x1024xf32>
    %10 = arith.addf %6, %9 : vector<32x1024xf32>
    %c0_13 = arith.constant 0 : index
    %c0_14 = arith.constant 0 : index
    %11 = vector.load %arg4[%c0_13, %c0_14] : memref<32x256xbf16, #tpu.memory_space<vmem>>, vector<32x256xbf16>
    %c0_15 = arith.constant 0 : index
    %c0_16 = arith.constant 0 : index
    %12 = vector.load %arg8[%c0_15, %c0_16] : memref<256x1024xbf16, #tpu.memory_space<vmem>>, vector<256x1024xbf16>
    %cst_17 = arith.constant dense<0.000000e+00> : vector<32x1024xf32>
    %13 = tpu.matmul %11, %12, %cst_17 {dimension_numbers = #tpu.dot_dimension_numbers<[1], [0], [0], [1], [0, 0, 1, 1], [], []>} : vector<32x256xbf16>, vector<256x1024xbf16>, vector<32x1024xf32> -> vector<32x1024xf32>
    %14 = arith.addf %10, %13 : vector<32x1024xf32>
    %c0_18 = arith.constant 0 : index
    %c0_19 = arith.constant 0 : index
    %15 = vector.load %arg9[%c0_18, %c0_19] : memref<1x1024xf32, #tpu.memory_space<vmem>>, vector<1x1024xf32>
    %16 = vector.broadcast %15 : vector<1x1024xf32> to vector<32x1024xf32>
    %17 = arith.addf %14, %16 : vector<32x1024xf32>
    %cst_20 = arith.constant 0.000000e+00 : f32
    %18 = vector.broadcast %cst_20 : f32 to vector<32x1024xf32>
    %19 = arith.cmpf ogt, %17, %18 : vector<32x1024xf32>
    %cst_21 = arith.constant 2.000000e-01 : f32
    %20 = vector.broadcast %cst_21 : f32 to vector<32x1024xf32>
    %21 = arith.mulf %20, %17 : vector<32x1024xf32>
    %22 = arith.select %19, %17, %21 : vector<32x1024xi1>, vector<32x1024xf32>
    %c0_22 = arith.constant 0 : index
    %c0_23 = arith.constant 0 : index
    %23 = vector.load %arg10[%c0_22, %c0_23] : memref<32x1024xf32, #tpu.memory_space<vmem>>, vector<32x1024xf32>
    tpu.vector_store %arg10[%c0_22, %c0_23], %22 {strides = array<i32>} : memref<32x1024xf32, #tpu.memory_space<vmem>>, vector<32x1024xf32>,
    return
  }
  func.func @transform_0(%arg0: i32) -> (i32, i32) {
    %c0_i32 = arith.constant 0 : i32
    %c0_i32_0 = arith.constant 0 : i32
    return %arg0, %c0_i32 : i32, i32
  }
  func.func @transform_1(%arg0: i32) -> (i32, i32) {
    %c0_i32 = arith.constant 0 : i32
    %c0_i32_0 = arith.constant 0 : i32
    return %arg0, %c0_i32 : i32, i32
  }
  func.func @transform_2(%arg0: i32) -> (i32, i32) {
    %c0_i32 = arith.constant 0 : i32
    %c0_i32_0 = arith.constant 0 : i32
    return %arg0, %c0_i32 : i32, i32
  }
  func.func @transform_3(%arg0: i32) -> (i32, i32) {
    %c0_i32 = arith.constant 0 : i32
    %c0_i32_0 = arith.constant 0 : i32
    return %arg0, %c0_i32 : i32, i32
  }
  func.func @transform_4(%arg0: i32) -> (i32, i32) {
    %c0_i32 = arith.constant 0 : i32
    %c0_i32_0 = arith.constant 0 : i32
    %c0_i32_1 = arith.constant 0 : i32
    return %c0_i32, %c0_i32_0 : i32, i32
  }
  func.func @transform_5(%arg0: i32) -> (i32, i32) {
    %c0_i32 = arith.constant 0 : i32
    %c0_i32_0 = arith.constant 0 : i32
    %c0_i32_1 = arith.constant 0 : i32
    return %c0_i32, %c0_i32_0 : i32, i32
  }
  func.func @transform_6(%arg0: i32) -> (i32, i32) {
    %c0_i32 = arith.constant 0 : i32
    %c0_i32_0 = arith.constant 0 : i32
    %c0_i32_1 = arith.constant 0 : i32
    return %c0_i32, %c0_i32_0 : i32, i32
  }
  func.func @transform_7(%arg0: i32) -> (i32, i32) {
    %c0_i32 = arith.constant 0 : i32
    %c0_i32_0 = arith.constant 0 : i32
    %c0_i32_1 = arith.constant 0 : i32
    return %c0_i32, %c0_i32_0 : i32, i32
  }
  func.func @transform_8(%arg0: i32) -> (i32, i32) {
    %c0_i32 = arith.constant 0 : i32
    %c0_i32_0 = arith.constant 0 : i32
    %c0_i32_1 = arith.constant 0 : i32
    return %c0_i32, %c0_i32_0 : i32, i32
  }
  func.func @transform_9(%arg0: i32) -> (i32, i32) {
    %c0_i32 = arith.constant 0 : i32
    %c0_i32_0 = arith.constant 0 : i32
    return %arg0, %c0_i32 : i32, i32
  }
}

module attributes {stable_mosaic.version = 11 : i64} {
  func.func @_tail_kernel(%arg0: i32, %arg1: memref<2x32x1024xf32, #tpu.memory_space<vmem>>, %arg2: memref<1024x512xf32, #tpu.memory_space<vmem>>, %arg3: memref<1x512xf32, #tpu.memory_space<vmem>>, %arg4: memref<512x256xf32, #tpu.memory_space<vmem>>, %arg5: memref<1x256xf32, #tpu.memory_space<vmem>>, %arg6: memref<256x8xf32, #tpu.memory_space<vmem>>, %arg7: memref<1x8xf32, #tpu.memory_space<vmem>>, %arg8: memref<2x8xf32, #tpu.memory_space<vmem>>) attributes {dimension_semantics = [#tpu.dimension_semantics<arbitrary>], iteration_bounds = array<i64: 1>, scalar_prefetch = 0 : i64, scratch_operands = 0 : i64, tpu.core_type = #tpu.core_type<tc>, window_params = [{pipeline_mode = #tpu.pipeline_mode<synchronous>, transform_indices = @transform_0, window_bounds = array<i64: 2, 32, 1024>}, {pipeline_mode = #tpu.pipeline_mode<synchronous>, transform_indices = @transform_1, window_bounds = array<i64: 1024, 512>}, {pipeline_mode = #tpu.pipeline_mode<synchronous>, transform_indices = @transform_2, window_bounds = array<i64: 1, 512>}, {pipeline_mode = #tpu.pipeline_mode<synchronous>, transform_indices = @transform_3, window_bounds = array<i64: 512, 256>}, {pipeline_mode = #tpu.pipeline_mode<synchronous>, transform_indices = @transform_4, window_bounds = array<i64: 1, 256>}, {pipeline_mode = #tpu.pipeline_mode<synchronous>, transform_indices = @transform_5, window_bounds = array<i64: 256, 8>}, {pipeline_mode = #tpu.pipeline_mode<synchronous>, transform_indices = @transform_6, window_bounds = array<i64: 1, 8>}, {pipeline_mode = #tpu.pipeline_mode<synchronous>, transform_indices = @transform_7, window_bounds = array<i64: 2, 8>}]} {
    %c0 = arith.constant 0 : index
    %c0_0 = arith.constant 0 : index
    %c0_1 = arith.constant 0 : index
    %0 = vector.load %arg1[%c0, %c0_0, %c0_1] : memref<2x32x1024xf32, #tpu.memory_space<vmem>>, vector<2x32x1024xf32>
    %cst = arith.constant dense<0xFF800000> : vector<2x1024xf32>
    %1 = vector.multi_reduction <maximumf>, %0, %cst [1] : vector<2x32x1024xf32> to vector<2x1024xf32>
    %c0_2 = arith.constant 0 : index
    %c0_3 = arith.constant 0 : index
    %2 = vector.load %arg2[%c0_2, %c0_3] : memref<1024x512xf32, #tpu.memory_space<vmem>>, vector<1024x512xf32>
    %cst_4 = arith.constant dense<0.000000e+00> : vector<2x512xf32>
    %3 = tpu.matmul %1, %2, %cst_4 {dimension_numbers = #tpu.dot_dimension_numbers<[1], [0], [0], [1], [0, 0, 1, 1], [], []>} : vector<2x1024xf32>, vector<1024x512xf32>, vector<2x512xf32> -> vector<2x512xf32>
    %c0_5 = arith.constant 0 : index
    %c0_6 = arith.constant 0 : index
    %4 = vector.load %arg3[%c0_5, %c0_6] : memref<1x512xf32, #tpu.memory_space<vmem>>, vector<1x512xf32>
    %5 = vector.broadcast %4 : vector<1x512xf32> to vector<2x512xf32>
    %6 = arith.addf %3, %5 : vector<2x512xf32>
    %cst_7 = arith.constant 0.000000e+00 : f32
    %7 = vector.broadcast %cst_7 : f32 to vector<2x512xf32>
    %8 = arith.maximumf %6, %7 : vector<2x512xf32>
    %c0_8 = arith.constant 0 : index
    %c0_9 = arith.constant 0 : index
    %9 = vector.load %arg4[%c0_8, %c0_9] : memref<512x256xf32, #tpu.memory_space<vmem>>, vector<512x256xf32>
    %cst_10 = arith.constant dense<0.000000e+00> : vector<2x256xf32>
    %10 = tpu.matmul %8, %9, %cst_10 {dimension_numbers = #tpu.dot_dimension_numbers<[1], [0], [0], [1], [0, 0, 1, 1], [], []>} : vector<2x512xf32>, vector<512x256xf32>, vector<2x256xf32> -> vector<2x256xf32>
    %c0_11 = arith.constant 0 : index
    %c0_12 = arith.constant 0 : index
    %11 = vector.load %arg5[%c0_11, %c0_12] : memref<1x256xf32, #tpu.memory_space<vmem>>, vector<1x256xf32>
    %12 = vector.broadcast %11 : vector<1x256xf32> to vector<2x256xf32>
    %13 = arith.addf %10, %12 : vector<2x256xf32>
    %cst_13 = arith.constant 0.000000e+00 : f32
    %14 = vector.broadcast %cst_13 : f32 to vector<2x256xf32>
    %15 = arith.maximumf %13, %14 : vector<2x256xf32>
    %c0_14 = arith.constant 0 : index
    %c0_15 = arith.constant 0 : index
    %16 = vector.load %arg6[%c0_14, %c0_15] : memref<256x8xf32, #tpu.memory_space<vmem>>, vector<256x8xf32>
    %cst_16 = arith.constant dense<0.000000e+00> : vector<2x8xf32>
    %17 = tpu.matmul %15, %16, %cst_16 {dimension_numbers = #tpu.dot_dimension_numbers<[1], [0], [0], [1], [0, 0, 1, 1], [], []>} : vector<2x256xf32>, vector<256x8xf32>, vector<2x8xf32> -> vector<2x8xf32>
    %c0_17 = arith.constant 0 : index
    %c0_18 = arith.constant 0 : index
    %18 = vector.load %arg7[%c0_17, %c0_18] : memref<1x8xf32, #tpu.memory_space<vmem>>, vector<1x8xf32>
    %19 = vector.broadcast %18 : vector<1x8xf32> to vector<2x8xf32>
    %20 = arith.addf %17, %19 : vector<2x8xf32>
    %cst_19 = arith.constant dense<0xFF800000> : vector<2xf32>
    %21 = vector.multi_reduction <maximumf>, %20, %cst_19 [1] : vector<2x8xf32> to vector<2xf32>
    %22 = vector.shape_cast %21 : vector<2xf32> to vector<2x1xf32>
    %23 = vector.broadcast %22 : vector<2x1xf32> to vector<2x8xf32>
    %24 = arith.subf %20, %23 : vector<2x8xf32>
    %25 = math.exp %24 : vector<2x8xf32>
    %cst_20 = arith.constant dense<0.000000e+00> : vector<2xf32>
    %26 = vector.multi_reduction <add>, %25, %cst_20 [1] : vector<2x8xf32> to vector<2xf32>
    %27 = vector.shape_cast %26 : vector<2xf32> to vector<2x1xf32>
    %28 = math.log %27 : vector<2x1xf32>
    %29 = arith.addf %28, %22 : vector<2x1xf32>
    %30 = vector.broadcast %29 : vector<2x1xf32> to vector<2x8xf32>
    %31 = arith.subf %20, %30 : vector<2x8xf32>
    %c0_21 = arith.constant 0 : index
    %c0_22 = arith.constant 0 : index
    %32 = vector.load %arg8[%c0_21, %c0_22] : memref<2x8xf32, #tpu.memory_space<vmem>>, vector<2x8xf32>
    tpu.vector_store %arg8[%c0_21, %c0_22], %31 {strides = array<i32>} : memref<2x8xf32, #tpu.memory_space<vmem>>, vector<2x8xf32>,
    return
  }
  func.func @transform_0(%arg0: i32) -> (i32, i32, i32) {
    %c0_i32 = arith.constant 0 : i32
    %c0_i32_0 = arith.constant 0 : i32
    %c0_i32_1 = arith.constant 0 : i32
    %c0_i32_2 = arith.constant 0 : i32
    return %c0_i32, %c0_i32_0, %c0_i32_1 : i32, i32, i32
  }
  func.func @transform_1(%arg0: i32) -> (i32, i32) {
    %c0_i32 = arith.constant 0 : i32
    %c0_i32_0 = arith.constant 0 : i32
    %c0_i32_1 = arith.constant 0 : i32
    return %c0_i32, %c0_i32_0 : i32, i32
  }
  func.func @transform_2(%arg0: i32) -> (i32, i32) {
    %c0_i32 = arith.constant 0 : i32
    %c0_i32_0 = arith.constant 0 : i32
    %c0_i32_1 = arith.constant 0 : i32
    return %c0_i32, %c0_i32_0 : i32, i32
  }
  func.func @transform_3(%arg0: i32) -> (i32, i32) {
    %c0_i32 = arith.constant 0 : i32
    %c0_i32_0 = arith.constant 0 : i32
    %c0_i32_1 = arith.constant 0 : i32
    return %c0_i32, %c0_i32_0 : i32, i32
  }
  func.func @transform_4(%arg0: i32) -> (i32, i32) {
    %c0_i32 = arith.constant 0 : i32
    %c0_i32_0 = arith.constant 0 : i32
    %c0_i32_1 = arith.constant 0 : i32
    return %c0_i32, %c0_i32_0 : i32, i32
  }
  func.func @transform_5(%arg0: i32) -> (i32, i32) {
    %c0_i32 = arith.constant 0 : i32
    %c0_i32_0 = arith.constant 0 : i32
    %c0_i32_1 = arith.constant 0 : i32
    return %c0_i32, %c0_i32_0 : i32, i32
  }
  func.func @transform_6(%arg0: i32) -> (i32, i32) {
    %c0_i32 = arith.constant 0 : i32
    %c0_i32_0 = arith.constant 0 : i32
    %c0_i32_1 = arith.constant 0 : i32
    return %c0_i32, %c0_i32_0 : i32, i32
  }
  func.func @transform_7(%arg0: i32) -> (i32, i32) {
    %c0_i32 = arith.constant 0 : i32
    %c0_i32_0 = arith.constant 0 : i32
    %c0_i32_1 = arith.constant 0 : i32
    return %c0_i32, %c0_i32_0 : i32, i32
  }
}

</mosaic_0001>

<bundles_post_ra>
// kernel: net_forward.6
= control target key start
LH: loop header
LB: loop body
LE: loop exit
PB: predicated region body
PF: predicated region fallthrough
CT: control target
= control target key end

     0   :  { %10 = vsyncpa [#allocation3], 0  ;;  %s1183_s18 = smov 0   ;;  %s1374_s0 = inlined_call_operand.vmem [shape: bf16[64,6], index: 0, kind: input, shape index: {}]   ;;  %s1375_s1 = inlined_call_operand.vmem [shape: bf16[512,6], index: 1, kind: input, shape index: {}]   ;;  %s1376_s2 = inlined_call_operand.vmem [shape: bf16[6,64], index: 2, kind: input, shape index: {}]   ;;  %s1377_s3 = inlined_call_operand.vmem [shape: bf16[6,64], index: 3, kind: input, shape index: {}]   ;;  %s1378_s4 = inlined_call_operand.hbm [shape: f32[1,64], index: 4, kind: input, shape index: {}]   ;;  %s1379_s5 = inlined_call_operand.vmem [shape: f32[64,64], index: 5, kind: output, shape index: {}]  }
   0x1 LB: > { %s964_s19 = sadd.s32 4294967295, %s1150_s18   ;;  %p966_p0 = scmp.ge.s32.totalorder %s1150_s18, 1  ;;  %s1150_s18 = sphi %s1183_s18, %s16_s18  }
   0x2   : > { %p162_p1 = scmp.lt.s32.totalorder %s1150_s18, 3  ;;  %s180_s22 = sshll.u32 %s1378_s4, 4  ;;  %s181_s22 = int_to_ptr.hbm [resolvable:$true] %s180_s22 }
   0x3   : > { %p1098_p3 = scmp.eq.s32.totalorder %s964_s19, 0  ;;  %s1152_s23 = smov [#allocation2]  }
   0x4   : > { %p163_p2 = pnand %p966_p0, %p162_p1  ;;  %s182_s24 = sshll.u32 %s1152_s23, 4  ;;  %s183_s24 = int_to_ptr.vmem [resolvable:$true] %s182_s24 }
   0x6   : > { %p1094_p4 = pneg %p163_p2  ;;  %213 = sbr.rel (%p163_p2) target bundleno = 246 (0xf6), region = 40 }
   0x8   : > { %p1095_p5 = pnand %p1098_p3, %p1094_p4 }
   0xa   : > { %1097 = dma.hbm_to_vmem [thread:$0]  (!%p1095_p5), %s181_s22, 16, %s183_s24, [#allocation3]  }
   0xb   : > { %1145 = dma.done.wait (%p1098_p3), [#allocation3], 16  }
   0xc   : > { %1147 = vsyncadd (%p1098_p3), [#allocation3], 4294967280  ;;  %s971_s25 = sshll.u32 %s964_s19, 2  ;;  %s973_s26 = sshll.u32 %s964_s19, 5  ;;  %vm292_vm0 = vcmask 1042432   ;;  %vm285_vm1 = vcmask 48128  }
   0xd   : > { %p248_p6 = scmp.lt.s32.totalorder %s971_s25, 7  ;;  %p254_p7 = scmp.lt.s32.totalorder %s973_s26, 63  ;;  %v270_v0 = vld [vmem:[%s1376_s2] sm:$0x7]  ;;  %vm568_vm2 = vcmask 523264   ;;  %vm825_vm3 = vcmask 1041409  }
   0xe   : > { %v347_v1 = vld [vmem:[%s1377_s3] sm:$0x7]  ;;  %v294_v2 = vsel %vm292_vm0, %v270_v0, 0  ;;  %vm829_vm4 = vcmask 1043459   ;;  %vm827_vm5 = vcmask 1042434   ;;  %vm831_vm6 = vcmask 1044484  }
   0xf   : > { %s1381_s25 = smov (!%p248_p6, %s971_s25), 7  ;;  %s1383_s26 = smov (!%p254_p7, %s973_s26), 63  ;;  %v477_v3 = vsel %vm292_vm0, %v347_v1, 0  ;;  %303 = vmatpush.bf16.msra.mxu0 %v294_v2  ;;  %v1256_v1 = vld [vmem:[#allocation2] ss:$0 sm:$0xff]  ;;  %vm833_vm7 = vcmask 1045509  }
  0x10   : > { %s972_s27 = sshll.u32 %s1381_s25, 2  ;;  %s974_s10 = sshll.u32 %s1383_s26, 2  ;;  %1087 = vmatpush.bf16.msra.mxu1 %v477_v3  ;;  %1088 = vmatpush.bf16.msra.mxu2 %v477_v3  ;;  %vm835_vm8 = vcmask 1046534   ;;  %vm837_vm9 = vcmask 1047559  }
  0x11   : > { %s251_s30 = scalar_lea.vmem %s1374_s0, %s972_s27  ;;  %s1209_s13 = scalar_lea.vmem %s1375_s1, %s974_s10  ;;  %1089 = vmatpush.bf16.msra.mxu3 %v477_v3 }
  0x12   : > { %v1069_v4 = vld [vmem:[%s251_s30] sm:$0xff]  ;;  %v1072_v5 = vld [vmem:[%s1209_s13 + $0x8] sm:$0xff]  ;;  %v1077_v6 = vld [vmem:[%s1209_s13 + $0x30] sm:$0xff]  ;;  %s976_s14 = sshll.u32 %s1381_s25, 3 }
  0x13   : > { %v1082_v7 = vld [vmem:[%s1209_s13 + $0x58] sm:$0xff]  ;;  %486 = vmatpush.bf16.msrb.mxu0 %v477_v3  ;;  %1052 = vmatmul.msk.bf16.vlgmr.msra.gmra.mxu1 %vm285_vm1, %v1072_v5  ;;  %v1070_v8 = vld [vmem:[%s251_s30 + $0x8] sm:$0xff]  ;;  %v1073_v9 = vld [vmem:[%s1209_s13 + $0x10] sm:$0xff]  ;;  %s1315_s17 = scalar_lea.vmem %s1379_s5, %s976_s14 }
  0x14   : > { %985 = vmatmul.msk.bf16.vlgmr.msra.gmra.mxu0 %vm285_vm1, %v1069_v4  ;;  %1057 = vmatmul.msk.bf16.vlgmr.msra.gmra.mxu2 %vm285_vm1, %v1077_v6  ;;  %v1078_v10 = vld [vmem:[%s1209_s13 + $0x38] sm:$0xff]  ;;  %v1083_v11 = vld [vmem:[%s1209_s13 + $0x60] sm:$0xff]  ;;  %v1084_v15 = vld [vmem:[%s1209_s13 + $0x68] sm:$0xff] }
  0x15   : > { %1062 = vmatmul.msk.bf16.vlgmr.msra.gmra.mxu3 %vm285_vm1, %v1082_v7  ;;  %v1071_v12 = vld [vmem:[%s1209_s13] sm:$0xff]  ;;  %v1074_v13 = vld [vmem:[%s1209_s13 + $0x18] sm:$0xff]  ;;  %v1080_v17 = vld [vmem:[%s1209_s13 + $0x48] sm:$0xff] }
  0x16   : > { %v1079_v14 = vld [vmem:[%s1209_s13 + $0x40] sm:$0xff]  ;;  %v1085_v18 = vld [vmem:[%s1209_s13 + $0x70] sm:$0xff]  ;;  %v1076_v19 = vld [vmem:[%s1209_s13 + $0x28] sm:$0xff] }
  0x17   : > { %v1075_v16 = vld [vmem:[%s1209_s13 + $0x20] sm:$0xff]  ;;  %v1081_v20 = vld [vmem:[%s1209_s13 + $0x50] sm:$0xff]  ;;  %v1086_v21 = vld [vmem:[%s1209_s13 + $0x78] sm:$0xff] }
  0x23   : > { %1053 = vmatmul.msk.bf16.gmra.mxu1 %vm285_vm1, %v1073_v9 }
  0x24   : > { %986 = vmatmul.msk.bf16.gmra.mxu0 %vm285_vm1, %v1070_v8  ;;  %1058 = vmatmul.msk.bf16.gmra.mxu2 %vm285_vm1, %v1078_v10 }
  0x25   : > { %1063 = vmatmul.msk.bf16.gmra.mxu3 %vm285_vm1, %v1083_v11 }
  0x33   : > { %1054 = vmatmul.msk.bf16.gmra.mxu1 %vm285_vm1, %v1074_v13 }
  0x34   : > { %1051 = vmatmul.msk.bf16.vlgmr.msrb.gmra.mxu0 %vm285_vm1, %v1071_v12  ;;  %1059 = vmatmul.msk.bf16.gmra.mxu2 %vm285_vm1, %v1079_v14 }
  0x35   : > { %1064 = vmatmul.msk.bf16.gmra.mxu3 %vm285_vm1, %v1084_v15 }
  0x43   : > { %1055 = vmatmul.msk.bf16.gmra.mxu1 %vm285_vm1, %v1075_v16 }
  0x44   : > { %1060 = vmatmul.msk.bf16.gmra.mxu2 %vm285_vm1, %v1080_v17 }
  0x45   : > { %1065 = vmatmul.msk.bf16.gmra.mxu3 %vm285_vm1, %v1085_v18 }
  0x53   : > { %1056 = vmatmul.msk.bf16.gmra.mxu1 %vm285_vm1, %v1076_v19 }
  0x54   : > { %1061 = vmatmul.msk.bf16.gmra.mxu2 %vm285_vm1, %v1081_v20 }
  0x55   : > { %1066 = vmatmul.msk.bf16.gmra.mxu3 %vm285_vm1, %v1086_v21 }
  0x90   : > { %v493_v23 = vpop.f32.mrf.mxu1 }
  0x91   : > { %v305_v22 = vpop.f32.mrf.mxu0  ;;  %v583_v30 = vsel %vm568_vm2, %v493_v23, -inf }
  0x92   : > { %v584_v33 = vrot.slane %v583_v30, 4  ;;  %v1263_v15 = vadd.f32 %v1256_v1, %v305_v22 }
  0x94   : > { %v585_v38 = vmax.f32 %v583_v30, %v584_v33 }
  0x96   : > { %v586_v48 = vrot.slane %v585_v38, 2 }
  0x97   : > { %v518_v24 = vpop.f32.mrf.mxu2 }
  0x98   : > { %v543_v25 = vpop.f32.mrf.mxu3  ;;  %v495_v27 = vpop.f32.mrf.mxu1  ;;  %v653_v34 = vsel %vm568_vm2, %v518_v24, -inf  ;;  %v587_v55 = vmax.f32 %v585_v38, %v586_v48 }
  0x99   : > { %v307_v26 = vpop.f32.mrf.mxu0  ;;  %v723_v35 = vsel %vm568_vm2, %v543_v25, -inf  ;;  %v590_v36 = vsel %vm568_vm2, %v495_v27, -inf  ;;  %v654_v37 = vrot.slane %v653_v34, 4 }
  0x9a   : > { %v724_v39 = vrot.slane %v723_v35, 4  ;;  %v591_v42 = vrot.slane %v590_v36, 4  ;;  %v588_v5 = vrot.slane %v587_v55, 1  ;;  %v1266_v17 = vadd.f32 %v1256_v1, %v307_v26 }
  0x9b   : > { %v655_v45 = vmax.f32 %v653_v34, %v654_v37 }
  0x9c   : > { %v725_v49 = vmax.f32 %v723_v35, %v724_v39  ;;  %v592_v50 = vmax.f32 %v590_v36, %v591_v42  ;;  %v1269_v27 = vmax.f32 %v587_v55, %v588_v5 }
  0x9d   : > { %v656_v53 = vrot.slane %v655_v45, 2 }
  0x9e   : > { %v726_v56 = vrot.slane %v725_v49, 2  ;;  %v593_v59 = vrot.slane %v592_v50, 2 }
  0x9f   : > { %v520_v28 = vpop.f32.mrf.mxu2  ;;  %v657_v2 = vmax.f32 %v655_v45, %v656_v53 }
  0xa0   : > { %v545_v29 = vpop.f32.mrf.mxu3  ;;  %v498_v32 = vpop.f32.mrf.mxu1  ;;  %v660_v46 = vsel %vm568_vm2, %v520_v28, -inf  ;;  %v727_v6 = vmax.f32 %v725_v49, %v726_v56  ;;  %v594_v7 = vmax.f32 %v592_v50, %v593_v59 }
  0xa1   : > { %v1246_v31 = vpop.f32.mrf.mxu0  ;;  %v730_v47 = vsel %vm568_vm2, %v545_v29, -inf  ;;  %v661_v51 = vrot.slane %v660_v46, 4  ;;  %v597_v54 = vsel %vm568_vm2, %v498_v32, -inf  ;;  %v658_v16 = vrot.slane %v657_v2, 1 }
  0xa2   : > { %v731_v52 = vrot.slane %v730_v47, 4  ;;  %v598_v0 = vrot.slane %v597_v54, 4  ;;  %v728_v19 = vrot.slane %v727_v6, 1  ;;  %v595_v28 = vrot.slane %v594_v7, 1 }
  0xa3   : > { %v662_v62 = vmax.f32 %v660_v46, %v661_v51  ;;  %v1274_v36 = vmax.f32 %v657_v2, %v658_v16 }
  0xa4   : > { %v732_v63 = vmax.f32 %v730_v47, %v731_v52  ;;  %v599_v13 = vmax.f32 %v597_v54, %v598_v0  ;;  %v1280_v45 = vmax.f32 %v594_v7, %v595_v28 }
  0xa5   : > { %v663_v11 = vrot.slane %v662_v62, 2 }
  0xa6   : > { %v733_v12 = vrot.slane %v732_v63, 2  ;;  %v600_v26 = vrot.slane %v599_v13, 2 }
  0xa7   : > { %v523_v40 = vpop.f32.mrf.mxu2  ;;  %v664_v33 = vmax.f32 %v662_v62, %v663_v11 }
  0xa8   : > { %v548_v41 = vpop.f32.mrf.mxu3  ;;  %v500_v44 = vpop.f32.mrf.mxu1  ;;  %v667_v8 = vsel %vm568_vm2, %v523_v40, -inf  ;;  %v1272_v34 = vmax.f32 %v732_v63, %v733_v12  ;;  %v1278_v40 = vmax.f32 %v727_v6, %v728_v19  ;;  %v601_v51 = vmax.f32 %v599_v13, %v600_v26 }
  0xa9   : > { %v1251_v43 = vpop.f32.mrf.mxu0  ;;  %v604_v3 = vsel %vm568_vm2, %v500_v44, -inf  ;;  %v668_v20 = vrot.slane %v667_v8, 4  ;;  %v737_v29 = vsel %vm568_vm2, %v548_v41, -inf  ;;  %v665_v49 = vrot.slane %v664_v33, 1 }
  0xaa   : > { %v605_v14 = vrot.slane %v604_v3, 4  ;;  %v738_v44 = vrot.slane %v737_v29, 4  ;;  %v735_v50 = vrot.slane %v1272_v34, 1  ;;  %v602_v6 = vrot.slane %v601_v51, 1 }
  0xab   : > { %v669_v42 = vmax.f32 %v667_v8, %v668_v20 }
  0xac   : > { %v606_v35 = vmax.f32 %v604_v3, %v605_v14  ;;  %v739_v59 = vmax.f32 %v737_v29, %v738_v44 }
  0xae   : > { %v607_v52 = vrot.slane %v606_v35, 2  ;;  %v740_v12 = vrot.slane %v739_v59, 2 }
  0xaf   : > { %v525_v57 = vpop.f32.mrf.mxu2 }
  0xb0   : > { %v550_v58 = vpop.f32.mrf.mxu3  ;;  %v503_v61 = vpop.f32.mrf.mxu1  ;;  %v674_v53 = vsel %vm568_vm2, %v525_v57, -inf  ;;  %v1286_v57 = vmax.f32 %v664_v33, %v665_v49  ;;  %v608_v7 = vmax.f32 %v606_v35, %v607_v52 }
  0xb1   : > { %v488_v60 = vpop.f32.mrf.mxu0  ;;  %v611_v10 = vsel %vm568_vm2, %v503_v61, -inf  ;;  %v744_v21 = vsel %vm568_vm2, %v550_v58, -inf  ;;  %v670_v58 = vrot.slane %v669_v42, 2  ;;  %v675_v8 = vrot.slane %v674_v53, 4 }
  0xb2   : > { %v569_v4 = vsel %vm568_vm2, %v488_v60, -inf  ;;  %v612_v23 = vrot.slane %v611_v10, 4  ;;  %v745_v37 = vrot.slane %v744_v21, 4 }
  0xb3   : > { %v570_v9 = vrot.slane %v569_v4, 4  ;;  %v1288_v16 = vmax.f32 %v669_v42, %v670_v58 }
  0xb4   : > { %v613_v41 = vmax.f32 %v611_v10, %v612_v23  ;;  %v746_v54 = vmax.f32 %v744_v21, %v745_v37  ;;  %v609_v21 = vrot.slane %v608_v7, 1  ;;  %v676_v23 = vmax.f32 %v674_v53, %v675_v8 }
  0xb5   : > { %v571_v18 = vmax.f32 %v569_v4, %v570_v9  ;;  %v672_v37 = vrot.slane %v1288_v16, 1 }
  0xb6   : > { %v614_v60 = vrot.slane %v613_v41, 2  ;;  %v747_v9 = vrot.slane %v746_v54, 2 }
  0xb7   : > { %v528_v24 = vpop.f32.mrf.mxu2  ;;  %v572_v30 = vrot.slane %v571_v18, 2 }
  0xb8   : > { %v553_v25 = vpop.f32.mrf.mxu3  ;;  %v505_v32 = vpop.f32.mrf.mxu1  ;;  %v681_v61 = vsel %vm568_vm2, %v528_v24, -inf  ;;  %v615_v13 = vmax.f32 %v613_v41, %v614_v60  ;;  %v610_v41 = vmax.f32 %v608_v7, %v609_v21 }
  0xb9   : > { %v490_v22 = vpop.f32.mrf.mxu0  ;;  %v618_v39 = vsel %vm568_vm2, %v505_v32, -inf  ;;  %v573_v46 = vmax.f32 %v571_v18, %v572_v30  ;;  %v751_v2 = vsel %vm568_vm2, %v553_v25, -inf  ;;  %v682_v10 = vrot.slane %v681_v61, 4 }
  0xba   : > { %v576_v38 = vsel %vm568_vm2, %v490_v22, -inf  ;;  %v619_v48 = vrot.slane %v618_v39, 4  ;;  %v752_v14 = vrot.slane %v751_v2, 4  ;;  %v748_v25 = vmax.f32 %v746_v54, %v747_v9 }
  0xbb   : > { %v577_v47 = vrot.slane %v576_v38, 4  ;;  %v574_v0 = vrot.slane %v573_v46, 1  ;;  %v683_v28 = vmax.f32 %v681_v61, %v682_v10  ;;  %v603_v30 = vmax.f32 %v601_v51, %v602_v6 }
  0xbc   : > { %v620_v56 = vmax.f32 %v618_v39, %v619_v48  ;;  %v741_v22 = vmax.f32 %v739_v59, %v740_v12  ;;  %v616_v32 = vrot.slane %v615_v13, 1  ;;  %v753_v33 = vmax.f32 %v751_v2, %v752_v14 }
  0xbd   : > { %v578_v55 = vmax.f32 %v576_v38, %v577_v47  ;;  %v575_v18 = vmax.f32 %v573_v46, %v574_v0  ;;  %v677_v46 = vrot.slane %v676_v23, 2  ;;  %v749_v49 = vrot.slane %v748_v25, 1 }
  0xbe   : > { %v621_v4 = vrot.slane %v620_v56, 2  ;;  %v684_v51 = vrot.slane %v683_v28, 2  ;;  %v617_v54 = vmax.f32 %v615_v13, %v616_v32 }
  0xbf   : > { %v530_v62 = vpop.f32.mrf.mxu2  ;;  %v579_v3 = vrot.slane %v578_v55, 2 }
  0xc0   : > { %v555_v63 = vpop.f32.mrf.mxu3  ;;  %v508_v5 = vpop.f32.mrf.mxu1  ;;  %v622_v20 = vmax.f32 %v620_v56, %v621_v4  ;;  %v688_v24 = vsel %vm568_vm2, %v530_v62, -inf  ;;  %v742_v62 = vrot.slane %v741_v22, 1  ;;  %v685_v6 = vmax.f32 %v683_v28, %v684_v51 }
  0xc1   : > { %v580_v11 = vmax.f32 %v578_v55, %v579_v3  ;;  %v689_v42 = vrot.slane %v688_v24, 4  ;;  %v758_v48 = vsel %vm568_vm2, %v555_v63, -inf  ;;  %v625_v53 = vsel %vm568_vm2, %v508_v5, -inf }
  0xc2   : > { %v623_v39 = vrot.slane %v622_v20, 1  ;;  %v754_v55 = vrot.slane %v753_v33, 2  ;;  %v759_v61 = vrot.slane %v758_v48, 4  ;;  %v1302_v63 = vmax.f32 %v676_v23, %v677_v46 }
  0xc3   : > { %v581_v19 = vrot.slane %v580_v11, 1  ;;  %v626_v2 = vrot.slane %v625_v53, 4 }
  0xc4   : > { %v624_v59 = vmax.f32 %v622_v20, %v623_v39  ;;  %v755_v7 = vmax.f32 %v753_v33, %v754_v55  ;;  %v760_v13 = vmax.f32 %v758_v48, %v759_v61 }
  0xc5   : > { %v582_v29 = vmax.f32 %v580_v11, %v581_v19 }
  0xc6   : > { %v761_v39 = vrot.slane %v760_v13, 2 }
  0xc7   : > { %v533_v26 = vpop.f32.mrf.mxu2  ;;  %v826_v38 = vsel %vm825_vm3, %v582_v29, %v575_v18  ;;  %v756_v29 = vrot.slane %v755_v7, 1 }
  0xc8   : > { %v558_v35 = vpop.f32.mrf.mxu3  ;;  %v510_v44 = vpop.f32.mrf.mxu1  ;;  %v828_v47 = vsel %vm827_vm5, %v1269_v27, %v826_v38  ;;  %v690_v27 = vmax.f32 %v688_v24, %v689_v42  ;;  %v695_v4 = vsel %vm568_vm2, %v533_v26, -inf  ;;  %v1319_v26 = vmax.f32 %v1288_v16, %v672_v37 }
  0xc9   : > { %v830_v52 = vsel %vm829_vm4, %v1280_v45, %v828_v47  ;;  %v632_v58 = vsel %vm568_vm2, %v510_v44, -inf  ;;  %v750_v45 = vmax.f32 %v748_v25, %v749_v49  ;;  %v765_v9 = vsel %vm568_vm2, %v558_v35, -inf }
  0xca   : > { %v832_v56 = vsel %vm831_vm6, %v603_v30, %v830_v52  ;;  %v633_v5 = vrot.slane %v632_v58, 4  ;;  %v691_v12 = vrot.slane %v690_v27, 2  ;;  %v696_v21 = vrot.slane %v695_v4, 4 }
  0xcb   : > { %v834_v60 = vsel %vm833_vm7, %v610_v41, %v832_v56  ;;  %v766_v23 = vrot.slane %v765_v9, 4  ;;  %v743_v35 = vmax.f32 %v741_v22, %v742_v62  ;;  %v679_v42 = vrot.slane %v1302_v63, 1 }
  0xcc   : > { %v836_v0 = vsel %vm835_vm8, %v617_v54, %v834_v60  ;;  %v634_v24 = vmax.f32 %v632_v58, %v633_v5  ;;  %v692_v38 = vmax.f32 %v690_v27, %v691_v12  ;;  %v697_v41 = vmax.f32 %v695_v4, %v696_v21 }
  0xcd   : > { %v838_v3 = vsel %vm837_vm9, %v624_v59, %v836_v0  ;;  %v853_v47 = vsel %vm825_vm3, %v750_v45, %v743_v35  ;;  %v767_v48 = vmax.f32 %v765_v9, %v766_v23  ;;  %v686_v52 = vrot.slane %v685_v6, 1 }
  0xce   : > { %v864_v8 = vadd.f32 %v838_v3, %v1263_v15  ;;  %v627_v15 = vmax.f32 %v625_v53, %v626_v2  ;;  %v635_v49 = vrot.slane %v634_v24, 2  ;;  %v757_v53 = vmax.f32 %v755_v7, %v756_v29 }
  0xcf   : > { %v535_v10 = vpop.f32.mrf.mxu2  ;;  %v693_v55 = vrot.slane %v692_v38, 1  ;;  %v762_v56 = vmax.f32 %v760_v13, %v761_v39  ;;  %v698_v61 = vrot.slane %v697_v41, 2  ;;  %v768_v2 = vrot.slane %v767_v48, 2 }
  0xd0   : > { %v560_v11 = vpop.f32.mrf.mxu3  ;;  %v702_v14 = vsel %vm568_vm2, %v535_v10, -inf  ;;  %v513_v19 = vpop.f32.mrf.mxu1  ;;  %vm868_vm10 = vcmp.gt.f32.partialorder %v864_v8, 0.0  ;;  %v872_v20 = vmul.f32 0.2, %v864_v8  ;;  %v628_v44 = vrot.slane %v627_v15, 2 }
  0xd1   : > { %v772_v18 = vsel %vm568_vm2, %v560_v11, -inf  ;;  %v703_v25 = vrot.slane %v702_v14, 4  ;;  %v639_v28 = vsel %vm568_vm2, %v513_v19, -inf  ;;  %v636_v45 = vmax.f32 %v634_v24, %v635_v49 }
  0xd2   : > { %v876_v30 = vsel %vm868_vm10, %v864_v8, %v872_v20  ;;  %v773_v32 = vrot.slane %v772_v18, 4  ;;  %v640_v33 = vrot.slane %v639_v28, 4  ;;  %v629_v27 = vmax.f32 %v627_v15, %v628_v44 }
  0xd3   : > { %880 = vst.msk [vmem:[%s1315_s17] sm:$0xff] %vm568_vm2, %v876_v30  ;;  %v704_v51 = vmax.f32 %v702_v14, %v703_v25  ;;  %v687_v10 = vmax.f32 %v685_v6, %v686_v52  ;;  %v854_v11 = vsel %vm827_vm5, %v757_v53, %v853_v47  ;;  %v763_v12 = vrot.slane %v762_v56, 1 }
  0xd4   : > { %v641_v46 = vmax.f32 %v639_v28, %v640_v33  ;;  %v774_v54 = vmax.f32 %v772_v18, %v773_v32  ;;  %v694_v14 = vmax.f32 %v692_v38, %v693_v55  ;;  %v699_v18 = vmax.f32 %v697_v41, %v698_v61 }
  0xd5   : > { %v705_v3 = vrot.slane %v704_v51, 2  ;;  %v769_v15 = vmax.f32 %v767_v48, %v768_v2  ;;  %v637_v21 = vrot.slane %v636_v45, 1  ;;  %v630_v25 = vrot.slane %v629_v27, 1 }
  0xd6   : > { %v642_v16 = vrot.slane %v641_v46, 2  ;;  %v775_v5 = vrot.slane %v774_v54, 2  ;;  %v764_v38 = vmax.f32 %v762_v56, %v763_v12  ;;  %v700_v41 = vrot.slane %v699_v18, 1 }
  0xd7   : > { %v538_v37 = vpop.f32.mrf.mxu2  ;;  %v706_v23 = vmax.f32 %v704_v51, %v705_v3  ;;  %v770_v48 = vrot.slane %v769_v15, 1  ;;  %v638_v49 = vmax.f32 %v636_v45, %v637_v21 }
  0xd8   : > { %v563_v22 = vpop.f32.mrf.mxu3  ;;  %v709_v58 = vsel %vm568_vm2, %v538_v37, -inf  ;;  %v515_v60 = vpop.f32.mrf.mxu1  ;;  %v643_v7 = vmax.f32 %v641_v46, %v642_v16  ;;  %v776_v28 = vmax.f32 %v774_v54, %v775_v5  ;;  %v701_v61 = vmax.f32 %v699_v18, %v700_v41 }
  0xd9   : > { %v779_v59 = vsel %vm568_vm2, %v563_v22, -inf  ;;  %v710_v62 = vrot.slane %v709_v58, 4  ;;  %v646_v4 = vsel %vm568_vm2, %v515_v60, -inf  ;;  %v707_v51 = vrot.slane %v706_v23, 1 }
  0xda   : > { %v780_v0 = vrot.slane %v779_v59, 4  ;;  %v647_v13 = vrot.slane %v646_v4, 4  ;;  %v644_v29 = vrot.slane %v643_v7, 1  ;;  %v777_v53 = vrot.slane %v776_v28, 1 }
  0xdb   : > { %v711_v8 = vmax.f32 %v709_v58, %v710_v62  ;;  %v631_v22 = vmax.f32 %v629_v27, %v630_v25  ;;  %v846_v60 = vsel %vm825_vm3, %v694_v14, %v687_v10  ;;  %v708_v3 = vmax.f32 %v706_v23, %v707_v51 }
  0xdc   : > { %v781_v9 = vmax.f32 %v779_v59, %v780_v0  ;;  %v648_v24 = vmax.f32 %v646_v4, %v647_v13  ;;  %v645_v54 = vmax.f32 %v643_v7, %v644_v29  ;;  %v771_v0 = vmax.f32 %v769_v15, %v770_v48 }
  0xdd   : > { %v712_v19 = vrot.slane %v711_v8, 2  ;;  %v839_v2 = vsel %vm825_vm3, %v638_v49, %v631_v22  ;;  %v778_v4 = vmax.f32 %v776_v28, %v777_v53  ;;  %v855_v27 = vsel %vm829_vm4, %v764_v38, %v854_v11 }
  0xde   : > { %v782_v20 = vrot.slane %v781_v9, 2  ;;  %v649_v6 = vrot.slane %v648_v24, 2  ;;  %v840_v5 = vsel %vm827_vm5, %v645_v54, %v839_v2  ;;  %v847_v10 = vsel %vm827_vm5, %v701_v61, %v846_v60 }
  0xdf   : > { %v713_v30 = vmax.f32 %v711_v8, %v712_v19  ;;  %v540_v32 = vpop.f32.mrf.mxu2  ;;  %v856_v15 = vsel %vm831_vm6, %v771_v0, %v855_v27  ;;  %v848_v21 = vsel %vm829_vm4, %v708_v3, %v847_v10  ;;  %v313_v28 = vadd.f32 %v1256_v1, %v1251_v43 }
  0xe0   : > { %v565_v33 = vpop.f32.mrf.mxu3  ;;  %v783_v35 = vmax.f32 %v781_v9, %v782_v20  ;;  %v716_v39 = vsel %vm568_vm2, %v540_v32, -inf  ;;  %v650_v52 = vmax.f32 %v648_v24, %v649_v6  ;;  %v680_v20 = vmax.f32 %v1302_v63, %v679_v42 }
  0xe1   : > { %v786_v44 = vsel %vm568_vm2, %v565_v33, -inf  ;;  %v717_v46 = vrot.slane %v716_v39, 4  ;;  %v714_v55 = vrot.slane %v713_v30, 1  ;;  %v857_v23 = vsel %vm833_vm7, %v778_v4, %v856_v15 }
  0xe2   : > { %v787_v47 = vrot.slane %v786_v44, 4  ;;  %v784_v58 = vrot.slane %v783_v35, 1  ;;  %v651_v59 = vrot.slane %v650_v52, 1  ;;  %v311_v43 = vadd.f32 %v1256_v1, %v1246_v31 }
  0xe3   : > { %v718_v16 = vmax.f32 %v716_v39, %v717_v46  ;;  %v715_v9 = vmax.f32 %v713_v30, %v714_v55 }
  0xe4   : > { %v788_v37 = vmax.f32 %v786_v44, %v787_v47  ;;  %v652_v45 = vmax.f32 %v650_v52, %v651_v59  ;;  %v785_v12 = vmax.f32 %v783_v35, %v784_v58 }
  0xe5   : > { %v719_v62 = vrot.slane %v718_v16, 2  ;;  %v849_v29 = vsel %vm831_vm6, %v715_v9, %v848_v21 }
  0xe6   : > { %v789_v56 = vrot.slane %v788_v37, 2  ;;  %v841_v13 = vsel %vm829_vm4, %v652_v45, %v840_v5  ;;  %v858_v63 = vsel %vm835_vm8, %v785_v12, %v857_v23 }
  0xe7   : > { %v720_v7 = vmax.f32 %v718_v16, %v719_v62  ;;  %v842_v14 = vsel %vm831_vm6, %v1274_v36, %v841_v13 }
  0xe8   : > { %v790_v8 = vmax.f32 %v788_v37, %v789_v56  ;;  %v843_v11 = vsel %vm833_vm7, %v1286_v57, %v842_v14  ;;  %v736_v57 = vmax.f32 %v1272_v34, %v735_v50 }
  0xe9   : > { %v721_v18 = vrot.slane %v720_v7, 1  ;;  %v844_v24 = vsel %vm835_vm8, %v1319_v26, %v843_v11 }
  0xea   : > { %v791_v19 = vrot.slane %v790_v8, 1  ;;  %v845_v42 = vsel %vm837_vm9, %v680_v20, %v844_v24 }
  0xeb   : > { %v722_v25 = vmax.f32 %v720_v7, %v721_v18  ;;  %v865_v30 = vadd.f32 %v845_v42, %v1266_v17 }
  0xec   : > { %v792_v36 = vmax.f32 %v790_v8, %v791_v19 }
  0xed   : > { %v850_v26 = vsel %vm833_vm7, %v722_v25, %v849_v29  ;;  %vm869_vm11 = vcmp.gt.f32.partialorder %v865_v30, 0.0  ;;  %v873_v6 = vmul.f32 0.2, %v865_v30 }
  0xee   : > { %v859_v32 = vsel %vm837_vm9, %v792_v36, %v858_v63  ;;  %v851_v33 = vsel %vm835_vm8, %v1278_v40, %v850_v26 }
  0xef   : > { %v867_v35 = vadd.f32 %v859_v32, %v313_v28  ;;  %v852_v39 = vsel %vm837_vm9, %v736_v57, %v851_v33  ;;  %v877_v50 = vsel %vm869_vm11, %v865_v30, %v873_v6 }
  0xf0   : > { %v866_v34 = vadd.f32 %v852_v39, %v311_v43  ;;  %881 = vst.msk [vmem:[%s1315_s17 + $0x8] sm:$0xff] %vm568_vm2, %v877_v50 }
  0xf1   : > { %v875_v17 = vmul.f32 0.2, %v867_v35  ;;  %vm871_vm13 = vcmp.gt.f32.partialorder %v867_v35, 0.0 }
  0xf2   : > { %vm870_vm12 = vcmp.gt.f32.partialorder %v866_v34, 0.0  ;;  %v874_v44 = vmul.f32 0.2, %v866_v34 }
  0xf3   : > { %v879_v31 = vsel %vm871_vm13, %v867_v35, %v875_v17 }
  0xf4   : > { %v878_v38 = vsel %vm870_vm12, %v866_v34, %v874_v44  ;;  %883 = vst.msk [vmem:[%s1315_s17 + $0x18] sm:$0xff] %vm568_vm2, %v879_v31 }
  0xf5   : > { %882 = vst.msk [vmem:[%s1315_s17 + $0x10] sm:$0xff] %vm568_vm2, %v878_v38 }
  0xf6 PF: > { %s16_s18 = sadd.s32 1, %s1150_s18  }
  0xf7   : > { %p13_p8 = scmp.ge.s32.totalorder %s16_s18, 4  }
  0xf9   :  { %15 = sbr.rel (!%p13_p8) target bundleno = 1 (0x1), region = 78 }
  0xfe   :  { %906 = vsyncpa [#allocation3], 1 }
  0xff   :  { %908 = vsyncpa [#allocation3 + $0x1], 1 }

// kernel: net_forward.7
= control target key start
LH: loop header
LB: loop body
LE: loop exit
PB: predicated region body
PF: predicated region fallthrough
CT: control target
= control target key end

     0   :  { %s1211_s18 = smov 0   ;;  %s1420_s0 = inlined_call_operand.vmem [shape: bf16[64,64], index: 0, kind: input, shape index: {}]   ;;  %s1421_s1 = inlined_call_operand.vmem [shape: bf16[512,64], index: 1, kind: input, shape index: {}]   ;;  %s1422_s2 = inlined_call_operand.vmem [shape: bf16[64,64], index: 2, kind: input, shape index: {}]   ;;  %s1423_s3 = inlined_call_operand.vmem [shape: bf16[64,64], index: 3, kind: input, shape index: {}]   ;;  %s1424_s4 = inlined_call_operand.vmem [shape: f32[1,64], index: 4, kind: input, shape index: {}]   ;;  %s1425_s5 = inlined_call_operand.vmem [shape: f32[64,64], index: 5, kind: output, shape index: {}]  }
   0x1 LB: > { %s991_s19 = sadd.s32 4294967295, %s1179_s18   ;;  %p995_p0 = scmp.ge.s32.totalorder %s1179_s18, 1  ;;  %s1179_s18 = sphi %s1211_s18, %s15_s18  }
   0x2   : > { %p199_p1 = scmp.lt.s32.totalorder %s1179_s18, 3 }
   0x4   : > { %p200_p2 = pnand %p995_p0, %p199_p1 }
   0x5   : > { %s996_s24 = sshll.u32 (!%p200_p2), %s991_s19, 2  ;;  %s998_s25 = sshll.u32 (!%p200_p2), %s991_s19, 5 }
   0x6   : > { %203 = sbr.rel (%p200_p2) target bundleno = 255 (0xff), region = 40  ;;  %p233_p3 = scmp.lt.s32.totalorder (!%p200_p2), %s996_s24, 7 }
   0x7   : > { %p239_p4 = scmp.lt.s32.totalorder (!%p200_p2), %s998_s25, 63 }
   0xb   : > { %v1131_v0 = vld [vmem:[%s1422_s2 + $0x18] sm:$0xff]  ;;  %v1130_v2 = vld [vmem:[%s1422_s2 + $0x10] sm:$0xff]  ;;  %s1427_s24 = smov (!%p233_p3, %s996_s24), 7  ;;  %s1429_s25 = smov (!%p239_p4, %s998_s25), 63  ;;  %v1129_v4 = vld [vmem:[%s1422_s2 + $0x8] sm:$0xff]  ;;  %vm301_vm0 = vcmask 523264  }
   0xc   : > { %v1151_v1 = vld [vmem:[%s1423_s3 + $0x18] sm:$0xff]  ;;  %312 = vmatpush.bf16.msra.mxu0 %v1131_v0  ;;  %v1150_v3 = vld [vmem:[%s1423_s3 + $0x10] sm:$0xff]  ;;  %v1149_v5 = vld [vmem:[%s1423_s3 + $0x8] sm:$0xff]  ;;  %s997_s9 = sshll.u32 %s1427_s24, 2  ;;  %s999_s10 = sshll.u32 %s1429_s25, 2  ;;  %vm864_vm1 = vcmask 1041409  }
   0xd   : > { %1152 = vmatpush.bf16.msra.mxu1 %v1151_v1  ;;  %1153 = vmatpush.bf16.msra.mxu2 %v1151_v1  ;;  %v1128_v6 = vld [vmem:[%s1422_s2] sm:$0xff]  ;;  %s236_s17 = scalar_lea.vmem %s1420_s0, %s997_s9  ;;  %s1252_s21 = scalar_lea.vmem %s1421_s1, %s999_s10  ;;  %vm868_vm2 = vcmask 1043459   ;;  %vm866_vm3 = vcmask 1042434   ;;  %vm870_vm4 = vcmask 1044484   ;;  %vm872_vm5 = vcmask 1045509  }
   0xe   : > { %1154 = vmatpush.bf16.msra.mxu3 %v1151_v1  ;;  %v1148_v7 = vld [vmem:[%s1423_s3] sm:$0xff]  ;;  %v1133_v9 = vld [vmem:[%s1252_s21 + $0x8] sm:$0xff]  ;;  %v1138_v10 = vld [vmem:[%s1252_s21 + $0x30] sm:$0xff]  ;;  %vm874_vm6 = vcmask 1046534   ;;  %vm876_vm7 = vcmask 1047559   ;;  %s1001_s25 = sshll.u32 %s1427_s24, 3 }
   0xf   : > { %v1126_v8 = vld [vmem:[%s236_s17] sm:$0xff]  ;;  %v1143_v11 = vld [vmem:[%s1252_s21 + $0x58] sm:$0xff]  ;;  %v1127_v12 = vld [vmem:[%s236_s17 + $0x8] sm:$0xff]  ;;  %s1361_s27 = scalar_lea.vmem %s1425_s5, %s1001_s25 }
  0x10   : > { %313 = vmatpush.bf16.msra.mxu0 %v1130_v2  ;;  %v1134_v13 = vld [vmem:[%s1252_s21 + $0x10] sm:$0xff]  ;;  %v1139_v14 = vld [vmem:[%s1252_s21 + $0x38] sm:$0xff]  ;;  %v1144_v15 = vld [vmem:[%s1252_s21 + $0x60] sm:$0xff] }
  0x11   : > { %1155 = vmatpush.bf16.msra.mxu1 %v1150_v3  ;;  %1156 = vmatpush.bf16.msra.mxu2 %v1150_v3  ;;  %v1132_v16 = vld [vmem:[%s1252_s21] sm:$0xff]  ;;  %v1135_v17 = vld [vmem:[%s1252_s21 + $0x18] sm:$0xff]  ;;  %v1145_v19 = vld [vmem:[%s1252_s21 + $0x68] sm:$0xff] }
  0x12   : > { %1157 = vmatpush.bf16.msra.mxu3 %v1150_v3  ;;  %v1140_v18 = vld [vmem:[%s1252_s21 + $0x40] sm:$0xff]  ;;  %v1141_v21 = vld [vmem:[%s1252_s21 + $0x48] sm:$0xff]  ;;  %v1146_v22 = vld [vmem:[%s1252_s21 + $0x70] sm:$0xff] }
  0x13   : > { %v1136_v20 = vld [vmem:[%s1252_s21 + $0x20] sm:$0xff]  ;;  %v1137_v23 = vld [vmem:[%s1252_s21 + $0x28] sm:$0xff]  ;;  %v1142_v24 = vld [vmem:[%s1252_s21 + $0x50] sm:$0xff] }
  0x14   : > { %314 = vmatpush.bf16.msra.mxu0 %v1129_v4  ;;  %v1147_v25 = vld [vmem:[%s1252_s21 + $0x78] sm:$0xff] }
  0x15   : > { %1158 = vmatpush.bf16.msra.mxu1 %v1149_v5  ;;  %1159 = vmatpush.bf16.msra.mxu2 %v1149_v5 }
  0x16   : > { %1160 = vmatpush.bf16.msra.mxu3 %v1149_v5 }
  0x18   : > { %315 = vmatpush.bf16.msra.mxu0 %v1128_v6 }
  0x19   : > { %1161 = vmatpush.bf16.msra.mxu1 %v1148_v7  ;;  %1162 = vmatpush.bf16.msra.mxu2 %v1148_v7 }
  0x1a   : > { %1163 = vmatpush.bf16.msra.mxu3 %v1148_v7 }
  0x1b   : > { %1026 = vmatmul.msk.bf16.vlgmr.msra.gmra.mxu0 %vm301_vm0, %v1126_v8 }
  0x1c   : > { %523 = vmatpush.bf16.msrb.mxu0 %v1151_v1  ;;  %1109 = vmatmul.msk.bf16.vlgmr.msra.gmra.mxu1 %vm301_vm0, %v1133_v9 }
  0x1d   : > { %1114 = vmatmul.msk.bf16.vlgmr.msra.gmra.mxu2 %vm301_vm0, %v1138_v10  ;;  %1119 = vmatmul.msk.bf16.vlgmr.msra.gmra.mxu3 %vm301_vm0, %v1143_v11 }
  0x20   : > { %524 = vmatpush.bf16.msrb.mxu0 %v1150_v3 }
  0x24   : > { %525 = vmatpush.bf16.msrb.mxu0 %v1149_v5  ;;  %v1302_v5 = vld [vmem:[%s1424_s4] ss:$0 sm:$0xff] }
  0x28   : > { %526 = vmatpush.bf16.msrb.mxu0 %v1148_v7 }
  0x2b   : > { %1027 = vmatmul.msk.bf16.gmra.mxu0 %vm301_vm0, %v1127_v12 }
  0x2c   : > { %1110 = vmatmul.msk.bf16.gmra.mxu1 %vm301_vm0, %v1134_v13 }
  0x2d   : > { %1115 = vmatmul.msk.bf16.gmra.mxu2 %vm301_vm0, %v1139_v14  ;;  %1120 = vmatmul.msk.bf16.gmra.mxu3 %vm301_vm0, %v1144_v15 }
  0x3b   : > { %1108 = vmatmul.msk.bf16.vlgmr.msrb.gmra.mxu0 %vm301_vm0, %v1132_v16 }
  0x3c   : > { %1111 = vmatmul.msk.bf16.gmra.mxu1 %vm301_vm0, %v1135_v17 }
  0x3d   : > { %1116 = vmatmul.msk.bf16.gmra.mxu2 %vm301_vm0, %v1140_v18  ;;  %1121 = vmatmul.msk.bf16.gmra.mxu3 %vm301_vm0, %v1145_v19 }
  0x4c   : > { %1112 = vmatmul.msk.bf16.gmra.mxu1 %vm301_vm0, %v1136_v20 }
  0x4d   : > { %1117 = vmatmul.msk.bf16.gmra.mxu2 %vm301_vm0, %v1141_v21  ;;  %1122 = vmatmul.msk.bf16.gmra.mxu3 %vm301_vm0, %v1146_v22 }
  0x5c   : > { %1113 = vmatmul.msk.bf16.gmra.mxu1 %vm301_vm0, %v1137_v23 }
  0x5d   : > { %1118 = vmatmul.msk.bf16.gmra.mxu2 %vm301_vm0, %v1142_v24  ;;  %1123 = vmatmul.msk.bf16.gmra.mxu3 %vm301_vm0, %v1147_v25 }
  0x98   : > { %v317_v26 = vpop.f32.mrf.mxu0 }
  0x99   : > { %v533_v27 = vpop.f32.mrf.mxu1  ;;  %v1309_v19 = vadd.f32 %v1302_v5, %v317_v26 }
  0x9a   : > { %v622_v34 = vsel %vm301_vm0, %v533_v27, -inf }
  0x9b   : > { %v623_v37 = vrot.slane %v622_v34, 4 }
  0x9d   : > { %v624_v42 = vmax.f32 %v622_v34, %v623_v37 }
  0x9f   : > { %v625_v52 = vrot.slane %v624_v42, 2 }
  0xa0   : > { %v558_v28 = vpop.f32.mrf.mxu2  ;;  %v583_v29 = vpop.f32.mrf.mxu3 }
  0xa1   : > { %v319_v30 = vpop.f32.mrf.mxu0  ;;  %v535_v31 = vpop.f32.mrf.mxu1  ;;  %v692_v38 = vsel %vm301_vm0, %v558_v28, -inf  ;;  %v762_v39 = vsel %vm301_vm0, %v583_v29, -inf  ;;  %v626_v59 = vmax.f32 %v624_v42, %v625_v52 }
  0xa2   : > { %v629_v40 = vsel %vm301_vm0, %v535_v31, -inf  ;;  %v693_v41 = vrot.slane %v692_v38, 4  ;;  %v763_v43 = vrot.slane %v762_v39, 4  ;;  %v1312_v21 = vadd.f32 %v1302_v5, %v319_v30 }
  0xa3   : > { %v630_v46 = vrot.slane %v629_v40, 4  ;;  %v627_v9 = vrot.slane %v626_v59, 1 }
  0xa4   : > { %v694_v49 = vmax.f32 %v692_v38, %v693_v41  ;;  %v764_v53 = vmax.f32 %v762_v39, %v763_v43 }
  0xa5   : > { %v631_v54 = vmax.f32 %v629_v40, %v630_v46  ;;  %v1315_v31 = vmax.f32 %v626_v59, %v627_v9 }
  0xa6   : > { %v695_v57 = vrot.slane %v694_v49, 2  ;;  %v765_v60 = vrot.slane %v764_v53, 2 }
  0xa7   : > { %v632_v63 = vrot.slane %v631_v54, 2 }
  0xa8   : > { %v560_v32 = vpop.f32.mrf.mxu2  ;;  %v585_v33 = vpop.f32.mrf.mxu3  ;;  %v696_v6 = vmax.f32 %v694_v49, %v695_v57  ;;  %v766_v10 = vmax.f32 %v764_v53, %v765_v60 }
  0xa9   : > { %v1289_v35 = vpop.f32.mrf.mxu0  ;;  %v538_v36 = vpop.f32.mrf.mxu1  ;;  %v699_v50 = vsel %vm301_vm0, %v560_v32, -inf  ;;  %v769_v51 = vsel %vm301_vm0, %v585_v33, -inf  ;;  %v633_v11 = vmax.f32 %v631_v54, %v632_v63 }
  0xaa   : > { %v700_v55 = vrot.slane %v699_v50, 4  ;;  %v770_v56 = vrot.slane %v769_v51, 4  ;;  %v636_v58 = vsel %vm301_vm0, %v538_v36, -inf  ;;  %v697_v20 = vrot.slane %v696_v6, 1 }
  0xab   : > { %v637_v4 = vrot.slane %v636_v58, 4  ;;  %v767_v23 = vrot.slane %v766_v10, 1  ;;  %v634_v32 = vrot.slane %v633_v11, 1 }
  0xac   : > { %v701_v2 = vmax.f32 %v699_v50, %v700_v55  ;;  %v771_v3 = vmax.f32 %v769_v51, %v770_v56  ;;  %v1320_v40 = vmax.f32 %v696_v6, %v697_v20 }
  0xad   : > { %v638_v17 = vmax.f32 %v636_v58, %v637_v4  ;;  %v1326_v49 = vmax.f32 %v633_v11, %v634_v32 }
  0xae   : > { %v702_v15 = vrot.slane %v701_v2, 2  ;;  %v772_v16 = vrot.slane %v771_v3, 2 }
  0xaf   : > { %v639_v30 = vrot.slane %v638_v17, 2 }
  0xb0   : > { %v563_v44 = vpop.f32.mrf.mxu2  ;;  %v588_v45 = vpop.f32.mrf.mxu3  ;;  %v703_v37 = vmax.f32 %v701_v2, %v702_v15  ;;  %v1318_v38 = vmax.f32 %v771_v3, %v772_v16 }
  0xb1   : > { %v1294_v47 = vpop.f32.mrf.mxu0  ;;  %v540_v48 = vpop.f32.mrf.mxu1  ;;  %v706_v12 = vsel %vm301_vm0, %v563_v44, -inf  ;;  %v776_v33 = vsel %vm301_vm0, %v588_v45, -inf  ;;  %v1324_v44 = vmax.f32 %v766_v10, %v767_v23  ;;  %v640_v55 = vmax.f32 %v638_v17, %v639_v30 }
  0xb2   : > { %v643_v7 = vsel %vm301_vm0, %v540_v48, -inf  ;;  %v707_v24 = vrot.slane %v706_v12, 4  ;;  %v777_v48 = vrot.slane %v776_v33, 4  ;;  %v704_v53 = vrot.slane %v703_v37, 1 }
  0xb3   : > { %v644_v18 = vrot.slane %v643_v7, 4  ;;  %v774_v54 = vrot.slane %v1318_v38, 1  ;;  %v641_v10 = vrot.slane %v640_v55, 1 }
  0xb4   : > { %v708_v46 = vmax.f32 %v706_v12, %v707_v24  ;;  %v778_v63 = vmax.f32 %v776_v33, %v777_v48 }
  0xb5   : > { %v645_v39 = vmax.f32 %v643_v7, %v644_v18 }
  0xb6   : > { %v779_v16 = vrot.slane %v778_v63, 2 }
  0xb7   : > { %v646_v56 = vrot.slane %v645_v39, 2 }
  0xb8   : > { %v565_v61 = vpop.f32.mrf.mxu2  ;;  %v590_v62 = vpop.f32.mrf.mxu3 }
  0xb9   : > { %v528_v0 = vpop.f32.mrf.mxu0  ;;  %v543_v1 = vpop.f32.mrf.mxu1  ;;  %v783_v25 = vsel %vm301_vm0, %v590_v62, -inf  ;;  %v713_v57 = vsel %vm301_vm0, %v565_v61, -inf  ;;  %v709_v62 = vrot.slane %v708_v46, 2  ;;  %v1332_v61 = vmax.f32 %v703_v37, %v704_v53 }
  0xba   : > { %v608_v8 = vsel %vm301_vm0, %v528_v0, -inf  ;;  %v650_v14 = vsel %vm301_vm0, %v543_v1, -inf  ;;  %v784_v41 = vrot.slane %v783_v25, 4  ;;  %v647_v11 = vmax.f32 %v645_v39, %v646_v56 }
  0xbb   : > { %v609_v13 = vrot.slane %v608_v8, 4  ;;  %v651_v27 = vrot.slane %v650_v14, 4  ;;  %v714_v12 = vrot.slane %v713_v57, 4  ;;  %v1334_v20 = vmax.f32 %v708_v46, %v709_v62 }
  0xbc   : > { %v785_v58 = vmax.f32 %v783_v25, %v784_v41  ;;  %v648_v25 = vrot.slane %v647_v11, 1 }
  0xbd   : > { %v610_v22 = vmax.f32 %v608_v8, %v609_v13  ;;  %v652_v45 = vmax.f32 %v650_v14, %v651_v27  ;;  %v715_v27 = vmax.f32 %v713_v57, %v714_v12  ;;  %v711_v41 = vrot.slane %v1334_v20, 1 }
  0xbe   : > { %v786_v13 = vrot.slane %v785_v58, 2 }
  0xbf   : > { %v611_v34 = vrot.slane %v610_v22, 2  ;;  %v653_v0 = vrot.slane %v652_v45, 2 }
  0xc0   : > { %v568_v28 = vpop.f32.mrf.mxu2  ;;  %v593_v29 = vpop.f32.mrf.mxu3 }
  0xc1   : > { %v530_v26 = vpop.f32.mrf.mxu0  ;;  %v545_v36 = vpop.f32.mrf.mxu1  ;;  %v612_v50 = vmax.f32 %v610_v22, %v611_v34  ;;  %v720_v1 = vsel %vm301_vm0, %v568_v28, -inf  ;;  %v790_v6 = vsel %vm301_vm0, %v593_v29, -inf  ;;  %v654_v17 = vmax.f32 %v652_v45, %v653_v0 }
  0xc2   : > { %v615_v42 = vsel %vm301_vm0, %v530_v26, -inf  ;;  %v657_v43 = vsel %vm301_vm0, %v545_v36, -inf  ;;  %v721_v14 = vrot.slane %v720_v1, 4  ;;  %v791_v18 = vrot.slane %v790_v6, 4 }
  0xc3   : > { %v616_v51 = vrot.slane %v615_v42, 4  ;;  %v658_v52 = vrot.slane %v657_v43, 4  ;;  %v613_v4 = vrot.slane %v612_v50, 1  ;;  %v787_v29 = vmax.f32 %v785_v58, %v786_v13 }
  0xc4   : > { %v722_v32 = vmax.f32 %v720_v1, %v721_v14  ;;  %v642_v34 = vmax.f32 %v640_v55, %v641_v10  ;;  %v780_v26 = vmax.f32 %v778_v63, %v779_v16  ;;  %v655_v36 = vrot.slane %v654_v17, 1 }
  0xc5   : > { %v617_v59 = vmax.f32 %v615_v42, %v616_v51  ;;  %v659_v60 = vmax.f32 %v657_v43, %v658_v52  ;;  %v614_v22 = vmax.f32 %v612_v50, %v613_v4  ;;  %v792_v37 = vmax.f32 %v790_v6, %v791_v18 }
  0xc6   : > { %v649_v45 = vmax.f32 %v647_v11, %v648_v25  ;;  %v716_v50 = vrot.slane %v715_v27, 2  ;;  %v788_v53 = vrot.slane %v787_v29, 1  ;;  %v723_v55 = vrot.slane %v722_v32, 2 }
  0xc7   : > { %v618_v7 = vrot.slane %v617_v59, 2  ;;  %v660_v8 = vrot.slane %v659_v60, 2  ;;  %v656_v58 = vmax.f32 %v654_v17, %v655_v36 }
  0xc8   : > { %v570_v2 = vpop.f32.mrf.mxu2  ;;  %v595_v3 = vpop.f32.mrf.mxu3  ;;  %v724_v10 = vmax.f32 %v722_v32, %v723_v55 }
  0xc9   : > { %v548_v9 = vpop.f32.mrf.mxu1  ;;  %v619_v15 = vmax.f32 %v617_v59, %v618_v7  ;;  %v661_v24 = vmax.f32 %v659_v60, %v660_v8  ;;  %v727_v28 = vsel %vm301_vm0, %v570_v2, -inf  ;;  %v797_v52 = vsel %vm301_vm0, %v595_v3, -inf }
  0xca   : > { %v728_v46 = vrot.slane %v727_v28, 4  ;;  %v664_v57 = vsel %vm301_vm0, %v548_v9, -inf  ;;  %v793_v59 = vrot.slane %v792_v37, 2  ;;  %v798_v1 = vrot.slane %v797_v52, 4 }
  0xcb   : > { %v620_v23 = vrot.slane %v619_v15, 1  ;;  %v662_v43 = vrot.slane %v661_v24, 1  ;;  %v781_v2 = vrot.slane %v780_v26, 1  ;;  %v1348_v3 = vmax.f32 %v715_v27, %v716_v50 }
  0xcc   : > { %v665_v6 = vrot.slane %v664_v57, 4  ;;  %v794_v11 = vmax.f32 %v792_v37, %v793_v59  ;;  %v799_v17 = vmax.f32 %v797_v52, %v798_v1 }
  0xcd   : > { %v621_v33 = vmax.f32 %v619_v15, %v620_v23  ;;  %v663_v63 = vmax.f32 %v661_v24, %v662_v43 }
  0xce   : > { %v800_v43 = vrot.slane %v799_v17, 2 }
  0xcf   : > { %v865_v42 = vsel %vm864_vm1, %v621_v33, %v614_v22  ;;  %v795_v33 = vrot.slane %v794_v11, 1 }
  0xd0   : > { %v573_v30 = vpop.f32.mrf.mxu2  ;;  %v598_v39 = vpop.f32.mrf.mxu3  ;;  %v867_v51 = vsel %vm866_vm3, %v1315_v31, %v865_v42  ;;  %v729_v31 = vmax.f32 %v727_v28, %v728_v46  ;;  %v718_v46 = vrot.slane %v1348_v3, 1 }
  0xd1   : > { %v550_v48 = vpop.f32.mrf.mxu1  ;;  %v869_v56 = vsel %vm868_vm2, %v1326_v49, %v867_v51  ;;  %v789_v49 = vmax.f32 %v787_v29, %v788_v53  ;;  %v734_v8 = vsel %vm301_vm0, %v573_v30, -inf  ;;  %v804_v13 = vsel %vm301_vm0, %v598_v39, -inf }
  0xd2   : > { %v871_v60 = vsel %vm870_vm4, %v642_v34, %v869_v56  ;;  %v671_v62 = vsel %vm301_vm0, %v550_v48, -inf  ;;  %v730_v16 = vrot.slane %v729_v31, 2  ;;  %v735_v25 = vrot.slane %v734_v8, 4 }
  0xd3   : > { %v873_v0 = vsel %vm872_vm5, %v649_v45, %v871_v60  ;;  %v672_v9 = vrot.slane %v671_v62, 4  ;;  %v805_v27 = vrot.slane %v804_v13, 4  ;;  %v1365_v30 = vmax.f32 %v1334_v20, %v711_v41 }
  0xd4   : > { %v875_v4 = vsel %vm874_vm6, %v656_v58, %v873_v0  ;;  %v782_v39 = vmax.f32 %v780_v26, %v781_v2  ;;  %v731_v42 = vmax.f32 %v729_v31, %v730_v16  ;;  %v736_v45 = vmax.f32 %v734_v8, %v735_v25 }
  0xd5   : > { %v877_v7 = vsel %vm876_vm7, %v663_v63, %v875_v4  ;;  %v673_v28 = vmax.f32 %v671_v62, %v672_v9  ;;  %v806_v52 = vmax.f32 %v804_v13, %v805_v27  ;;  %v725_v56 = vrot.slane %v724_v10, 1 }
  0xd6   : > { %v903_v12 = vadd.f32 %v877_v7, %v1309_v19  ;;  %v666_v19 = vmax.f32 %v664_v57, %v665_v6  ;;  %v892_v51 = vsel %vm864_vm1, %v789_v49, %v782_v39  ;;  %v796_v57 = vmax.f32 %v794_v11, %v795_v33 }
  0xd7   : > { %v674_v53 = vrot.slane %v673_v28, 2  ;;  %v732_v59 = vrot.slane %v731_v42, 1  ;;  %v801_v60 = vmax.f32 %v799_v17, %v800_v43  ;;  %v737_v1 = vrot.slane %v736_v45, 2 }
  0xd8   : > { %v575_v14 = vpop.f32.mrf.mxu2  ;;  %v600_v15 = vpop.f32.mrf.mxu3  ;;  %vm907_vm8 = vcmp.gt.f32.partialorder %v903_v12, 0.0  ;;  %v911_v24 = vmul.f32 0.2, %v903_v12  ;;  %v667_v48 = vrot.slane %v666_v19, 2  ;;  %v807_v6 = vrot.slane %v806_v52, 2 }
  0xd9   : > { %v741_v18 = vsel %vm301_vm0, %v575_v14, -inf  ;;  %v811_v22 = vsel %vm301_vm0, %v600_v15, -inf  ;;  %v553_v23 = vpop.f32.mrf.mxu1  ;;  %v675_v49 = vmax.f32 %v673_v28, %v674_v53  ;;  %v726_v14 = vmax.f32 %v724_v10, %v725_v56 }
  0xda   : > { %v742_v29 = vrot.slane %v741_v18, 4  ;;  %v678_v32 = vsel %vm301_vm0, %v553_v23, -inf  ;;  %v915_v34 = vsel %vm907_vm8, %v903_v12, %v911_v24  ;;  %v812_v36 = vrot.slane %v811_v22, 4 }
  0xdb   : > { %v679_v37 = vrot.slane %v678_v32, 4  ;;  %919 = vst.msk [vmem:[%s1361_s27] sm:$0xff] %vm301_vm0, %v915_v34  ;;  %v668_v31 = vmax.f32 %v666_v19, %v667_v48  ;;  %v893_v15 = vsel %vm866_vm3, %v796_v57, %v892_v51  ;;  %v802_v16 = vrot.slane %v801_v60, 1 }
  0xdc   : > { %v743_v55 = vmax.f32 %v741_v18, %v742_v29  ;;  %v813_v58 = vmax.f32 %v811_v22, %v812_v36  ;;  %v733_v18 = vmax.f32 %v731_v42, %v732_v59  ;;  %v738_v22 = vmax.f32 %v736_v45, %v737_v1 }
  0xdd   : > { %v680_v50 = vmax.f32 %v678_v32, %v679_v37  ;;  %v808_v19 = vmax.f32 %v806_v52, %v807_v6  ;;  %v676_v25 = vrot.slane %v675_v49, 1  ;;  %v669_v29 = vrot.slane %v668_v31, 1 }
  0xde   : > { %v744_v7 = vrot.slane %v743_v55, 2  ;;  %v814_v9 = vrot.slane %v813_v58, 2  ;;  %v803_v42 = vmax.f32 %v801_v60, %v802_v16  ;;  %v739_v45 = vrot.slane %v738_v22, 1 }
  0xdf   : > { %v681_v20 = vrot.slane %v680_v50, 2  ;;  %v809_v52 = vrot.slane %v808_v19, 1  ;;  %v677_v53 = vmax.f32 %v675_v49, %v676_v25 }
  0xe0   : > { %v578_v41 = vpop.f32.mrf.mxu2  ;;  %v603_v26 = vpop.f32.mrf.mxu3  ;;  %v745_v27 = vmax.f32 %v743_v55, %v744_v7  ;;  %v815_v32 = vmax.f32 %v813_v58, %v814_v9  ;;  %v740_v1 = vmax.f32 %v738_v22, %v739_v45 }
  0xe1   : > { %v748_v62 = vsel %vm301_vm0, %v578_v41, -inf  ;;  %v818_v63 = vsel %vm301_vm0, %v603_v26, -inf  ;;  %v555_v0 = vpop.f32.mrf.mxu1  ;;  %v682_v11 = vmax.f32 %v680_v50, %v681_v20  ;;  %v670_v26 = vmax.f32 %v668_v31, %v669_v29 }
  0xe2   : > { %v749_v2 = vrot.slane %v748_v62, 4  ;;  %v819_v4 = vrot.slane %v818_v63, 4  ;;  %v685_v8 = vsel %vm301_vm0, %v555_v0, -inf  ;;  %v746_v55 = vrot.slane %v745_v27, 1 }
  0xe3   : > { %v686_v17 = vrot.slane %v685_v8, 4  ;;  %v683_v33 = vrot.slane %v682_v11, 1  ;;  %v816_v57 = vrot.slane %v815_v32, 1  ;;  %v885_v0 = vsel %vm864_vm1, %v733_v18, %v726_v14 }
  0xe4   : > { %v750_v12 = vmax.f32 %v748_v62, %v749_v2  ;;  %v820_v13 = vmax.f32 %v818_v63, %v819_v4  ;;  %v810_v4 = vmax.f32 %v808_v19, %v809_v52  ;;  %v878_v6 = vsel %vm864_vm1, %v677_v53, %v670_v26 }
  0xe5   : > { %v687_v28 = vmax.f32 %v685_v8, %v686_v17  ;;  %v684_v58 = vmax.f32 %v682_v11, %v683_v33  ;;  %v747_v7 = vmax.f32 %v745_v27, %v746_v55  ;;  %v817_v8 = vmax.f32 %v815_v32, %v816_v57 }
  0xe6   : > { %v751_v23 = vrot.slane %v750_v12, 2  ;;  %v821_v24 = vrot.slane %v820_v13, 2  ;;  %v894_v31 = vsel %vm868_vm2, %v803_v42, %v893_v15  ;;  %v886_v14 = vsel %vm866_vm3, %v740_v1, %v885_v0 }
  0xe7   : > { %v688_v10 = vrot.slane %v687_v28, 2  ;;  %v879_v9 = vsel %vm866_vm3, %v684_v58, %v878_v6  ;;  %v895_v19 = vsel %vm870_vm4, %v810_v4, %v894_v31  ;;  %v887_v25 = vsel %vm868_vm2, %v747_v7, %v886_v14 }
  0xe8   : > { %v752_v34 = vmax.f32 %v750_v12, %v751_v23  ;;  %v580_v36 = vpop.f32.mrf.mxu2  ;;  %v605_v37 = vpop.f32.mrf.mxu3  ;;  %v822_v39 = vmax.f32 %v820_v13, %v821_v24  ;;  %v719_v24 = vmax.f32 %v1348_v3, %v718_v46  ;;  %v896_v27 = vsel %vm872_vm5, %v817_v8, %v895_v19 }
  0xe9   : > { %v755_v43 = vsel %vm301_vm0, %v580_v36, -inf  ;;  %v825_v48 = vsel %vm301_vm0, %v605_v37, -inf  ;;  %v689_v56 = vmax.f32 %v687_v28, %v688_v10  ;;  %v325_v32 = vadd.f32 %v1302_v5, %v1294_v47 }
  0xea   : > { %v756_v50 = vrot.slane %v755_v43, 4  ;;  %v826_v51 = vrot.slane %v825_v48, 4  ;;  %v753_v59 = vrot.slane %v752_v34, 1  ;;  %v823_v62 = vrot.slane %v822_v39, 1 }
  0xeb   : > { %v690_v63 = vrot.slane %v689_v56, 1  ;;  %v323_v47 = vadd.f32 %v1302_v5, %v1289_v35 }
  0xec   : > { %v757_v20 = vmax.f32 %v755_v43, %v756_v50  ;;  %v827_v41 = vmax.f32 %v825_v48, %v826_v51  ;;  %v754_v13 = vmax.f32 %v752_v34, %v753_v59  ;;  %v824_v16 = vmax.f32 %v822_v39, %v823_v62 }
  0xed   : > { %v691_v49 = vmax.f32 %v689_v56, %v690_v63 }
  0xee   : > { %v758_v2 = vrot.slane %v757_v20, 2  ;;  %v828_v60 = vrot.slane %v827_v41, 2  ;;  %v888_v33 = vsel %vm870_vm4, %v754_v13, %v887_v25  ;;  %v897_v3 = vsel %vm874_vm6, %v824_v16, %v896_v27 }
  0xef   : > { %v880_v17 = vsel %vm868_vm2, %v691_v49, %v879_v9 }
  0xf0   : > { %v759_v11 = vmax.f32 %v757_v20, %v758_v2  ;;  %v829_v12 = vmax.f32 %v827_v41, %v828_v60  ;;  %v881_v18 = vsel %vm870_vm4, %v1320_v40, %v880_v17 }
  0xf1   : > { %v882_v15 = vsel %vm872_vm5, %v1332_v61, %v881_v18  ;;  %v775_v61 = vmax.f32 %v1318_v38, %v774_v54 }
  0xf2   : > { %v760_v22 = vrot.slane %v759_v11, 1  ;;  %v830_v23 = vrot.slane %v829_v12, 1  ;;  %v883_v28 = vsel %vm874_vm6, %v1365_v30, %v882_v15 }
  0xf3   : > { %v884_v46 = vsel %vm876_vm7, %v719_v24, %v883_v28 }
  0xf4   : > { %v761_v29 = vmax.f32 %v759_v11, %v760_v22  ;;  %v831_v40 = vmax.f32 %v829_v12, %v830_v23  ;;  %v904_v34 = vadd.f32 %v884_v46, %v1312_v21 }
  0xf6   : > { %v889_v30 = vsel %vm872_vm5, %v761_v29, %v888_v33  ;;  %v898_v36 = vsel %vm876_vm7, %v831_v40, %v897_v3  ;;  %vm908_vm9 = vcmp.gt.f32.partialorder %v904_v34, 0.0  ;;  %v912_v10 = vmul.f32 0.2, %v904_v34 }
  0xf7   : > { %v890_v37 = vsel %vm874_vm6, %v1324_v44, %v889_v30  ;;  %v906_v39 = vadd.f32 %v898_v36, %v325_v32 }
  0xf8   : > { %v891_v43 = vsel %vm876_vm7, %v775_v61, %v890_v37  ;;  %v916_v54 = vsel %vm908_vm9, %v904_v34, %v912_v10 }
  0xf9   : > { %v905_v38 = vadd.f32 %v891_v43, %v323_v47  ;;  %v914_v21 = vmul.f32 0.2, %v906_v39  ;;  %920 = vst.msk [vmem:[%s1361_s27 + $0x8] sm:$0xff] %vm301_vm0, %v916_v54  ;;  %vm910_vm11 = vcmp.gt.f32.partialorder %v906_v39, 0.0 }
  0xfb   : > { %vm909_vm10 = vcmp.gt.f32.partialorder %v905_v38, 0.0  ;;  %v913_v48 = vmul.f32 0.2, %v905_v38  ;;  %v918_v35 = vsel %vm910_vm11, %v906_v39, %v914_v21 }
  0xfc   : > { %922 = vst.msk [vmem:[%s1361_s27 + $0x18] sm:$0xff] %vm301_vm0, %v918_v35 }
  0xfd   : > { %v917_v42 = vsel %vm909_vm10, %v905_v38, %v913_v48 }
  0xfe   : > { %921 = vst.msk [vmem:[%s1361_s27 + $0x10] sm:$0xff] %vm301_vm0, %v917_v42 }
  0xff PF: > { %s15_s18 = sadd.s32 1, %s1179_s18  }
 0x100   : > { %p12_p5 = scmp.ge.s32.totalorder %s15_s18, 4  }
 0x102   :  { %14 = sbr.rel (!%p12_p5) target bundleno = 1 (0x1), region = 73 }

// kernel: net_forward.8
= control target key start
LH: loop header
LB: loop body
LE: loop exit
PB: predicated region body
PF: predicated region fallthrough
CT: control target
= control target key end

     0   :  { %s1179_s18 = smov 0   ;;  %s1392_s0 = inlined_call_operand.vmem [shape: bf16[64,64], index: 0, kind: input, shape index: {}]   ;;  %s1393_s1 = inlined_call_operand.vmem [shape: bf16[512,64], index: 1, kind: input, shape index: {}]   ;;  %s1394_s2 = inlined_call_operand.vmem [shape: bf16[64,128], index: 2, kind: input, shape index: {}]   ;;  %s1395_s3 = inlined_call_operand.vmem [shape: bf16[64,128], index: 3, kind: input, shape index: {}]   ;;  %s1396_s4 = inlined_call_operand.vmem [shape: f32[1,128], index: 4, kind: input, shape index: {}]   ;;  %s1397_s5 = inlined_call_operand.vmem [shape: f32[64,128], index: 5, kind: output, shape index: {}]  }
   0x1 LB: > { %s959_s19 = sadd.s32 4294967295, %s1147_s18   ;;  %p963_p0 = scmp.ge.s32.totalorder %s1147_s18, 1  ;;  %s1147_s18 = sphi %s1179_s18, %s15_s18  }
   0x2   : > { %p199_p1 = scmp.lt.s32.totalorder %s1147_s18, 3 }
   0x4   : > { %p200_p2 = pnand %p963_p0, %p199_p1 }
   0x5   : > { %s964_s24 = sshll.u32 (!%p200_p2), %s959_s19, 2  ;;  %s966_s25 = sshll.u32 (!%p200_p2), %s959_s19, 5 }
   0x6   : > { %203 = sbr.rel (%p200_p2) target bundleno = 254 (0xfe), region = 40  ;;  %p233_p3 = scmp.lt.s32.totalorder (!%p200_p2), %s964_s24, 7 }
   0x7   : > { %p239_p4 = scmp.lt.s32.totalorder (!%p200_p2), %s966_s25, 63 }
   0xb   : > { %v1099_v0 = vld [vmem:[%s1394_s2 + $0x18] sm:$0xff]  ;;  %v1098_v2 = vld [vmem:[%s1394_s2 + $0x10] sm:$0xff]  ;;  %s1399_s24 = smov (!%p233_p3, %s964_s24), 7  ;;  %s1401_s25 = smov (!%p239_p4, %s966_s25), 63  ;;  %v1097_v4 = vld [vmem:[%s1394_s2 + $0x8] sm:$0xff]  ;;  %vm301_vm0 = vcmask 523264  }
   0xc   : > { %v1119_v1 = vld [vmem:[%s1395_s3 + $0x18] sm:$0xff]  ;;  %312 = vmatpush.bf16.msra.mxu0 %v1099_v0  ;;  %v1118_v3 = vld [vmem:[%s1395_s3 + $0x10] sm:$0xff]  ;;  %v1117_v5 = vld [vmem:[%s1395_s3 + $0x8] sm:$0xff]  ;;  %s965_s9 = sshll.u32 %s1399_s24, 2  ;;  %s967_s10 = sshll.u32 %s1401_s25, 2  ;;  %vm832_vm1 = vcmask 1041409  }
   0xd   : > { %1120 = vmatpush.bf16.msra.mxu1 %v1119_v1  ;;  %1121 = vmatpush.bf16.msra.mxu2 %v1119_v1  ;;  %v1096_v6 = vld [vmem:[%s1394_s2] sm:$0xff]  ;;  %s236_s17 = scalar_lea.vmem %s1392_s0, %s965_s9  ;;  %s1220_s21 = scalar_lea.vmem %s1393_s1, %s967_s10  ;;  %vm834_vm2 = vcmask 1042434   ;;  %vm836_vm3 = vcmask 1043459   ;;  %vm838_vm4 = vcmask 1044484   ;;  %vm840_vm5 = vcmask 1045509  }
   0xe   : > { %1122 = vmatpush.bf16.msra.mxu3 %v1119_v1  ;;  %v1116_v7 = vld [vmem:[%s1395_s3] sm:$0xff]  ;;  %v1101_v9 = vld [vmem:[%s1220_s21 + $0x8] sm:$0xff]  ;;  %v1106_v10 = vld [vmem:[%s1220_s21 + $0x30] sm:$0xff]  ;;  %vm842_vm6 = vcmask 1046534   ;;  %vm844_vm7 = vcmask 1047559   ;;  %s969_s25 = sshll.u32 %s1399_s24, 3 }
   0xf   : > { %v1094_v8 = vld [vmem:[%s236_s17] sm:$0xff]  ;;  %v1111_v11 = vld [vmem:[%s1220_s21 + $0x58] sm:$0xff]  ;;  %v1095_v12 = vld [vmem:[%s236_s17 + $0x8] sm:$0xff]  ;;  %s1337_s27 = scalar_lea.vmem %s1397_s5, %s969_s25 }
  0x10   : > { %313 = vmatpush.bf16.msra.mxu0 %v1098_v2  ;;  %v1102_v13 = vld [vmem:[%s1220_s21 + $0x10] sm:$0xff]  ;;  %v1107_v14 = vld [vmem:[%s1220_s21 + $0x38] sm:$0xff]  ;;  %v1112_v15 = vld [vmem:[%s1220_s21 + $0x60] sm:$0xff] }
  0x11   : > { %1123 = vmatpush.bf16.msra.mxu1 %v1118_v3  ;;  %1124 = vmatpush.bf16.msra.mxu2 %v1118_v3  ;;  %v1100_v16 = vld [vmem:[%s1220_s21] sm:$0xff]  ;;  %v1103_v17 = vld [vmem:[%s1220_s21 + $0x18] sm:$0xff]  ;;  %v1113_v19 = vld [vmem:[%s1220_s21 + $0x68] sm:$0xff] }
  0x12   : > { %1125 = vmatpush.bf16.msra.mxu3 %v1118_v3  ;;  %v1108_v18 = vld [vmem:[%s1220_s21 + $0x40] sm:$0xff]  ;;  %v1109_v21 = vld [vmem:[%s1220_s21 + $0x48] sm:$0xff]  ;;  %v1114_v22 = vld [vmem:[%s1220_s21 + $0x70] sm:$0xff] }
  0x13   : > { %v1104_v20 = vld [vmem:[%s1220_s21 + $0x20] sm:$0xff]  ;;  %v1105_v23 = vld [vmem:[%s1220_s21 + $0x28] sm:$0xff]  ;;  %v1110_v24 = vld [vmem:[%s1220_s21 + $0x50] sm:$0xff] }
  0x14   : > { %314 = vmatpush.bf16.msra.mxu0 %v1097_v4  ;;  %v1115_v25 = vld [vmem:[%s1220_s21 + $0x78] sm:$0xff]  ;;  %v1273_v58 = vld [vmem:[%s1396_s4] ss:$0 sm:$0xff] }
  0x15   : > { %1126 = vmatpush.bf16.msra.mxu1 %v1117_v5  ;;  %1127 = vmatpush.bf16.msra.mxu2 %v1117_v5 }
  0x16   : > { %1128 = vmatpush.bf16.msra.mxu3 %v1117_v5 }
  0x18   : > { %315 = vmatpush.bf16.msra.mxu0 %v1096_v6 }
  0x19   : > { %1129 = vmatpush.bf16.msra.mxu1 %v1116_v7  ;;  %1130 = vmatpush.bf16.msra.mxu2 %v1116_v7 }
  0x1a   : > { %1131 = vmatpush.bf16.msra.mxu3 %v1116_v7 }
  0x1b   : > { %994 = vmatmul.msk.bf16.vlgmr.msra.gmra.mxu0 %vm301_vm0, %v1094_v8 }
  0x1c   : > { %523 = vmatpush.bf16.msrb.mxu0 %v1119_v1  ;;  %1077 = vmatmul.msk.bf16.vlgmr.msra.gmra.mxu1 %vm301_vm0, %v1101_v9 }
  0x1d   : > { %1082 = vmatmul.msk.bf16.vlgmr.msra.gmra.mxu2 %vm301_vm0, %v1106_v10  ;;  %1087 = vmatmul.msk.bf16.vlgmr.msra.gmra.mxu3 %vm301_vm0, %v1111_v11 }
  0x20   : > { %524 = vmatpush.bf16.msrb.mxu0 %v1118_v3 }
  0x24   : > { %525 = vmatpush.bf16.msrb.mxu0 %v1117_v5 }
  0x28   : > { %526 = vmatpush.bf16.msrb.mxu0 %v1116_v7 }
  0x2b   : > { %995 = vmatmul.msk.bf16.gmra.mxu0 %vm301_vm0, %v1095_v12 }
  0x2c   : > { %1078 = vmatmul.msk.bf16.gmra.mxu1 %vm301_vm0, %v1102_v13 }
  0x2d   : > { %1083 = vmatmul.msk.bf16.gmra.mxu2 %vm301_vm0, %v1107_v14  ;;  %1088 = vmatmul.msk.bf16.gmra.mxu3 %vm301_vm0, %v1112_v15 }
  0x3b   : > { %1076 = vmatmul.msk.bf16.vlgmr.msrb.gmra.mxu0 %vm301_vm0, %v1100_v16 }
  0x3c   : > { %1079 = vmatmul.msk.bf16.gmra.mxu1 %vm301_vm0, %v1103_v17 }
  0x3d   : > { %1084 = vmatmul.msk.bf16.gmra.mxu2 %vm301_vm0, %v1108_v18  ;;  %1089 = vmatmul.msk.bf16.gmra.mxu3 %vm301_vm0, %v1113_v19 }
  0x4c   : > { %1080 = vmatmul.msk.bf16.gmra.mxu1 %vm301_vm0, %v1104_v20 }
  0x4d   : > { %1085 = vmatmul.msk.bf16.gmra.mxu2 %vm301_vm0, %v1109_v21  ;;  %1090 = vmatmul.msk.bf16.gmra.mxu3 %vm301_vm0, %v1114_v22 }
  0x5c   : > { %1081 = vmatmul.msk.bf16.gmra.mxu1 %vm301_vm0, %v1105_v23 }
  0x5d   : > { %1086 = vmatmul.msk.bf16.gmra.mxu2 %vm301_vm0, %v1110_v24  ;;  %1091 = vmatmul.msk.bf16.gmra.mxu3 %vm301_vm0, %v1115_v25 }
  0x98   : > { %v317_v26 = vpop.f32.mrf.mxu0 }
  0x99   : > { %v533_v27 = vpop.f32.mrf.mxu1  ;;  %v1280_v6 = vadd.f32 %v1273_v58, %v317_v26 }
  0x9a   : > { %v620_v38 = vrot.slane %v533_v27, 4 }
  0x9c   : > { %v621_v42 = vmax.f32 %v533_v27, %v620_v38 }
  0x9e   : > { %v622_v48 = vrot.slane %v621_v42, 2 }
  0xa0   : > { %v558_v28 = vpop.f32.mrf.mxu2  ;;  %v583_v29 = vpop.f32.mrf.mxu3  ;;  %v623_v59 = vmax.f32 %v621_v42, %v622_v48 }
  0xa1   : > { %v319_v30 = vpop.f32.mrf.mxu0  ;;  %v535_v31 = vpop.f32.mrf.mxu1  ;;  %v680_v43 = vrot.slane %v558_v28, 4  ;;  %v740_v44 = vrot.slane %v583_v29, 4 }
  0xa2   : > { %v626_v41 = vrot.slane %v535_v31, 4  ;;  %v624_v7 = vrot.slane %v623_v59, 1  ;;  %v1287_v17 = vadd.f32 %v1273_v58, %v319_v30 }
  0xa3   : > { %v681_v52 = vmax.f32 %v558_v28, %v680_v43  ;;  %v741_v54 = vmax.f32 %v583_v29, %v740_v44 }
  0xa4   : > { %v627_v45 = vmax.f32 %v535_v31, %v626_v41  ;;  %v625_v24 = vmax.f32 %v623_v59, %v624_v7 }
  0xa5   : > { %v682_v62 = vrot.slane %v681_v52, 2  ;;  %v742_v0 = vrot.slane %v741_v54, 2 }
  0xa6   : > { %v628_v55 = vrot.slane %v627_v45, 2 }
  0xa7   : > { %v1282_v12 = vmax.f32 %v681_v52, %v682_v62  ;;  %v1284_v16 = vmax.f32 %v741_v54, %v742_v0 }
  0xa8   : > { %v560_v32 = vpop.f32.mrf.mxu2  ;;  %v1256_v33 = vpop.f32.mrf.mxu3  ;;  %v629_v2 = vmax.f32 %v627_v45, %v628_v55 }
  0xa9   : > { %v1258_v34 = vpop.f32.mrf.mxu0  ;;  %v538_v35 = vpop.f32.mrf.mxu1  ;;  %v686_v1 = vrot.slane %v560_v32, 4  ;;  %v746_v19 = vrot.slane %v1256_v33, 4  ;;  %v684_v27 = vrot.slane %v1282_v12, 1 }
  0xaa   : > { %v632_v49 = vrot.slane %v538_v35, 4  ;;  %v630_v20 = vrot.slane %v629_v2, 1 }
  0xab   : > { %v687_v18 = vmax.f32 %v560_v32, %v686_v1  ;;  %v747_v32 = vmax.f32 %v1256_v33, %v746_v19 }
  0xac   : > { %v633_v60 = vmax.f32 %v538_v35, %v632_v49  ;;  %v744_v35 = vrot.slane %v1284_v16, 1 }
  0xad   : > { %v688_v30 = vrot.slane %v687_v18, 2 }
  0xae   : > { %v634_v8 = vrot.slane %v633_v60, 2 }
  0xaf   : > { %v1303_v55 = vmax.f32 %v687_v18, %v688_v30 }
  0xb0   : > { %v1260_v36 = vpop.f32.mrf.mxu2  ;;  %v1262_v37 = vpop.f32.mrf.mxu3  ;;  %v635_v25 = vmax.f32 %v633_v60, %v634_v8 }
  0xb1   : > { %v1264_v39 = vpop.f32.mrf.mxu0  ;;  %v540_v40 = vpop.f32.mrf.mxu1  ;;  %v692_v38 = vrot.slane %v1260_v36, 4  ;;  %v752_v48 = vrot.slane %v1262_v37, 4 }
  0xb2   : > { %v638_v56 = vrot.slane %v540_v40, 4  ;;  %v636_v45 = vrot.slane %v635_v25, 1 }
  0xb3   : > { %v753_v62 = vmax.f32 %v1262_v37, %v752_v48 }
  0xb4   : > { %v639_v3 = vmax.f32 %v540_v40, %v638_v56  ;;  %v631_v40 = vmax.f32 %v629_v2, %v630_v20  ;;  %v748_v56 = vrot.slane %v747_v32, 2  ;;  %v637_v1 = vmax.f32 %v635_v25, %v636_v45 }
  0xb6   : > { %v640_v21 = vrot.slane %v639_v3, 2  ;;  %v1316_v20 = vmax.f32 %v747_v32, %v748_v56  ;;  %v1328_v32 = vmax.f32 %v1282_v12, %v684_v27 }
  0xb8   : > { %v1266_v46 = vpop.f32.mrf.mxu2  ;;  %v1268_v47 = vpop.f32.mrf.mxu3  ;;  %v641_v41 = vmax.f32 %v639_v3, %v640_v21 }
  0xb9   : > { %v528_v50 = vpop.f32.mrf.mxu0  ;;  %v543_v51 = vpop.f32.mrf.mxu1  ;;  %v698_v49 = vrot.slane %v1266_v46, 4  ;;  %v758_v33 = vrot.slane %v1268_v47, 4 }
  0xba   : > { %v608_v53 = vrot.slane %v528_v50, 4  ;;  %v644_v61 = vrot.slane %v543_v51, 4  ;;  %v642_v59 = vrot.slane %v641_v41, 1 }
  0xbb   : > { %v759_v2 = vmax.f32 %v1268_v47, %v758_v33 }
  0xbc   : > { %v609_v57 = vmax.f32 %v528_v50, %v608_v53  ;;  %v645_v9 = vmax.f32 %v543_v51, %v644_v61 }
  0xbd   : > { %v760_v21 = vrot.slane %v759_v2, 2 }
  0xbe   : > { %v610_v63 = vrot.slane %v609_v57, 2  ;;  %v646_v26 = vrot.slane %v645_v9, 2 }
  0xbf   : > { %v761_v45 = vmax.f32 %v759_v2, %v760_v21 }
  0xc0   : > { %v1275_v4 = vpop.f32.mrf.mxu2  ;;  %v1277_v5 = vpop.f32.mrf.mxu3  ;;  %v611_v13 = vmax.f32 %v609_v57, %v610_v63  ;;  %v647_v50 = vmax.f32 %v645_v9, %v646_v26  ;;  %v693_v57 = vmax.f32 %v1260_v36, %v692_v38  ;;  %v699_v63 = vmax.f32 %v1266_v46, %v698_v49 }
  0xc1   : > { %v530_v10 = vpop.f32.mrf.mxu0  ;;  %v545_v11 = vpop.f32.mrf.mxu1  ;;  %v764_v60 = vrot.slane %v1277_v5, 4  ;;  %v704_v36 = vrot.slane %v1275_v4, 4  ;;  %v762_v2 = vrot.slane %v761_v45, 1 }
  0xc2   : > { %v614_v14 = vrot.slane %v530_v10, 4  ;;  %v650_v15 = vrot.slane %v545_v11, 4  ;;  %v612_v28 = vrot.slane %v611_v13, 1  ;;  %v648_v0 = vrot.slane %v647_v50, 1 }
  0xc3   : > { %v694_v8 = vrot.slane %v693_v57, 2  ;;  %v700_v47 = vrot.slane %v699_v63, 2  ;;  %v763_v21 = vmax.f32 %v761_v45, %v762_v2 }
  0xc4   : > { %v615_v22 = vmax.f32 %v530_v10, %v614_v14  ;;  %v651_v23 = vmax.f32 %v545_v11, %v650_v15  ;;  %v613_v52 = vmax.f32 %v611_v13, %v612_v28  ;;  %v643_v10 = vmax.f32 %v641_v41, %v642_v59 }
  0xc5   : > { %v765_v11 = vmax.f32 %v1277_v5, %v764_v60  ;;  %v754_v14 = vrot.slane %v753_v62, 2  ;;  %v649_v15 = vmax.f32 %v647_v50, %v648_v0  ;;  %v705_v5 = vmax.f32 %v1275_v4, %v704_v36 }
  0xc6   : > { %v616_v29 = vrot.slane %v615_v22, 2  ;;  %v652_v31 = vrot.slane %v651_v23, 2  ;;  %v690_v41 = vrot.slane %v1303_v55, 1 }
  0xc7   : > { %v766_v28 = vrot.slane %v765_v11, 2  ;;  %v755_v38 = vmax.f32 %v753_v62, %v754_v14  ;;  %v706_v49 = vrot.slane %v705_v5, 2 }
  0xc8   : > { %v617_v42 = vmax.f32 %v615_v22, %v616_v29  ;;  %v1294_v43 = vpop.f32.mrf.mxu2  ;;  %v1296_v44 = vpop.f32.mrf.mxu3  ;;  %v653_v54 = vmax.f32 %v651_v23, %v652_v31 }
  0xc9   : > { %v1300_v51 = vpop.f32.mrf.mxu1  ;;  %v710_v26 = vrot.slane %v1294_v43, 4  ;;  %v770_v31 = vrot.slane %v1296_v44, 4  ;;  %v756_v56 = vrot.slane %v755_v38, 1 }
  0xca   : > { %v618_v53 = vrot.slane %v617_v42, 1  ;;  %v654_v7 = vrot.slane %v653_v54, 1  ;;  %v656_v48 = vrot.slane %v1300_v51, 4 }
  0xcb   : > { %v711_v27 = vmax.f32 %v1294_v43, %v710_v26  ;;  %v771_v33 = vmax.f32 %v1296_v44, %v770_v31  ;;  %v707_v43 = vmax.f32 %v705_v5, %v706_v49 }
  0xcc   : > { %v619_v61 = vmax.f32 %v617_v42, %v618_v53  ;;  %v655_v22 = vmax.f32 %v653_v54, %v654_v7  ;;  %v750_v42 = vrot.slane %v1316_v20, 1  ;;  %v657_v62 = vmax.f32 %v1300_v51, %v656_v48 }
  0xcd   : > { %v772_v44 = vrot.slane %v771_v33, 2  ;;  %v708_v5 = vrot.slane %v707_v43, 1 }
  0xce   : > { %v833_v3 = vsel %vm832_vm1, %v619_v61, %v613_v52 }
  0xcf   : > { %v835_v9 = vsel %vm834_vm2, %v625_v24, %v833_v3  ;;  %v695_v24 = vmax.f32 %v693_v57, %v694_v8  ;;  %v712_v3 = vrot.slane %v711_v27, 2  ;;  %v773_v26 = vmax.f32 %v771_v33, %v772_v44 }
  0xd0   : > { %v837_v37 = vsel %vm836_vm3, %v631_v40, %v835_v9  ;;  %v573_v46 = vpop.f32.mrf.mxu2  ;;  %v598_v13 = vpop.f32.mrf.mxu3  ;;  %v701_v40 = vmax.f32 %v699_v63, %v700_v47  ;;  %v658_v47 = vrot.slane %v657_v62, 2 }
  0xd1   : > { %v839_v18 = vsel %vm838_vm4, %v637_v1, %v837_v37  ;;  %v550_v19 = vpop.f32.mrf.mxu1  ;;  %v696_v50 = vrot.slane %v695_v24, 1  ;;  %v716_v60 = vrot.slane %v573_v46, 4  ;;  %v776_v63 = vrot.slane %v598_v13, 4 }
  0xd2   : > { %v841_v23 = vsel %vm840_vm5, %v643_v10, %v839_v18  ;;  %v662_v30 = vrot.slane %v550_v19, 4  ;;  %v702_v57 = vrot.slane %v701_v40, 1  ;;  %v1344_v10 = vmax.f32 %v1303_v55, %v690_v41 }
  0xd3   : > { %v843_v25 = vsel %vm842_vm6, %v649_v15, %v841_v23  ;;  %v757_v37 = vmax.f32 %v755_v38, %v756_v56  ;;  %v717_v14 = vmax.f32 %v573_v46, %v716_v60  ;;  %v777_v51 = vmax.f32 %v598_v13, %v776_v63 }
  0xd4   : > { %v845_v29 = vsel %vm844_vm7, %v655_v22, %v843_v25  ;;  %v663_v52 = vmax.f32 %v550_v19, %v662_v30  ;;  %v1348_v19 = vmax.f32 %v701_v40, %v702_v57  ;;  %v713_v22 = vmax.f32 %v711_v27, %v712_v3 }
  0xd5   : > { %v871_v4 = vadd.f32 %v845_v29, %v1280_v6  ;;  %v767_v6 = vmax.f32 %v765_v11, %v766_v28  ;;  %v1346_v11 = vmax.f32 %v695_v24, %v696_v50  ;;  %v718_v31 = vrot.slane %v717_v14, 2 }
  0xd6   : > { %v664_v36 = vrot.slane %v663_v52, 2  ;;  %v778_v13 = vrot.slane %v777_v51, 2  ;;  %v714_v40 = vrot.slane %v713_v22, 1  ;;  %v860_v27 = vsel %vm832_vm1, %v763_v21, %v757_v37 }
  0xd7   : > { %vm875_vm8 = vcmp.gt.f32.partialorder %v871_v4, 0.0  ;;  %v879_v12 = vmul.f32 0.2, %v871_v4  ;;  %v768_v8 = vrot.slane %v767_v6, 1  ;;  %v709_v50 = vmax.f32 %v707_v43, %v708_v5 }
  0xd8   : > { %v575_v53 = vpop.f32.mrf.mxu2  ;;  %v600_v54 = vpop.f32.mrf.mxu3  ;;  %v665_v28 = vmax.f32 %v663_v52, %v664_v36  ;;  %v719_v52 = vmax.f32 %v717_v14, %v718_v31  ;;  %v715_v63 = vmax.f32 %v713_v22, %v714_v40 }
  0xd9   : > { %v883_v59 = vsel %vm875_vm8, %v871_v4, %v879_v12  ;;  %v553_v61 = vpop.f32.mrf.mxu1  ;;  %v722_v0 = vrot.slane %v575_v53, 4  ;;  %v782_v7 = vrot.slane %v600_v54, 4  ;;  %v769_v25 = vmax.f32 %v767_v6, %v768_v8 }
  0xda   : > { %887 = vst [vmem:[%s1337_s27] sm:$0xff] %v883_v59  ;;  %v668_v1 = vrot.slane %v553_v61, 4  ;;  %v659_v4 = vmax.f32 %v657_v62, %v658_v47  ;;  %v666_v6 = vrot.slane %v665_v28, 1  ;;  %v779_v59 = vmax.f32 %v777_v51, %v778_v13 }
  0xdb   : > { %v723_v15 = vmax.f32 %v575_v53, %v722_v0  ;;  %v783_v23 = vmax.f32 %v600_v54, %v782_v7  ;;  %v861_v62 = vsel %vm834_vm2, %v769_v25, %v860_v27  ;;  %v774_v0 = vrot.slane %v773_v26, 1 }
  0xdc   : > { %v669_v9 = vmax.f32 %v553_v61, %v668_v1  ;;  %v660_v57 = vrot.slane %v659_v4, 1  ;;  %v667_v2 = vmax.f32 %v665_v28, %v666_v6  ;;  %v720_v36 = vrot.slane %v719_v52, 1 }
  0xdd   : > { %v724_v41 = vrot.slane %v723_v15, 2  ;;  %v784_v49 = vrot.slane %v783_v23, 2  ;;  %v775_v21 = vmax.f32 %v773_v26, %v774_v0  ;;  %v323_v0 = vadd.f32 %v1273_v58, %v1258_v34 }
  0xde   : > { %v670_v18 = vrot.slane %v669_v9, 2  ;;  %v661_v47 = vmax.f32 %v659_v4, %v660_v57  ;;  %v721_v31 = vmax.f32 %v719_v52, %v720_v36 }
  0xdf   : > { %v725_v60 = vmax.f32 %v723_v15, %v724_v41  ;;  %v785_v1 = vmax.f32 %v783_v23, %v784_v49 }
  0xe0   : > { %v578_v29 = vpop.f32.mrf.mxu2  ;;  %v603_v55 = vpop.f32.mrf.mxu3  ;;  %v671_v24 = vmax.f32 %v669_v9, %v670_v18  ;;  %v780_v18 = vrot.slane %v779_v59, 1  ;;  %v846_v23 = vsel %vm832_vm1, %v667_v2, %v661_v47 }
  0xe1   : > { %v728_v30 = vrot.slane %v578_v29, 4  ;;  %v788_v38 = vrot.slane %v603_v55, 4  ;;  %v555_v46 = vpop.f32.mrf.mxu1  ;;  %v726_v51 = vrot.slane %v725_v60, 1  ;;  %v786_v5 = vrot.slane %v785_v1, 1 }
  0xe2   : > { %v674_v48 = vrot.slane %v555_v46, 4  ;;  %v672_v53 = vrot.slane %v671_v24, 1  ;;  %v781_v4 = vmax.f32 %v779_v59, %v780_v18 }
  0xe3   : > { %v729_v45 = vmax.f32 %v578_v29, %v728_v30  ;;  %v789_v12 = vmax.f32 %v603_v55, %v788_v38  ;;  %v727_v13 = vmax.f32 %v725_v60, %v726_v51  ;;  %v787_v26 = vmax.f32 %v785_v1, %v786_v5 }
  0xe4   : > { %v675_v33 = vmax.f32 %v555_v46, %v674_v48  ;;  %v673_v9 = vmax.f32 %v671_v24, %v672_v53  ;;  %v853_v46 = vsel %vm832_vm1, %v715_v63, %v709_v50 }
  0xe5   : > { %v730_v54 = vrot.slane %v729_v45, 2  ;;  %v790_v56 = vrot.slane %v789_v12, 2 }
  0xe6   : > { %v676_v61 = vrot.slane %v675_v33, 2  ;;  %v847_v30 = vsel %vm834_vm2, %v673_v9, %v846_v23 }
  0xe7   : > { %v731_v3 = vmax.f32 %v729_v45, %v730_v54  ;;  %v791_v7 = vmax.f32 %v789_v12, %v790_v56  ;;  %v862_v45 = vsel %vm836_vm3, %v775_v21, %v861_v62 }
  0xe8   : > { %v677_v8 = vmax.f32 %v675_v33, %v676_v61  ;;  %v580_v43 = vpop.f32.mrf.mxu2  ;;  %v605_v44 = vpop.f32.mrf.mxu3  ;;  %v854_v33 = vsel %vm834_vm2, %v721_v31, %v853_v46  ;;  %v863_v54 = vsel %vm838_vm4, %v781_v4, %v862_v45  ;;  %v751_v61 = vmax.f32 %v1316_v20, %v750_v42 }
  0xe9   : > { %v734_v37 = vrot.slane %v580_v43, 4  ;;  %v794_v14 = vrot.slane %v605_v44, 4  ;;  %v732_v28 = vrot.slane %v731_v3, 1  ;;  %v792_v29 = vrot.slane %v791_v7, 1 }
  0xea   : > { %v678_v15 = vrot.slane %v677_v8, 1  ;;  %v855_v56 = vsel %vm836_vm3, %v727_v13, %v854_v33 }
  0xeb   : > { %v735_v25 = vmax.f32 %v580_v43, %v734_v37  ;;  %v795_v22 = vmax.f32 %v605_v44, %v794_v14  ;;  %v733_v12 = vmax.f32 %v731_v3, %v732_v28  ;;  %v793_v27 = vmax.f32 %v791_v7, %v792_v29 }
  0xec   : > { %v679_v55 = vmax.f32 %v677_v8, %v678_v15 }
  0xed   : > { %v736_v38 = vrot.slane %v735_v25, 2  ;;  %v796_v24 = vrot.slane %v795_v22, 2 }
  0xee   : > { %v848_v41 = vsel %vm836_vm3, %v679_v55, %v847_v30 }
  0xef   : > { %v849_v48 = vsel %vm838_vm4, %v1328_v32, %v848_v41  ;;  %v737_v40 = vmax.f32 %v735_v25, %v736_v38  ;;  %v797_v49 = vmax.f32 %v795_v22, %v796_v24  ;;  %v745_v32 = vmax.f32 %v1284_v16, %v744_v35 }
  0xf0   : > { %v850_v6 = vsel %vm840_vm5, %v1344_v10, %v849_v48  ;;  %v864_v10 = vsel %vm840_vm5, %v787_v26, %v863_v54  ;;  %v325_v16 = vadd.f32 %v1273_v58, %v1264_v39  ;;  %v856_v35 = vsel %vm838_vm4, %v733_v12, %v855_v56 }
  0xf1   : > { %v851_v50 = vsel %vm842_vm6, %v1346_v11, %v850_v6  ;;  %v738_v52 = vrot.slane %v737_v40, 1  ;;  %v798_v53 = vrot.slane %v797_v49, 1  ;;  %v865_v62 = vsel %vm842_vm6, %v793_v27, %v864_v10 }
  0xf2   : > { %v852_v57 = vsel %vm844_vm7, %v1348_v19, %v851_v50 }
  0xf3   : > { %v872_v59 = vadd.f32 %v852_v57, %v1287_v17  ;;  %v739_v60 = vmax.f32 %v737_v40, %v738_v52  ;;  %v799_v11 = vmax.f32 %v797_v49, %v798_v53 }
  0xf5   : > { %vm876_vm9 = vcmp.gt.f32.partialorder %v872_v59, 0.0  ;;  %v880_v19 = vmul.f32 0.2, %v872_v59  ;;  %v857_v63 = vsel %vm840_vm5, %v739_v60, %v856_v35  ;;  %v866_v17 = vsel %vm844_vm7, %v799_v11, %v865_v62 }
  0xf6   : > { %v858_v20 = vsel %vm842_vm6, %v745_v32, %v857_v63  ;;  %v874_v42 = vadd.f32 %v866_v17, %v325_v16 }
  0xf7   : > { %v859_v39 = vsel %vm844_vm7, %v751_v61, %v858_v20  ;;  %v884_v1 = vsel %vm876_vm9, %v872_v59, %v880_v19 }
  0xf8   : > { %v873_v2 = vadd.f32 %v859_v39, %v323_v0  ;;  %888 = vst [vmem:[%s1337_s27 + $0x8] sm:$0xff] %v884_v1  ;;  %v882_v3 = vmul.f32 0.2, %v874_v42  ;;  %vm878_vm11 = vcmp.gt.f32.partialorder %v874_v42, 0.0 }
  0xfa   : > { %vm877_vm10 = vcmp.gt.f32.partialorder %v873_v2, 0.0  ;;  %v881_v7 = vmul.f32 0.2, %v873_v2  ;;  %v886_v43 = vsel %vm878_vm11, %v874_v42, %v882_v3 }
  0xfb   : > { %890 = vst [vmem:[%s1337_s27 + $0x18] sm:$0xff] %v886_v43 }
  0xfc   : > { %v885_v8 = vsel %vm877_vm10, %v873_v2, %v881_v7 }
  0xfd   : > { %889 = vst [vmem:[%s1337_s27 + $0x10] sm:$0xff] %v885_v8 }
  0xfe PF: > { %s15_s18 = sadd.s32 1, %s1147_s18  }
  0xff   : > { %p12_p5 = scmp.ge.s32.totalorder %s15_s18, 4  }
 0x101   :  { %14 = sbr.rel (!%p12_p5) target bundleno = 1 (0x1), region = 73 }

// kernel: net_forward.9
= control target key start
LH: loop header
LB: loop body
LE: loop exit
PB: predicated region body
PF: predicated region fallthrough
CT: control target
= control target key end

     0   :  { %s1766_s18 = smov 0   ;;  %s2291_s0 = inlined_call_operand.vmem [shape: bf16[64,128], index: 0, kind: input, shape index: {}]   ;;  %s2292_s1 = inlined_call_operand.vmem [shape: bf16[512,128], index: 1, kind: input, shape index: {}]   ;;  %s2293_s2 = inlined_call_operand.vmem [shape: bf16[128,256], index: 2, kind: input, shape index: {}]   ;;  %s2294_s3 = inlined_call_operand.vmem [shape: bf16[128,256], index: 3, kind: input, shape index: {}]   ;;  %s2295_s4 = inlined_call_operand.vmem [shape: f32[1,256], index: 4, kind: input, shape index: {}]   ;;  %s2296_s5 = inlined_call_operand.vmem [shape: f32[64,256], index: 5, kind: output, shape index: {}]  }
   0x1 LB: > { %s1439_s19 = sadd.s32 4294967295, %s1734_s18   ;;  %p1443_p0 = scmp.ge.s32.totalorder %s1734_s18, 1  ;;  %s1734_s18 = sphi %s1766_s18, %s15_s18  }
   0x2   : > { %p199_p1 = scmp.lt.s32.totalorder %s1734_s18, 3 }
   0x4   : > { %p200_p2 = pnand %p1443_p0, %p199_p1 }
   0x5   : > { %s1444_s11 = sshll.u32 (!%p200_p2), %s1439_s19, 2  ;;  %s1446_s12 = sshll.u32 (!%p200_p2), %s1439_s19, 5 }
   0x6   : > { %203 = sbr.rel (%p200_p2) target bundleno = 335 (0x14f), region = 40  ;;  %p234_p3 = scmp.lt.s32.totalorder (!%p200_p2), %s1444_s11, 7 }
   0x7   : > { %p240_p4 = scmp.lt.s32.totalorder (!%p200_p2), %s1446_s12, 63 }
   0xb   : > { %v1517_v0 = vld [vmem:[%s2293_s2 + $0x70] sm:$0xf]  ;;  %v1671_v1 = vld [vmem:[%s2293_s2 + $0x74] sm:$0xf0]  ;;  %v1670_v2 = vld [vmem:[%s2293_s2 + $0x74] sm:$0xf] }
   0xc   : > { %v1518_v3 = vor.u32 %v1671_v1, %v1517_v0  ;;  %v1519_v4 = vld [vmem:[%s2293_s2 + $0x78] sm:$0xf0]  ;;  %v1645_v5 = vld [vmem:[%s2294_s3 + $0x70] sm:$0xf]  ;;  %v1703_v6 = vld [vmem:[%s2294_s3 + $0x74] sm:$0xf0] }
   0xd   : > { %v1522_v7 = vor.u32 %v1670_v2, %v1519_v4  ;;  %v1792_v8 = vor.u32 %v1703_v6, %v1645_v5  ;;  %v1702_v9 = vld [vmem:[%s2294_s3 + $0x74] sm:$0xf]  ;;  %v1647_v10 = vld [vmem:[%s2294_s3 + $0x78] sm:$0xf0]  ;;  %v1509_v11 = vld [vmem:[%s2293_s2 + $0x60] sm:$0xf] }
   0xe   : > { %370 = vmatpush.bf16.msra.mxu0 %v1518_v3  ;;  %v1803_v12 = vor.u32 %v1702_v9, %v1647_v10  ;;  %v1669_v13 = vld [vmem:[%s2293_s2 + $0x64] sm:$0xf0]  ;;  %v1668_v14 = vld [vmem:[%s2293_s2 + $0x64] sm:$0xf]  ;;  %v1511_v15 = vld [vmem:[%s2293_s2 + $0x68] sm:$0xf0] }
   0xf   : > { %389 = vmatpush.bf16.msra.mxu1 %v1522_v7  ;;  %1704 = vmatpush.bf16.msra.mxu2 %v1792_v8  ;;  %v1510_v16 = vor.u32 %v1669_v13, %v1509_v11  ;;  %v1514_v17 = vor.u32 %v1668_v14, %v1511_v15  ;;  %v1637_v18 = vld [vmem:[%s2294_s3 + $0x60] sm:$0xf]  ;;  %v1701_v19 = vld [vmem:[%s2294_s3 + $0x64] sm:$0xf0]  ;;  %v1700_v20 = vld [vmem:[%s2294_s3 + $0x64] sm:$0xf] }
  0x10   : > { %1712 = vmatpush.bf16.msra.mxu3 %v1803_v12  ;;  %v1825_v21 = vor.u32 %v1701_v19, %v1637_v18  ;;  %v1639_v22 = vld [vmem:[%s2294_s3 + $0x68] sm:$0xf0]  ;;  %v1501_v23 = vld [vmem:[%s2293_s2 + $0x50] sm:$0xf]  ;;  %v1667_v24 = vld [vmem:[%s2293_s2 + $0x54] sm:$0xf0] }
  0x11   : > { %v1836_v25 = vor.u32 %v1700_v20, %v1639_v22  ;;  %v1666_v26 = vld [vmem:[%s2293_s2 + $0x54] sm:$0xf]  ;;  %v1503_v27 = vld [vmem:[%s2293_s2 + $0x58] sm:$0xf0]  ;;  %v1629_v28 = vld [vmem:[%s2294_s3 + $0x50] sm:$0xf]  ;;  %v1502_v29 = vor.u32 %v1667_v24, %v1501_v23 }
  0x12   : > { %371 = vmatpush.bf16.msra.mxu0 %v1510_v16  ;;  %v1699_v30 = vld [vmem:[%s2294_s3 + $0x54] sm:$0xf0]  ;;  %v1698_v31 = vld [vmem:[%s2294_s3 + $0x54] sm:$0xf]  ;;  %v1631_v32 = vld [vmem:[%s2294_s3 + $0x58] sm:$0xf0]  ;;  %v1506_v33 = vor.u32 %v1666_v26, %v1503_v27 }
  0x13   : > { %390 = vmatpush.bf16.msra.mxu1 %v1514_v17  ;;  %1705 = vmatpush.bf16.msra.mxu2 %v1825_v21  ;;  %v1857_v34 = vor.u32 %v1699_v30, %v1629_v28  ;;  %v1493_v35 = vld [vmem:[%s2293_s2 + $0x40] sm:$0xf]  ;;  %v1665_v36 = vld [vmem:[%s2293_s2 + $0x44] sm:$0xf0]  ;;  %v1664_v37 = vld [vmem:[%s2293_s2 + $0x44] sm:$0xf]  ;;  %v1869_v38 = vor.u32 %v1698_v31, %v1631_v32 }
  0x14   : > { %1713 = vmatpush.bf16.msra.mxu3 %v1836_v25  ;;  %v1495_v39 = vld [vmem:[%s2293_s2 + $0x48] sm:$0xf0]  ;;  %v1621_v40 = vld [vmem:[%s2294_s3 + $0x40] sm:$0xf]  ;;  %v1697_v41 = vld [vmem:[%s2294_s3 + $0x44] sm:$0xf0]  ;;  %v1494_v44 = vor.u32 %v1665_v36, %v1493_v35 }
  0x15   : > { %v1696_v42 = vld [vmem:[%s2294_s3 + $0x44] sm:$0xf]  ;;  %v1623_v43 = vld [vmem:[%s2294_s3 + $0x48] sm:$0xf0]  ;;  %v1498_v45 = vor.u32 %v1664_v37, %v1495_v39  ;;  %v1887_v46 = vor.u32 %v1697_v41, %v1621_v40  ;;  %v1485_v47 = vld [vmem:[%s2293_s2 + $0x30] sm:$0xf] }
  0x16   : > { %372 = vmatpush.bf16.msra.mxu0 %v1502_v29  ;;  %v1663_v48 = vld [vmem:[%s2293_s2 + $0x34] sm:$0xf0]  ;;  %v1662_v49 = vld [vmem:[%s2293_s2 + $0x34] sm:$0xf]  ;;  %v1899_v50 = vor.u32 %v1696_v42, %v1623_v43  ;;  %v1487_v51 = vld [vmem:[%s2293_s2 + $0x38] sm:$0xf0] }
  0x17   : > { %391 = vmatpush.bf16.msra.mxu1 %v1506_v33  ;;  %1706 = vmatpush.bf16.msra.mxu2 %v1857_v34  ;;  %v1613_v52 = vld [vmem:[%s2294_s3 + $0x30] sm:$0xf]  ;;  %v1695_v53 = vld [vmem:[%s2294_s3 + $0x34] sm:$0xf0]  ;;  %v1694_v54 = vld [vmem:[%s2294_s3 + $0x34] sm:$0xf]  ;;  %v1486_v56 = vor.u32 %v1663_v48, %v1485_v47  ;;  %v1490_v57 = vor.u32 %v1662_v49, %v1487_v51 }
  0x18   : > { %1714 = vmatpush.bf16.msra.mxu3 %v1869_v38  ;;  %v1615_v55 = vld [vmem:[%s2294_s3 + $0x38] sm:$0xf0]  ;;  %v1917_v58 = vor.u32 %v1695_v53, %v1613_v52  ;;  %v1477_v59 = vld [vmem:[%s2293_s2 + $0x20] sm:$0xf]  ;;  %v1661_v60 = vld [vmem:[%s2293_s2 + $0x24] sm:$0xf0] }
  0x19   : > { %v1660_v61 = vld [vmem:[%s2293_s2 + $0x24] sm:$0xf]  ;;  %v1929_v62 = vor.u32 %v1694_v54, %v1615_v55  ;;  %v1479_v63 = vld [vmem:[%s2293_s2 + $0x28] sm:$0xf0]  ;;  %v1605_v0 = vld [vmem:[%s2294_s3 + $0x20] sm:$0xf]  ;;  %v1478_v4 = vor.u32 %v1661_v60, %v1477_v59 }
  0x1a   : > { %373 = vmatpush.bf16.msra.mxu0 %v1494_v44  ;;  %v1693_v1 = vld [vmem:[%s2294_s3 + $0x24] sm:$0xf0]  ;;  %v1692_v2 = vld [vmem:[%s2294_s3 + $0x24] sm:$0xf]  ;;  %v1607_v3 = vld [vmem:[%s2294_s3 + $0x28] sm:$0xf0]  ;;  %v1482_v6 = vor.u32 %v1660_v61, %v1479_v63 }
  0x1b   : > { %392 = vmatpush.bf16.msra.mxu1 %v1498_v45  ;;  %1707 = vmatpush.bf16.msra.mxu2 %v1887_v46  ;;  %v1469_v5 = vld [vmem:[%s2293_s2 + $0x10] sm:$0xf]  ;;  %v1950_v7 = vor.u32 %v1693_v1, %v1605_v0  ;;  %v1659_v9 = vld [vmem:[%s2293_s2 + $0x14] sm:$0xf0]  ;;  %v1658_v10 = vld [vmem:[%s2293_s2 + $0x14] sm:$0xf]  ;;  %v1962_v13 = vor.u32 %v1692_v2, %v1607_v3 }
  0x1c   : > { %1715 = vmatpush.bf16.msra.mxu3 %v1899_v50  ;;  %v1471_v11 = vld [vmem:[%s2293_s2 + $0x18] sm:$0xf0]  ;;  %v1597_v14 = vld [vmem:[%s2294_s3 + $0x10] sm:$0xf]  ;;  %v1691_v15 = vld [vmem:[%s2294_s3 + $0x14] sm:$0xf0]  ;;  %v1470_v18 = vor.u32 %v1659_v9, %v1469_v5 }
  0x1d   : > { %v1690_v16 = vld [vmem:[%s2294_s3 + $0x14] sm:$0xf]  ;;  %v1599_v17 = vld [vmem:[%s2294_s3 + $0x18] sm:$0xf0]  ;;  %v1461_v19 = vld [vmem:[%s2293_s2] sm:$0xf]  ;;  %v1474_v22 = vor.u32 %v1658_v10, %v1471_v11  ;;  %v1598_v23 = vor.u32 %v1691_v15, %v1597_v14 }
  0x1e   : > { %374 = vmatpush.bf16.msra.mxu0 %v1486_v56  ;;  %v1657_v20 = vld [vmem:[%s2293_s2 + $0x4] sm:$0xf0]  ;;  %v1656_v24 = vld [vmem:[%s2293_s2 + $0x4] sm:$0xf]  ;;  %v1463_v26 = vld [vmem:[%s2293_s2 + $0x8] sm:$0xf0]  ;;  %v1602_v27 = vor.u32 %v1690_v16, %v1599_v17 }
  0x1f   : > { %393 = vmatpush.bf16.msra.mxu1 %v1490_v57  ;;  %1708 = vmatpush.bf16.msra.mxu2 %v1917_v58  ;;  %s2298_s11 = smov (!%p234_p3, %s1444_s11), 7  ;;  %v1589_v28 = vld [vmem:[%s2294_s3] sm:$0xf]  ;;  %v1689_v29 = vld [vmem:[%s2294_s3 + $0x4] sm:$0xf0]  ;;  %s2300_s12 = smov (!%p240_p4, %s1446_s12), 63  ;;  %v1462_v32 = vor.u32 %v1657_v20, %v1461_v19  ;;  %v1466_v33 = vor.u32 %v1656_v24, %v1463_v26 }
  0x20   : > { %1716 = vmatpush.bf16.msra.mxu3 %v1929_v62  ;;  %v1688_v30 = vld [vmem:[%s2294_s3 + $0x4] sm:$0xf]  ;;  %v1591_v31 = vld [vmem:[%s2294_s3 + $0x8] sm:$0xf0]  ;;  %s1445_s9 = sshll.u32 %s2298_s11, 2  ;;  %v1590_v35 = vor.u32 %v1689_v29, %v1589_v28  ;;  %s1447_s15 = sshll.u32 %s2300_s12, 2 }
  0x21   : > { %s237_s14 = scalar_lea.vmem %s2291_s0, %s1445_s9  ;;  %v1594_v36 = vor.u32 %v1688_v30, %v1591_v31  ;;  %s2016_s20 = scalar_lea.vmem %s2292_s1, %s1447_s15  ;;  %vm1258_vm0 = vcmask 1041409   ;;  %vm1260_vm1 = vcmask 1042434   ;;  %vm1262_vm2 = vcmask 1043459  }
  0x22   : > { %375 = vmatpush.bf16.msra.mxu0 %v1478_v4  ;;  %v1654_v37 = vld [vmem:[%s237_s14] sm:$0xff]  ;;  %v1679_v39 = vld [vmem:[%s2016_s20 + $0x38] sm:$0xff]  ;;  %v1685_v45 = vld [vmem:[%s2016_s20 + $0x68] sm:$0xff]  ;;  %vm1264_vm3 = vcmask 1044484   ;;  %vm1266_vm4 = vcmask 1045509   ;;  %vm1268_vm5 = vcmask 1046534  }
  0x23   : > { %394 = vmatpush.bf16.msra.mxu1 %v1482_v6  ;;  %1709 = vmatpush.bf16.msra.mxu2 %v1950_v7  ;;  %v1680_v40 = vld [vmem:[%s2016_s20 + $0x40] sm:$0xff]  ;;  %v1683_v41 = vld [vmem:[%s2016_s20 + $0x58] sm:$0xff]  ;;  %v1686_v47 = vld [vmem:[%s2016_s20 + $0x70] sm:$0xff]  ;;  %vm1270_vm6 = vcmask 1047559   ;;  %s1653_s22 = sshll.u32 %s2298_s11, 4 }
  0x24   : > { %1717 = vmatpush.bf16.msra.mxu3 %v1962_v13  ;;  %v1675_v42 = vld [vmem:[%s2016_s20 + $0x18] sm:$0xff]  ;;  %v1684_v43 = vld [vmem:[%s2016_s20 + $0x60] sm:$0xff]  ;;  %v1678_v48 = vld [vmem:[%s2016_s20 + $0x30] sm:$0xff]  ;;  %s2211_s23 = scalar_lea.vmem %s2296_s5, %s1653_s22 }
  0x25   : > { %v1676_v44 = vld [vmem:[%s2016_s20 + $0x20] sm:$0xff] }
  0x26   : > { %376 = vmatpush.bf16.msra.mxu0 %v1470_v18 }
  0x27   : > { %395 = vmatpush.bf16.msra.mxu1 %v1474_v22  ;;  %1710 = vmatpush.bf16.msra.mxu2 %v1598_v23 }
  0x28   : > { %1718 = vmatpush.bf16.msra.mxu3 %v1602_v27 }
  0x2a   : > { %377 = vmatpush.bf16.msra.mxu0 %v1462_v32 }
  0x2b   : > { %396 = vmatpush.bf16.msra.mxu1 %v1466_v33  ;;  %1711 = vmatpush.bf16.msra.mxu2 %v1590_v35 }
  0x2c   : > { %1719 = vmatpush.bf16.msra.mxu3 %v1594_v36 }
  0x2d   : > { %378 = vmatmul.bf16.vlgmr.msra.gmra.mxu0 %v1654_v37 }
  0x2e   : > { %632 = vmatpush.bf16.msrb.mxu0 %v1792_v8  ;;  %397 = vmatmul.bf16.vlgmr.msra.gmra.mxu1 %v1654_v37  ;;  %v1655_v8 = vld [vmem:[%s237_s14 + $0x8] sm:$0xff] }
  0x2f   : > { %721 = vmatpush.bf16.msrb.mxu1 %v1803_v12  ;;  %675 = vmatmul.bf16.vlgmr.msra.gmra.mxu2 %v1679_v39  ;;  %v1672_v12 = vld [vmem:[%s2016_s20] sm:$0xff] }
  0x30   : > { %764 = vmatmul.bf16.vlgmr.msra.gmra.mxu3 %v1679_v39 }
  0x32   : > { %633 = vmatpush.bf16.msrb.mxu0 %v1825_v21  ;;  %v1681_v21 = vld [vmem:[%s2016_s20 + $0x48] sm:$0xff] }
  0x33   : > { %722 = vmatpush.bf16.msrb.mxu1 %v1836_v25  ;;  %v1673_v25 = vld [vmem:[%s2016_s20 + $0x8] sm:$0xff] }
  0x36   : > { %634 = vmatpush.bf16.msrb.mxu0 %v1857_v34  ;;  %v1682_v34 = vld [vmem:[%s2016_s20 + $0x50] sm:$0xff] }
  0x37   : > { %723 = vmatpush.bf16.msrb.mxu1 %v1869_v38  ;;  %v1674_v38 = vld [vmem:[%s2016_s20 + $0x10] sm:$0xff] }
  0x3a   : > { %635 = vmatpush.bf16.msrb.mxu0 %v1887_v46  ;;  %v1677_v46 = vld [vmem:[%s2016_s20 + $0x28] sm:$0xff] }
  0x3b   : > { %724 = vmatpush.bf16.msrb.mxu1 %v1899_v50  ;;  %v1687_v50 = vld [vmem:[%s2016_s20 + $0x78] sm:$0xff] }
  0x3d   : > { %383 = vmatmul.bf16.gmra.mxu0 %v1655_v8 }
  0x3e   : > { %636 = vmatpush.bf16.msrb.mxu0 %v1917_v58  ;;  %402 = vmatmul.bf16.gmra.mxu1 %v1655_v8 }
  0x3f   : > { %725 = vmatpush.bf16.msrb.mxu1 %v1929_v62  ;;  %680 = vmatmul.bf16.gmra.mxu2 %v1680_v40 }
  0x40   : > { %769 = vmatmul.bf16.gmra.mxu3 %v1680_v40 }
  0x42   : > { %637 = vmatpush.bf16.msrb.mxu0 %v1950_v7 }
  0x43   : > { %726 = vmatpush.bf16.msrb.mxu1 %v1962_v13 }
  0x46   : > { %638 = vmatpush.bf16.msrb.mxu0 %v1598_v23 }
  0x47   : > { %727 = vmatpush.bf16.msrb.mxu1 %v1602_v27 }
  0x4a   : > { %639 = vmatpush.bf16.msrb.mxu0 %v1590_v35 }
  0x4b   : > { %728 = vmatpush.bf16.msrb.mxu1 %v1594_v36 }
  0x4d   : > { %640 = vmatmul.bf16.vlgmr.msrb.gmra.mxu0 %v1672_v12 }
  0x4e   : > { %729 = vmatmul.bf16.vlgmr.msrb.gmra.mxu1 %v1672_v12 }
  0x4f   : > { %685 = vmatmul.bf16.gmra.mxu2 %v1681_v21 }
  0x50   : > { %774 = vmatmul.bf16.gmra.mxu3 %v1681_v21 }
  0x5d   : > { %645 = vmatmul.bf16.gmra.mxu0 %v1673_v25 }
  0x5e   : > { %734 = vmatmul.bf16.gmra.mxu1 %v1673_v25 }
  0x5f   : > { %690 = vmatmul.bf16.gmra.mxu2 %v1682_v34 }
  0x60   : > { %779 = vmatmul.bf16.gmra.mxu3 %v1682_v34 }
  0x6d   : > { %650 = vmatmul.bf16.gmra.mxu0 %v1674_v38 }
  0x6e   : > { %739 = vmatmul.bf16.gmra.mxu1 %v1674_v38 }
  0x6f   : > { %695 = vmatmul.bf16.gmra.mxu2 %v1683_v41 }
  0x70   : > { %784 = vmatmul.bf16.gmra.mxu3 %v1683_v41 }
  0x7d   : > { %655 = vmatmul.bf16.gmra.mxu0 %v1675_v42 }
  0x7e   : > { %744 = vmatmul.bf16.gmra.mxu1 %v1675_v42  ;;  %v272_v42 = vld [vmem:[%s2295_s4] sm:$0x3] }
  0x7f   : > { %700 = vmatmul.bf16.gmra.mxu2 %v1684_v43 }
  0x80   : > { %789 = vmatmul.bf16.gmra.mxu3 %v1684_v43 }
  0x8d   : > { %660 = vmatmul.bf16.gmra.mxu0 %v1676_v44 }
  0x8e   : > { %749 = vmatmul.bf16.gmra.mxu1 %v1676_v44 }
  0x8f   : > { %705 = vmatmul.bf16.gmra.mxu2 %v1685_v45 }
  0x90   : > { %794 = vmatmul.bf16.gmra.mxu3 %v1685_v45 }
  0x9d   : > { %665 = vmatmul.bf16.gmra.mxu0 %v1677_v46 }
  0x9e   : > { %754 = vmatmul.bf16.gmra.mxu1 %v1677_v46 }
  0x9f   : > { %710 = vmatmul.bf16.gmra.mxu2 %v1686_v47 }
  0xa0   : > { %799 = vmatmul.bf16.gmra.mxu3 %v1686_v47 }
  0xaa   : > { %v2045_v49 = vpop.f32.mrf.mxu0 }
  0xab   : > { %v2048_v51 = vpop.f32.mrf.mxu1 }
  0xad   : > { %670 = vmatmul.bf16.gmra.mxu0 %v1678_v48 }
  0xae   : > { %759 = vmatmul.bf16.gmra.mxu1 %v1678_v48 }
  0xaf   : > { %715 = vmatmul.bf16.gmra.mxu2 %v1687_v50 }
  0xb0   : > { %804 = vmatmul.bf16.gmra.mxu3 %v1687_v50 }
  0xb2   : > { %v676_v52 = vpop.f32.mrf.mxu2  ;;  %v2050_v54 = vpop.f32.mrf.mxu0 }
  0xb3   : > { %v765_v53 = vpop.f32.mrf.mxu3  ;;  %v2052_v55 = vpop.f32.mrf.mxu1  ;;  %v978_v20 = vrot.slane %v676_v52, 4 }
  0xb4   : > { %v984_v24 = vrot.slane %v765_v53, 4 }
  0xb5   : > { %v979_v37 = vmax.f32 %v676_v52, %v978_v20  ;;  %v2079_v52 = vperm.slane %v272_v42, 0 }
  0xb6   : > { %v985_v12 = vmax.f32 %v765_v53, %v984_v24  ;;  %v2081_v53 = vperm.slane %v272_v42, 1 }
  0xb7   : > { %v980_v45 = vrot.slane %v979_v37, 2 }
  0xb8   : > { %v986_v47 = vrot.slane %v985_v12, 2 }
  0xba   : > { %v2054_v56 = vpop.f32.mrf.mxu2  ;;  %v2058_v58 = vpop.f32.mrf.mxu0 }
  0xbb   : > { %v2056_v57 = vpop.f32.mrf.mxu3  ;;  %v2060_v59 = vpop.f32.mrf.mxu1 }
  0xc2   : > { %v681_v60 = vpop.f32.mrf.mxu2  ;;  %v2062_v63 = vpop.f32.mrf.mxu0 }
  0xc3   : > { %v1002_v61 = vrot.slane %v681_v60, 4  ;;  %v770_v62 = vpop.f32.mrf.mxu3  ;;  %v2064_v1 = vpop.f32.mrf.mxu1 }
  0xc4   : > { %v1008_v0 = vrot.slane %v770_v62, 4 }
  0xc5   : > { %v1003_v2 = vmax.f32 %v681_v60, %v1002_v61 }
  0xc6   : > { %v1009_v3 = vmax.f32 %v770_v62, %v1008_v0 }
  0xc7   : > { %v1004_v4 = vrot.slane %v1003_v2, 2 }
  0xc8   : > { %v1010_v5 = vrot.slane %v1009_v3, 2 }
  0xc9   : > { %v1005_v14 = vmax.f32 %v1003_v2, %v1004_v4 }
  0xca   : > { %v683_v6 = vpop.f32.mrf.mxu2  ;;  %v2066_v10 = vpop.f32.mrf.mxu0  ;;  %v1011_v16 = vmax.f32 %v1009_v3, %v1010_v5  ;;  %v981_v5 = vmax.f32 %v979_v37, %v980_v45 }
  0xcb   : > { %v1014_v7 = vrot.slane %v683_v6, 4  ;;  %v772_v9 = vpop.f32.mrf.mxu3  ;;  %v2068_v13 = vpop.f32.mrf.mxu1  ;;  %v1006_v22 = vrot.slane %v1005_v14, 1 }
  0xcc   : > { %v1020_v11 = vrot.slane %v772_v9, 4  ;;  %v1012_v26 = vrot.slane %v1011_v16, 1 }
  0xcd   : > { %v1015_v15 = vmax.f32 %v683_v6, %v1014_v7  ;;  %v1007_v39 = vmax.f32 %v1005_v14, %v1006_v22  ;;  %v810_v6 = vrot.slane %v2066_v10, 4  ;;  %v816_v14 = vrot.slane %v2068_v13, 4 }
  0xce   : > { %v1021_v17 = vmax.f32 %v772_v9, %v1020_v11  ;;  %v1013_v21 = vmax.f32 %v1011_v16, %v1012_v26  ;;  %v2088_v11 = vmax.f32 %v985_v12, %v986_v47  ;;  %v2102_v22 = vadd.f32 %v2050_v54, %v2079_v52 }
  0xcf   : > { %v1016_v18 = vrot.slane %v1015_v15, 2  ;;  %v817_v54 = vmax.f32 %v2068_v13, %v816_v14  ;;  %v2123_v13 = vadd.f32 %v2058_v58, %v2079_v52 }
  0xd0   : > { %v1022_v19 = vrot.slane %v1021_v17, 2 }
  0xd1   : > { %v1017_v23 = vmax.f32 %v1015_v15, %v1016_v18  ;;  %v2097_v18 = vadd.f32 %v2048_v51, %v2081_v53  ;;  %v811_v51 = vmax.f32 %v2066_v10, %v810_v6 }
  0xd2   : > { %v1023_v27 = vmax.f32 %v1021_v17, %v1022_v19  ;;  %v686_v28 = vpop.f32.mrf.mxu2  ;;  %v2070_v32 = vpop.f32.mrf.mxu0  ;;  %v2093_v17 = vadd.f32 %v2045_v49, %v2079_v52  ;;  %v2108_v49 = vadd.f32 %v2052_v55, %v2081_v53 }
  0xd3   : > { %v1018_v29 = vrot.slane %v1017_v23, 1  ;;  %v1026_v30 = vrot.slane %v686_v28, 4  ;;  %v775_v31 = vpop.f32.mrf.mxu3  ;;  %v2072_v36 = vpop.f32.mrf.mxu1  ;;  %v822_v24 = vrot.slane %v2070_v32, 4 }
  0xd4   : > { %v1024_v33 = vrot.slane %v1023_v27, 1  ;;  %v1032_v35 = vrot.slane %v775_v31, 4  ;;  %v828_v37 = vrot.slane %v2072_v36, 4 }
  0xd5   : > { %v1019_v8 = vmax.f32 %v1017_v23, %v1018_v29  ;;  %v1027_v40 = vmax.f32 %v686_v28, %v1026_v30  ;;  %v988_v29 = vrot.slane %v2088_v11, 1  ;;  %v990_v30 = vrot.slane %v2054_v56, 4 }
  0xd6   : > { %v1025_v25 = vmax.f32 %v1023_v27, %v1024_v33  ;;  %v1033_v34 = vmax.f32 %v775_v31, %v1032_v35  ;;  %v982_v27 = vrot.slane %v981_v5, 1  ;;  %v996_v35 = vrot.slane %v2056_v57, 4 }
  0xd7   : > { %v1293_v38 = vsel %vm1258_vm0, %v1019_v8, %v1007_v39  ;;  %v1028_v41 = vrot.slane %v1027_v40, 2  ;;  %v823_v10 = vmax.f32 %v2070_v32, %v822_v24  ;;  %v991_v42 = vmax.f32 %v2054_v56, %v990_v30 }
  0xd8   : > { %v1300_v43 = vsel %vm1258_vm0, %v1025_v25, %v1013_v21  ;;  %v1034_v44 = vrot.slane %v1033_v34, 2  ;;  %v829_v32 = vmax.f32 %v2072_v36, %v828_v37  ;;  %v2138_v36 = vmax.f32 %v2056_v57, %v996_v35 }
  0xd9   : > { %v1029_v46 = vmax.f32 %v1027_v40, %v1028_v41 }
  0xda   : > { %v1035_v48 = vmax.f32 %v1033_v34, %v1034_v44  ;;  %v688_v50 = vpop.f32.mrf.mxu2  ;;  %v2083_v0 = vpop.f32.mrf.mxu0  ;;  %v812_v34 = vrot.slane %v811_v51, 2  ;;  %v830_v14 = vrot.slane %v829_v32, 2 }
  0xdb   : > { %v1030_v60 = vrot.slane %v1029_v46, 1  ;;  %v1038_v61 = vrot.slane %v688_v50, 4  ;;  %v777_v62 = vpop.f32.mrf.mxu3  ;;  %v2085_v4 = vpop.f32.mrf.mxu1  ;;  %v834_v58 = vrot.slane %v2083_v0, 4 }
  0xdc   : > { %v1036_v2 = vrot.slane %v1035_v48, 1  ;;  %v1044_v3 = vrot.slane %v777_v62, 4  ;;  %v813_v56 = vmax.f32 %v811_v51, %v812_v34  ;;  %v831_v37 = vmax.f32 %v829_v32, %v830_v14 }
  0xdd   : > { %v1031_v7 = vmax.f32 %v1029_v46, %v1030_v60  ;;  %v1039_v9 = vmax.f32 %v688_v50, %v1038_v61  ;;  %v2126_v46 = vmax.f32 %v981_v5, %v982_v27  ;;  %v824_v50 = vrot.slane %v823_v10, 2 }
  0xde   : > { %v1037_v15 = vmax.f32 %v1035_v48, %v1036_v2  ;;  %v1045_v16 = vmax.f32 %v777_v62, %v1044_v3  ;;  %v2134_v62 = vadd.f32 %v2060_v59, %v2081_v53  ;;  %v840_v2 = vrot.slane %v2085_v4, 4 }
  0xdf   : > { %v1294_v19 = vsel %vm1260_vm1, %v1031_v7, %v1293_v38  ;;  %v1040_v20 = vrot.slane %v1039_v9, 2  ;;  %v992_v5 = vrot.slane %v991_v42, 2  ;;  %v835_v59 = vmax.f32 %v2083_v0, %v834_v58 }
  0xe0   : > { %v1301_v23 = vsel %vm1260_vm1, %v1037_v15, %v1300_v43  ;;  %v1046_v26 = vrot.slane %v1045_v16, 2  ;;  %v818_v43 = vrot.slane %v817_v54, 2  ;;  %v814_v51 = vrot.slane %v813_v56, 1 }
  0xe1   : > { %v1041_v28 = vmax.f32 %v1039_v9, %v1040_v20  ;;  %v2146_v34 = vmax.f32 %v991_v42, %v992_v5 }
  0xe2   : > { %v1047_v31 = vmax.f32 %v1045_v16, %v1046_v26  ;;  %v691_v33 = vpop.f32.mrf.mxu2  ;;  %v2116_v55 = vpop.f32.mrf.mxu0  ;;  %v819_v6 = vmax.f32 %v817_v54, %v818_v43  ;;  %v998_v54 = vrot.slane %v2138_v36, 2 }
  0xe3   : > { %v1042_v39 = vrot.slane %v1041_v28, 1  ;;  %v1050_v8 = vrot.slane %v691_v33, 4  ;;  %v780_v40 = vpop.f32.mrf.mxu3  ;;  %v2119_v25 = vpop.f32.mrf.mxu1 }
  0xe4   : > { %v1048_v12 = vrot.slane %v1047_v31, 1  ;;  %v1056_v21 = vrot.slane %v780_v40, 4 }
  0xe5   : > { %v1043_v38 = vmax.f32 %v1041_v28, %v1042_v39  ;;  %v1051_v41 = vmax.f32 %v691_v33, %v1050_v8  ;;  %v841_v28 = vmax.f32 %v2085_v4, %v840_v2  ;;  %v846_v8 = vrot.slane %v2116_v55, 4 }
  0xe6   : > { %v1049_v44 = vmax.f32 %v1047_v31, %v1048_v12  ;;  %v1057_v45 = vmax.f32 %v780_v40, %v1056_v21  ;;  %v820_v31 = vrot.slane %v819_v6, 1  ;;  %v2148_v4 = vmax.f32 %v813_v56, %v814_v51 }
  0xe7   : > { %v1295_v47 = vsel %vm1262_vm2, %v1043_v38, %v1294_v19  ;;  %v1052_v48 = vrot.slane %v1051_v41, 2  ;;  %v842_v38 = vrot.slane %v841_v28, 2 }
  0xe8   : > { %v1302_v60 = vsel %vm1262_vm2, %v1049_v44, %v1301_v23  ;;  %v1058_v61 = vrot.slane %v1057_v45, 2  ;;  %v825_v23 = vmax.f32 %v823_v10, %v824_v50  ;;  %v836_v10 = vrot.slane %v835_v59, 2 }
  0xe9   : > { %v1053_v3 = vmax.f32 %v1051_v41, %v1052_v48  ;;  %v2150_v43 = vmax.f32 %v819_v6, %v820_v31  ;;  %v852_v44 = vrot.slane %v2119_v25, 4  ;;  %v847_v48 = vmax.f32 %v2116_v55, %v846_v8 }
  0xea   : > { %v1059_v7 = vmax.f32 %v1057_v45, %v1058_v61  ;;  %v693_v9 = vpop.f32.mrf.mxu2  ;;  %v651_v20 = vpop.f32.mrf.mxu0  ;;  %v826_v0 = vrot.slane %v825_v23, 1  ;;  %v837_v56 = vmax.f32 %v835_v59, %v836_v10  ;;  %v843_v6 = vmax.f32 %v841_v28, %v842_v38 }
  0xeb   : > { %v1054_v15 = vrot.slane %v1053_v3, 1  ;;  %v1062_v16 = vrot.slane %v693_v9, 4  ;;  %v782_v19 = vpop.f32.mrf.mxu3  ;;  %v740_v27 = vpop.f32.mrf.mxu1  ;;  %v848_v55 = vrot.slane %v847_v48, 2 }
  0xec   : > { %v1060_v24 = vrot.slane %v1059_v7, 1  ;;  %v1068_v26 = vrot.slane %v782_v19, 4  ;;  %v2154_v42 = vmax.f32 %v825_v23, %v826_v0  ;;  %v838_v28 = vrot.slane %v837_v56, 1 }
  0xed   : > { %v1055_v57 = vmax.f32 %v1053_v3, %v1054_v15  ;;  %v1063_v30 = vmax.f32 %v693_v9, %v1062_v16  ;;  %v858_v9 = vrot.slane %v651_v20, 4  ;;  %v853_v15 = vmax.f32 %v2119_v25, %v852_v44 }
  0xee   : > { %v1061_v33 = vmax.f32 %v1059_v7, %v1060_v24  ;;  %v1069_v35 = vmax.f32 %v782_v19, %v1068_v26  ;;  %v864_v19 = vrot.slane %v740_v27, 4  ;;  %v844_v8 = vrot.slane %v843_v6, 1 }
  0xef   : > { %v1296_v39 = vsel %vm1264_vm3, %v1055_v57, %v1295_v47  ;;  %v1064_v40 = vrot.slane %v1063_v30, 2  ;;  %v832_v47 = vrot.slane %v831_v37, 1  ;;  %v854_v25 = vrot.slane %v853_v15, 2 }
  0xf0   : > { %v1303_v12 = vsel %vm1264_vm3, %v1061_v33, %v1302_v60  ;;  %v1070_v21 = vrot.slane %v1069_v35, 2  ;;  %v859_v33 = vmax.f32 %v651_v20, %v858_v9 }
  0xf1   : > { %v1065_v41 = vmax.f32 %v1063_v30, %v1064_v40  ;;  %v2158_v23 = vmax.f32 %v831_v37, %v832_v47  ;;  %v865_v40 = vmax.f32 %v740_v27, %v864_v19 }
  0xf2   : > { %v1071_v45 = vmax.f32 %v1069_v35, %v1070_v21  ;;  %v696_v32 = vpop.f32.mrf.mxu2  ;;  %v653_v61 = vpop.f32.mrf.mxu0  ;;  %v849_v21 = vmax.f32 %v847_v48, %v848_v55 }
  0xf3   : > { %v1066_v50 = vrot.slane %v1065_v41, 1  ;;  %v1074_v58 = vrot.slane %v696_v32, 4  ;;  %v785_v60 = vpop.f32.mrf.mxu3  ;;  %v742_v5 = vpop.f32.mrf.mxu1  ;;  %v870_v57 = vrot.slane %v653_v61, 4 }
  0xf4   : > { %v1072_v2 = vrot.slane %v1071_v45, 1  ;;  %v1080_v3 = vrot.slane %v785_v60, 4  ;;  %v876_v31 = vrot.slane %v742_v5, 4 }
  0xf5   : > { %v1067_v7 = vmax.f32 %v1065_v41, %v1066_v50  ;;  %v1075_v14 = vmax.f32 %v696_v32, %v1074_v58  ;;  %v860_v58 = vrot.slane %v859_v33, 2 }
  0xf6   : > { %v1073_v16 = vmax.f32 %v1071_v45, %v1072_v2  ;;  %v1081_v24 = vmax.f32 %v785_v60, %v1080_v3  ;;  %v877_v32 = vmax.f32 %v742_v5, %v876_v31  ;;  %v866_v3 = vrot.slane %v865_v40, 2 }
  0xf7   : > { %v1297_v26 = vsel %vm1266_vm4, %v1067_v7, %v1296_v39  ;;  %v1076_v51 = vrot.slane %v1075_v14, 2  ;;  %v871_v39 = vmax.f32 %v653_v61, %v870_v57  ;;  %v855_v57 = vmax.f32 %v853_v15, %v854_v25 }
  0xf8   : > { %v1304_v59 = vsel %vm1266_vm4, %v1073_v16, %v1303_v12  ;;  %v1082_v30 = vrot.slane %v1081_v24, 2 }
  0xf9   : > { %v1077_v35 = vmax.f32 %v1075_v14, %v1076_v51  ;;  %v872_v14 = vrot.slane %v871_v39, 2  ;;  %v839_v51 = vmax.f32 %v837_v56, %v838_v28  ;;  %v856_v28 = vrot.slane %v855_v57, 1 }
  0xfa   : > { %v1083_v0 = vmax.f32 %v1081_v24, %v1082_v30  ;;  %v698_v10 = vpop.f32.mrf.mxu2  ;;  %v656_v37 = vpop.f32.mrf.mxu0  ;;  %v878_v24 = vrot.slane %v877_v32, 2 }
  0xfb   : > { %v1078_v38 = vrot.slane %v1077_v35, 1  ;;  %v1086_v41 = vrot.slane %v698_v10, 4  ;;  %v787_v44 = vpop.f32.mrf.mxu3  ;;  %v882_v47 = vrot.slane %v656_v37, 4  ;;  %v745_v50 = vpop.f32.mrf.mxu1 }
  0xfc   : > { %v1084_v45 = vrot.slane %v1083_v0, 1  ;;  %v1092_v12 = vrot.slane %v787_v44, 4  ;;  %v888_v2 = vrot.slane %v745_v50, 4 }
  0xfd   : > { %v1079_v20 = vmax.f32 %v1077_v35, %v1078_v38  ;;  %v1087_v60 = vmax.f32 %v698_v10, %v1086_v41  ;;  %v883_v9 = vmax.f32 %v656_v37, %v882_v47  ;;  %v845_v35 = vmax.f32 %v843_v6, %v844_v8 }
  0xfe   : > { %v1085_v7 = vmax.f32 %v1083_v0, %v1084_v45  ;;  %v1093_v27 = vmax.f32 %v787_v44, %v1092_v12  ;;  %v889_v16 = vmax.f32 %v745_v50, %v888_v2  ;;  %v850_v10 = vrot.slane %v849_v21, 1 }
  0xff   : > { %v1298_v48 = vsel %vm1268_vm5, %v1079_v20, %v1297_v26  ;;  %v1088_v61 = vrot.slane %v1087_v60, 2  ;;  %v884_v55 = vrot.slane %v883_v9, 2  ;;  %v861_v38 = vmax.f32 %v859_v33, %v860_v58 }
 0x100   : > { %v1305_v19 = vsel %vm1268_vm5, %v1085_v7, %v1304_v59  ;;  %v1094_v5 = vrot.slane %v1093_v27, 2  ;;  %v890_v31 = vrot.slane %v889_v16, 2  ;;  %v867_v44 = vmax.f32 %v865_v40, %v866_v3 }
 0x101   : > { %v1089_v30 = vmax.f32 %v1087_v60, %v1088_v61  ;;  %v873_v26 = vmax.f32 %v871_v39, %v872_v14  ;;  %v879_v12 = vmax.f32 %v877_v32, %v878_v24  ;;  %v885_v50 = vmax.f32 %v883_v9, %v884_v55 }
 0x102   : > { %v1095_v0 = vmax.f32 %v1093_v27, %v1094_v5  ;;  %v2163_v41 = vpop.f32.mrf.mxu2  ;;  %v658_v59 = vpop.f32.mrf.mxu0  ;;  %v891_v6 = vmax.f32 %v889_v16, %v890_v31  ;;  %v851_v33 = vmax.f32 %v849_v21, %v850_v10  ;;  %v862_v58 = vrot.slane %v861_v38, 1 }
 0x103   : > { %v1090_v37 = vrot.slane %v1089_v30, 1  ;;  %v2165_v45 = vpop.f32.mrf.mxu3  ;;  %v894_v56 = vrot.slane %v658_v59, 4  ;;  %v747_v15 = vpop.f32.mrf.mxu1  ;;  %v868_v40 = vrot.slane %v867_v44, 1  ;;  %v874_v39 = vrot.slane %v873_v26, 1 }
 0x104   : > { %v1096_v47 = vrot.slane %v1095_v0, 1  ;;  %v900_v8 = vrot.slane %v747_v15, 4  ;;  %v880_v7 = vrot.slane %v879_v12, 1  ;;  %v886_v9 = vrot.slane %v885_v50, 1 }
 0x105   : > { %v1091_v25 = vmax.f32 %v1089_v30, %v1090_v37  ;;  %v895_v60 = vmax.f32 %v658_v59, %v894_v56  ;;  %v857_v14 = vmax.f32 %v855_v57, %v856_v28  ;;  %v892_v21 = vrot.slane %v891_v6, 1 }
 0x106   : > { %v1097_v20 = vmax.f32 %v1095_v0, %v1096_v47  ;;  %v901_v3 = vmax.f32 %v747_v15, %v900_v8  ;;  %v1259_v24 = vsel %vm1258_vm0, %v2154_v42, %v2148_v4  ;;  %v863_v5 = vmax.f32 %v861_v38, %v862_v58 }
 0x107   : > { %v1299_v2 = vsel %vm1270_vm6, %v1091_v25, %v1298_v48  ;;  %v896_v16 = vrot.slane %v895_v60, 2  ;;  %v1272_v48 = vsel %vm1258_vm0, %v2158_v23, %v2150_v43  ;;  %v869_v30 = vmax.f32 %v867_v44, %v868_v40 }
 0x108   : > { %v2169_v32 = vadd.f32 %v1299_v2, %v2123_v13  ;;  %v1306_v27 = vsel %vm1270_vm6, %v1097_v20, %v1305_v19  ;;  %v902_v13 = vrot.slane %v901_v3, 2  ;;  %v1261_v19 = vsel %vm1260_vm1, %v839_v51, %v1259_v24 }
 0x109   : > { %v2173_v61 = vadd.f32 %v1306_v27, %v2134_v62  ;;  %v875_v57 = vmax.f32 %v873_v26, %v874_v39  ;;  %v897_v31 = vmax.f32 %v895_v60, %v896_v16  ;;  %v1273_v0 = vsel %vm1260_vm1, %v845_v35, %v1272_v48 }
 0x10a   : > { %v703_v55 = vpop.f32.mrf.mxu2  ;;  %v661_v10 = vpop.f32.mrf.mxu0  ;;  %v881_v37 = vmax.f32 %v879_v12, %v880_v7  ;;  %v887_v59 = vmax.f32 %v885_v50, %v886_v9  ;;  %v903_v47 = vmax.f32 %v901_v3, %v902_v13  ;;  %v1263_v42 = vsel %vm1262_vm2, %v851_v33, %v1261_v19 }
 0x10b   : > { %v792_v62 = vpop.f32.mrf.mxu3  ;;  %v750_v4 = vpop.f32.mrf.mxu1  ;;  %v1274_v43 = vsel %vm1262_vm2, %v857_v14, %v1273_v0  ;;  %v893_v23 = vmax.f32 %v891_v6, %v892_v21  ;;  %v898_v38 = vrot.slane %v897_v31, 1  ;;  %v1265_v51 = vsel %vm1264_vm3, %v863_v5, %v1263_v42 }
 0x10c   : > { %v1098_v44 = vrot.slane %v2163_v41, 4  ;;  %v1104_v26 = vrot.slane %v2165_v45, 4  ;;  %v904_v56 = vrot.slane %v903_v47, 1  ;;  %v1275_v35 = vsel %vm1264_vm3, %v869_v30, %v1274_v43 }
 0x10d   : > { %v1267_v12 = vsel %vm1266_vm4, %v875_v57, %v1265_v51  ;;  %v899_v50 = vmax.f32 %v897_v31, %v898_v38  ;;  %v1110_v15 = vrot.slane %v703_v55, 4  ;;  %v1276_v28 = vsel %vm1266_vm4, %v881_v37, %v1275_v35 }
 0x10e   : > { %v1269_v25 = vsel %vm1268_vm5, %v887_v59, %v1267_v12  ;;  %v905_v8 = vmax.f32 %v903_v47, %v904_v56  ;;  %v1116_v6 = vrot.slane %v792_v62, 4  ;;  %v2196_v33 = vmax.f32 %v2088_v11, %v988_v29 }
 0x10f   : > { %v999_v58 = vmax.f32 %v2138_v36, %v998_v54  ;;  %v1277_v20 = vsel %vm1268_vm5, %v893_v23, %v1276_v28  ;;  %v1271_v60 = vsel %vm1270_vm6, %v899_v50, %v1269_v25  ;;  %v1099_v40 = vmax.f32 %v2163_v41, %v1098_v44 }
 0x110   : > { %v1105_v39 = vmax.f32 %v2165_v45, %v1104_v26  ;;  %v1329_v2 = vadd.f32 %v1271_v60, %v2093_v17  ;;  %v1278_v3 = vsel %vm1270_vm6, %v905_v8, %v1277_v20  ;;  %v1111_v29 = vmax.f32 %v703_v55, %v1110_v15 }
 0x111   : > { %v1330_v11 = vadd.f32 %v1278_v3, %v2097_v18  ;;  %v906_v27 = vrot.slane %v661_v10, 4  ;;  %v994_v54 = vrot.slane %v2146_v34, 1  ;;  %v1117_v41 = vmax.f32 %v792_v62, %v1116_v6 }
 0x112   : > { %v706_v7 = vpop.f32.mrf.mxu2  ;;  %v663_v36 = vpop.f32.mrf.mxu0  ;;  %vm1337_vm7 = vcmp.gt.f32.partialorder %v1329_v2, 0.0  ;;  %v1345_v17 = vmul.f32 0.2, %v1329_v2  ;;  %v1000_v21 = vrot.slane %v999_v58, 1  ;;  %v912_v16 = vrot.slane %v750_v4, 4 }
 0x113   : > { %v1122_v9 = vrot.slane %v706_v7, 4  ;;  %v795_v14 = vpop.f32.mrf.mxu3  ;;  %v752_v45 = vpop.f32.mrf.mxu1  ;;  %vm1338_vm8 = vcmp.gt.f32.partialorder %v1330_v11, 0.0  ;;  %v1346_v18 = vmul.f32 0.2, %v1330_v11  ;;  %v1100_v24 = vrot.slane %v1099_v40, 2 }
 0x114   : > { %v1106_v48 = vrot.slane %v1105_v39, 2  ;;  %v1353_v5 = vsel %vm1337_vm7, %v1329_v2, %v1345_v17  ;;  %v1112_v19 = vrot.slane %v1111_v29, 2  ;;  %v907_v30 = vmax.f32 %v661_v10, %v906_v27 }
 0x115   : > { %v1123_v13 = vmax.f32 %v706_v7, %v1122_v9  ;;  %1361 = vst [vmem:[%s2211_s23] sm:$0xff] %v1353_v5  ;;  %v1354_v55 = vsel %vm1338_vm8, %v1330_v11, %v1346_v18  ;;  %v1128_v57 = vrot.slane %v795_v14, 4  ;;  %v2216_v31 = vmax.f32 %v2146_v34, %v994_v54 }
 0x116   : > { %v2220_v62 = vadd.f32 %v2062_v63, %v2079_v52  ;;  %1362 = vst [vmem:[%s2211_s23 + $0x8] sm:$0xff] %v1354_v55  ;;  %v1118_v0 = vrot.slane %v1117_v41, 2  ;;  %v918_v37 = vrot.slane %v663_v36, 4  ;;  %v2225_v59 = vadd.f32 %v2064_v1, %v2081_v53 }
 0x117   : > { %v913_v47 = vmax.f32 %v750_v4, %v912_v16  ;;  %v1124_v42 = vrot.slane %v1123_v13, 2  ;;  %v924_v43 = vrot.slane %v752_v45, 4  ;;  %v2227_v23 = vmax.f32 %v999_v58, %v1000_v21 }
 0x118   : > { %v1101_v10 = vmax.f32 %v1099_v40, %v1100_v24  ;;  %v1107_v38 = vmax.f32 %v1105_v39, %v1106_v48  ;;  %v1129_v34 = vmax.f32 %v795_v14, %v1128_v57  ;;  %v1113_v44 = vmax.f32 %v1111_v29, %v1112_v19 }
 0x119   : > { %v908_v26 = vrot.slane %v907_v30, 2  ;;  %v919_v63 = vmax.f32 %v663_v36, %v918_v37  ;;  %v1119_v12 = vmax.f32 %v1117_v41, %v1118_v0  ;;  %v925_v50 = vmax.f32 %v752_v45, %v924_v43 }
 0x11a   : > { %v708_v51 = vpop.f32.mrf.mxu2  ;;  %v666_v35 = vpop.f32.mrf.mxu0  ;;  %v914_v4 = vrot.slane %v913_v47, 2  ;;  %v1125_v28 = vmax.f32 %v1123_v13, %v1124_v42  ;;  %v1102_v6 = vrot.slane %v1101_v10, 1  ;;  %v1108_v58 = vrot.slane %v1107_v38, 1 }
 0x11b   : > { %v1134_v52 = vrot.slane %v708_v51, 4  ;;  %v797_v56 = vpop.f32.mrf.mxu3  ;;  %v930_v1 = vrot.slane %v666_v35, 4  ;;  %v755_v53 = vpop.f32.mrf.mxu1  ;;  %v1130_v20 = vrot.slane %v1129_v34, 2  ;;  %v1114_v40 = vrot.slane %v1113_v44, 1 }
 0x11c   : > { %v1140_v15 = vrot.slane %v797_v56, 4  ;;  %v936_v8 = vrot.slane %v755_v53, 4  ;;  %v909_v39 = vmax.f32 %v907_v30, %v908_v26  ;;  %v920_v2 = vrot.slane %v919_v63, 2 }
 0x11d   : > { %v1135_v25 = vmax.f32 %v708_v51, %v1134_v52  ;;  %v931_v3 = vmax.f32 %v666_v35, %v930_v1  ;;  %v2230_v7 = vmul.f32 0.2, %v2169_v32  ;;  %v1120_v11 = vrot.slane %v1119_v12, 1 }
 0x11e   : > { %v1141_v60 = vmax.f32 %v797_v56, %v1140_v15  ;;  %v926_v29 = vrot.slane %v925_v50, 2  ;;  %v2233_v9 = vmul.f32 0.2, %v2173_v61  ;;  %v915_v14 = vmax.f32 %v913_v47, %v914_v4 }
 0x11f   : > { %v1136_v27 = vrot.slane %v1135_v25, 2  ;;  %v1126_v36 = vrot.slane %v1125_v28, 1  ;;  %v937_v54 = vmax.f32 %v755_v53, %v936_v8  ;;  %v1103_v17 = vmax.f32 %v1101_v10, %v1102_v6 }
 0x120   : > { %v1109_v41 = vmax.f32 %v1107_v38, %v1108_v58  ;;  %v1131_v45 = vmax.f32 %v1129_v34, %v1130_v20  ;;  %v1142_v21 = vrot.slane %v1141_v60, 2  ;;  %v1115_v16 = vmax.f32 %v1113_v44, %v1114_v40 }
 0x121   : > { %v910_v24 = vrot.slane %v909_v39, 1  ;;  %v921_v48 = vmax.f32 %v919_v63, %v920_v2  ;;  %v932_v5 = vrot.slane %v931_v3, 2  ;;  %v1121_v19 = vmax.f32 %v1119_v12, %v1120_v11 }
 0x122   : > { %v711_v18 = vpop.f32.mrf.mxu2  ;;  %v668_v55 = vpop.f32.mrf.mxu0  ;;  %v927_v30 = vmax.f32 %v925_v50, %v926_v29  ;;  %v1137_v57 = vmax.f32 %v1135_v25, %v1136_v27  ;;  %v916_v42 = vrot.slane %v915_v14, 1  ;;  %v1127_v47 = vmax.f32 %v1125_v28, %v1126_v36 }
 0x123   : > { %v800_v13 = vpop.f32.mrf.mxu3  ;;  %v1146_v0 = vrot.slane %v711_v18, 4  ;;  %v757_v37 = vpop.f32.mrf.mxu1  ;;  %v938_v43 = vrot.slane %v937_v54, 2  ;;  %v1132_v10 = vrot.slane %v1131_v45, 1  ;;  %v1143_v38 = vmax.f32 %v1141_v60, %v1142_v21 }
 0x124   : > { %v1152_v51 = vrot.slane %v800_v13, 4  ;;  %v942_v26 = vrot.slane %v668_v55, 4  ;;  %v922_v52 = vrot.slane %v921_v48, 1  ;;  %v933_v44 = vmax.f32 %v931_v3, %v932_v5 }
 0x125   : > { %v1147_v34 = vmax.f32 %v711_v18, %v1146_v0  ;;  %v948_v63 = vrot.slane %v757_v37, 4  ;;  %v1307_v35 = vsel %vm1258_vm0, %v1115_v16, %v1103_v17  ;;  %v911_v15 = vmax.f32 %v909_v39, %v910_v24 }
 0x126   : > { %v1153_v56 = vmax.f32 %v800_v13, %v1152_v51  ;;  %v928_v12 = vrot.slane %v927_v30, 1  ;;  %v1138_v50 = vrot.slane %v1137_v57, 1  ;;  %v1314_v1 = vsel %vm1258_vm0, %v1121_v19, %v1109_v41 }
 0x127   : > { %v917_v53 = vmax.f32 %v915_v14, %v916_v42  ;;  %v939_v4 = vmax.f32 %v937_v54, %v938_v43  ;;  %v943_v28 = vmax.f32 %v668_v55, %v942_v26  ;;  %v1308_v25 = vsel %vm1260_vm1, %v1127_v47, %v1307_v35 }
 0x128   : > { %v1144_v8 = vrot.slane %v1143_v38, 1  ;;  %v1148_v6 = vrot.slane %v1147_v34, 2  ;;  %v949_v58 = vmax.f32 %v757_v37, %v948_v63  ;;  %v1133_v60 = vmax.f32 %v1131_v45, %v1132_v10 }
 0x129   : > { %v923_v40 = vmax.f32 %v921_v48, %v922_v52  ;;  %v934_v2 = vrot.slane %v933_v44, 1  ;;  %v1154_v3 = vrot.slane %v1153_v56, 2  ;;  %v929_v39 = vmax.f32 %v927_v30, %v928_v12 }
 0x12a   : > { %v713_v20 = vpop.f32.mrf.mxu2  ;;  %v671_v29 = vpop.f32.mrf.mxu0  ;;  %v1139_v27 = vmax.f32 %v1137_v57, %v1138_v50  ;;  %v940_v14 = vrot.slane %v939_v4, 1  ;;  %v944_v54 = vrot.slane %v943_v28, 2  ;;  %v1145_v16 = vmax.f32 %v1143_v38, %v1144_v8 }
 0x12b   : > { %v802_v11 = vpop.f32.mrf.mxu3  ;;  %v1158_v36 = vrot.slane %v713_v20, 4  ;;  %v954_v17 = vrot.slane %v671_v29, 4  ;;  %v760_v41 = vpop.f32.mrf.mxu1  ;;  %v1149_v24 = vmax.f32 %v1147_v34, %v1148_v6  ;;  %v950_v5 = vrot.slane %v949_v58, 2 }
 0x12c   : > { %v1164_v21 = vrot.slane %v802_v11, 4  ;;  %v960_v18 = vrot.slane %v760_v41, 4  ;;  %v1315_v45 = vsel %vm1260_vm1, %v1133_v60, %v1314_v1  ;;  %v935_v48 = vmax.f32 %v933_v44, %v934_v2 }
 0x12d   : > { %v955_v13 = vmax.f32 %v671_v29, %v954_v17  ;;  %v1155_v55 = vmax.f32 %v1153_v56, %v1154_v3  ;;  %v1279_v0 = vsel %vm1258_vm0, %v923_v40, %v911_v15  ;;  %v1286_v30 = vsel %vm1258_vm0, %v929_v39, %v917_v53 }
 0x12e   : > { %v961_v19 = vmax.f32 %v760_v41, %v960_v18  ;;  %v1159_v57 = vmax.f32 %v713_v20, %v1158_v36  ;;  %v1309_v42 = vsel %vm1262_vm2, %v1139_v27, %v1308_v25  ;;  %v945_v47 = vmax.f32 %v943_v28, %v944_v54 }
 0x12f   : > { %v956_v37 = vrot.slane %v955_v13, 2  ;;  %v1165_v43 = vmax.f32 %v802_v11, %v1164_v21  ;;  %v2243_v10 = vsel %vm1262_vm2, %v1145_v16, %v1315_v45  ;;  %v941_v38 = vmax.f32 %v939_v4, %v940_v14 }
 0x130   : > { %v962_v51 = vrot.slane %v961_v19, 2  ;;  %v1150_v34 = vrot.slane %v1149_v24, 1  ;;  %v951_v26 = vmax.f32 %v949_v58, %v950_v5  ;;  %v1280_v44 = vsel %vm1260_vm1, %v935_v48, %v1279_v0 }
 0x131   : > { %v1156_v56 = vrot.slane %v1155_v55, 1  ;;  %v957_v63 = vmax.f32 %v955_v13, %v956_v37  ;;  %v1160_v50 = vrot.slane %v1159_v57, 2  ;;  %v946_v8 = vrot.slane %v945_v47, 1 }
 0x132   : > { %v716_v52 = vpop.f32.mrf.mxu2  ;;  %v673_v12 = vpop.f32.mrf.mxu0  ;;  %v963_v1 = vmax.f32 %v961_v19, %v962_v51  ;;  %v1166_v6 = vrot.slane %v1165_v43, 2  ;;  %v1151_v4 = vmax.f32 %v1149_v24, %v1150_v34  ;;  %v952_v40 = vrot.slane %v951_v26, 1 }
 0x133   : > { %v1170_v35 = vrot.slane %v716_v52, 4  ;;  %v805_v15 = vpop.f32.mrf.mxu3  ;;  %v966_v28 = vrot.slane %v673_v12, 4  ;;  %v762_v25 = vpop.f32.mrf.mxu1  ;;  %v1287_v3 = vsel %vm1260_vm1, %v941_v38, %v1286_v30  ;;  %v958_v11 = vrot.slane %v957_v63, 1 }
 0x134   : > { %v1176_v53 = vrot.slane %v805_v15, 4  ;;  %v972_v60 = vrot.slane %v762_v25, 4  ;;  %v1161_v27 = vmax.f32 %v1159_v57, %v1160_v50  ;;  %v964_v36 = vrot.slane %v963_v1, 1 }
 0x135   : > { %v1171_v20 = vmax.f32 %v716_v52, %v1170_v35  ;;  %v967_v2 = vmax.f32 %v673_v12, %v966_v28  ;;  %v1157_v14 = vmax.f32 %v1155_v55, %v1156_v56  ;;  %v947_v54 = vmax.f32 %v945_v47, %v946_v8 }
 0x136   : > { %v1177_v58 = vmax.f32 %v805_v15, %v1176_v53  ;;  %v973_v39 = vmax.f32 %v762_v25, %v972_v60  ;;  %v1167_v21 = vmax.f32 %v1165_v43, %v1166_v6  ;;  %v1310_v16 = vsel %vm1264_vm3, %v1151_v4, %v1309_v42 }
 0x137   : > { %v1172_v29 = vrot.slane %v1171_v20, 2  ;;  %v968_v41 = vrot.slane %v967_v2, 2  ;;  %v953_v5 = vmax.f32 %v951_v26, %v952_v40  ;;  %v959_v48 = vmax.f32 %v957_v63, %v958_v11 }
 0x138   : > { %v1178_v17 = vrot.slane %v1177_v58, 2  ;;  %v974_v18 = vrot.slane %v973_v39, 2  ;;  %v1162_v51 = vrot.slane %v1161_v27, 1  ;;  %v965_v57 = vmax.f32 %v963_v1, %v964_v36 }
 0x139   : > { %v1173_v24 = vmax.f32 %v1171_v20, %v1172_v29  ;;  %v969_v13 = vmax.f32 %v967_v2, %v968_v41  ;;  %v1281_v55 = vsel %vm1262_vm2, %v947_v54, %v1280_v44  ;;  %v1168_v47 = vrot.slane %v1167_v21, 1 }
 0x13a   : > { %v718_v45 = vpop.f32.mrf.mxu2  ;;  %v1179_v19 = vmax.f32 %v1177_v58, %v1178_v17  ;;  %v975_v0 = vmax.f32 %v973_v39, %v974_v18  ;;  %vm1341_vm9 = vcmp.gt.f32.partialorder %v2169_v32, 0.0  ;;  %v1288_v42 = vsel %vm1262_vm2, %v953_v5, %v1287_v3 }
 0x13b   : > { %v1182_v30 = vrot.slane %v718_v45, 4  ;;  %v807_v37 = vpop.f32.mrf.mxu3  ;;  %v970_v38 = vrot.slane %v969_v13, 1  ;;  %v1174_v26 = vrot.slane %v1173_v24, 1  ;;  %v1282_v35 = vsel %vm1264_vm3, %v959_v48, %v1281_v55 }
 0x13c   : > { %v1188_v34 = vrot.slane %v807_v37, 4  ;;  %v976_v43 = vrot.slane %v975_v0, 1  ;;  %v1180_v15 = vrot.slane %v1179_v19, 1  ;;  %v1163_v1 = vmax.f32 %v1161_v27, %v1162_v51 }
 0x13d   : > { %v1183_v52 = vmax.f32 %v718_v45, %v1182_v30  ;;  %v971_v56 = vmax.f32 %v969_v13, %v970_v38  ;;  %v1289_v53 = vsel %vm1264_vm3, %v965_v57, %v1288_v42  ;;  %v1169_v25 = vmax.f32 %v1167_v21, %v1168_v47 }
 0x13e   : > { %v1189_v63 = vmax.f32 %v807_v37, %v1188_v34  ;;  %v977_v12 = vmax.f32 %v975_v0, %v976_v43  ;;  %v1175_v60 = vmax.f32 %v1173_v24, %v1174_v26  ;;  %v1181_v2 = vmax.f32 %v1179_v19, %v1180_v15 }
 0x13f   : > { %v1184_v50 = vrot.slane %v1183_v52, 2  ;;  %v1283_v44 = vsel %vm1266_vm4, %v971_v56, %v1282_v35  ;;  %v1311_v39 = vsel %vm1266_vm4, %v1163_v1, %v1310_v16  ;;  %vm1342_vm12 = vcmp.gt.f32.partialorder %v2173_v61, 0.0 }
 0x140   : > { %v1190_v28 = vrot.slane %v1189_v63, 2  ;;  %v1284_v8 = vsel %vm1268_vm5, %v2126_v46, %v1283_v44  ;;  %v1290_v6 = vsel %vm1266_vm4, %v977_v12, %v1289_v53  ;;  %v1317_v46 = vsel %vm1264_vm3, %v1157_v14, %v2243_v10 }
 0x141   : > { %v1185_v20 = vmax.f32 %v1183_v52, %v1184_v50  ;;  %v1285_v4 = vsel %vm1270_vm6, %v2216_v31, %v1284_v8  ;;  %v1291_v40 = vsel %vm1268_vm5, %v2196_v33, %v1290_v6  ;;  %v1318_v36 = vsel %vm1266_vm4, %v1169_v25, %v1317_v46 }
 0x142   : > { %v1191_v58 = vmax.f32 %v1189_v63, %v1190_v28  ;;  %v1331_v3 = vadd.f32 %v1285_v4, %v2102_v22  ;;  %v1292_v11 = vsel %vm1270_vm6, %v2227_v23, %v1291_v40  ;;  %v1312_v22 = vsel %vm1268_vm5, %v1175_v60, %v1311_v39 }
 0x143   : > { %v1186_v29 = vrot.slane %v1185_v20, 1  ;;  %v1332_v27 = vadd.f32 %v1292_v11, %v2108_v49  ;;  %v1319_v10 = vsel %vm1268_vm5, %v1181_v2, %v1318_v36  ;;  %v1357_v16 = vsel %vm1341_vm9, %v2169_v32, %v2230_v7 }
 0x144   : > { %v1192_v31 = vrot.slane %v1191_v58, 1  ;;  %vm1339_vm10 = vcmp.gt.f32.partialorder %v1331_v3, 0.0  ;;  %v1347_v33 = vmul.f32 0.2, %v1331_v3  ;;  %v1358_v24 = vsel %vm1342_vm12, %v2173_v61, %v2233_v9  ;;  %1365 = vst [vmem:[%s2211_s23 + $0x20] sm:$0xff] %v1357_v16 }
 0x145   : > { %v1187_v17 = vmax.f32 %v1185_v20, %v1186_v29  ;;  %vm1340_vm11 = vcmp.gt.f32.partialorder %v1332_v27, 0.0  ;;  %v1348_v23 = vmul.f32 0.2, %v1332_v27  ;;  %1366 = vst [vmem:[%s2211_s23 + $0x28] sm:$0xff] %v1358_v24 }
 0x146   : > { %v1193_v41 = vmax.f32 %v1191_v58, %v1192_v31  ;;  %v1355_v14 = vsel %vm1339_vm10, %v1331_v3, %v1347_v33 }
 0x147   : > { %v1313_v49 = vsel %vm1270_vm6, %v1187_v17, %v1312_v22  ;;  %1363 = vst [vmem:[%s2211_s23 + $0x10] sm:$0xff] %v1355_v14  ;;  %v1356_v54 = vsel %vm1340_vm11, %v1332_v27, %v1348_v23 }
 0x148   : > { %v1335_v21 = vadd.f32 %v1313_v49, %v2220_v62  ;;  %v1320_v18 = vsel %vm1270_vm6, %v1193_v41, %v1319_v10  ;;  %1364 = vst [vmem:[%s2211_s23 + $0x18] sm:$0xff] %v1356_v54 }
 0x149   : > { %v1336_v5 = vadd.f32 %v1320_v18, %v2225_v59 }
 0x14a   : > { %vm1343_vm13 = vcmp.gt.f32.partialorder %v1335_v21, 0.0  ;;  %v1351_v13 = vmul.f32 0.2, %v1335_v21 }
 0x14b   : > { %vm1344_vm14 = vcmp.gt.f32.partialorder %v1336_v5, 0.0  ;;  %v1352_v45 = vmul.f32 0.2, %v1336_v5 }
 0x14c   : > { %v1359_v62 = vsel %vm1343_vm13, %v1335_v21, %v1351_v13 }
 0x14d   : > { %1367 = vst [vmem:[%s2211_s23 + $0x30] sm:$0xff] %v1359_v62  ;;  %v1360_v48 = vsel %vm1344_vm14, %v1336_v5, %v1352_v45 }
 0x14e   : > { %1368 = vst [vmem:[%s2211_s23 + $0x38] sm:$0xff] %v1360_v48 }
 0x14f PF: > { %s15_s18 = sadd.s32 1, %s1734_s18  }
 0x150   : > { %p12_p5 = scmp.ge.s32.totalorder %s15_s18, 4  }
 0x152   :  { %14 = sbr.rel (!%p12_p5) target bundleno = 1 (0x1), region = 73 }

// kernel: net_forward.10
= control target key start
LH: loop header
LB: loop body
LE: loop exit
PB: predicated region body
PF: predicated region fallthrough
CT: control target
= control target key end

     0   :  { %s4570_s30 = smov 0   ;;  %s6651_s0 = inlined_call_operand.vmem [shape: bf16[64,64], index: 0, kind: input, shape index: {}]   ;;  %s6652_s1 = inlined_call_operand.vmem [shape: bf16[64,64], index: 1, kind: input, shape index: {}]   ;;  %s6653_s2 = inlined_call_operand.vmem [shape: bf16[64,128], index: 2, kind: input, shape index: {}]   ;;  %s6654_s3 = inlined_call_operand.vmem [shape: bf16[64,256], index: 3, kind: input, shape index: {}]   ;;  %s6655_s4 = inlined_call_operand.vmem [shape: bf16[64,1024], index: 4, kind: input, shape index: {}]   ;;  %s6656_s5 = inlined_call_operand.vmem [shape: bf16[64,1024], index: 5, kind: input, shape index: {}]   ;;  %s6657_s6 = inlined_call_operand.vmem [shape: bf16[128,1024], index: 6, kind: input, shape index: {}]   ;;  %s6658_s7 = inlined_call_operand.vmem [shape: bf16[256,1024], index: 7, kind: input, shape index: {}]   ;;  %s6659_s8 = inlined_call_operand.vmem [shape: f32[1,1024], index: 8, kind: input, shape index: {}]   ;;  %s6660_s9 = inlined_call_operand.vmem [shape: f32[64,1024], index: 9, kind: output, shape index: {}]  }
   0x1 LB: > { %s3121_s10 = sadd.s32 4294967295, %s4518_s30   ;;  %p3125_p0 = scmp.ge.s32.totalorder %s4518_s30, 1  ;;  %s4518_s30 = sphi %s4570_s30, %s19_s30  }
   0x2   : > { %p322_p1 = scmp.lt.s32.totalorder %s4518_s30, 3 }
   0x4   : > { %p323_p2 = pnand %p3125_p0, %p322_p1 }
   0x5   : > { %s3126_s18 = sshll.u32 (!%p323_p2), %s3121_s10, 2 }
   0x6   : > { %326 = sbr.rel (%p323_p2) target bundleno = 486 (0x1e6), region = 56  ;;  %p376_p3 = scmp.lt.s32.totalorder (!%p323_p2), %s3126_s18, 7 }
   0xb   : > { %v3244_v0 = vld [vmem:[%s6656_s5 + $0xc0] sm:$0xf]  ;;  %v4298_v2 = vld [vmem:[%s6656_s5 + $0xc4] sm:$0xf]  ;;  %v3252_v5 = vld [vmem:[%s6656_s5 + $0xc8] sm:$0xf] }
   0xc   : > { %v4302_v1 = vld [vmem:[%s6656_s5 + $0xdc] sm:$0xf0]  ;;  %v3246_v4 = vld [vmem:[%s6656_s5 + $0xe0] sm:$0xf0]  ;;  %v4303_v6 = vld [vmem:[%s6656_s5 + $0xe4] sm:$0xf0] }
   0xd   : > { %v3245_v3 = vor.u32 %v4302_v1, %v3244_v0  ;;  %v3249_v7 = vor.u32 %v4298_v2, %v3246_v4  ;;  %v3253_v8 = vor.u32 %v4303_v6, %v3252_v5  ;;  %v4299_v9 = vld [vmem:[%s6656_s5 + $0xcc] sm:$0xf]  ;;  %v3212_v11 = vld [vmem:[%s6656_s5 + $0x80] sm:$0xf]  ;;  %v4290_v14 = vld [vmem:[%s6656_s5 + $0x84] sm:$0xf] }
   0xe   : > { %v3254_v10 = vld [vmem:[%s6656_s5 + $0xe8] sm:$0xf0]  ;;  %v4294_v13 = vld [vmem:[%s6656_s5 + $0x9c] sm:$0xf0]  ;;  %v3214_v15 = vld [vmem:[%s6656_s5 + $0xa0] sm:$0xf0] }
   0xf   : > { %661 = vmatpush.bf16.msra.mxu0 %v3245_v3  ;;  %v3257_v12 = vor.u32 %v4299_v9, %v3254_v10  ;;  %680 = vmatpush.bf16.msra.mxu1 %v3249_v7  ;;  %v3213_v16 = vor.u32 %v4294_v13, %v3212_v11  ;;  %v3217_v17 = vor.u32 %v4290_v14, %v3214_v15  ;;  %v3220_v18 = vld [vmem:[%s6656_s5 + $0x88] sm:$0xf]  ;;  %v4291_v20 = vld [vmem:[%s6656_s5 + $0x8c] sm:$0xf]  ;;  %v3180_v23 = vld [vmem:[%s6656_s5 + $0x40] sm:$0xf] }
  0x10   : > { %699 = vmatpush.bf16.msra.mxu2 %v3253_v8  ;;  %v4295_v19 = vld [vmem:[%s6656_s5 + $0xa4] sm:$0xf0]  ;;  %v3222_v22 = vld [vmem:[%s6656_s5 + $0xa8] sm:$0xf0]  ;;  %v4286_v24 = vld [vmem:[%s6656_s5 + $0x5c] sm:$0xf0] }
  0x11   : > { %718 = vmatpush.bf16.msra.mxu3 %v3257_v12  ;;  %v3221_v21 = vor.u32 %v4295_v19, %v3220_v18  ;;  %v3225_v25 = vor.u32 %v4291_v20, %v3222_v22  ;;  %v4282_v26 = vld [vmem:[%s6656_s5 + $0x44] sm:$0xf]  ;;  %v3188_v28 = vld [vmem:[%s6656_s5 + $0x48] sm:$0xf]  ;;  %v3181_v29 = vor.u32 %v4286_v24, %v3180_v23  ;;  %v4283_v31 = vld [vmem:[%s6656_s5 + $0x4c] sm:$0xf] }
  0x12   : > { %v3182_v27 = vld [vmem:[%s6656_s5 + $0x60] sm:$0xf0]  ;;  %v4287_v30 = vld [vmem:[%s6656_s5 + $0x64] sm:$0xf0]  ;;  %v3190_v32 = vld [vmem:[%s6656_s5 + $0x68] sm:$0xf0] }
  0x13   : > { %662 = vmatpush.bf16.msra.mxu0 %v3213_v16  ;;  %681 = vmatpush.bf16.msra.mxu1 %v3217_v17  ;;  %v3185_v33 = vor.u32 %v4282_v26, %v3182_v27  ;;  %v3189_v34 = vor.u32 %v4287_v30, %v3188_v28  ;;  %v3148_v35 = vld [vmem:[%s6656_s5] sm:$0xf]  ;;  %v4274_v37 = vld [vmem:[%s6656_s5 + $0x4] sm:$0xf]  ;;  %v3193_v38 = vor.u32 %v4283_v31, %v3190_v32  ;;  %v3156_v40 = vld [vmem:[%s6656_s5 + $0x8] sm:$0xf] }
  0x14   : > { %700 = vmatpush.bf16.msra.mxu2 %v3221_v21  ;;  %v4278_v36 = vld [vmem:[%s6656_s5 + $0x1c] sm:$0xf0]  ;;  %v3150_v39 = vld [vmem:[%s6656_s5 + $0x20] sm:$0xf0]  ;;  %v4279_v41 = vld [vmem:[%s6656_s5 + $0x24] sm:$0xf0] }
  0x15   : > { %719 = vmatpush.bf16.msra.mxu3 %v3225_v25  ;;  %v4275_v42 = vld [vmem:[%s6656_s5 + $0xc] sm:$0xf]  ;;  %v3149_v44 = vor.u32 %v4278_v36, %v3148_v35  ;;  %v3268_v45 = vld [vmem:[%s6656_s5 + $0xd8] sm:$0xf]  ;;  %v3153_v47 = vor.u32 %v4274_v37, %v3150_v39  ;;  %v3157_v48 = vor.u32 %v4279_v41, %v3156_v40  ;;  %v4301_v49 = vld [vmem:[%s6656_s5 + $0xdc] sm:$0xf] }
  0x16   : > { %v3158_v43 = vld [vmem:[%s6656_s5 + $0x28] sm:$0xf0]  ;;  %v4305_v46 = vld [vmem:[%s6656_s5 + $0xf4] sm:$0xf0]  ;;  %v3270_v50 = vld [vmem:[%s6656_s5 + $0xf8] sm:$0xf0] }
  0x17   : > { %663 = vmatpush.bf16.msra.mxu0 %v3181_v29  ;;  %682 = vmatpush.bf16.msra.mxu1 %v3185_v33  ;;  %v3260_v51 = vld [vmem:[%s6656_s5 + $0xd0] sm:$0xf]  ;;  %v3161_v52 = vor.u32 %v4275_v42, %v3158_v43  ;;  %s6662_s18 = smov (!%p376_p3, %s3126_s18), 7  ;;  %v3269_v53 = vor.u32 %v4305_v46, %v3268_v45  ;;  %v4300_v55 = vld [vmem:[%s6656_s5 + $0xd4] sm:$0xf]  ;;  %v3273_v56 = vor.u32 %v4301_v49, %v3270_v50  ;;  %vm650_vm0 = vcmask 523264  }
  0x18   : > { %701 = vmatpush.bf16.msra.mxu2 %v3189_v34  ;;  %v4304_v54 = vld [vmem:[%s6656_s5 + $0xec] sm:$0xf0]  ;;  %v3262_v58 = vld [vmem:[%s6656_s5 + $0xf0] sm:$0xf0]  ;;  %v3236_v59 = vld [vmem:[%s6656_s5 + $0x98] sm:$0xf] }
  0x19   : > { %720 = vmatpush.bf16.msra.mxu3 %v3193_v38  ;;  %v3261_v57 = vor.u32 %v4304_v54, %v3260_v51  ;;  %v4297_v60 = vld [vmem:[%s6656_s5 + $0xb4] sm:$0xf0]  ;;  %s4709_s20 = sshll.u32 %s6662_s18, 2  ;;  %v4293_v61 = vld [vmem:[%s6656_s5 + $0x9c] sm:$0xf]  ;;  %v3265_v2 = vor.u32 %v4300_v55, %v3262_v58  ;;  %s4236_s12 = sshll.u32 %s6662_s18, 3 }
  0x1a   : > { %v3238_v62 = vld [vmem:[%s6656_s5 + $0xb8] sm:$0xf0]  ;;  %s4721_s26 = scalar_lea.vmem %s6652_s1, %s4709_s20  ;;  %v3228_v63 = vld [vmem:[%s6656_s5 + $0x90] sm:$0xf]  ;;  %v3237_v3 = vor.u32 %v4297_v60, %v3236_v59  ;;  %v4292_v4 = vld [vmem:[%s6656_s5 + $0x94] sm:$0xf]  ;;  %s5409_s24 = scalar_lea.vmem %s6653_s2, %s4709_s20 }
  0x1b   : > { %664 = vmatpush.bf16.msra.mxu0 %v3149_v44  ;;  %683 = vmatpush.bf16.msra.mxu1 %v3153_v47  ;;  %v4296_v0 = vld [vmem:[%s6656_s5 + $0xac] sm:$0xf0]  ;;  %v4730_v1 = vld [vmem:[%s4721_s26] sm:$0xff]  ;;  %v3230_v5 = vld [vmem:[%s6656_s5 + $0xb0] sm:$0xf0]  ;;  %v3241_v6 = vor.u32 %v4293_v61, %v3238_v62  ;;  %s5859_s29 = scalar_lea.vmem %s6654_s3, %s4236_s12  ;;  %s4237_s23 = sshll.u32 %s6662_s18, 6 }
  0x1c   : > { %702 = vmatpush.bf16.msra.mxu2 %v3157_v48  ;;  %v3229_v7 = vor.u32 %v4296_v0, %v3228_v63  ;;  %v3204_v8 = vld [vmem:[%s6656_s5 + $0x58] sm:$0xf]  ;;  %v4285_v10 = vld [vmem:[%s6656_s5 + $0x5c] sm:$0xf]  ;;  %v3196_v12 = vld [vmem:[%s6656_s5 + $0x50] sm:$0xf]  ;;  %v3233_v14 = vor.u32 %v4292_v4, %v3230_v5  ;;  %s6558_s27 = scalar_lea.vmem %s6660_s9, %s4237_s23 }
  0x1d   : > { %721 = vmatpush.bf16.msra.mxu3 %v3161_v52  ;;  %v4289_v9 = vld [vmem:[%s6656_s5 + $0x74] sm:$0xf0]  ;;  %v3206_v11 = vld [vmem:[%s6656_s5 + $0x78] sm:$0xf0]  ;;  %v4288_v13 = vld [vmem:[%s6656_s5 + $0x6c] sm:$0xf0] }
  0x1e   : > { %3274 = vmatmul.msk.bf16.vlgmr.msra.gmra.mxu0 %vm650_vm0, %v4730_v1  ;;  %3276 = vmatmul.msk.bf16.vlgmr.msra.gmra.mxu1 %vm650_vm0, %v4730_v1  ;;  %v3205_v15 = vor.u32 %v4289_v9, %v3204_v8  ;;  %v4284_v16 = vld [vmem:[%s6656_s5 + $0x54] sm:$0xf]  ;;  %v3172_v18 = vld [vmem:[%s6656_s5 + $0x18] sm:$0xf]  ;;  %v3209_v19 = vor.u32 %v4285_v10, %v3206_v11  ;;  %v3197_v20 = vor.u32 %v4288_v13, %v3196_v12  ;;  %v4277_v22 = vld [vmem:[%s6656_s5 + $0x1c] sm:$0xf] }
  0x1f   : > { %737 = vmatpush.bf16.msrb.mxu0 %v3261_v57  ;;  %3278 = vmatmul.msk.bf16.vlgmr.msra.gmra.mxu2 %vm650_vm0, %v4730_v1  ;;  %v3198_v17 = vld [vmem:[%s6656_s5 + $0x70] sm:$0xf0]  ;;  %v4281_v21 = vld [vmem:[%s6656_s5 + $0x34] sm:$0xf0]  ;;  %v3174_v23 = vld [vmem:[%s6656_s5 + $0x38] sm:$0xf0] }
  0x20   : > { %775 = vmatpush.bf16.msrb.mxu2 %v3269_v53  ;;  %3280 = vmatmul.msk.bf16.vlgmr.msra.gmra.mxu3 %vm650_vm0, %v4730_v1  ;;  %v3164_v24 = vld [vmem:[%s6656_s5 + $0x10] sm:$0xf]  ;;  %v3404_v26 = vld [vmem:[%s6655_s4 + $0xc8] sm:$0xf]  ;;  %v4265_v28 = vld [vmem:[%s6655_s4 + $0xcc] sm:$0xf]  ;;  %v3201_v30 = vor.u32 %v4284_v16, %v3198_v17  ;;  %v3173_v31 = vor.u32 %v4281_v21, %v3172_v18  ;;  %v3177_v34 = vor.u32 %v4277_v22, %v3174_v23 }
  0x21   : > { %794 = vmatpush.bf16.msrb.mxu3 %v3273_v56  ;;  %756 = vmatpush.bf16.msrb.mxu1 %v3265_v2  ;;  %v4280_v25 = vld [vmem:[%s6656_s5 + $0x2c] sm:$0xf0]  ;;  %v4269_v27 = vld [vmem:[%s6655_s4 + $0xe4] sm:$0xf0]  ;;  %v3406_v29 = vld [vmem:[%s6655_s4 + $0xe8] sm:$0xf0] }
  0x22   : > { %v3396_v32 = vld [vmem:[%s6655_s4 + $0xc0] sm:$0xf]  ;;  %v3165_v35 = vor.u32 %v4280_v25, %v3164_v24  ;;  %v4276_v36 = vld [vmem:[%s6656_s5 + $0x14] sm:$0xf]  ;;  %v3405_v38 = vor.u32 %v4269_v27, %v3404_v26  ;;  %v3409_v39 = vor.u32 %v4265_v28, %v3406_v29  ;;  %v4264_v40 = vld [vmem:[%s6655_s4 + $0xc4] sm:$0xf] }
  0x23   : > { %738 = vmatpush.bf16.msrb.mxu0 %v3229_v7  ;;  %v4268_v33 = vld [vmem:[%s6655_s4 + $0xdc] sm:$0xf0]  ;;  %v3166_v37 = vld [vmem:[%s6656_s5 + $0x30] sm:$0xf0]  ;;  %v3398_v41 = vld [vmem:[%s6655_s4 + $0xe0] sm:$0xf0] }
  0x24   : > { %776 = vmatpush.bf16.msrb.mxu2 %v3237_v3  ;;  %v3397_v42 = vor.u32 %v4268_v33, %v3396_v32  ;;  %v4819_v43 = vld [vmem:[%s4721_s26 + $0x8] sm:$0xff]  ;;  %v3169_v44 = vor.u32 %v4276_v36, %v3166_v37  ;;  %v3401_v47 = vor.u32 %v4264_v40, %v3398_v41  ;;  %v3364_v50 = vld [vmem:[%s6655_s4 + $0x80] sm:$0xf]  ;;  %v4256_v52 = vld [vmem:[%s6655_s4 + $0x84] sm:$0xf]  ;;  %s5017_s26 = scalar_lea.vmem %s6651_s0, %s4709_s20 }
  0x25   : > { %795 = vmatpush.bf16.msrb.mxu3 %v3241_v6  ;;  %757 = vmatpush.bf16.msrb.mxu1 %v3233_v14  ;;  %v3372_v45 = vld [vmem:[%s6655_s4 + $0x88] sm:$0xf]  ;;  %v4257_v48 = vld [vmem:[%s6655_s4 + $0x8c] sm:$0xf]  ;;  %v4260_v51 = vld [vmem:[%s6655_s4 + $0x9c] sm:$0xf0] }
  0x26   : > { %v4261_v46 = vld [vmem:[%s6655_s4 + $0xa4] sm:$0xf0]  ;;  %v3374_v49 = vld [vmem:[%s6655_s4 + $0xa8] sm:$0xf0]  ;;  %v3366_v53 = vld [vmem:[%s6655_s4 + $0xa0] sm:$0xf0]  ;;  %v3365_v56 = vor.u32 %v4260_v51, %v3364_v50 }
  0x27   : > { %739 = vmatpush.bf16.msrb.mxu0 %v3197_v20  ;;  %v3373_v54 = vor.u32 %v4261_v46, %v3372_v45  ;;  %v3377_v55 = vor.u32 %v4257_v48, %v3374_v49  ;;  %v3369_v57 = vor.u32 %v4256_v52, %v3366_v53  ;;  %v3340_v58 = vld [vmem:[%s6655_s4 + $0x48] sm:$0xf]  ;;  %v4249_v60 = vld [vmem:[%s6655_s4 + $0x4c] sm:$0xf]  ;;  %v3332_v63 = vld [vmem:[%s6655_s4 + $0x40] sm:$0xf] }
  0x28   : > { %777 = vmatpush.bf16.msrb.mxu2 %v3205_v15  ;;  %v4253_v59 = vld [vmem:[%s6655_s4 + $0x64] sm:$0xf0]  ;;  %v3342_v62 = vld [vmem:[%s6655_s4 + $0x68] sm:$0xf0]  ;;  %v4252_v0 = vld [vmem:[%s6655_s4 + $0x5c] sm:$0xf0] }
  0x29   : > { %796 = vmatpush.bf16.msrb.mxu3 %v3209_v19  ;;  %758 = vmatpush.bf16.msrb.mxu1 %v3201_v30  ;;  %v3341_v61 = vor.u32 %v4253_v59, %v3340_v58  ;;  %v3345_v2 = vor.u32 %v4249_v60, %v3342_v62  ;;  %v3333_v3 = vor.u32 %v4252_v0, %v3332_v63  ;;  %v4248_v4 = vld [vmem:[%s6655_s4 + $0x44] sm:$0xf]  ;;  %v3308_v6 = vld [vmem:[%s6655_s4 + $0x8] sm:$0xf]  ;;  %v4241_v9 = vld [vmem:[%s6655_s4 + $0xc] sm:$0xf] }
  0x2a   : > { %v3334_v5 = vld [vmem:[%s6655_s4 + $0x60] sm:$0xf0]  ;;  %v4245_v8 = vld [vmem:[%s6655_s4 + $0x24] sm:$0xf0]  ;;  %v3310_v10 = vld [vmem:[%s6655_s4 + $0x28] sm:$0xf0] }
  0x2b   : > { %740 = vmatpush.bf16.msrb.mxu0 %v3165_v35  ;;  %v3337_v7 = vor.u32 %v4248_v4, %v3334_v5  ;;  %v3300_v11 = vld [vmem:[%s6655_s4] sm:$0xf]  ;;  %v4240_v13 = vld [vmem:[%s6655_s4 + $0x4] sm:$0xf]  ;;  %v3309_v14 = vor.u32 %v4245_v8, %v3308_v6  ;;  %v3313_v15 = vor.u32 %v4241_v9, %v3310_v10  ;;  %v3420_v19 = vld [vmem:[%s6655_s4 + $0xd8] sm:$0xf] }
  0x2c   : > { %778 = vmatpush.bf16.msrb.mxu2 %v3173_v31  ;;  %v4244_v12 = vld [vmem:[%s6655_s4 + $0x1c] sm:$0xf0]  ;;  %v3302_v16 = vld [vmem:[%s6655_s4 + $0x20] sm:$0xf0]  ;;  %v4271_v20 = vld [vmem:[%s6655_s4 + $0xf4] sm:$0xf0] }
  0x2d   : > { %797 = vmatpush.bf16.msrb.mxu3 %v3177_v34  ;;  %759 = vmatpush.bf16.msrb.mxu1 %v3169_v44  ;;  %v3301_v17 = vor.u32 %v4244_v12, %v3300_v11  ;;  %v3305_v18 = vor.u32 %v4240_v13, %v3302_v16  ;;  %v4267_v21 = vld [vmem:[%s6655_s4 + $0xdc] sm:$0xf]  ;;  %v3421_v22 = vor.u32 %v4271_v20, %v3420_v19  ;;  %v4270_v24 = vld [vmem:[%s6655_s4 + $0xec] sm:$0xf0]  ;;  %v4266_v27 = vld [vmem:[%s6655_s4 + $0xd4] sm:$0xf] }
  0x2e   : > { %3275 = vmatmul.msk.bf16.gmra.mxu0 %vm650_vm0, %v4819_v43  ;;  %3277 = vmatmul.msk.bf16.gmra.mxu1 %vm650_vm0, %v4819_v43  ;;  %v3422_v23 = vld [vmem:[%s6655_s4 + $0xf8] sm:$0xf0]  ;;  %v3414_v28 = vld [vmem:[%s6655_s4 + $0xf0] sm:$0xf0]  ;;  %v3388_v29 = vld [vmem:[%s6655_s4 + $0x98] sm:$0xf] }
  0x2f   : > { %989 = vmatpush.bf16.msra.mxu0 %v3397_v42  ;;  %3279 = vmatmul.msk.bf16.gmra.mxu2 %vm650_vm0, %v4819_v43  ;;  %v3425_v25 = vor.u32 %v4267_v21, %v3422_v23  ;;  %v3417_v30 = vor.u32 %v4266_v27, %v3414_v28  ;;  %v4263_v31 = vld [vmem:[%s6655_s4 + $0xb4] sm:$0xf0]  ;;  %v4259_v32 = vld [vmem:[%s6655_s4 + $0x9c] sm:$0xf]  ;;  %v3380_v36 = vld [vmem:[%s6655_s4 + $0x90] sm:$0xf] }
  0x30   : > { %1027 = vmatpush.bf16.msra.mxu2 %v3405_v38  ;;  %3281 = vmatmul.msk.bf16.gmra.mxu3 %vm650_vm0, %v4819_v43  ;;  %v3390_v33 = vld [vmem:[%s6655_s4 + $0xb8] sm:$0xf0]  ;;  %v3389_v34 = vor.u32 %v4263_v31, %v3388_v29  ;;  %v4262_v37 = vld [vmem:[%s6655_s4 + $0xac] sm:$0xf0]  ;;  %v4258_v38 = vld [vmem:[%s6655_s4 + $0x94] sm:$0xf] }
  0x31   : > { %1046 = vmatpush.bf16.msra.mxu3 %v3409_v39  ;;  %1008 = vmatpush.bf16.msra.mxu1 %v3401_v47  ;;  %v3393_v35 = vor.u32 %v4259_v32, %v3390_v33  ;;  %v3381_v39 = vor.u32 %v4262_v37, %v3380_v36  ;;  %v3382_v40 = vld [vmem:[%s6655_s4 + $0xb0] sm:$0xf0]  ;;  %v3356_v42 = vld [vmem:[%s6655_s4 + $0x58] sm:$0xf]  ;;  %v4251_v45 = vld [vmem:[%s6655_s4 + $0x5c] sm:$0xf] }
  0x32   : > { %v3385_v41 = vor.u32 %v4258_v38, %v3382_v40  ;;  %v4255_v44 = vld [vmem:[%s6655_s4 + $0x74] sm:$0xf0]  ;;  %v3358_v47 = vld [vmem:[%s6655_s4 + $0x78] sm:$0xf0]  ;;  %v4254_v48 = vld [vmem:[%s6655_s4 + $0x6c] sm:$0xf0] }
  0x33   : > { %990 = vmatpush.bf16.msra.mxu0 %v3365_v56  ;;  %v3357_v46 = vor.u32 %v4255_v44, %v3356_v42  ;;  %v3361_v49 = vor.u32 %v4251_v45, %v3358_v47  ;;  %v4250_v51 = vld [vmem:[%s6655_s4 + $0x54] sm:$0xf]  ;;  %v3324_v53 = vld [vmem:[%s6655_s4 + $0x18] sm:$0xf]  ;;  %v4243_v56 = vld [vmem:[%s6655_s4 + $0x1c] sm:$0xf] }
  0x34   : > { %1028 = vmatpush.bf16.msra.mxu2 %v3373_v54  ;;  %v3350_v52 = vld [vmem:[%s6655_s4 + $0x70] sm:$0xf0]  ;;  %v3316_v60 = vld [vmem:[%s6655_s4 + $0x10] sm:$0xf]  ;;  %v3684_v4 = vld [vmem:[%s6657_s6 + $0x1c8] sm:$0xf] }
  0x35   : > { %1047 = vmatpush.bf16.msra.mxu3 %v3377_v55  ;;  %1009 = vmatpush.bf16.msra.mxu1 %v3369_v57  ;;  %v3353_v54 = vor.u32 %v4250_v51, %v3350_v52  ;;  %v4247_v55 = vld [vmem:[%s6655_s4 + $0x34] sm:$0xf0]  ;;  %v3326_v57 = vld [vmem:[%s6655_s4 + $0x38] sm:$0xf0]  ;;  %v4242_v62 = vld [vmem:[%s6655_s4 + $0x14] sm:$0xf] }
  0x36   : > { %v3325_v58 = vor.u32 %v4247_v55, %v3324_v53  ;;  %v3329_v59 = vor.u32 %v4243_v56, %v3326_v57  ;;  %v3318_v0 = vld [vmem:[%s6655_s4 + $0x30] sm:$0xf0]  ;;  %v4369_v5 = vld [vmem:[%s6657_s6 + $0x1e4] sm:$0xf0]  ;;  %v4365_v6 = vld [vmem:[%s6657_s6 + $0x1cc] sm:$0xf] }
  0x37   : > { %991 = vmatpush.bf16.msra.mxu0 %v3333_v3  ;;  %v5020_v3 = vld [vmem:[%s5017_s26] sm:$0xff]  ;;  %v3686_v8 = vld [vmem:[%s6657_s6 + $0x1e8] sm:$0xf0]  ;;  %v4353_v27 = vld [vmem:[%s6657_s6 + $0x164] sm:$0xf0] }
  0x38   : > { %1029 = vmatpush.bf16.msra.mxu2 %v3341_v61  ;;  %v4246_v61 = vld [vmem:[%s6655_s4 + $0x2c] sm:$0xf0]  ;;  %v3676_v9 = vld [vmem:[%s6657_s6 + $0x1c0] sm:$0xf]  ;;  %v3689_v11 = vor.u32 %v4365_v6, %v3686_v8  ;;  %v4364_v13 = vld [vmem:[%s6657_s6 + $0x1c4] sm:$0xf] }
  0x39   : > { %1048 = vmatpush.bf16.msra.mxu3 %v3345_v2  ;;  %1010 = vmatpush.bf16.msra.mxu1 %v3337_v7  ;;  %v3317_v63 = vor.u32 %v4246_v61, %v3316_v60  ;;  %v3321_v2 = vor.u32 %v4242_v62, %v3318_v0  ;;  %v3685_v7 = vor.u32 %v4369_v5, %v3684_v4  ;;  %v4368_v10 = vld [vmem:[%s6657_s6 + $0x1dc] sm:$0xf0]  ;;  %v3654_v19 = vld [vmem:[%s6657_s6 + $0x1a8] sm:$0xf0]  ;;  %v3588_v38 = vld [vmem:[%s6657_s6 + $0x108] sm:$0xf] }
  0x3a   : > { %v3677_v12 = vor.u32 %v4368_v10, %v3676_v9  ;;  %v4360_v23 = vld [vmem:[%s6657_s6 + $0x19c] sm:$0xf0]  ;;  %v4349_v29 = vld [vmem:[%s6657_s6 + $0x14c] sm:$0xf]  ;;  %v3556_v52 = vld [vmem:[%s6657_s6 + $0xc8] sm:$0xf] }
  0x3b   : > { %992 = vmatpush.bf16.msra.mxu0 %v3301_v17  ;;  %v4361_v17 = vld [vmem:[%s6657_s6 + $0x1a4] sm:$0xf0]  ;;  %v3612_v31 = vld [vmem:[%s6657_s6 + $0x140] sm:$0xf]  ;;  %v4341_v40 = vld [vmem:[%s6657_s6 + $0x10c] sm:$0xf] }
  0x3c   : > { %1030 = vmatpush.bf16.msra.mxu2 %v3309_v14  ;;  %v3678_v14 = vld [vmem:[%s6657_s6 + $0x1e0] sm:$0xf0]  ;;  %v4352_v33 = vld [vmem:[%s6657_s6 + $0x15c] sm:$0xf0]  ;;  %v3590_v42 = vld [vmem:[%s6657_s6 + $0x128] sm:$0xf0] }
  0x3d   : > { %1049 = vmatpush.bf16.msra.mxu3 %v3313_v15  ;;  %1011 = vmatpush.bf16.msra.mxu1 %v3305_v18  ;;  %v3652_v15 = vld [vmem:[%s6657_s6 + $0x188] sm:$0xf]  ;;  %v3681_v16 = vor.u32 %v4364_v13, %v3678_v14  ;;  %v4357_v18 = vld [vmem:[%s6657_s6 + $0x18c] sm:$0xf]  ;;  %v3613_v37 = vor.u32 %v4352_v33, %v3612_v31  ;;  %v3580_v44 = vld [vmem:[%s6657_s6 + $0x100] sm:$0xf]  ;;  %v3593_v47 = vor.u32 %v4341_v40, %v3590_v42 }
  0x3e   : > { %3282 = vmatmul.msk.bf16.vlgmr.msrb.gmra.mxu0 %vm650_vm0, %v4730_v1  ;;  %3284 = vmatmul.msk.bf16.vlgmr.msrb.gmra.mxu1 %vm650_vm0, %v4730_v1  ;;  %v3653_v20 = vor.u32 %v4361_v17, %v3652_v15  ;;  %v3657_v21 = vor.u32 %v4357_v18, %v3654_v19  ;;  %v4344_v45 = vld [vmem:[%s6657_s6 + $0x11c] sm:$0xf0]  ;;  %v4337_v53 = vld [vmem:[%s6657_s6 + $0xe4] sm:$0xf0]  ;;  %v3558_v56 = vld [vmem:[%s6657_s6 + $0xe8] sm:$0xf0] }
  0x3f   : > { %3286 = vmatmul.msk.bf16.vlgmr.msrb.gmra.mxu2 %vm650_vm0, %v4730_v1  ;;  %v3557_v55 = vor.u32 %v4337_v53, %v3556_v52  ;;  %v3548_v57 = vld [vmem:[%s6657_s6 + $0xc0] sm:$0xf]  ;;  %v4332_v61 = vld [vmem:[%s6657_s6 + $0xc4] sm:$0xf]  ;;  %v4325_v4 = vld [vmem:[%s6657_s6 + $0x8c] sm:$0xf] }
  0x40   : > { %3288 = vmatmul.msk.bf16.vlgmr.msrb.gmra.mxu3 %vm650_vm0, %v4730_v1  ;;  %v3412_v1 = vld [vmem:[%s6655_s4 + $0xd0] sm:$0xf]  ;;  %1103 = vmatpush.bf16.msrb.mxu2 %v3421_v22  ;;  %v3644_v22 = vld [vmem:[%s6657_s6 + $0x180] sm:$0xf]  ;;  %v3550_v62 = vld [vmem:[%s6657_s6 + $0xe0] sm:$0xf0] }
  0x41   : > { %v3413_v26 = vor.u32 %v4270_v24, %v3412_v1  ;;  %1122 = vmatpush.bf16.msrb.mxu3 %v3425_v25  ;;  %1084 = vmatpush.bf16.msrb.mxu1 %v3417_v30  ;;  %v4356_v1 = vld [vmem:[%s6657_s6 + $0x184] sm:$0xf]  ;;  %v3645_v24 = vor.u32 %v4360_v23, %v3644_v22  ;;  %v3622_v30 = vld [vmem:[%s6657_s6 + $0x168] sm:$0xf0]  ;;  %v3553_v0 = vor.u32 %v4332_v61, %v3550_v62  ;;  %v3516_v8 = vld [vmem:[%s6657_s6 + $0x80] sm:$0xf] }
  0x42   : > { %v3646_v25 = vld [vmem:[%s6657_s6 + $0x1a0] sm:$0xf0]  ;;  %v3625_v36 = vor.u32 %v4349_v29, %v3622_v30  ;;  %v3526_v5 = vld [vmem:[%s6657_s6 + $0xa8] sm:$0xf0]  ;;  %v4328_v9 = vld [vmem:[%s6657_s6 + $0x9c] sm:$0xf0] }
  0x43   : > { %1065 = vmatpush.bf16.msrb.mxu0 %v3413_v26  ;;  %v3620_v26 = vld [vmem:[%s6657_s6 + $0x148] sm:$0xf]  ;;  %v3649_v28 = vor.u32 %v4356_v1, %v3646_v25  ;;  %v4324_v10 = vld [vmem:[%s6657_s6 + $0x84] sm:$0xf]  ;;  %v4317_v15 = vld [vmem:[%s6657_s6 + $0x4c] sm:$0xf] }
  0x44   : > { %1104 = vmatpush.bf16.msrb.mxu2 %v3389_v34  ;;  %v3621_v32 = vor.u32 %v4353_v27, %v3620_v26  ;;  %v4348_v34 = vld [vmem:[%s6657_s6 + $0x144] sm:$0xf]  ;;  %v3492_v13 = vld [vmem:[%s6657_s6 + $0x48] sm:$0xf]  ;;  %v3484_v17 = vld [vmem:[%s6657_s6 + $0x40] sm:$0xf] }
  0x45   : > { %1123 = vmatpush.bf16.msrb.mxu3 %v3393_v35  ;;  %1085 = vmatpush.bf16.msrb.mxu1 %v3385_v41  ;;  %v3614_v35 = vld [vmem:[%s6657_s6 + $0x160] sm:$0xf0]  ;;  %v4321_v14 = vld [vmem:[%s6657_s6 + $0x64] sm:$0xf0]  ;;  %v4309_v26 = vld [vmem:[%s6657_s6 + $0xc] sm:$0xf] }
  0x46   : > { %v3617_v41 = vor.u32 %v4348_v34, %v3614_v35  ;;  %v3493_v19 = vor.u32 %v4321_v14, %v3492_v13  ;;  %v3486_v1 = vld [vmem:[%s6657_s6 + $0x60] sm:$0xf0]  ;;  %v4313_v25 = vld [vmem:[%s6657_s6 + $0x24] sm:$0xf0]  ;;  %v3462_v27 = vld [vmem:[%s6657_s6 + $0x28] sm:$0xf0] }
  0x47   : > { %1066 = vmatpush.bf16.msrb.mxu0 %v3381_v39  ;;  %v4345_v39 = vld [vmem:[%s6657_s6 + $0x124] sm:$0xf0]  ;;  %v3465_v30 = vor.u32 %v4309_v26, %v3462_v27  ;;  %v3452_v31 = vld [vmem:[%s6657_s6] sm:$0xf]  ;;  %v4308_v33 = vld [vmem:[%s6657_s6 + $0x4] sm:$0xf] }
  0x48   : > { %1105 = vmatpush.bf16.msrb.mxu2 %v3357_v46  ;;  %v3589_v46 = vor.u32 %v4345_v39, %v3588_v38  ;;  %v3454_v35 = vld [vmem:[%s6657_s6 + $0x20] sm:$0xf0]  ;;  %v4371_v38 = vld [vmem:[%s6657_s6 + $0x1f4] sm:$0xf0]  ;;  %v4367_v39 = vld [vmem:[%s6657_s6 + $0x1dc] sm:$0xf] }
  0x49   : > { %1124 = vmatpush.bf16.msrb.mxu3 %v3361_v49  ;;  %1086 = vmatpush.bf16.msrb.mxu1 %v3353_v54  ;;  %v3582_v49 = vld [vmem:[%s6657_s6 + $0x120] sm:$0xf0]  ;;  %v4333_v54 = vld [vmem:[%s6657_s6 + $0xcc] sm:$0xf]  ;;  %v3692_v42 = vld [vmem:[%s6657_s6 + $0x1d0] sm:$0xf] }
  0x4a   : > { %v3670_v53 = vld [vmem:[%s6657_s6 + $0x1b8] sm:$0xf0]  ;;  %v4355_v62 = vld [vmem:[%s6657_s6 + $0x174] sm:$0xf0]  ;;  %v3564_v27 = vld [vmem:[%s6657_s6 + $0xd0] sm:$0xf] }
  0x4b   : > { %v4343_v13 = vld [vmem:[%s6657_s6 + $0x11c] sm:$0xf] }
  0x4c   : > { %1106 = vmatpush.bf16.msrb.mxu2 %v3325_v58  ;;  %v4336_v58 = vld [vmem:[%s6657_s6 + $0xdc] sm:$0xf0]  ;;  %v3574_v26 = vld [vmem:[%s6657_s6 + $0xf8] sm:$0xf0] }
  0x4d   : > { %1125 = vmatpush.bf16.msrb.mxu3 %v3329_v59  ;;  %1087 = vmatpush.bf16.msrb.mxu1 %v3321_v2  ;;  %v3561_v59 = vor.u32 %v4333_v54, %v3558_v56  ;;  %v3549_v60 = vor.u32 %v4336_v58, %v3548_v57  ;;  %v4329_v2 = vld [vmem:[%s6657_s6 + $0xa4] sm:$0xf0]  ;;  %v3660_v54 = vld [vmem:[%s6657_s6 + $0x190] sm:$0xf]  ;;  %v4358_v58 = vld [vmem:[%s6657_s6 + $0x194] sm:$0xf] }
  0x4e   : > { %3283 = vmatmul.msk.bf16.gmra.mxu0 %vm650_vm0, %v4819_v43  ;;  %3285 = vmatmul.msk.bf16.gmra.mxu1 %vm650_vm0, %v4819_v43 }
  0x4f   : > { %3287 = vmatmul.msk.bf16.gmra.mxu2 %vm650_vm0, %v4819_v43 }
  0x50   : > { %3289 = vmatmul.msk.bf16.gmra.mxu3 %vm650_vm0, %v4819_v43  ;;  %v3348_v43 = vld [vmem:[%s6655_s4 + $0x50] sm:$0xf] }
  0x51   : > { %v3349_v50 = vor.u32 %v4254_v48, %v3348_v43  ;;  %v3581_v43 = vor.u32 %v4344_v45, %v3580_v44  ;;  %v4340_v48 = vld [vmem:[%s6657_s6 + $0x104] sm:$0xf]  ;;  %v4370_v44 = vld [vmem:[%s6657_s6 + $0x1ec] sm:$0xf0] }
  0x52   : > { %v3585_v51 = vor.u32 %v4340_v48, %v3582_v49  ;;  %v3668_v49 = vld [vmem:[%s6657_s6 + $0x198] sm:$0xf] }
  0x53   : > { %1067 = vmatpush.bf16.msrb.mxu0 %v3349_v50  ;;  %v5127_v50 = vld [vmem:[%s5017_s26 + $0x8] sm:$0xff] }
  0x57   : > { %1068 = vmatpush.bf16.msrb.mxu0 %v3317_v63  ;;  %v3524_v63 = vld [vmem:[%s6657_s6 + $0x88] sm:$0xf] }
  0x58   : > { %v3525_v6 = vor.u32 %v4329_v2, %v3524_v63  ;;  %v4351_v63 = vld [vmem:[%s6657_s6 + $0x15c] sm:$0xf] }
  0x5e   : > { %3426 = vmatmul.msk.bf16.vlgmr.msra.gmra.mxu0 %vm650_vm0, %v5020_v3  ;;  %3428 = vmatmul.msk.bf16.vlgmr.msra.gmra.mxu1 %vm650_vm0, %v5020_v3 }
  0x5f   : > { %3430 = vmatmul.msk.bf16.vlgmr.msra.gmra.mxu2 %vm650_vm0, %v5020_v3  ;;  %1537 = vmatpush.bf16.msra.mxu0 %v3677_v12  ;;  %v3518_v12 = vld [vmem:[%s6657_s6 + $0xa0] sm:$0xf0] }
  0x60   : > { %3432 = vmatmul.msk.bf16.vlgmr.msra.gmra.mxu3 %vm650_vm0, %v5020_v3  ;;  %1575 = vmatpush.bf16.msra.mxu2 %v3685_v7  ;;  %v3529_v7 = vor.u32 %v4325_v4, %v3526_v5  ;;  %v3521_v18 = vor.u32 %v4324_v10, %v3518_v12  ;;  %v3628_v5 = vld [vmem:[%s6657_s6 + $0x150] sm:$0xf]  ;;  %v4347_v12 = vld [vmem:[%s6657_s6 + $0x134] sm:$0xf0] }
  0x61   : > { %1594 = vmatpush.bf16.msra.mxu3 %v3689_v11  ;;  %1556 = vmatpush.bf16.msra.mxu1 %v3681_v16  ;;  %v3517_v11 = vor.u32 %v4328_v9, %v3516_v8  ;;  %v3494_v16 = vld [vmem:[%s6657_s6 + $0x68] sm:$0xf0]  ;;  %v3630_v9 = vld [vmem:[%s6657_s6 + $0x170] sm:$0xf0] }
  0x62   : > { %v3497_v22 = vor.u32 %v4317_v15, %v3494_v16  ;;  %v3606_v15 = vld [vmem:[%s6657_s6 + $0x138] sm:$0xf0]  ;;  %v3596_v16 = vld [vmem:[%s6657_s6 + $0x110] sm:$0xf] }
  0x63   : > { %1538 = vmatpush.bf16.msra.mxu0 %v3645_v24  ;;  %v3460_v24 = vld [vmem:[%s6657_s6 + $0x8] sm:$0xf] }
  0x64   : > { %1576 = vmatpush.bf16.msra.mxu2 %v3653_v20  ;;  %v4320_v20 = vld [vmem:[%s6657_s6 + $0x5c] sm:$0xf0]  ;;  %v3461_v29 = vor.u32 %v4313_v25, %v3460_v24  ;;  %v4335_v24 = vld [vmem:[%s6657_s6 + $0xdc] sm:$0xf] }
  0x65   : > { %1595 = vmatpush.bf16.msra.mxu3 %v3657_v21  ;;  %1557 = vmatpush.bf16.msra.mxu1 %v3649_v28  ;;  %v4316_v21 = vld [vmem:[%s6657_s6 + $0x44] sm:$0xf]  ;;  %v3485_v23 = vor.u32 %v4320_v20, %v3484_v17  ;;  %v4346_v17 = vld [vmem:[%s6657_s6 + $0x12c] sm:$0xf0]  ;;  %v4342_v20 = vld [vmem:[%s6657_s6 + $0x114] sm:$0xf] }
  0x66   : > { %v3489_v28 = vor.u32 %v4316_v21, %v3486_v1  ;;  %v3598_v21 = vld [vmem:[%s6657_s6 + $0x130] sm:$0xf0]  ;;  %v4339_v1 = vld [vmem:[%s6657_s6 + $0xf4] sm:$0xf0] }
  0x67   : > { %1539 = vmatpush.bf16.msra.mxu0 %v3613_v37  ;;  %v3700_v37 = vld [vmem:[%s6657_s6 + $0x1d8] sm:$0xf] }
  0x68   : > { %1577 = vmatpush.bf16.msra.mxu2 %v3621_v32  ;;  %v4312_v32 = vld [vmem:[%s6657_s6 + $0x1c] sm:$0xf0]  ;;  %v3701_v40 = vor.u32 %v4371_v38, %v3700_v37  ;;  %v3542_v37 = vld [vmem:[%s6657_s6 + $0xb8] sm:$0xf0]  ;;  %v3532_v38 = vld [vmem:[%s6657_s6 + $0x90] sm:$0xf] }
  0x69   : > { %1596 = vmatpush.bf16.msra.mxu3 %v3625_v36  ;;  %1558 = vmatpush.bf16.msra.mxu1 %v3617_v41  ;;  %v3453_v34 = vor.u32 %v4312_v32, %v3452_v31  ;;  %v3457_v36 = vor.u32 %v4308_v33, %v3454_v35  ;;  %v3702_v41 = vld [vmem:[%s6657_s6 + $0x1f8] sm:$0xf0]  ;;  %v4334_v31 = vld [vmem:[%s6657_s6 + $0xd4] sm:$0xf] }
  0x6a   : > { %v3705_v45 = vor.u32 %v4367_v39, %v3702_v41  ;;  %v3566_v32 = vld [vmem:[%s6657_s6 + $0xf0] sm:$0xf0]  ;;  %v4327_v35 = vld [vmem:[%s6657_s6 + $0x9c] sm:$0xf]  ;;  %v4330_v39 = vld [vmem:[%s6657_s6 + $0xac] sm:$0xf0] }
  0x6b   : > { %1540 = vmatpush.bf16.msra.mxu0 %v3581_v43  ;;  %v3694_v43 = vld [vmem:[%s6657_s6 + $0x1f0] sm:$0xf0]  ;;  %v3569_v33 = vor.u32 %v4334_v31, %v3566_v32  ;;  %v3533_v41 = vor.u32 %v4330_v39, %v3532_v38  ;;  %v4480_v38 = vld [vmem:[%s6658_s7 + $0x344] sm:$0xf] }
  0x6c   : > { %1578 = vmatpush.bf16.msra.mxu2 %v3589_v46  ;;  %v3693_v46 = vor.u32 %v4370_v44, %v3692_v42  ;;  %v4326_v42 = vld [vmem:[%s6657_s6 + $0x94] sm:$0xf]  ;;  %v4142_v39 = vld [vmem:[%s6658_s7 + $0x360] sm:$0xf0] }
  0x6d   : > { %1597 = vmatpush.bf16.msra.mxu3 %v3593_v47  ;;  %1559 = vmatpush.bf16.msra.mxu1 %v3585_v51  ;;  %v4366_v47 = vld [vmem:[%s6657_s6 + $0x1d4] sm:$0xf]  ;;  %v4359_v51 = vld [vmem:[%s6657_s6 + $0x19c] sm:$0xf] }
  0x6e   : > { %3427 = vmatmul.msk.bf16.gmra.mxu0 %vm650_vm0, %v5127_v50  ;;  %3429 = vmatmul.msk.bf16.gmra.mxu1 %vm650_vm0, %v5127_v50  ;;  %v3697_v48 = vor.u32 %v4366_v47, %v3694_v43  ;;  %v3673_v56 = vor.u32 %v4359_v51, %v3670_v53  ;;  %v3534_v44 = vld [vmem:[%s6657_s6 + $0xb0] sm:$0xf0]  ;;  %v4323_v47 = vld [vmem:[%s6657_s6 + $0x74] sm:$0xf0]  ;;  %v4319_v43 = vld [vmem:[%s6657_s6 + $0x5c] sm:$0xf] }
  0x6f   : > { %3431 = vmatmul.msk.bf16.gmra.mxu2 %vm650_vm0, %v5127_v50  ;;  %1541 = vmatpush.bf16.msra.mxu0 %v3549_v60  ;;  %v3636_v60 = vld [vmem:[%s6657_s6 + $0x158] sm:$0xf]  ;;  %v3500_v51 = vld [vmem:[%s6657_s6 + $0x50] sm:$0xf]  ;;  %v4318_v53 = vld [vmem:[%s6657_s6 + $0x54] sm:$0xf] }
  0x70   : > { %3433 = vmatmul.msk.bf16.gmra.mxu3 %vm650_vm0, %v5127_v50  ;;  %1579 = vmatpush.bf16.msra.mxu2 %v3557_v55  ;;  %v4362_v55 = vld [vmem:[%s6657_s6 + $0x1ac] sm:$0xf0]  ;;  %v3637_v2 = vor.u32 %v4355_v62, %v3636_v60  ;;  %v4311_v60 = vld [vmem:[%s6657_s6 + $0x1c] sm:$0xf] }
  0x71   : > { %1598 = vmatpush.bf16.msra.mxu3 %v3561_v59  ;;  %1560 = vmatpush.bf16.msra.mxu1 %v3553_v0  ;;  %v3661_v57 = vor.u32 %v4362_v55, %v3660_v54  ;;  %v3662_v59 = vld [vmem:[%s6657_s6 + $0x1b0] sm:$0xf0]  ;;  %v3638_v0 = vld [vmem:[%s6657_s6 + $0x178] sm:$0xf0] }
  0x72   : > { %v3665_v61 = vor.u32 %v4358_v58, %v3662_v59  ;;  %v3641_v4 = vor.u32 %v4351_v63, %v3638_v0  ;;  %v3502_v55 = vld [vmem:[%s6657_s6 + $0x70] sm:$0xf0]  ;;  %v3476_v58 = vld [vmem:[%s6657_s6 + $0x18] sm:$0xf]  ;;  %v3478_v62 = vld [vmem:[%s6657_s6 + $0x38] sm:$0xf0] }
  0x73   : > { %1542 = vmatpush.bf16.msra.mxu0 %v3517_v11  ;;  %v3604_v11 = vld [vmem:[%s6657_s6 + $0x118] sm:$0xf]  ;;  %v3468_v63 = vld [vmem:[%s6657_s6 + $0x10] sm:$0xf] }
  0x74   : > { %1580 = vmatpush.bf16.msra.mxu2 %v3525_v6  ;;  %v4354_v6 = vld [vmem:[%s6657_s6 + $0x16c] sm:$0xf0]  ;;  %v3605_v14 = vor.u32 %v4347_v12, %v3604_v11  ;;  %v4315_v59 = vld [vmem:[%s6657_s6 + $0x34] sm:$0xf0]  ;;  %v3950_v11 = vld [vmem:[%s6658_s7 + $0x1e0] sm:$0xf0] }
  0x75   : > { %1599 = vmatpush.bf16.msra.mxu3 %v3529_v7  ;;  %1561 = vmatpush.bf16.msra.mxu1 %v3521_v18  ;;  %v4350_v7 = vld [vmem:[%s6657_s6 + $0x154] sm:$0xf]  ;;  %v3629_v8 = vor.u32 %v4354_v6, %v3628_v5  ;;  %v3609_v18 = vor.u32 %v4343_v13, %v3606_v15  ;;  %v4314_v0 = vld [vmem:[%s6657_s6 + $0x2c] sm:$0xf0]  ;;  %v3481_v5 = vor.u32 %v4311_v60, %v3478_v62  ;;  %v4496_v12 = vld [vmem:[%s6658_s7 + $0x3c4] sm:$0xf] }
  0x76   : > { %v3633_v10 = vor.u32 %v4350_v7, %v3630_v9  ;;  %v3469_v6 = vor.u32 %v4314_v0, %v3468_v63  ;;  %v4310_v7 = vld [vmem:[%s6657_s6 + $0x14] sm:$0xf]  ;;  %v3948_v15 = vld [vmem:[%s6658_s7 + $0x1c0] sm:$0xf] }
  0x77   : > { %1543 = vmatpush.bf16.msra.mxu0 %v3485_v23  ;;  %v3572_v23 = vld [vmem:[%s6657_s6 + $0xd8] sm:$0xf]  ;;  %v4108_v63 = vld [vmem:[%s6658_s7 + $0x300] sm:$0xf] }
  0x78   : > { %1581 = vmatpush.bf16.msra.mxu2 %v3493_v19  ;;  %v3597_v19 = vor.u32 %v4346_v17, %v3596_v16  ;;  %v3573_v25 = vor.u32 %v4339_v1, %v3572_v23  ;;  %v4436_v16 = vld [vmem:[%s6658_s7 + $0x1dc] sm:$0xf0]  ;;  %v3918_v23 = vld [vmem:[%s6658_s7 + $0x1a0] sm:$0xf0] }
  0x79   : > { %1600 = vmatpush.bf16.msra.mxu3 %v3497_v22  ;;  %1562 = vmatpush.bf16.msra.mxu1 %v3489_v28  ;;  %v3601_v22 = vor.u32 %v4342_v20, %v3598_v21  ;;  %v4338_v28 = vld [vmem:[%s6657_s6 + $0xec] sm:$0xf0]  ;;  %v4500_v20 = vld [vmem:[%s6658_s7 + $0x3dc] sm:$0xf0]  ;;  %v4488_v1 = vld [vmem:[%s6658_s7 + $0x384] sm:$0xf] }
  0x7a   : > { %v4476_v0 = vld [vmem:[%s6658_s7 + $0x31c] sm:$0xf0] }
  0x7b   : > { %1544 = vmatpush.bf16.msra.mxu0 %v3453_v34  ;;  %v3540_v34 = vld [vmem:[%s6657_s6 + $0x98] sm:$0xf] }
  0x7c   : > { %1582 = vmatpush.bf16.msra.mxu2 %v3461_v29  ;;  %v3577_v29 = vor.u32 %v4335_v24, %v3574_v26 }
  0x7d   : > { %1601 = vmatpush.bf16.msra.mxu3 %v3465_v30  ;;  %1563 = vmatpush.bf16.msra.mxu1 %v3457_v36  ;;  %v3565_v30 = vor.u32 %v4338_v28, %v3564_v27  ;;  %v4174_v27 = vld [vmem:[%s6658_s7 + $0x3a0] sm:$0xf0]  ;;  %v3916_v28 = vld [vmem:[%s6658_s7 + $0x180] sm:$0xf] }
  0x7e   : > { %3434 = vmatmul.msk.bf16.vlgmr.msrb.gmra.mxu0 %vm650_vm0, %v5020_v3  ;;  %3436 = vmatmul.msk.bf16.vlgmr.msrb.gmra.mxu1 %vm650_vm0, %v5020_v3  ;;  %v4177_v32 = vor.u32 %v4488_v1, %v4174_v27  ;;  %v4046_v1 = vld [vmem:[%s6658_s7 + $0x2a0] sm:$0xf0]  ;;  %v4396_v27 = vld [vmem:[%s6658_s7 + $0x9c] sm:$0xf0] }
  0x7f   : > { %3438 = vmatmul.msk.bf16.vlgmr.msrb.gmra.mxu2 %vm650_vm0, %v5020_v3  ;;  %1613 = vmatpush.bf16.msrb.mxu0 %v3693_v46  ;;  %v3537_v46 = vor.u32 %v4326_v42, %v3534_v44  ;;  %v3884_v42 = vld [vmem:[%s6658_s7 + $0x140] sm:$0xf] }
  0x80   : > { %3440 = vmatmul.msk.bf16.vlgmr.msrb.gmra.mxu3 %vm650_vm0, %v5020_v3  ;;  %1651 = vmatpush.bf16.msrb.mxu2 %v3701_v40  ;;  %v4363_v3 = vld [vmem:[%s6657_s6 + $0x1b4] sm:$0xf0]  ;;  %v3545_v40 = vor.u32 %v4327_v35, %v3542_v37  ;;  %v4416_v35 = vld [vmem:[%s6658_s7 + $0x144] sm:$0xf]  ;;  %v4420_v44 = vld [vmem:[%s6658_s7 + $0x15c] sm:$0xf0] }
  0x81   : > { %1670 = vmatpush.bf16.msrb.mxu3 %v3705_v45  ;;  %1632 = vmatpush.bf16.msrb.mxu1 %v3697_v48  ;;  %v3669_v52 = vor.u32 %v4363_v3, %v3668_v49  ;;  %v3508_v45 = vld [vmem:[%s6657_s6 + $0x58] sm:$0xf]  ;;  %v3510_v48 = vld [vmem:[%s6657_s6 + $0x78] sm:$0xf0]  ;;  %v3886_v37 = vld [vmem:[%s6658_s7 + $0x160] sm:$0xf0] }
  0x82   : > { %v3509_v49 = vor.u32 %v4323_v47, %v3508_v45  ;;  %v3513_v3 = vor.u32 %v4319_v43, %v3510_v48  ;;  %v4140_v45 = vld [vmem:[%s6658_s7 + $0x340] sm:$0xf]  ;;  %v5539_v48 = vld [vmem:[%s5409_s24 + $0x8] sm:$0xff] }
  0x83   : > { %1614 = vmatpush.bf16.msrb.mxu0 %v3661_v57  ;;  %v3505_v57 = vor.u32 %v4318_v53, %v3502_v55  ;;  %v4484_v47 = vld [vmem:[%s6658_s7 + $0x35c] sm:$0xf0]  ;;  %v4110_v55 = vld [vmem:[%s6658_s7 + $0x320] sm:$0xf0] }
  0x84   : > { %1652 = vmatpush.bf16.msrb.mxu2 %v3669_v52  ;;  %v4322_v52 = vld [vmem:[%s6657_s6 + $0x6c] sm:$0xf0]  ;;  %v4141_v43 = vor.u32 %v4484_v47, %v4140_v45  ;;  %v4012_v45 = vld [vmem:[%s6658_s7 + $0x240] sm:$0xf] }
  0x85   : > { %1671 = vmatpush.bf16.msrb.mxu3 %v3673_v56  ;;  %1633 = vmatpush.bf16.msrb.mxu1 %v3665_v61  ;;  %v3501_v54 = vor.u32 %v4322_v52, %v3500_v51  ;;  %v5424_v56 = vld [vmem:[%s5409_s24] sm:$0xff]  ;;  %v3477_v61 = vor.u32 %v4315_v59, %v3476_v58 }
  0x86   : > { %v4472_v51 = vld [vmem:[%s6658_s7 + $0x304] sm:$0xf]  ;;  %v4412_v58 = vld [vmem:[%s6658_s7 + $0x11c] sm:$0xf0] }
  0x87   : > { %1615 = vmatpush.bf16.msrb.mxu0 %v3629_v8  ;;  %v3470_v8 = vld [vmem:[%s6657_s6 + $0x30] sm:$0xf0]  ;;  %v4452_v47 = vld [vmem:[%s6658_s7 + $0x25c] sm:$0xf0] }
  0x88   : > { %1653 = vmatpush.bf16.msrb.mxu2 %v3637_v2  ;;  %v3473_v9 = vor.u32 %v4310_v7, %v3470_v8  ;;  %v3822_v7 = vld [vmem:[%s6658_s7 + $0xe0] sm:$0xf0] }
  0x89   : > { %1672 = vmatpush.bf16.msrb.mxu3 %v3641_v4  ;;  %1634 = vmatpush.bf16.msrb.mxu1 %v3633_v10  ;;  %v4432_v10 = vld [vmem:[%s6658_s7 + $0x1c4] sm:$0xf] }
  0x8a   : > { %v3953_v13 = vor.u32 %v4432_v10, %v3950_v11  ;;  %v4464_v8 = vld [vmem:[%s6658_s7 + $0x2c4] sm:$0xf]  ;;  %v3820_v11 = vld [vmem:[%s6658_s7 + $0xc0] sm:$0xf] }
  0x8b   : > { %1616 = vmatpush.bf16.msrb.mxu0 %v3597_v19  ;;  %v4204_v19 = vld [vmem:[%s6658_s7 + $0x3c0] sm:$0xf]  ;;  %v4078_v10 = vld [vmem:[%s6658_s7 + $0x2e0] sm:$0xf0] }
  0x8c   : > { %1654 = vmatpush.bf16.msrb.mxu2 %v3605_v14  ;;  %v4206_v14 = vld [vmem:[%s6658_s7 + $0x3e0] sm:$0xf0]  ;;  %v4205_v21 = vor.u32 %v4500_v20, %v4204_v19 }
  0x8d   : > { %1673 = vmatpush.bf16.msrb.mxu3 %v3609_v18  ;;  %1635 = vmatpush.bf16.msrb.mxu1 %v3601_v22  ;;  %v4209_v17 = vor.u32 %v4496_v12, %v4206_v14  ;;  %v3949_v18 = vor.u32 %v4436_v16, %v3948_v15  ;;  %v4424_v22 = vld [vmem:[%s6658_s7 + $0x184] sm:$0xf]  ;;  %v4404_v12 = vld [vmem:[%s6658_s7 + $0xdc] sm:$0xf0] }
  0x8e   : > { %3435 = vmatmul.msk.bf16.gmra.mxu0 %vm650_vm0, %v5127_v50  ;;  %3437 = vmatmul.msk.bf16.gmra.mxu1 %vm650_vm0, %v5127_v50  ;;  %v3921_v26 = vor.u32 %v4424_v22, %v3918_v23  ;;  %v3821_v14 = vor.u32 %v4404_v12, %v3820_v11  ;;  %v4076_v15 = vld [vmem:[%s6658_s7 + $0x2c0] sm:$0xf]  ;;  %v3790_v19 = vld [vmem:[%s6658_s7 + $0xa0] sm:$0xf0]  ;;  %v3958_v11 = vld [vmem:[%s6658_s7 + $0x1e8] sm:$0xf0] }
  0x8f   : > { %3439 = vmatmul.msk.bf16.gmra.mxu2 %vm650_vm0, %v5127_v50  ;;  %1617 = vmatpush.bf16.msrb.mxu0 %v3565_v30  ;;  %v4468_v16 = vld [vmem:[%s6658_s7 + $0x2dc] sm:$0xf0]  ;;  %v4456_v20 = vld [vmem:[%s6658_s7 + $0x284] sm:$0xf] }
  0x90   : > { %3441 = vmatmul.msk.bf16.gmra.mxu3 %vm650_vm0, %v5127_v50  ;;  %1655 = vmatpush.bf16.msrb.mxu2 %v3573_v25  ;;  %v4331_v50 = vld [vmem:[%s6657_s6 + $0xb4] sm:$0xf0] }
  0x91   : > { %1674 = vmatpush.bf16.msrb.mxu3 %v3577_v29  ;;  %v3541_v36 = vor.u32 %v4331_v50, %v3540_v34  ;;  %1636 = vmatpush.bf16.msrb.mxu1 %v3569_v33  ;;  %v4428_v29 = vld [vmem:[%s6658_s7 + $0x19c] sm:$0xf0] }
  0x92   : > { %v3917_v33 = vor.u32 %v4428_v29, %v3916_v28  ;;  %v4172_v34 = vld [vmem:[%s6658_s7 + $0x380] sm:$0xf] }
  0x93   : > { %1618 = vmatpush.bf16.msrb.mxu0 %v3533_v41  ;;  %v4492_v50 = vld [vmem:[%s6658_s7 + $0x39c] sm:$0xf0]  ;;  %v4145_v41 = vor.u32 %v4480_v38, %v4142_v39  ;;  %v4448_v38 = vld [vmem:[%s6658_s7 + $0x244] sm:$0xf] }
  0x94   : > { %1656 = vmatpush.bf16.msrb.mxu2 %v3541_v36  ;;  %v4173_v36 = vor.u32 %v4492_v50, %v4172_v34  ;;  %v4044_v34 = vld [vmem:[%s6658_s7 + $0x280] sm:$0xf]  ;;  %v4014_v39 = vld [vmem:[%s6658_s7 + $0x260] sm:$0xf0] }
  0x95   : > { %1675 = vmatpush.bf16.msrb.mxu3 %v3545_v40  ;;  %1637 = vmatpush.bf16.msrb.mxu1 %v3537_v46  ;;  %v3889_v40 = vor.u32 %v4416_v35, %v3886_v37  ;;  %v3885_v46 = vor.u32 %v4420_v44, %v3884_v42  ;;  %v4460_v50 = vld [vmem:[%s6658_s7 + $0x29c] sm:$0xf0]  ;;  %v4384_v35 = vld [vmem:[%s6658_s7 + $0x44] sm:$0xf] }
  0x96   : > { %v3758_v37 = vld [vmem:[%s6658_s7 + $0x60] sm:$0xf0]  ;;  %v3756_v42 = vld [vmem:[%s6658_s7 + $0x40] sm:$0xf] }
  0x97   : > { %1619 = vmatpush.bf16.msrb.mxu0 %v3501_v54  ;;  %v4388_v44 = vld [vmem:[%s6658_s7 + $0x5c] sm:$0xf0] }
  0x98   : > { %1657 = vmatpush.bf16.msrb.mxu2 %v3509_v49  ;;  %v4408_v49 = vld [vmem:[%s6658_s7 + $0x104] sm:$0xf] }
  0x99   : > { %1676 = vmatpush.bf16.msrb.mxu3 %v3513_v3  ;;  %1638 = vmatpush.bf16.msrb.mxu1 %v3505_v57  ;;  %v3854_v3 = vld [vmem:[%s6658_s7 + $0x120] sm:$0xf0]  ;;  %v3852_v57 = vld [vmem:[%s6658_s7 + $0x100] sm:$0xf] }
  0x9a   : > { %v3857_v54 = vor.u32 %v4408_v49, %v3854_v3  ;;  %v3853_v62 = vor.u32 %v4412_v58, %v3852_v57  ;;  %v4376_v49 = vld [vmem:[%s6658_s7 + $0x4] sm:$0xf] }
  0x9b   : > { %v5444_v2 = vpop.f32.mrf.mxu0  ;;  %v5446_v4 = vpop.f32.mrf.mxu1  ;;  %1620 = vmatpush.bf16.msrb.mxu0 %v3469_v6  ;;  %v4400_v6 = vld [vmem:[%s6658_s7 + $0xc4] sm:$0xf] }
  0x9c   : > { %1658 = vmatpush.bf16.msrb.mxu2 %v3477_v61  ;;  %v4113_v61 = vor.u32 %v4472_v51, %v4110_v55  ;;  %v3726_v3 = vld [vmem:[%s6658_s7 + $0x20] sm:$0xf0] }
  0x9d   : > { %1677 = vmatpush.bf16.msrb.mxu3 %v3481_v5  ;;  %1639 = vmatpush.bf16.msrb.mxu1 %v3473_v9  ;;  %v4109_v5 = vor.u32 %v4476_v0, %v4108_v63  ;;  %v3825_v9 = vor.u32 %v4400_v6, %v3822_v7  ;;  %v4440_v51 = vld [vmem:[%s6658_s7 + $0x204] sm:$0xf]  ;;  %v3729_v57 = vor.u32 %v4376_v49, %v3726_v3  ;;  %v3980_v7 = vld [vmem:[%s6658_s7 + $0x200] sm:$0xf]  ;;  %v3892_v49 = vld [vmem:[%s6658_s7 + $0x148] sm:$0xf] }
  0x9e   : > { %1545 = vmatmul.bf16.vlgmr.msra.gmra.mxu0 %v5424_v56  ;;  %1564 = vmatmul.bf16.vlgmr.msra.gmra.mxu1 %v5424_v56  ;;  %v3982_v58 = vld [vmem:[%s6658_s7 + $0x220] sm:$0xf0]  ;;  %v4421_v3 = vld [vmem:[%s6658_s7 + $0x164] sm:$0xf0] }
  0x9f   : > { %1583 = vmatmul.bf16.vlgmr.msra.gmra.mxu2 %v5424_v56  ;;  %2513 = vmatpush.bf16.msra.mxu0 %v3949_v18  ;;  %v4392_v18 = vld [vmem:[%s6658_s7 + $0x84] sm:$0xf] }
  0xa0   : > { %1602 = vmatmul.bf16.vlgmr.msra.gmra.mxu3 %v5424_v56  ;;  %2551 = vmatpush.bf16.msra.mxu2 %v3953_v13  ;;  %v4081_v13 = vor.u32 %v4464_v8, %v4078_v10  ;;  %v3793_v23 = vor.u32 %v4392_v18, %v3790_v19  ;;  %v4444_v8 = vld [vmem:[%s6658_s7 + $0x21c] sm:$0xf0]  ;;  %v4433_v10 = vld [vmem:[%s6658_s7 + $0x1cc] sm:$0xf]  ;;  %v4212_v18 = vld [vmem:[%s6658_s7 + $0x3c8] sm:$0xf] }
  0xa1   : > { %2570 = vmatpush.bf16.msra.mxu3 %v4209_v17  ;;  %2532 = vmatpush.bf16.msra.mxu1 %v4205_v21  ;;  %v4077_v17 = vor.u32 %v4468_v16, %v4076_v15  ;;  %v3961_v12 = vor.u32 %v4433_v10, %v3958_v11  ;;  %v3956_v15 = vld [vmem:[%s6658_s7 + $0x1c8] sm:$0xf]  ;;  %v4118_v11 = vld [vmem:[%s6658_s7 + $0x328] sm:$0xf0] }
  0xa2   : > { %v5491_v24 = vpop.f32.mrf.mxu2  ;;  %v4501_v19 = vld [vmem:[%s6658_s7 + $0x3e4] sm:$0xf0] }
  0xa3   : > { %v5493_v25 = vpop.f32.mrf.mxu3  ;;  %v5504_v30 = vpop.f32.mrf.mxu0  ;;  %2514 = vmatpush.bf16.msra.mxu0 %v3917_v33 }
  0xa4   : > { %v5506_v31 = vpop.f32.mrf.mxu1  ;;  %2552 = vmatpush.bf16.msra.mxu2 %v3921_v26  ;;  %v3788_v26 = vld [vmem:[%s6658_s7 + $0x80] sm:$0xf] }
  0xa5   : > { %2571 = vmatpush.bf16.msra.mxu3 %v4177_v32  ;;  %2533 = vmatpush.bf16.msra.mxu1 %v4173_v36  ;;  %v4049_v32 = vor.u32 %v4456_v20, %v4046_v1  ;;  %v3789_v33 = vor.u32 %v4396_v27, %v3788_v26  ;;  %v4045_v36 = vor.u32 %v4460_v50, %v4044_v34  ;;  %v3926_v1 = vld [vmem:[%s6658_s7 + $0x1a8] sm:$0xf0]  ;;  %v3924_v50 = vld [vmem:[%s6658_s7 + $0x188] sm:$0xf] }
  0xa6   : > { %v4489_v26 = vld [vmem:[%s6658_s7 + $0x38c] sm:$0xf] }
  0xa7   : > { %2515 = vmatpush.bf16.msra.mxu0 %v3885_v46  ;;  %v3757_v46 = vor.u32 %v4388_v44, %v3756_v42  ;;  %v4182_v34 = vld [vmem:[%s6658_s7 + $0x3a8] sm:$0xf0] }
  0xa8   : > { %2553 = vmatpush.bf16.msra.mxu2 %v3889_v40  ;;  %v3761_v40 = vor.u32 %v4384_v35, %v3758_v37  ;;  %v4429_v35 = vld [vmem:[%s6658_s7 + $0x1a4] sm:$0xf0]  ;;  %v4417_v44 = vld [vmem:[%s6658_s7 + $0x14c] sm:$0xf] }
  0xa9   : > { %2572 = vmatpush.bf16.msra.mxu3 %v4145_v41  ;;  %2534 = vmatpush.bf16.msra.mxu1 %v4141_v43  ;;  %v4017_v41 = vor.u32 %v4448_v38, %v4014_v39  ;;  %v4013_v43 = vor.u32 %v4452_v47, %v4012_v45  ;;  %v4185_v38 = vor.u32 %v4489_v26, %v4182_v34  ;;  %v3894_v45 = vld [vmem:[%s6658_s7 + $0x168] sm:$0xf0]  ;;  %v3828_v34 = vld [vmem:[%s6658_s7 + $0xc8] sm:$0xf] }
  0xaa   : > { %v5550_v52 = vpop.f32.mrf.mxu2  ;;  %v3925_v39 = vor.u32 %v4429_v35, %v3924_v50  ;;  %v3897_v47 = vor.u32 %v4417_v44, %v3894_v45  ;;  %v4465_v26 = vld [vmem:[%s6658_s7 + $0x2cc] sm:$0xf]  ;;  %v4405_v35 = vld [vmem:[%s6658_s7 + $0xe4] sm:$0xf0] }
  0xab   : > { %v5552_v53 = vpop.f32.mrf.mxu3  ;;  %v5563_v59 = vpop.f32.mrf.mxu0  ;;  %2516 = vmatpush.bf16.msra.mxu0 %v3853_v62  ;;  %v4380_v62 = vld [vmem:[%s6658_s7 + $0x1c] sm:$0xf0]  ;;  %v4457_v44 = vld [vmem:[%s6658_s7 + $0x28c] sm:$0xf] }
  0xac   : > { %v5565_v60 = vpop.f32.mrf.mxu1  ;;  %2554 = vmatpush.bf16.msra.mxu2 %v3857_v54 }
  0xad   : > { %2573 = vmatpush.bf16.msra.mxu3 %v4113_v61  ;;  %2535 = vmatpush.bf16.msra.mxu1 %v4109_v5  ;;  %v3724_v61 = vld [vmem:[%s6658_s7] sm:$0xf]  ;;  %v3985_v5 = vor.u32 %v4440_v51, %v3982_v58  ;;  %v4148_v58 = vld [vmem:[%s6658_s7 + $0x348] sm:$0xf] }
  0xae   : > { %1550 = vmatmul.bf16.gmra.mxu0 %v5539_v48  ;;  %1569 = vmatmul.bf16.gmra.mxu1 %v5539_v48  ;;  %v3725_v6 = vor.u32 %v4380_v62, %v3724_v61  ;;  %v4485_v61 = vld [vmem:[%s6658_s7 + $0x364] sm:$0xf0] }
  0xaf   : > { %1588 = vmatmul.bf16.gmra.mxu2 %v5539_v48  ;;  %2517 = vmatpush.bf16.msra.mxu0 %v3821_v14  ;;  %v4214_v14 = vld [vmem:[%s6658_s7 + $0x3e8] sm:$0xf0]  ;;  %v4149_v62 = vor.u32 %v4485_v61, %v4148_v58  ;;  %v4052_v61 = vld [vmem:[%s6658_s7 + $0x288] sm:$0xf] }
  0xb0   : > { %1607 = vmatmul.bf16.gmra.mxu3 %v5539_v48  ;;  %2555 = vmatpush.bf16.msra.mxu2 %v3825_v9  ;;  %v3981_v9 = vor.u32 %v4444_v8, %v3980_v7  ;;  %v4473_v7 = vld [vmem:[%s6658_s7 + $0x30c] sm:$0xf] }
  0xb1   : > { %2574 = vmatpush.bf16.msra.mxu3 %v4081_v13  ;;  %2536 = vmatpush.bf16.msra.mxu1 %v4077_v17  ;;  %v4497_v13 = vld [vmem:[%s6658_s7 + $0x3cc] sm:$0xf]  ;;  %v4437_v17 = vld [vmem:[%s6658_s7 + $0x1e4] sm:$0xf0] }
  0xb2   : > { %v5610_v21 = vpop.f32.mrf.mxu2  ;;  %v4217_v16 = vor.u32 %v4497_v13, %v4214_v14  ;;  %v3957_v20 = vor.u32 %v4437_v17, %v3956_v15  ;;  %v4413_v13 = vld [vmem:[%s6658_s7 + $0x124] sm:$0xf0] }
  0xb3   : > { %v5612_v22 = vpop.f32.mrf.mxu3  ;;  %v5623_v28 = vpop.f32.mrf.mxu0  ;;  %2518 = vmatpush.bf16.msra.mxu0 %v3789_v33  ;;  %v4116_v17 = vld [vmem:[%s6658_s7 + $0x308] sm:$0xf] }
  0xb4   : > { %v5625_v29 = vpop.f32.mrf.mxu1  ;;  %2556 = vmatpush.bf16.msra.mxu2 %v3793_v23  ;;  %v4213_v23 = vor.u32 %v4501_v19, %v4212_v18  ;;  %v4477_v18 = vld [vmem:[%s6658_s7 + $0x324] sm:$0xf0] }
  0xb5   : > { %2575 = vmatpush.bf16.msra.mxu3 %v4049_v32  ;;  %2537 = vmatpush.bf16.msra.mxu1 %v4045_v36 }
  0xb7   : > { %2519 = vmatpush.bf16.msra.mxu0 %v3757_v46  ;;  %v4481_v46 = vld [vmem:[%s6658_s7 + $0x34c] sm:$0xf] }
  0xb8   : > { %2557 = vmatpush.bf16.msra.mxu2 %v3761_v40  ;;  %v4180_v40 = vld [vmem:[%s6658_s7 + $0x388] sm:$0xf] }
  0xb9   : > { %2576 = vmatpush.bf16.msra.mxu3 %v4017_v41  ;;  %2538 = vmatpush.bf16.msra.mxu1 %v4013_v43  ;;  %v4493_v41 = vld [vmem:[%s6658_s7 + $0x3a4] sm:$0xf0]  ;;  %v4150_v43 = vld [vmem:[%s6658_s7 + $0x368] sm:$0xf0] }
  0xba   : > { %v5666_v54 = vpop.f32.mrf.mxu2  ;;  %v4181_v42 = vor.u32 %v4493_v41, %v4180_v40  ;;  %v4153_v51 = vor.u32 %v4481_v46, %v4150_v43  ;;  %v3829_v40 = vor.u32 %v4405_v35, %v3828_v34  ;;  %v4054_v43 = vld [vmem:[%s6658_s7 + $0x2a8] sm:$0xf0] }
  0xbb   : > { %v5668_v55 = vpop.f32.mrf.mxu3  ;;  %v5679_v63 = vpop.f32.mrf.mxu0  ;;  %2520 = vmatpush.bf16.msra.mxu0 %v3725_v6  ;;  %v3862_v6 = vld [vmem:[%s6658_s7 + $0x128] sm:$0xf0]  ;;  %v4057_v58 = vor.u32 %v4457_v44, %v4054_v43  ;;  %v4381_v43 = vld [vmem:[%s6658_s7 + $0x24] sm:$0xf0] }
  0xbc   : > { %v5681_v0 = vpop.f32.mrf.mxu1  ;;  %2558 = vmatpush.bf16.msra.mxu2 %v3729_v57  ;;  %v3893_v57 = vor.u32 %v4421_v3, %v3892_v49  ;;  %v3796_v49 = vld [vmem:[%s6658_s7 + $0x88] sm:$0xf]  ;;  %v3734_v35 = vld [vmem:[%s6658_s7 + $0x28] sm:$0xf0] }
  0xbd   : > { %2577 = vmatpush.bf16.msra.mxu3 %v3985_v5  ;;  %2539 = vmatpush.bf16.msra.mxu1 %v3981_v9  ;;  %v4409_v5 = vld [vmem:[%s6658_s7 + $0x10c] sm:$0xf]  ;;  %v4397_v3 = vld [vmem:[%s6658_s7 + $0xa4] sm:$0xf0] }
  0xbe   : > { %1621 = vmatmul.bf16.vlgmr.msrb.gmra.mxu0 %v5424_v56  ;;  %1640 = vmatmul.bf16.vlgmr.msrb.gmra.mxu1 %v5424_v56  ;;  %v3865_v10 = vor.u32 %v4409_v5, %v3862_v6  ;;  %v3797_v5 = vor.u32 %v4397_v3, %v3796_v49  ;;  %v3990_v44 = vld [vmem:[%s6658_s7 + $0x228] sm:$0xf0] }
  0xbf   : > { %1659 = vmatmul.bf16.vlgmr.msrb.gmra.mxu2 %v5424_v56  ;;  %2589 = vmatpush.bf16.msrb.mxu0 %v3957_v20  ;;  %v4117_v20 = vor.u32 %v4477_v18, %v4116_v17  ;;  %v4389_v17 = vld [vmem:[%s6658_s7 + $0x64] sm:$0xf0]  ;;  %v3708_v18 = vld [vmem:[%s5859_s29] sm:$0xf] }
  0xc0   : > { %1678 = vmatmul.bf16.vlgmr.msrb.gmra.mxu3 %v5424_v56  ;;  %2627 = vmatpush.bf16.msrb.mxu2 %v3961_v12  ;;  %v4425_v56 = vld [vmem:[%s6658_s7 + $0x18c] sm:$0xf]  ;;  %v3860_v12 = vld [vmem:[%s6658_s7 + $0x108] sm:$0xf] }
  0xc1   : > { %2646 = vmatpush.bf16.msrb.mxu3 %v4217_v16  ;;  %2608 = vmatpush.bf16.msrb.mxu1 %v4213_v23  ;;  %v3929_v33 = vor.u32 %v4425_v56, %v3926_v1  ;;  %v4121_v16 = vor.u32 %v4473_v7, %v4118_v11  ;;  %v3861_v19 = vor.u32 %v4413_v13, %v3860_v12  ;;  %v4401_v23 = vld [vmem:[%s6658_s7 + $0xcc] sm:$0xf] }
  0xc2   : > { %v5726_v27 = vpop.f32.mrf.mxu2  ;;  %v3830_v56 = vld [vmem:[%s6658_s7 + $0xe8] sm:$0xf0] }
  0xc3   : > { %v5728_v32 = vpop.f32.mrf.mxu3  ;;  %v5739_v36 = vpop.f32.mrf.mxu0  ;;  %2590 = vmatpush.bf16.msrb.mxu0 %v3925_v39  ;;  %v3833_v1 = vor.u32 %v4401_v23, %v3830_v56  ;;  %v4469_v39 = vld [vmem:[%s6658_s7 + $0x2e4] sm:$0xf0]  ;;  %v4385_v7 = vld [vmem:[%s6658_s7 + $0x4c] sm:$0xf] }
  0xc4   : > { %v5741_v37 = vpop.f32.mrf.mxu1  ;;  %2628 = vmatpush.bf16.msrb.mxu2 %v3929_v33  ;;  %v4086_v33 = vld [vmem:[%s6658_s7 + $0x2e8] sm:$0xf0]  ;;  %v4453_v23 = vld [vmem:[%s6658_s7 + $0x264] sm:$0xf0] }
  0xc5   : > { %2647 = vmatpush.bf16.msrb.mxu3 %v4185_v38  ;;  %2609 = vmatpush.bf16.msrb.mxu1 %v4181_v42  ;;  %v4089_v50 = vor.u32 %v4465_v26, %v4086_v33  ;;  %v4084_v38 = vld [vmem:[%s6658_s7 + $0x2c8] sm:$0xf]  ;;  %v3798_v42 = vld [vmem:[%s6658_s7 + $0xa8] sm:$0xf0] }
  0xc6   : > { %v4085_v41 = vor.u32 %v4469_v39, %v4084_v38  ;;  %v4449_v11 = vld [vmem:[%s6658_s7 + $0x24c] sm:$0xf]  ;;  %v4373_v56 = vld [vmem:[%s5859_s29 + $0x4] sm:$0xf0] }
  0xc7   : > { %2591 = vmatpush.bf16.msrb.mxu0 %v3893_v57  ;;  %v4022_v13 = vld [vmem:[%s6658_s7 + $0x268] sm:$0xf0] }
  0xc8   : > { %2629 = vmatpush.bf16.msrb.mxu2 %v3897_v47  ;;  %v3710_v26 = vld [vmem:[%s5859_s29 + $0x8] sm:$0xf0] }
  0xc9   : > { %2648 = vmatpush.bf16.msrb.mxu3 %v4153_v51  ;;  %2610 = vmatpush.bf16.msrb.mxu1 %v4149_v62  ;;  %v4461_v62 = vld [vmem:[%s6658_s7 + $0x2a4] sm:$0xf0]  ;;  %v4441_v38 = vld [vmem:[%s6658_s7 + $0x20c] sm:$0xf] }
  0xca   : > { %v5782_v8 = vpop.f32.mrf.mxu2  ;;  %v4053_v6 = vor.u32 %v4461_v62, %v4052_v61  ;;  %v3988_v62 = vld [vmem:[%s6658_s7 + $0x208] sm:$0xf] }
  0xcb   : > { %v5784_v9 = vpop.f32.mrf.mxu3  ;;  %v5795_v14 = vpop.f32.mrf.mxu0  ;;  %2592 = vmatpush.bf16.msrb.mxu0 %v3861_v19  ;;  %v4025_v19 = vor.u32 %v4449_v11, %v4022_v13  ;;  %v4434_v11 = vld [vmem:[%s6658_s7 + $0x1d4] sm:$0xf] }
  0xcc   : > { %v5797_v15 = vpop.f32.mrf.mxu1  ;;  %2630 = vmatpush.bf16.msrb.mxu2 %v3865_v10  ;;  %v3766_v10 = vld [vmem:[%s6658_s7 + $0x68] sm:$0xf0]  ;;  %v4222_v13 = vld [vmem:[%s6658_s7 + $0x3f0] sm:$0xf0] }
  0xcd   : > { %2649 = vmatpush.bf16.msrb.mxu3 %v4121_v16  ;;  %2611 = vmatpush.bf16.msrb.mxu1 %v4117_v20  ;;  %v3769_v12 = vor.u32 %v4385_v7, %v3766_v10  ;;  %v3764_v16 = vld [vmem:[%s6658_s7 + $0x48] sm:$0xf] }
  0xce   : > { %1626 = vmatmul.bf16.gmra.mxu0 %v5539_v48  ;;  %1645 = vmatmul.bf16.gmra.mxu1 %v5539_v48  ;;  %v4020_v20 = vld [vmem:[%s6658_s7 + $0x248] sm:$0xf]  ;;  %v3765_v33 = vor.u32 %v4389_v17, %v3764_v16  ;;  %v3964_v16 = vld [vmem:[%s6658_s7 + $0x1d0] sm:$0xf] }
  0xcf   : > { %1664 = vmatmul.bf16.gmra.mxu2 %v5539_v48  ;;  %2593 = vmatpush.bf16.msrb.mxu0 %v3829_v40  ;;  %v4021_v34 = vor.u32 %v4453_v23, %v4020_v20  ;;  %v4438_v17 = vld [vmem:[%s6658_s7 + $0x1ec] sm:$0xf0] }
  0xd0   : > { %1683 = vmatmul.bf16.gmra.mxu3 %v5539_v48  ;;  %2631 = vmatpush.bf16.msrb.mxu2 %v3833_v1  ;;  %v4393_v48 = vld [vmem:[%s6658_s7 + $0x8c] sm:$0xf]  ;;  %v4372_v1 = vld [vmem:[%s5859_s29 + $0x4] sm:$0xf]  ;;  %v4220_v20 = vld [vmem:[%s6658_s7 + $0x3d0] sm:$0xf] }
  0xd1   : > { %2650 = vmatpush.bf16.msrb.mxu3 %v4089_v50  ;;  %v3801_v47 = vor.u32 %v4393_v48, %v3798_v42  ;;  %2612 = vmatpush.bf16.msrb.mxu1 %v4085_v41  ;;  %v4377_v50 = vld [vmem:[%s6658_s7 + $0xc] sm:$0xf]  ;;  %v5912_v41 = vor.u32 %v4373_v56, %v3708_v18  ;;  %v5914_v48 = vor.u32 %v4372_v1, %v3710_v26  ;;  %v4502_v23 = vld [vmem:[%s6658_s7 + $0x3ec] sm:$0xf0]  ;;  %v4426_v1 = vld [vmem:[%s6658_s7 + $0x194] sm:$0xf] }
  0xd2   : > { %v5843_v45 = vpop.f32.mrf.mxu2  ;;  %v3737_v42 = vor.u32 %v4377_v50, %v3734_v35  ;;  %v4221_v56 = vor.u32 %v4502_v23, %v4220_v20  ;;  %v3934_v26 = vld [vmem:[%s6658_s7 + $0x1b0] sm:$0xf0]  ;;  %v4486_v20 = vld [vmem:[%s6658_s7 + $0x36c] sm:$0xf0]  ;;  %v4375_v23 = vld [vmem:[%s5859_s29 + $0x14] sm:$0xf0] }
  0xd3   : > { %v5845_v46 = vpop.f32.mrf.mxu3  ;;  %v5861_v51 = vpop.f32.mrf.mxu0  ;;  %2594 = vmatpush.bf16.msrb.mxu0 %v3797_v5  ;;  %v4445_v5 = vld [vmem:[%s6658_s7 + $0x224] sm:$0xf0]  ;;  %v3937_v35 = vor.u32 %v4426_v1, %v3934_v26  ;;  %v3718_v1 = vld [vmem:[%s5859_s29 + $0x18] sm:$0xf0] }
  0xd4   : > { %v5863_v57 = vpop.f32.mrf.mxu1  ;;  %2632 = vmatpush.bf16.msrb.mxu2 %v3801_v47  ;;  %v3732_v47 = vld [vmem:[%s6658_s7 + $0x8] sm:$0xf]  ;;  %v3989_v10 = vor.u32 %v4445_v5, %v3988_v62  ;;  %v4188_v62 = vld [vmem:[%s6658_s7 + $0x390] sm:$0xf] }
  0xd5   : > { %2651 = vmatpush.bf16.msrb.mxu3 %v4057_v58  ;;  %2613 = vmatpush.bf16.msrb.mxu1 %v4053_v6  ;;  %v3993_v58 = vor.u32 %v4441_v38, %v3990_v44  ;;  %v3733_v61 = vor.u32 %v4381_v43, %v3732_v47  ;;  %v4190_v38 = vld [vmem:[%s6658_s7 + $0x3b0] sm:$0xf0]  ;;  %v4430_v44 = vld [vmem:[%s6658_s7 + $0x1ac] sm:$0xf0] }
  0xd6   : > { %v4494_v5 = vld [vmem:[%s6658_s7 + $0x3ac] sm:$0xf0] }
  0xd7   : > { %2595 = vmatpush.bf16.msrb.mxu0 %v3765_v33  ;;  %v4490_v33 = vld [vmem:[%s6658_s7 + $0x394] sm:$0xf] }
  0xd8   : > { %2633 = vmatpush.bf16.msrb.mxu2 %v3769_v12  ;;  %v3966_v12 = vld [vmem:[%s6658_s7 + $0x1f0] sm:$0xf0] }
  0xd9   : > { %2652 = vmatpush.bf16.msrb.mxu3 %v4025_v19  ;;  %2614 = vmatpush.bf16.msrb.mxu1 %v4021_v34  ;;  %v3965_v19 = vor.u32 %v4438_v17, %v3964_v16  ;;  %v3716_v16 = vld [vmem:[%s5859_s29 + $0x10] sm:$0xf] }
  0xda   : > { %v5908_v39 = vpop.f32.mrf.mxu2 }
  0xdb   : > { %v5910_v40 = vpop.f32.mrf.mxu3  ;;  %v994_v49 = vpop.f32.mrf.mxu0  ;;  %2596 = vmatpush.bf16.msrb.mxu0 %v3733_v61 }
  0xdc   : > { %v1013_v3 = vpop.f32.mrf.mxu1  ;;  %v5932_v6 = vadd.f32 %v994_v49, %v5444_v2  ;;  %2634 = vmatpush.bf16.msrb.mxu2 %v3737_v42  ;;  %v4498_v2 = vld [vmem:[%s6658_s7 + $0x3d4] sm:$0xf]  ;;  %v3932_v42 = vld [vmem:[%s6658_s7 + $0x190] sm:$0xf] }
  0xdd   : > { %v5935_v7 = vadd.f32 %v1013_v3, %v5446_v4  ;;  %2653 = vmatpush.bf16.msrb.mxu3 %v3993_v58  ;;  %v3969_v4 = vor.u32 %v4434_v11, %v3966_v12  ;;  %v4225_v18 = vor.u32 %v4498_v2, %v4222_v13  ;;  %2615 = vmatpush.bf16.msrb.mxu1 %v3989_v10  ;;  %v4418_v11 = vld [vmem:[%s6658_s7 + $0x154] sm:$0xf]  ;;  %v4422_v13 = vld [vmem:[%s6658_s7 + $0x16c] sm:$0xf0] }
  0xde   : > { %2521 = vmatmul.bf16.vlgmr.msra.gmra.mxu0 %v5912_v41  ;;  %2540 = vmatmul.bf16.vlgmr.msra.gmra.mxu1 %v5914_v48  ;;  %v4193_v58 = vor.u32 %v4490_v33, %v4190_v38  ;;  %v3933_v61 = vor.u32 %v4430_v44, %v3932_v42  ;;  %v3902_v12 = vld [vmem:[%s6658_s7 + $0x170] sm:$0xf0]  ;;  %v6038_v42 = vor.u32 %v4375_v23, %v3716_v16  ;;  %v4092_v23 = vld [vmem:[%s6658_s7 + $0x2d0] sm:$0xf] }
  0xdf   : > { %2559 = vmatmul.bf16.vlgmr.msra.gmra.mxu2 %v5912_v41  ;;  %2665 = vmatpush.bf16.msra.mxu0 %v3965_v19  ;;  %v4482_v2 = vld [vmem:[%s6658_s7 + $0x354] sm:$0xf]  ;;  %v4156_v19 = vld [vmem:[%s6658_s7 + $0x350] sm:$0xf] }
  0xe0   : > { %2578 = vmatmul.bf16.vlgmr.msra.gmra.mxu3 %v5914_v48  ;;  %2703 = vmatpush.bf16.msra.mxu2 %v3969_v4  ;;  %v3900_v4 = vld [vmem:[%s6658_s7 + $0x150] sm:$0xf]  ;;  %v4157_v26 = vor.u32 %v4486_v20, %v4156_v19  ;;  %v4410_v33 = vld [vmem:[%s6658_s7 + $0x114] sm:$0xf] }
  0xe1   : > { %2722 = vmatpush.bf16.msra.mxu3 %v4225_v18  ;;  %2684 = vmatpush.bf16.msra.mxu1 %v4221_v56  ;;  %v3901_v18 = vor.u32 %v4422_v13, %v3900_v4  ;;  %v4374_v56 = vld [vmem:[%s5859_s29 + $0x14] sm:$0xf]  ;;  %v4406_v19 = vld [vmem:[%s6658_s7 + $0xec] sm:$0xf0] }
  0xe2   : > { %v1032_v34 = vpop.f32.mrf.mxu2  ;;  %v6040_v44 = vor.u32 %v4374_v56, %v3718_v1  ;;  %v4402_v13 = vld [vmem:[%s6658_s7 + $0xd4] sm:$0xf]  ;;  %v4470_v56 = vld [vmem:[%s6658_s7 + $0x2ec] sm:$0xf0] }
  0xe3   : > { %v1051_v50 = vpop.f32.mrf.mxu3  ;;  %v5984_v47 = vadd.f32 %v1032_v34, %v5491_v24  ;;  %v996_v49 = vpop.f32.mrf.mxu0  ;;  %2666 = vmatpush.bf16.msra.mxu0 %v3933_v61  ;;  %v3870_v34 = vld [vmem:[%s6658_s7 + $0x130] sm:$0xf0]  ;;  %v4414_v61 = vld [vmem:[%s6658_s7 + $0x12c] sm:$0xf0] }
  0xe4   : > { %v5987_v43 = vadd.f32 %v1051_v50, %v5493_v25  ;;  %v1015_v3 = vpop.f32.mrf.mxu1  ;;  %v5996_v10 = vadd.f32 %v996_v49, %v5504_v30  ;;  %v4189_v25 = vor.u32 %v4494_v5, %v4188_v62  ;;  %2704 = vmatpush.bf16.msra.mxu2 %v3937_v35  ;;  %v3905_v30 = vor.u32 %v4418_v11, %v3902_v12  ;;  %v4474_v50 = vld [vmem:[%s6658_s7 + $0x314] sm:$0xf] }
  0xe5   : > { %v5999_v24 = vadd.f32 %v1015_v3, %v5506_v31  ;;  %2723 = vmatpush.bf16.msra.mxu3 %v4193_v58  ;;  %v4158_v31 = vld [vmem:[%s6658_s7 + $0x370] sm:$0xf0]  ;;  %v3873_v49 = vor.u32 %v4410_v33, %v3870_v34  ;;  %v3868_v58 = vld [vmem:[%s6658_s7 + $0x110] sm:$0xf] }
  0xe6   : > { %2685 = vmatpush.bf16.msra.mxu1 %v4189_v25  ;;  %v4161_v17 = vor.u32 %v4482_v2, %v4158_v31  ;;  %v4126_v3 = vld [vmem:[%s6658_s7 + $0x330] sm:$0xf0]  ;;  %v4124_v2 = vld [vmem:[%s6658_s7 + $0x310] sm:$0xf]  ;;  %v3869_v4 = vor.u32 %v4414_v61, %v3868_v58 }
  0xe7   : > { %2667 = vmatpush.bf16.msra.mxu0 %v3901_v18  ;;  %v4129_v12 = vor.u32 %v4474_v50, %v4126_v3  ;;  %v3838_v16 = vld [vmem:[%s6658_s7 + $0xf0] sm:$0xf0]  ;;  %v3836_v18 = vld [vmem:[%s6658_s7 + $0xd0] sm:$0xf] }
  0xe8   : > { %2705 = vmatpush.bf16.msra.mxu2 %v3905_v30  ;;  %v4478_v30 = vld [vmem:[%s6658_s7 + $0x32c] sm:$0xf0]  ;;  %v3837_v1 = vor.u32 %v4406_v19, %v3836_v18  ;;  %v4394_v33 = vld [vmem:[%s6658_s7 + $0x94] sm:$0xf] }
  0xe9   : > { %2724 = vmatpush.bf16.msra.mxu3 %v4161_v17  ;;  %v4094_v17 = vld [vmem:[%s6658_s7 + $0x2f0] sm:$0xf0]  ;;  %v3804_v58 = vld [vmem:[%s6658_s7 + $0x90] sm:$0xf] }
  0xea   : > { %v1034_v35 = vpop.f32.mrf.mxu2  ;;  %2686 = vmatpush.bf16.msra.mxu1 %v4157_v26  ;;  %v4093_v26 = vor.u32 %v4470_v56, %v4092_v23  ;;  %v3806_v34 = vld [vmem:[%s6658_s7 + $0xb0] sm:$0xf0]  ;;  %v4398_v61 = vld [vmem:[%s6658_s7 + $0xac] sm:$0xf0] }
  0xeb   : > { %v1053_v38 = vpop.f32.mrf.mxu3  ;;  %v6052_v62 = vadd.f32 %v1034_v35, %v5550_v52  ;;  %v999_v25 = vpop.f32.mrf.mxu0  ;;  %2668 = vmatpush.bf16.msra.mxu0 %v3869_v4  ;;  %v4458_v50 = vld [vmem:[%s6658_s7 + $0x294] sm:$0xf]  ;;  %v3805_v4 = vor.u32 %v4398_v61, %v3804_v58  ;;  %v3772_v18 = vld [vmem:[%s6658_s7 + $0x50] sm:$0xf] }
  0xec   : > { %v6055_v5 = vadd.f32 %v1053_v38, %v5552_v53  ;;  %v1018_v11 = vpop.f32.mrf.mxu1  ;;  %v6064_v31 = vadd.f32 %v999_v25, %v5563_v59  ;;  %v4125_v53 = vor.u32 %v4478_v30, %v4124_v2  ;;  %2706 = vmatpush.bf16.msra.mxu2 %v3873_v49  ;;  %v4466_v59 = vld [vmem:[%s6658_s7 + $0x2d4] sm:$0xf]  ;;  %v3809_v49 = vor.u32 %v4394_v33, %v3806_v34  ;;  %v4390_v19 = vld [vmem:[%s6658_s7 + $0x6c] sm:$0xf0] }
  0xed   : > { %v6067_v52 = vadd.f32 %v1018_v11, %v5565_v60  ;;  %2725 = vmatpush.bf16.msra.mxu3 %v4129_v12  ;;  %v3841_v60 = vor.u32 %v4402_v13, %v3838_v16  ;;  %v4097_v20 = vor.u32 %v4466_v59, %v4094_v17  ;;  %v4062_v3 = vld [vmem:[%s6658_s7 + $0x2b0] sm:$0xf0]  ;;  %v4462_v13 = vld [vmem:[%s6658_s7 + $0x2ac] sm:$0xf0] }
  0xee   : > { %2526 = vmatmul.bf16.gmra.mxu0 %v6038_v42  ;;  %2545 = vmatmul.bf16.gmra.mxu1 %v6040_v44  ;;  %v4065_v30 = vor.u32 %v4458_v50, %v4062_v3  ;;  %v4386_v59 = vld [vmem:[%s6658_s7 + $0x54] sm:$0xf]  ;;  %v4028_v23 = vld [vmem:[%s6658_s7 + $0x250] sm:$0xf] }
  0xef   : > { %2564 = vmatmul.bf16.gmra.mxu2 %v6038_v42  ;;  %2687 = vmatpush.bf16.msra.mxu1 %v4125_v53  ;;  %v4060_v53 = vld [vmem:[%s6658_s7 + $0x290] sm:$0xf]  ;;  %v4450_v17 = vld [vmem:[%s6658_s7 + $0x254] sm:$0xf] }
  0xf0   : > { %2583 = vmatmul.bf16.gmra.mxu3 %v6040_v44  ;;  %2707 = vmatpush.bf16.msra.mxu2 %v3841_v60  ;;  %v3774_v60 = vld [vmem:[%s6658_s7 + $0x70] sm:$0xf0]  ;;  %v4454_v56 = vld [vmem:[%s6658_s7 + $0x26c] sm:$0xf0] }
  0xf1   : > { %2726 = vmatpush.bf16.msra.mxu3 %v4097_v20  ;;  %2669 = vmatpush.bf16.msra.mxu0 %v3837_v1  ;;  %v3773_v1 = vor.u32 %v4390_v19, %v3772_v18  ;;  %v4378_v33 = vld [vmem:[%s6658_s7 + $0x14] sm:$0xf]  ;;  %v3740_v58 = vld [vmem:[%s6658_s7 + $0x10] sm:$0xf]  ;;  %v3972_v18 = vld [vmem:[%s6658_s7 + $0x1d8] sm:$0xf] }
  0xf2   : > { %v1037_v35 = vpop.f32.mrf.mxu2  ;;  %v3742_v34 = vld [vmem:[%s6658_s7 + $0x30] sm:$0xf0]  ;;  %v4382_v61 = vld [vmem:[%s6658_s7 + $0x2c] sm:$0xf0]  ;;  %v4439_v19 = vld [vmem:[%s6658_s7 + $0x1f4] sm:$0xf0] }
  0xf3   : > { %v1056_v38 = vpop.f32.mrf.mxu3  ;;  %v6116_v25 = vadd.f32 %v1037_v35, %v5610_v21  ;;  %v1001_v12 = vpop.f32.mrf.mxu0  ;;  %2688 = vmatpush.bf16.msra.mxu1 %v4093_v26  ;;  %v4029_v26 = vor.u32 %v4454_v56, %v4028_v23  ;;  %v4442_v50 = vld [vmem:[%s6658_s7 + $0x214] sm:$0xf]  ;;  %v3973_v23 = vor.u32 %v4439_v19, %v3972_v18  ;;  %v4228_v56 = vld [vmem:[%s6658_s7 + $0x3d8] sm:$0xf] }
  0xf4   : > { %v6119_v11 = vadd.f32 %v1056_v38, %v5612_v22  ;;  %v1020_v2 = vpop.f32.mrf.mxu1  ;;  %v6128_v16 = vadd.f32 %v1001_v12, %v5623_v28  ;;  %v4061_v22 = vor.u32 %v4462_v13, %v4060_v53  ;;  %2708 = vmatpush.bf16.msra.mxu2 %v3809_v49  ;;  %v3777_v28 = vor.u32 %v4386_v59, %v3774_v60  ;;  %v3998_v3 = vld [vmem:[%s6658_s7 + $0x230] sm:$0xf0]  ;;  %v4446_v59 = vld [vmem:[%s6658_s7 + $0x22c] sm:$0xf0]  ;;  %v3908_v18 = vld [vmem:[%s6658_s7 + $0x158] sm:$0xf] }
  0xf5   : > { %v6131_v21 = vadd.f32 %v1020_v2, %v5625_v29  ;;  %2727 = vmatpush.bf16.msra.mxu3 %v4065_v30  ;;  %v4030_v29 = vld [vmem:[%s6658_s7 + $0x270] sm:$0xf0]  ;;  %2670 = vmatpush.bf16.msra.mxu0 %v3805_v4  ;;  %v3745_v49 = vor.u32 %v4378_v33, %v3742_v34  ;;  %v4001_v53 = vor.u32 %v4442_v50, %v3998_v3  ;;  %v4427_v33 = vld [vmem:[%s6658_s7 + $0x19c] sm:$0xf]  ;;  %v4423_v19 = vld [vmem:[%s6658_s7 + $0x174] sm:$0xf0] }
  0xf6   : > { %v4033_v20 = vor.u32 %v4450_v17, %v4030_v29  ;;  %v3741_v13 = vor.u32 %v4382_v61, %v3740_v58  ;;  %v4435_v17 = vld [vmem:[%s6658_s7 + $0x1dc] sm:$0xf]  ;;  %v3940_v58 = vld [vmem:[%s6658_s7 + $0x198] sm:$0xf] }
  0xf7   : > { %2689 = vmatpush.bf16.msra.mxu1 %v4061_v22  ;;  %v3996_v22 = vld [vmem:[%s6658_s7 + $0x210] sm:$0xf]  ;;  %v4230_v29 = vld [vmem:[%s6658_s7 + $0x3f8] sm:$0xf0]  ;;  %v4431_v61 = vld [vmem:[%s6658_s7 + $0x1b4] sm:$0xf0] }
  0xf8   : > { %2709 = vmatpush.bf16.msra.mxu2 %v3777_v28  ;;  %v3974_v28 = vld [vmem:[%s6658_s7 + $0x1f8] sm:$0xf0] }
  0xf9   : > { %2728 = vmatpush.bf16.msra.mxu3 %v4033_v20  ;;  %2671 = vmatpush.bf16.msra.mxu0 %v3773_v1  ;;  %v4503_v1 = vld [vmem:[%s6658_s7 + $0x3f4] sm:$0xf0]  ;;  %v3942_v34 = vld [vmem:[%s6658_s7 + $0x1b8] sm:$0xf0] }
  0xfa   : > { %v1039_v35 = vpop.f32.mrf.mxu2  ;;  %v4491_v50 = vld [vmem:[%s6658_s7 + $0x39c] sm:$0xf] }
  0xfb   : > { %v1058_v38 = vpop.f32.mrf.mxu3  ;;  %v6176_v12 = vadd.f32 %v1039_v35, %v5666_v54  ;;  %v1070_v30 = vpop.f32.mrf.mxu0  ;;  %2690 = vmatpush.bf16.msra.mxu1 %v4029_v26  ;;  %v4229_v26 = vor.u32 %v4503_v1, %v4228_v56  ;;  %v4198_v3 = vld [vmem:[%s6658_s7 + $0x3b8] sm:$0xf0]  ;;  %v4164_v56 = vld [vmem:[%s6658_s7 + $0x358] sm:$0xf] }
  0xfc   : > { %v6179_v2 = vadd.f32 %v1058_v38, %v5668_v55  ;;  %v1089_v4 = vpop.f32.mrf.mxu1  ;;  %v6188_v60 = vadd.f32 %v1070_v30, %v5679_v63  ;;  %v3997_v55 = vor.u32 %v4446_v59, %v3996_v22  ;;  %2710 = vmatpush.bf16.msra.mxu2 %v3745_v49  ;;  %v4499_v63 = vld [vmem:[%s6658_s7 + $0x3dc] sm:$0xf]  ;;  %v3945_v49 = vor.u32 %v4427_v33, %v3942_v34  ;;  %v4487_v1 = vld [vmem:[%s6658_s7 + $0x374] sm:$0xf0] }
  0xfd   : > { %v6191_v54 = vadd.f32 %v1089_v4, %v5681_v0  ;;  %2729 = vmatpush.bf16.msra.mxu3 %v4001_v53  ;;  %v3977_v0 = vor.u32 %v4435_v17, %v3974_v28  ;;  %v4233_v20 = vor.u32 %v4499_v63, %v4230_v29  ;;  %2672 = vmatpush.bf16.msra.mxu0 %v3741_v13  ;;  %v4495_v17 = vld [vmem:[%s6658_s7 + $0x3b4] sm:$0xf0]  ;;  %v4419_v63 = vld [vmem:[%s6658_s7 + $0x15c] sm:$0xf] }
  0xfe   : > { %2597 = vmatmul.bf16.vlgmr.msrb.gmra.mxu0 %v5912_v41  ;;  %2616 = vmatmul.bf16.vlgmr.msrb.gmra.mxu1 %v5914_v48  ;;  %v4201_v22 = vor.u32 %v4491_v50, %v4198_v3  ;;  %v3941_v59 = vor.u32 %v4431_v61, %v3940_v58  ;;  %v4483_v29 = vld [vmem:[%s6658_s7 + $0x35c] sm:$0xf]  ;;  %v3876_v58 = vld [vmem:[%s6658_s7 + $0x118] sm:$0xf] }
  0xff   : > { %2635 = vmatmul.bf16.vlgmr.msrb.gmra.mxu2 %v5912_v41  ;;  %2691 = vmatpush.bf16.msra.mxu1 %v3997_v55  ;;  %v4196_v55 = vld [vmem:[%s6658_s7 + $0x398] sm:$0xf]  ;;  %v4411_v33 = vld [vmem:[%s6658_s7 + $0x11c] sm:$0xf] }
 0x100   : > { %2654 = vmatmul.bf16.vlgmr.msrb.gmra.mxu3 %v5914_v48  ;;  %2779 = vmatpush.bf16.msrb.mxu2 %v3977_v0  ;;  %v3910_v0 = vld [vmem:[%s6658_s7 + $0x178] sm:$0xf0]  ;;  %v4415_v61 = vld [vmem:[%s6658_s7 + $0x134] sm:$0xf0] }
 0x101   : > { %2798 = vmatpush.bf16.msrb.mxu3 %v4233_v20  ;;  %2741 = vmatpush.bf16.msrb.mxu0 %v3973_v23  ;;  %v3909_v23 = vor.u32 %v4423_v19, %v3908_v18  ;;  %v3878_v34 = vld [vmem:[%s6658_s7 + $0x138] sm:$0xf0]  ;;  %v3844_v18 = vld [vmem:[%s6658_s7 + $0xd8] sm:$0xf] }
 0x102   : > { %v1108_v35 = vpop.f32.mrf.mxu2  ;;  %v4475_v50 = vld [vmem:[%s6658_s7 + $0x31c] sm:$0xf]  ;;  %v4407_v19 = vld [vmem:[%s6658_s7 + $0xf4] sm:$0xf0] }
 0x103   : > { %v1127_v38 = vpop.f32.mrf.mxu3  ;;  %2760 = vmatpush.bf16.msrb.mxu1 %v4229_v26  ;;  %v6240_v30 = vadd.f32 %v1108_v35, %v5726_v27  ;;  %v1072_v53 = vpop.f32.mrf.mxu0  ;;  %v4165_v26 = vor.u32 %v4487_v1, %v4164_v56  ;;  %v4134_v3 = vld [vmem:[%s6658_s7 + $0x338] sm:$0xf0]  ;;  %v4471_v56 = vld [vmem:[%s6658_s7 + $0x2f4] sm:$0xf0]  ;;  %v3845_v1 = vor.u32 %v4407_v19, %v3844_v18 }
 0x104   : > { %v6243_v4 = vadd.f32 %v1127_v38, %v5728_v32  ;;  %v1091_v13 = vpop.f32.mrf.mxu1  ;;  %v6252_v28 = vadd.f32 %v1072_v53, %v5739_v36  ;;  %v4197_v32 = vor.u32 %v4495_v17, %v4196_v55  ;;  %2780 = vmatpush.bf16.msrb.mxu2 %v3945_v49  ;;  %v3913_v36 = vor.u32 %v4419_v63, %v3910_v0  ;;  %v4132_v17 = vld [vmem:[%s6658_s7 + $0x318] sm:$0xf] }
 0x105   : > { %v6255_v27 = vadd.f32 %v1091_v13, %v5741_v37  ;;  %2799 = vmatpush.bf16.msrb.mxu3 %v4201_v22  ;;  %v4166_v37 = vld [vmem:[%s6658_s7 + $0x378] sm:$0xf0]  ;;  %2742 = vmatpush.bf16.msrb.mxu0 %v3941_v59  ;;  %v3881_v49 = vor.u32 %v4411_v33, %v3878_v34  ;;  %v4137_v55 = vor.u32 %v4475_v50, %v4134_v3  ;;  %v3780_v18 = vld [vmem:[%s6658_s7 + $0x58] sm:$0xf] }
 0x106   : > { %v4169_v20 = vor.u32 %v4483_v29, %v4166_v37  ;;  %v3877_v0 = vor.u32 %v4415_v61, %v3876_v58  ;;  %v4403_v29 = vld [vmem:[%s6658_s7 + $0xdc] sm:$0xf]  ;;  %v3812_v58 = vld [vmem:[%s6658_s7 + $0x98] sm:$0xf] }
 0x107   : > { %2761 = vmatpush.bf16.msrb.mxu1 %v4197_v32  ;;  %v4479_v32 = vld [vmem:[%s6658_s7 + $0x334] sm:$0xf0]  ;;  %v4102_v37 = vld [vmem:[%s6658_s7 + $0x2f8] sm:$0xf0] }
 0x108   : > { %2781 = vmatpush.bf16.msrb.mxu2 %v3913_v36  ;;  %v3846_v36 = vld [vmem:[%s6658_s7 + $0xf8] sm:$0xf0]  ;;  %v4399_v61 = vld [vmem:[%s6658_s7 + $0xb4] sm:$0xf0] }
 0x109   : > { %2800 = vmatpush.bf16.msrb.mxu3 %v4169_v20  ;;  %2743 = vmatpush.bf16.msrb.mxu0 %v3909_v23  ;;  %v4100_v23 = vld [vmem:[%s6658_s7 + $0x2d8] sm:$0xf]  ;;  %v4395_v33 = vld [vmem:[%s6658_s7 + $0x9c] sm:$0xf] }
 0x10a   : > { %v1110_v35 = vpop.f32.mrf.mxu2  ;;  %v3814_v34 = vld [vmem:[%s6658_s7 + $0xb8] sm:$0xf0]  ;;  %v4391_v19 = vld [vmem:[%s6658_s7 + $0x74] sm:$0xf0] }
 0x10b   : > { %v1129_v38 = vpop.f32.mrf.mxu3  ;;  %2762 = vmatpush.bf16.msrb.mxu1 %v4165_v26  ;;  %v6300_v53 = vadd.f32 %v1110_v35, %v5782_v8  ;;  %v1075_v22 = vpop.f32.mrf.mxu0  ;;  %v4101_v26 = vor.u32 %v4471_v56, %v4100_v23  ;;  %v4459_v50 = vld [vmem:[%s6658_s7 + $0x29c] sm:$0xf]  ;;  %v4036_v23 = vld [vmem:[%s6658_s7 + $0x258] sm:$0xf] }
 0x10c   : > { %v6303_v13 = vadd.f32 %v1129_v38, %v5784_v9  ;;  %v1094_v59 = vpop.f32.mrf.mxu1  ;;  %v6312_v63 = vadd.f32 %v1075_v22, %v5795_v14  ;;  %v4133_v9 = vor.u32 %v4479_v32, %v4132_v17  ;;  %2782 = vmatpush.bf16.msrb.mxu2 %v3881_v49  ;;  %v4467_v14 = vld [vmem:[%s6658_s7 + $0x2dc] sm:$0xf]  ;;  %v3817_v49 = vor.u32 %v4395_v33, %v3814_v34  ;;  %v4455_v56 = vld [vmem:[%s6658_s7 + $0x274] sm:$0xf0] }
 0x10d   : > { %v6315_v8 = vadd.f32 %v1094_v59, %v5797_v15  ;;  %2801 = vmatpush.bf16.msrb.mxu3 %v4137_v55  ;;  %v3849_v15 = vor.u32 %v4403_v29, %v3846_v36  ;;  %v4105_v20 = vor.u32 %v4467_v14, %v4102_v37  ;;  %2744 = vmatpush.bf16.msrb.mxu0 %v3877_v0  ;;  %v4070_v3 = vld [vmem:[%s6658_s7 + $0x2b8] sm:$0xf0]  ;;  %v4463_v29 = vld [vmem:[%s6658_s7 + $0x2b4] sm:$0xf0] }
 0x10e   : > { %2602 = vmatmul.bf16.gmra.mxu0 %v6038_v42  ;;  %2621 = vmatmul.bf16.gmra.mxu1 %v6040_v44  ;;  %v4073_v32 = vor.u32 %v4459_v50, %v4070_v3  ;;  %v3813_v0 = vor.u32 %v4399_v61, %v3812_v58  ;;  %v4387_v14 = vld [vmem:[%s6658_s7 + $0x5c] sm:$0xf]  ;;  %v3748_v58 = vld [vmem:[%s6658_s7 + $0x18] sm:$0xf] }
 0x10f   : > { %2640 = vmatmul.bf16.gmra.mxu2 %v6038_v42  ;;  %2763 = vmatpush.bf16.msrb.mxu1 %v4133_v9  ;;  %v4068_v9 = vld [vmem:[%s6658_s7 + $0x298] sm:$0xf]  ;;  %v4451_v37 = vld [vmem:[%s6658_s7 + $0x25c] sm:$0xf] }
 0x110   : > { %2659 = vmatmul.bf16.gmra.mxu3 %v6040_v44  ;;  %2783 = vmatpush.bf16.msrb.mxu2 %v3849_v15  ;;  %v3782_v15 = vld [vmem:[%s6658_s7 + $0x78] sm:$0xf0]  ;;  %v4383_v61 = vld [vmem:[%s6658_s7 + $0x34] sm:$0xf0] }
 0x111   : > { %2802 = vmatpush.bf16.msrb.mxu3 %v4105_v20  ;;  %2745 = vmatpush.bf16.msrb.mxu0 %v3845_v1  ;;  %v3781_v1 = vor.u32 %v4391_v19, %v3780_v18  ;;  %v4379_v33 = vld [vmem:[%s6658_s7 + $0x1c] sm:$0xf] }
 0x112   : > { %v1113_v35 = vpop.f32.mrf.mxu2  ;;  %v3750_v34 = vld [vmem:[%s6658_s7 + $0x38] sm:$0xf0] }
 0x113   : > { %v1132_v38 = vpop.f32.mrf.mxu3  ;;  %v6364_v22 = vadd.f32 %v1113_v35, %v5843_v45  ;;  %v1077_v55 = vpop.f32.mrf.mxu0  ;;  %2764 = vmatpush.bf16.msrb.mxu1 %v4101_v26  ;;  %v4037_v26 = vor.u32 %v4455_v56, %v4036_v23  ;;  %v4443_v50 = vld [vmem:[%s6658_s7 + $0x21c] sm:$0xf] }
 0x114   : > { %v6367_v59 = vadd.f32 %v1132_v38, %v5845_v46  ;;  %v1096_v17 = vpop.f32.mrf.mxu1  ;;  %v6376_v36 = vadd.f32 %v1077_v55, %v5861_v51  ;;  %v4069_v46 = vor.u32 %v4463_v29, %v4068_v9  ;;  %2784 = vmatpush.bf16.msrb.mxu2 %v3817_v49  ;;  %v3785_v51 = vor.u32 %v4387_v14, %v3782_v15  ;;  %v4006_v3 = vld [vmem:[%s6658_s7 + $0x238] sm:$0xf0]  ;;  %v4447_v14 = vld [vmem:[%s6658_s7 + $0x234] sm:$0xf0] }
 0x115   : > { %v6379_v45 = vadd.f32 %v1096_v17, %v5863_v57  ;;  %2803 = vmatpush.bf16.msrb.mxu3 %v4073_v32  ;;  %v4038_v57 = vld [vmem:[%s6658_s7 + $0x278] sm:$0xf0]  ;;  %2746 = vmatpush.bf16.msrb.mxu0 %v3813_v0  ;;  %v3753_v49 = vor.u32 %v4379_v33, %v3750_v34  ;;  %v4009_v9 = vor.u32 %v4443_v50, %v4006_v3 }
 0x116   : > { %v4041_v20 = vor.u32 %v4451_v37, %v4038_v57  ;;  %v3749_v29 = vor.u32 %v4383_v61, %v3748_v58 }
 0x117   : > { %2765 = vmatpush.bf16.msrb.mxu1 %v4069_v46  ;;  %v4004_v46 = vld [vmem:[%s6658_s7 + $0x218] sm:$0xf] }
 0x118   : > { %2785 = vmatpush.bf16.msrb.mxu2 %v3785_v51 }
 0x119   : > { %2804 = vmatpush.bf16.msrb.mxu3 %v4041_v20  ;;  %2747 = vmatpush.bf16.msrb.mxu0 %v3781_v1 }
 0x11a   : > { %v1115_v35 = vpop.f32.mrf.mxu2 }
 0x11b   : > { %v1134_v38 = vpop.f32.mrf.mxu3  ;;  %v6424_v55 = vadd.f32 %v1115_v35, %v5908_v39  ;;  %v1546_v32 = vpop.f32.mrf.mxu0  ;;  %2766 = vmatpush.bf16.msrb.mxu1 %v4037_v26 }
 0x11c   : > { %v6427_v17 = vadd.f32 %v1134_v38, %v5910_v40  ;;  %v1565_v0 = vpop.f32.mrf.mxu1  ;;  %v6436_v15 = vadd.f32 %v1546_v32, %v5932_v6  ;;  %v4005_v40 = vor.u32 %v4447_v14, %v4004_v46  ;;  %2786 = vmatpush.bf16.msrb.mxu2 %v3753_v49 }
 0x11d   : > { %v6439_v39 = vadd.f32 %v1565_v0, %v5935_v7  ;;  %2805 = vmatpush.bf16.msrb.mxu3 %v4009_v9  ;;  %2748 = vmatpush.bf16.msrb.mxu0 %v3749_v29 }
 0x11e   : > { %2673 = vmatmul.bf16.vlgmr.msra.gmra.mxu0 %v5912_v41  ;;  %2692 = vmatmul.bf16.vlgmr.msra.gmra.mxu1 %v5914_v48 }
 0x11f   : > { %2711 = vmatmul.bf16.vlgmr.msra.gmra.mxu2 %v5912_v41  ;;  %2767 = vmatpush.bf16.msrb.mxu1 %v4005_v40 }
 0x120   : > { %2730 = vmatmul.bf16.vlgmr.msra.gmra.mxu3 %v5914_v48 }
 0x122   : > { %v1584_v6 = vpop.f32.mrf.mxu2 }
 0x123   : > { %v1603_v37 = vpop.f32.mrf.mxu3  ;;  %v6446_v7 = vadd.f32 %v1584_v6, %v5984_v47  ;;  %v1548_v57 = vpop.f32.mrf.mxu0 }
 0x124   : > { %v6449_v51 = vadd.f32 %v1603_v37, %v5987_v43  ;;  %v1567_v18 = vpop.f32.mrf.mxu1  ;;  %v6452_v19 = vadd.f32 %v1548_v57, %v5996_v10 }
 0x125   : > { %v6455_v20 = vadd.f32 %v1567_v18, %v5999_v24 }
 0x12a   : > { %v1586_v23 = vpop.f32.mrf.mxu2 }
 0x12b   : > { %v1605_v56 = vpop.f32.mrf.mxu3  ;;  %v6458_v1 = vadd.f32 %v1586_v23, %v6052_v62  ;;  %v1551_v47 = vpop.f32.mrf.mxu0 }
 0x12c   : > { %v6461_v26 = vadd.f32 %v1605_v56, %v6055_v5  ;;  %v1570_v33 = vpop.f32.mrf.mxu1  ;;  %v6464_v43 = vadd.f32 %v1551_v47, %v6064_v31 }
 0x12d   : > { %v6467_v34 = vadd.f32 %v1570_v33, %v6067_v52 }
 0x12e   : > { %2678 = vmatmul.bf16.gmra.mxu0 %v6038_v42  ;;  %2697 = vmatmul.bf16.gmra.mxu1 %v6040_v44 }
 0x12f   : > { %2716 = vmatmul.bf16.gmra.mxu2 %v6038_v42 }
 0x130   : > { %2735 = vmatmul.bf16.gmra.mxu3 %v6040_v44 }
 0x132   : > { %v1589_v10 = vpop.f32.mrf.mxu2 }
 0x133   : > { %v1608_v24 = vpop.f32.mrf.mxu3  ;;  %v6474_v62 = vadd.f32 %v1589_v10, %v6116_v25  ;;  %v1553_v31 = vpop.f32.mrf.mxu0 }
 0x134   : > { %v6477_v5 = vadd.f32 %v1608_v24, %v6119_v11  ;;  %v1572_v50 = vpop.f32.mrf.mxu1  ;;  %v6480_v52 = vadd.f32 %v1553_v31, %v6128_v16 }
 0x135   : > { %v6483_v35 = vadd.f32 %v1572_v50, %v6131_v21 }
 0x13a   : > { %v1591_v38 = vpop.f32.mrf.mxu2 }
 0x13b   : > { %v1610_v49 = vpop.f32.mrf.mxu3  ;;  %v6486_v3 = vadd.f32 %v1591_v38, %v6176_v12  ;;  %v1622_v25 = vpop.f32.mrf.mxu0 }
 0x13c   : > { %v6489_v58 = vadd.f32 %v1610_v49, %v6179_v2  ;;  %v1641_v61 = vpop.f32.mrf.mxu1  ;;  %v6492_v11 = vadd.f32 %v1622_v25, %v6188_v60 }
 0x13d   : > { %v6495_v32 = vadd.f32 %v1641_v61, %v6191_v54 }
 0x13e   : > { %2749 = vmatmul.bf16.vlgmr.msrb.gmra.mxu0 %v5912_v41  ;;  %2768 = vmatmul.bf16.vlgmr.msrb.gmra.mxu1 %v5914_v48 }
 0x13f   : > { %2787 = vmatmul.bf16.vlgmr.msrb.gmra.mxu2 %v5912_v41 }
 0x140   : > { %2806 = vmatmul.bf16.vlgmr.msrb.gmra.mxu3 %v5914_v48 }
 0x142   : > { %v1660_v16 = vpop.f32.mrf.mxu2 }
 0x143   : > { %v1679_v21 = vpop.f32.mrf.mxu3  ;;  %v6502_v12 = vadd.f32 %v1660_v16, %v6240_v30  ;;  %v1624_v60 = vpop.f32.mrf.mxu0 }
 0x144   : > { %v6505_v2 = vadd.f32 %v1679_v21, %v6243_v4  ;;  %v1643_v0 = vpop.f32.mrf.mxu1  ;;  %v6508_v54 = vadd.f32 %v1624_v60, %v6252_v28 }
 0x145   : > { %v6511_v9 = vadd.f32 %v1643_v0, %v6255_v27 }
 0x14a   : > { %v1662_v29 = vpop.f32.mrf.mxu2 }
 0x14b   : > { %v1681_v41 = vpop.f32.mrf.mxu3  ;;  %v6514_v48 = vadd.f32 %v1662_v29, %v6300_v53  ;;  %v1627_v30 = vpop.f32.mrf.mxu0 }
 0x14c   : > { %v6517_v46 = vadd.f32 %v1681_v41, %v6303_v13  ;;  %v1646_v14 = vpop.f32.mrf.mxu1  ;;  %v6520_v4 = vadd.f32 %v1627_v30, %v6312_v63 }
 0x14d   : > { %v6523_v40 = vadd.f32 %v1646_v14, %v6315_v8 }
 0x14e   : > { %2754 = vmatmul.bf16.gmra.mxu0 %v6038_v42  ;;  %2773 = vmatmul.bf16.gmra.mxu1 %v6040_v44 }
 0x14f   : > { %2792 = vmatmul.bf16.gmra.mxu2 %v6038_v42  ;;  %v6544_v42 = vld [vmem:[%s6659_s8] sm:$0xff] }
 0x150   : > { %2811 = vmatmul.bf16.gmra.mxu3 %v6040_v44  ;;  %v2851_v56 = vperm.slane %v6544_v42, 0  ;;  %v6561_v24 = vperm.slane %v6544_v42, 1 }
 0x152   : > { %v1665_v28 = vpop.f32.mrf.mxu2 }
 0x153   : > { %v1684_v27 = vpop.f32.mrf.mxu3  ;;  %v6530_v53 = vadd.f32 %v1665_v28, %v6364_v22  ;;  %v1629_v63 = vpop.f32.mrf.mxu0 }
 0x154   : > { %v6533_v13 = vadd.f32 %v1684_v27, %v6367_v59  ;;  %v1648_v8 = vpop.f32.mrf.mxu1  ;;  %v6536_v6 = vadd.f32 %v1629_v63, %v6376_v36 }
 0x155   : > { %v6539_v37 = vadd.f32 %v1648_v8, %v6379_v45 }
 0x15a   : > { %v1667_v44 = vpop.f32.mrf.mxu2 }
 0x15b   : > { %v1686_v22 = vpop.f32.mrf.mxu3  ;;  %v6547_v57 = vadd.f32 %v1667_v44, %v6424_v55  ;;  %v2522_v18 = vpop.f32.mrf.mxu0 }
 0x15c   : > { %v6550_v59 = vadd.f32 %v1686_v22, %v6427_v17  ;;  %v2541_v23 = vpop.f32.mrf.mxu1 }
 0x15d   : > { %v2542_v36 = vadd.f32 %v2541_v23, %v2522_v18 }
 0x15f   : > { %v2817_v45 = vadd.f32 %v2542_v36, %v6436_v15 }
 0x161   : > { %v2867_v47 = vadd.f32 %v2851_v56, %v2817_v45 }
 0x162   : > { %v2560_v33 = vpop.f32.mrf.mxu2 }
 0x163   : > { %vm2899_vm1 = vcmp.gt.f32.partialorder %v2867_v47, 0.0  ;;  %v2931_v55 = vmul.f32 0.2, %v2867_v47  ;;  %v2579_v17 = vpop.f32.mrf.mxu3  ;;  %v2524_v31 = vpop.f32.mrf.mxu0 }
 0x164   : > { %v2580_v10 = vadd.f32 %v2579_v17, %v2560_v33  ;;  %v2543_v50 = vpop.f32.mrf.mxu1 }
 0x165   : > { %v2963_v38 = vsel %vm2899_vm1, %v2867_v47, %v2931_v55  ;;  %v2544_v15 = vadd.f32 %v2543_v50, %v2524_v31 }
 0x166   : > { %2995 = vst [vmem:[%s6558_s27] sm:$0xff] %v2963_v38  ;;  %v2818_v49 = vadd.f32 %v2580_v10, %v6439_v39 }
 0x167   : > { %v2825_v25 = vadd.f32 %v2544_v15, %v6452_v19 }
 0x168   : > { %v2868_v61 = vadd.f32 %v6561_v24, %v2818_v49 }
 0x169   : > { %v2875_v16 = vadd.f32 %v2851_v56, %v2825_v25 }
 0x16a   : > { %vm2900_vm2 = vcmp.gt.f32.partialorder %v2868_v61, 0.0  ;;  %v2932_v21 = vmul.f32 0.2, %v2868_v61  ;;  %v2562_v0 = vpop.f32.mrf.mxu2 }
 0x16b   : > { %vm2907_vm3 = vcmp.gt.f32.partialorder %v2875_v16, 0.0  ;;  %v2939_v60 = vmul.f32 0.2, %v2875_v16  ;;  %v2581_v29 = vpop.f32.mrf.mxu3  ;;  %v2527_v14 = vpop.f32.mrf.mxu0 }
 0x16c   : > { %v2964_v41 = vsel %vm2900_vm2, %v2868_v61, %v2932_v21  ;;  %v2582_v30 = vadd.f32 %v2581_v29, %v2562_v0  ;;  %v2546_v28 = vpop.f32.mrf.mxu1 }
 0x16d   : > { %2996 = vst [vmem:[%s6558_s27 + $0x8] sm:$0xff] %v2964_v41  ;;  %v2971_v27 = vsel %vm2907_vm3, %v2875_v16, %v2939_v60  ;;  %v2547_v63 = vadd.f32 %v2546_v28, %v2527_v14 }
 0x16e   : > { %3003 = vst [vmem:[%s6558_s27 + $0x40] sm:$0xff] %v2971_v27  ;;  %v2826_v39 = vadd.f32 %v2582_v30, %v6455_v20 }
 0x16f   : > { %v2833_v19 = vadd.f32 %v2547_v63, %v6464_v43 }
 0x170   : > { %v2876_v8 = vadd.f32 %v6561_v24, %v2826_v39 }
 0x171   : > { %v2883_v44 = vadd.f32 %v2851_v56, %v2833_v19 }
 0x172   : > { %vm2908_vm4 = vcmp.gt.f32.partialorder %v2876_v8, 0.0  ;;  %v2940_v22 = vmul.f32 0.2, %v2876_v8  ;;  %v2565_v23 = vpop.f32.mrf.mxu2 }
 0x173   : > { %vm2915_vm5 = vcmp.gt.f32.partialorder %v2883_v44, 0.0  ;;  %v2947_v18 = vmul.f32 0.2, %v2883_v44  ;;  %v2584_v36 = vpop.f32.mrf.mxu3  ;;  %v2529_v55 = vpop.f32.mrf.mxu0 }
 0x174   : > { %v2972_v45 = vsel %vm2908_vm4, %v2876_v8, %v2940_v22  ;;  %v2585_v47 = vadd.f32 %v2584_v36, %v2565_v23  ;;  %v2548_v33 = vpop.f32.mrf.mxu1  ;;  %v6584_v8 = vperm.slane %v6544_v42, 3 }
 0x175   : > { %3004 = vst [vmem:[%s6558_s27 + $0x48] sm:$0xff] %v2972_v45  ;;  %v2979_v17 = vsel %vm2915_vm5, %v2883_v44, %v2947_v18  ;;  %v2549_v10 = vadd.f32 %v2548_v33, %v2529_v55 }
 0x176   : > { %3011 = vst [vmem:[%s6558_s27 + $0x80] sm:$0xff] %v2979_v17  ;;  %v2834_v20 = vadd.f32 %v2585_v47, %v6467_v34  ;;  %v2853_v34 = vperm.slane %v6544_v42, 2 }
 0x177   : > { %v2841_v43 = vadd.f32 %v2549_v10, %v6480_v52 }
 0x178   : > { %v2884_v31 = vadd.f32 %v6561_v24, %v2834_v20 }
 0x179   : > { %v2891_v50 = vadd.f32 %v2851_v56, %v2841_v43 }
 0x17a   : > { %vm2916_vm6 = vcmp.gt.f32.partialorder %v2884_v31, 0.0  ;;  %v2948_v38 = vmul.f32 0.2, %v2884_v31  ;;  %v2567_v49 = vpop.f32.mrf.mxu2 }
 0x17b   : > { %vm2923_vm7 = vcmp.gt.f32.partialorder %v2891_v50, 0.0  ;;  %v2955_v15 = vmul.f32 0.2, %v2891_v50  ;;  %v2586_v25 = vpop.f32.mrf.mxu3  ;;  %v2598_v21 = vpop.f32.mrf.mxu0 }
 0x17c   : > { %v2980_v61 = vsel %vm2916_vm6, %v2884_v31, %v2948_v38  ;;  %v2587_v16 = vadd.f32 %v2586_v25, %v2567_v49  ;;  %v2617_v60 = vpop.f32.mrf.mxu1 }
 0x17d   : > { %3012 = vst [vmem:[%s6558_s27 + $0x88] sm:$0xff] %v2980_v61  ;;  %v2987_v0 = vsel %vm2923_vm7, %v2891_v50, %v2955_v15  ;;  %v2618_v29 = vadd.f32 %v2617_v60, %v2598_v21 }
 0x17e   : > { %3019 = vst [vmem:[%s6558_s27 + $0xc0] sm:$0xff] %v2987_v0  ;;  %v2842_v52 = vadd.f32 %v2587_v16, %v6483_v35 }
 0x17f   : > { %v2819_v56 = vadd.f32 %v2618_v29, %v6446_v7 }
 0x180   : > { %v2892_v41 = vadd.f32 %v6561_v24, %v2842_v52 }
 0x181   : > { %v2869_v30 = vadd.f32 %v2853_v34, %v2819_v56 }
 0x182   : > { %vm2924_vm8 = vcmp.gt.f32.partialorder %v2892_v41, 0.0  ;;  %v2956_v14 = vmul.f32 0.2, %v2892_v41  ;;  %v2636_v27 = vpop.f32.mrf.mxu2 }
 0x183   : > { %vm2901_vm9 = vcmp.gt.f32.partialorder %v2869_v30, 0.0  ;;  %v2933_v28 = vmul.f32 0.2, %v2869_v30  ;;  %v2655_v63 = vpop.f32.mrf.mxu3  ;;  %v2600_v44 = vpop.f32.mrf.mxu0 }
 0x184   : > { %v2988_v39 = vsel %vm2924_vm8, %v2892_v41, %v2956_v14  ;;  %v2656_v19 = vadd.f32 %v2655_v63, %v2636_v27  ;;  %v2619_v22 = vpop.f32.mrf.mxu1 }
 0x185   : > { %3020 = vst [vmem:[%s6558_s27 + $0xc8] sm:$0xff] %v2988_v39  ;;  %v2965_v35 = vsel %vm2901_vm9, %v2869_v30, %v2933_v28  ;;  %v2620_v7 = vadd.f32 %v2619_v22, %v2600_v44 }
 0x186   : > { %2997 = vst [vmem:[%s6558_s27 + $0x10] sm:$0xff] %v2965_v35  ;;  %v2820_v24 = vadd.f32 %v2656_v19, %v6449_v51 }
 0x187   : > { %v2827_v18 = vadd.f32 %v2620_v7, %v6458_v1 }
 0x188   : > { %v2870_v23 = vadd.f32 %v6584_v8, %v2820_v24 }
 0x189   : > { %v2877_v36 = vadd.f32 %v2853_v34, %v2827_v18 }
 0x18a   : > { %vm2902_vm10 = vcmp.gt.f32.partialorder %v2870_v23, 0.0  ;;  %v2934_v45 = vmul.f32 0.2, %v2870_v23  ;;  %v2638_v55 = vpop.f32.mrf.mxu2 }
 0x18b   : > { %vm2909_vm11 = vcmp.gt.f32.partialorder %v2877_v36, 0.0  ;;  %v2941_v47 = vmul.f32 0.2, %v2877_v36  ;;  %v2657_v33 = vpop.f32.mrf.mxu3  ;;  %v2603_v20 = vpop.f32.mrf.mxu0 }
 0x18c   : > { %v2966_v17 = vsel %vm2902_vm10, %v2870_v23, %v2934_v45  ;;  %v2658_v10 = vadd.f32 %v2657_v33, %v2638_v55  ;;  %v2622_v43 = vpop.f32.mrf.mxu1 }
 0x18d   : > { %2998 = vst [vmem:[%s6558_s27 + $0x18] sm:$0xff] %v2966_v17  ;;  %v2973_v31 = vsel %vm2909_vm11, %v2877_v36, %v2941_v47  ;;  %v2623_v50 = vadd.f32 %v2622_v43, %v2603_v20  ;;  %v6608_v17 = vperm.slane %v6544_v42, 5 }
 0x18e   : > { %3005 = vst [vmem:[%s6558_s27 + $0x50] sm:$0xff] %v2973_v31  ;;  %v2828_v51 = vadd.f32 %v2658_v10, %v6461_v26 }
 0x18f   : > { %v2835_v1 = vadd.f32 %v2623_v50, %v6474_v62 }
 0x190   : > { %v2878_v38 = vadd.f32 %v6584_v8, %v2828_v51 }
 0x191   : > { %v2885_v15 = vadd.f32 %v2853_v34, %v2835_v1 }
 0x192   : > { %vm2910_vm12 = vcmp.gt.f32.partialorder %v2878_v38, 0.0  ;;  %v2942_v49 = vmul.f32 0.2, %v2878_v38  ;;  %v2641_v61 = vpop.f32.mrf.mxu2 }
 0x193   : > { %vm2917_vm13 = vcmp.gt.f32.partialorder %v2885_v15, 0.0  ;;  %v2949_v25 = vmul.f32 0.2, %v2885_v15  ;;  %v2660_v16 = vpop.f32.mrf.mxu3  ;;  %v2605_v0 = vpop.f32.mrf.mxu0 }
 0x194   : > { %v2974_v21 = vsel %vm2910_vm12, %v2878_v38, %v2942_v49  ;;  %v2661_v60 = vadd.f32 %v2660_v16, %v2641_v61  ;;  %v2624_v29 = vpop.f32.mrf.mxu1 }
 0x195   : > { %3006 = vst [vmem:[%s6558_s27 + $0x58] sm:$0xff] %v2974_v21  ;;  %v2981_v52 = vsel %vm2917_vm13, %v2885_v15, %v2949_v25  ;;  %v2625_v56 = vadd.f32 %v2624_v29, %v2605_v0 }
 0x196   : > { %3013 = vst [vmem:[%s6558_s27 + $0x90] sm:$0xff] %v2981_v52  ;;  %v2836_v26 = vadd.f32 %v2661_v60, %v6477_v5  ;;  %v2855_v5 = vperm.slane %v6544_v42, 4 }
 0x197   : > { %v2843_v62 = vadd.f32 %v2625_v56, %v6486_v3 }
 0x198   : > { %v2886_v41 = vadd.f32 %v6584_v8, %v2836_v26 }
 0x199   : > { %v2893_v30 = vadd.f32 %v2853_v34, %v2843_v62 }
 0x19a   : > { %vm2918_vm14 = vcmp.gt.f32.partialorder %v2886_v41, 0.0  ;;  %v2950_v14 = vmul.f32 0.2, %v2886_v41  ;;  %v2643_v27 = vpop.f32.mrf.mxu2 }
 0x19b   : > { %vm2925_vm15 = vcmp.gt.f32.partialorder %v2893_v30, 0.0  ;;  %v2957_v28 = vmul.f32 0.2, %v2893_v30  ;;  %v2662_v63 = vpop.f32.mrf.mxu3  ;;  %v2674_v44 = vpop.f32.mrf.mxu0 }
 0x19c   : > { %v2982_v39 = vsel %vm2918_vm14, %v2886_v41, %v2950_v14  ;;  %v2663_v19 = vadd.f32 %v2662_v63, %v2643_v27  ;;  %v2693_v22 = vpop.f32.mrf.mxu1 }
 0x19d   : > { %3014 = vst [vmem:[%s6558_s27 + $0x98] sm:$0xff] %v2982_v39  ;;  %v2989_v35 = vsel %vm2925_vm15, %v2893_v30, %v2957_v28  ;;  %v2694_v7 = vadd.f32 %v2693_v22, %v2674_v44 }
 0x19e   : > { %3021 = vst [vmem:[%s6558_s27 + $0xd0] sm:$0xff] %v2989_v35  ;;  %v2844_v3 = vadd.f32 %v2663_v19, %v6489_v58 }
 0x19f   : > { %v2821_v34 = vadd.f32 %v2694_v7, %v6492_v11 }
 0x1a0   : > { %v2894_v24 = vadd.f32 %v6584_v8, %v2844_v3 }
 0x1a1   : > { %v2871_v18 = vadd.f32 %v2855_v5, %v2821_v34 }
 0x1a2   : > { %vm2926_vm0 = vcmp.gt.f32.partialorder %v2894_v24, 0.0  ;;  %v2958_v23 = vmul.f32 0.2, %v2894_v24  ;;  %v2712_v45 = vpop.f32.mrf.mxu2 }
 0x1a3   : > { %vm2903_vm1 = vcmp.gt.f32.partialorder %v2871_v18, 0.0  ;;  %v2935_v36 = vmul.f32 0.2, %v2871_v18  ;;  %v2731_v47 = vpop.f32.mrf.mxu3  ;;  %v2676_v10 = vpop.f32.mrf.mxu0 }
 0x1a4   : > { %v2990_v55 = vsel %vm2926_vm0, %v2894_v24, %v2958_v23  ;;  %v2732_v33 = vadd.f32 %v2731_v47, %v2712_v45  ;;  %v2695_v20 = vpop.f32.mrf.mxu1 }
 0x1a5   : > { %3022 = vst [vmem:[%s6558_s27 + $0xd8] sm:$0xff] %v2990_v55  ;;  %v2967_v58 = vsel %vm2903_vm1, %v2871_v18, %v2935_v36  ;;  %v2696_v11 = vadd.f32 %v2695_v20, %v2676_v10 }
 0x1a6   : > { %2999 = vst [vmem:[%s6558_s27 + $0x20] sm:$0xff] %v2967_v58  ;;  %v2822_v8 = vadd.f32 %v2732_v33, %v6495_v32 }
 0x1a7   : > { %v2829_v43 = vadd.f32 %v2696_v11, %v6508_v54 }
 0x1a8   : > { %v2872_v31 = vadd.f32 %v6608_v17, %v2822_v8  ;;  %v2858_v8 = vperm.slane %v6544_v42, 7 }
 0x1a9   : > { %v2879_v50 = vadd.f32 %v2855_v5, %v2829_v43 }
 0x1aa   : > { %vm2904_vm2 = vcmp.gt.f32.partialorder %v2872_v31, 0.0  ;;  %v2936_v51 = vmul.f32 0.2, %v2872_v31  ;;  %v2714_v38 = vpop.f32.mrf.mxu2 }
 0x1ab   : > { %vm2911_vm3 = vcmp.gt.f32.partialorder %v2879_v50, 0.0  ;;  %v2943_v1 = vmul.f32 0.2, %v2879_v50  ;;  %v2733_v15 = vpop.f32.mrf.mxu3  ;;  %v2679_v61 = vpop.f32.mrf.mxu0 }
 0x1ac   : > { %v2968_v49 = vsel %vm2904_vm2, %v2872_v31, %v2936_v51  ;;  %v2734_v25 = vadd.f32 %v2733_v15, %v2714_v38  ;;  %v2698_v16 = vpop.f32.mrf.mxu1 }
 0x1ad   : > { %3000 = vst [vmem:[%s6558_s27 + $0x28] sm:$0xff] %v2968_v49  ;;  %v2975_v21 = vsel %vm2911_vm3, %v2879_v50, %v2943_v1  ;;  %v2699_v60 = vadd.f32 %v2698_v16, %v2679_v61 }
 0x1ae   : > { %3007 = vst [vmem:[%s6558_s27 + $0x60] sm:$0xff] %v2975_v21  ;;  %v2830_v32 = vadd.f32 %v2734_v25, %v6511_v9 }
 0x1af   : > { %v2837_v54 = vadd.f32 %v2699_v60, %v6520_v4 }
 0x1b0   : > { %v2880_v0 = vadd.f32 %v6608_v17, %v2830_v32 }
 0x1b1   : > { %v2887_v29 = vadd.f32 %v2855_v5, %v2837_v54 }
 0x1b2   : > { %vm2912_vm4 = vcmp.gt.f32.partialorder %v2880_v0, 0.0  ;;  %v2944_v52 = vmul.f32 0.2, %v2880_v0  ;;  %v2717_v26 = vpop.f32.mrf.mxu2 }
 0x1b3   : > { %vm2919_vm5 = vcmp.gt.f32.partialorder %v2887_v29, 0.0  ;;  %v2951_v56 = vmul.f32 0.2, %v2887_v29  ;;  %v2736_v62 = vpop.f32.mrf.mxu3  ;;  %v2681_v14 = vpop.f32.mrf.mxu0 }
 0x1b4   : > { %v2976_v41 = vsel %vm2912_vm4, %v2880_v0, %v2944_v52  ;;  %v2737_v30 = vadd.f32 %v2736_v62, %v2717_v26  ;;  %v2700_v28 = vpop.f32.mrf.mxu1 }
 0x1b5   : > { %3008 = vst [vmem:[%s6558_s27 + $0x68] sm:$0xff] %v2976_v41  ;;  %v2983_v27 = vsel %vm2919_vm5, %v2887_v29, %v2951_v56  ;;  %v2701_v63 = vadd.f32 %v2700_v28, %v2681_v14 }
 0x1b6   : > { %3015 = vst [vmem:[%s6558_s27 + $0xa0] sm:$0xff] %v2983_v27  ;;  %v2838_v9 = vadd.f32 %v2737_v30, %v6523_v40  ;;  %v2857_v40 = vperm.slane %v6544_v42, 6 }
 0x1b7   : > { %v2845_v4 = vadd.f32 %v2701_v63, %v6536_v6 }
 0x1b8   : > { %v2888_v39 = vadd.f32 %v6608_v17, %v2838_v9 }
 0x1b9   : > { %v2895_v19 = vadd.f32 %v2855_v5, %v2845_v4 }
 0x1ba   : > { %vm2920_vm6 = vcmp.gt.f32.partialorder %v2888_v39, 0.0  ;;  %v2952_v44 = vmul.f32 0.2, %v2888_v39  ;;  %v2719_v35 = vpop.f32.mrf.mxu2 }
 0x1bb   : > { %vm2927_vm7 = vcmp.gt.f32.partialorder %v2895_v19, 0.0  ;;  %v2959_v22 = vmul.f32 0.2, %v2895_v19  ;;  %v2738_v7 = vpop.f32.mrf.mxu3  ;;  %v2750_v24 = vpop.f32.mrf.mxu0 }
 0x1bc   : > { %v2984_v3 = vsel %vm2920_vm6, %v2888_v39, %v2952_v44  ;;  %v2739_v34 = vadd.f32 %v2738_v7, %v2719_v35  ;;  %v2769_v18 = vpop.f32.mrf.mxu1 }
 0x1bd   : > { %3016 = vst [vmem:[%s6558_s27 + $0xa8] sm:$0xff] %v2984_v3  ;;  %v2991_v23 = vsel %vm2927_vm7, %v2895_v19, %v2959_v22  ;;  %v2770_v36 = vadd.f32 %v2769_v18, %v2750_v24 }
 0x1be   : > { %3023 = vst [vmem:[%s6558_s27 + $0xe0] sm:$0xff] %v2991_v23  ;;  %v2846_v6 = vadd.f32 %v2739_v34, %v6539_v37 }
 0x1bf   : > { %v2823_v5 = vadd.f32 %v2770_v36, %v6502_v12 }
 0x1c0   : > { %v2896_v45 = vadd.f32 %v6608_v17, %v2846_v6 }
 0x1c1   : > { %v2873_v47 = vadd.f32 %v2857_v40, %v2823_v5 }
 0x1c2   : > { %vm2928_vm8 = vcmp.gt.f32.partialorder %v2896_v45, 0.0  ;;  %v2960_v55 = vmul.f32 0.2, %v2896_v45  ;;  %v2788_v10 = vpop.f32.mrf.mxu2 }
 0x1c3   : > { %vm2905_vm9 = vcmp.gt.f32.partialorder %v2873_v47, 0.0  ;;  %v2937_v33 = vmul.f32 0.2, %v2873_v47  ;;  %v2807_v20 = vpop.f32.mrf.mxu3  ;;  %v2752_v43 = vpop.f32.mrf.mxu0 }
 0x1c4   : > { %v2992_v58 = vsel %vm2928_vm8, %v2896_v45, %v2960_v55  ;;  %v2808_v11 = vadd.f32 %v2807_v20, %v2788_v10  ;;  %v2771_v31 = vpop.f32.mrf.mxu1 }
 0x1c5   : > { %3024 = vst [vmem:[%s6558_s27 + $0xe8] sm:$0xff] %v2992_v58  ;;  %v2969_v37 = vsel %vm2905_vm9, %v2873_v47, %v2937_v33  ;;  %v2772_v50 = vadd.f32 %v2771_v31, %v2752_v43 }
 0x1c6   : > { %3001 = vst [vmem:[%s6558_s27 + $0x30] sm:$0xff] %v2969_v37  ;;  %v2824_v12 = vadd.f32 %v2808_v11, %v6505_v2 }
 0x1c7   : > { %v2831_v17 = vadd.f32 %v2772_v50, %v6514_v48 }
 0x1c8   : > { %v2874_v51 = vadd.f32 %v2858_v8, %v2824_v12 }
 0x1c9   : > { %v2881_v1 = vadd.f32 %v2857_v40, %v2831_v17 }
 0x1ca   : > { %vm2906_vm10 = vcmp.gt.f32.partialorder %v2874_v51, 0.0  ;;  %v2938_v38 = vmul.f32 0.2, %v2874_v51  ;;  %v2790_v49 = vpop.f32.mrf.mxu2 }
 0x1cb   : > { %vm2913_vm11 = vcmp.gt.f32.partialorder %v2881_v1, 0.0  ;;  %v2945_v15 = vmul.f32 0.2, %v2881_v1  ;;  %v2809_v42 = vpop.f32.mrf.mxu3  ;;  %v2755_v16 = vpop.f32.mrf.mxu0 }
 0x1cc   : > { %v2970_v25 = vsel %vm2906_vm10, %v2874_v51, %v2938_v38  ;;  %v2810_v61 = vadd.f32 %v2809_v42, %v2790_v49  ;;  %v2774_v21 = vpop.f32.mrf.mxu1 }
 0x1cd   : > { %3002 = vst [vmem:[%s6558_s27 + $0x38] sm:$0xff] %v2970_v25  ;;  %v2977_v60 = vsel %vm2913_vm11, %v2881_v1, %v2945_v15  ;;  %v2775_v32 = vadd.f32 %v2774_v21, %v2755_v16 }
 0x1ce   : > { %3009 = vst [vmem:[%s6558_s27 + $0x70] sm:$0xff] %v2977_v60  ;;  %v2832_v2 = vadd.f32 %v2810_v61, %v6517_v46 }
 0x1cf   : > { %v2839_v48 = vadd.f32 %v2775_v32, %v6530_v53 }
 0x1d0   : > { %v2882_v54 = vadd.f32 %v2858_v8, %v2832_v2 }
 0x1d1   : > { %v2889_v0 = vadd.f32 %v2857_v40, %v2839_v48 }
 0x1d2   : > { %vm2914_vm12 = vcmp.gt.f32.partialorder %v2882_v54, 0.0  ;;  %v2946_v29 = vmul.f32 0.2, %v2882_v54  ;;  %v2793_v56 = vpop.f32.mrf.mxu2 }
 0x1d3   : > { %vm2921_vm13 = vcmp.gt.f32.partialorder %v2889_v0, 0.0  ;;  %v2953_v52 = vmul.f32 0.2, %v2889_v0  ;;  %v2812_v26 = vpop.f32.mrf.mxu3  ;;  %v2757_v30 = vpop.f32.mrf.mxu0 }
 0x1d4   : > { %v2978_v62 = vsel %vm2914_vm12, %v2882_v54, %v2946_v29  ;;  %v2813_v41 = vadd.f32 %v2812_v26, %v2793_v56  ;;  %v2776_v14 = vpop.f32.mrf.mxu1 }
 0x1d5   : > { %3010 = vst [vmem:[%s6558_s27 + $0x78] sm:$0xff] %v2978_v62  ;;  %v2985_v28 = vsel %vm2921_vm13, %v2889_v0, %v2953_v52  ;;  %v2777_v27 = vadd.f32 %v2776_v14, %v2757_v30 }
 0x1d6   : > { %3017 = vst [vmem:[%s6558_s27 + $0xb0] sm:$0xff] %v2985_v28  ;;  %v2840_v46 = vadd.f32 %v2813_v41, %v6533_v13 }
 0x1d7   : > { %v2847_v53 = vadd.f32 %v2777_v27, %v6547_v57 }
 0x1d8   : > { %v2890_v63 = vadd.f32 %v2858_v8, %v2840_v46 }
 0x1d9   : > { %v2897_v9 = vadd.f32 %v2857_v40, %v2847_v53 }
 0x1da   : > { %vm2922_vm14 = vcmp.gt.f32.partialorder %v2890_v63, 0.0  ;;  %v2954_v4 = vmul.f32 0.2, %v2890_v63  ;;  %v2795_v19 = vpop.f32.mrf.mxu2 }
 0x1db   : > { %vm2929_vm15 = vcmp.gt.f32.partialorder %v2897_v9, 0.0  ;;  %v2961_v39 = vmul.f32 0.2, %v2897_v9  ;;  %v2814_v44 = vpop.f32.mrf.mxu3 }
 0x1dc   : > { %v2986_v22 = vsel %vm2922_vm14, %v2890_v63, %v2954_v4  ;;  %v2815_v35 = vadd.f32 %v2814_v44, %v2795_v19 }
 0x1dd   : > { %3018 = vst [vmem:[%s6558_s27 + $0xb8] sm:$0xff] %v2986_v22  ;;  %v2993_v7 = vsel %vm2929_vm15, %v2897_v9, %v2961_v39 }
 0x1de   : > { %3025 = vst [vmem:[%s6558_s27 + $0xf0] sm:$0xff] %v2993_v7  ;;  %v2848_v3 = vadd.f32 %v2815_v35, %v6550_v59 }
 0x1e0   : > { %v2898_v34 = vadd.f32 %v2858_v8, %v2848_v3 }
 0x1e2   : > { %vm2930_vm0 = vcmp.gt.f32.partialorder %v2898_v34, 0.0  ;;  %v2962_v13 = vmul.f32 0.2, %v2898_v34 }
 0x1e4   : > { %v2994_v57 = vsel %vm2930_vm0, %v2898_v34, %v2962_v13 }
 0x1e5   : > { %3026 = vst [vmem:[%s6558_s27 + $0xf8] sm:$0xff] %v2994_v57 }
 0x1e6 PF: > { %s19_s30 = sadd.s32 1, %s4518_s30  }
 0x1e7   : > { %p16_p4 = scmp.ge.s32.totalorder %s19_s30, 4  }
 0x1e9   :  { %18 = sbr.rel (!%p16_p4) target bundleno = 1 (0x1), region = 95 }

// kernel: net_forward.11
= control target key start
LH: loop header
LB: loop body
LE: loop exit
PB: predicated region body
PF: predicated region fallthrough
CT: control target
= control target key end

     0   :  { %vm773_vm0 = vcmask 1041409   ;;  %s4239_s0 = inlined_call_operand.vmem [shape: f32[2,32,1024], index: 0, kind: input, shape index: {}]   ;;  %s4240_s1 = inlined_call_operand.vmem [shape: f32[1024,512], index: 1, kind: input, shape index: {}]   ;;  %s4241_s2 = inlined_call_operand.vmem [shape: f32[1,512], index: 2, kind: input, shape index: {}]   ;;  %s4242_s3 = inlined_call_operand.vmem [shape: f32[512,256], index: 3, kind: input, shape index: {}]   ;;  %s4243_s4 = inlined_call_operand.vmem [shape: f32[1,256], index: 4, kind: input, shape index: {}]   ;;  %s4244_s5 = inlined_call_operand.vmem [shape: f32[256,8], index: 5, kind: input, shape index: {}]   ;;  %s4245_s6 = inlined_call_operand.vmem [shape: f32[1,8], index: 6, kind: input, shape index: {}]   ;;  %s4246_s7 = inlined_call_operand.hbm [shape: f32[2,8], index: 7, kind: output, shape index: {}]  }
   0x1   :  { %v295_v0 = vld [vmem:[%s4240_s1 + $0x1e0] sm:$0xff] }
   0x2   :  { %v359_v1 = vld [vmem:[%s4240_s1 + $0x3e0] sm:$0xff]  ;;  %790 = vmatpush.msra.mxu0 %v295_v0 }
   0x3   :  { %v423_v2 = vld [vmem:[%s4240_s1 + $0x5e0] sm:$0xff]  ;;  %810 = vmatpush.msra.mxu1 %v359_v1 }
   0x4   :  { %v291_v3 = vld [vmem:[%s4240_s1 + $0x1c0] sm:$0xff]  ;;  %830 = vmatpush.msra.mxu2 %v423_v2 }
   0x5   :  { %v355_v4 = vld [vmem:[%s4240_s1 + $0x3c0] sm:$0xff]  ;;  %791 = vmatpush.msra.mxu0 %v291_v3 }
   0x6   :  { %v419_v5 = vld [vmem:[%s4240_s1 + $0x5c0] sm:$0xff]  ;;  %811 = vmatpush.msra.mxu1 %v355_v4 }
   0x7   :  { %v487_v6 = vld [vmem:[%s4240_s1 + $0x7e0] sm:$0xff]  ;;  %831 = vmatpush.msra.mxu2 %v419_v5 }
   0x8   :  { %v287_v7 = vld [vmem:[%s4240_s1 + $0x1a0] sm:$0xff]  ;;  %850 = vmatpush.msra.mxu3 %v487_v6 }
   0x9   :  { %v351_v8 = vld [vmem:[%s4240_s1 + $0x3a0] sm:$0xff]  ;;  %792 = vmatpush.msra.mxu0 %v287_v7 }
   0xa   :  { %v415_v9 = vld [vmem:[%s4240_s1 + $0x5a0] sm:$0xff]  ;;  %812 = vmatpush.msra.mxu1 %v351_v8 }
   0xb   :  { %v483_v10 = vld [vmem:[%s4240_s1 + $0x7c0] sm:$0xff]  ;;  %832 = vmatpush.msra.mxu2 %v415_v9 }
   0xc   :  { %v283_v11 = vld [vmem:[%s4240_s1 + $0x180] sm:$0xff]  ;;  %851 = vmatpush.msra.mxu3 %v483_v10 }
   0xd   :  { %v347_v12 = vld [vmem:[%s4240_s1 + $0x380] sm:$0xff]  ;;  %793 = vmatpush.msra.mxu0 %v283_v11 }
   0xe   :  { %v411_v13 = vld [vmem:[%s4240_s1 + $0x580] sm:$0xff]  ;;  %813 = vmatpush.msra.mxu1 %v347_v12 }
   0xf   :  { %v479_v14 = vld [vmem:[%s4240_s1 + $0x7a0] sm:$0xff]  ;;  %833 = vmatpush.msra.mxu2 %v411_v13 }
  0x10   :  { %v279_v15 = vld [vmem:[%s4240_s1 + $0x160] sm:$0xff]  ;;  %852 = vmatpush.msra.mxu3 %v479_v14 }
  0x11   :  { %v343_v16 = vld [vmem:[%s4240_s1 + $0x360] sm:$0xff]  ;;  %794 = vmatpush.msra.mxu0 %v279_v15 }
  0x12   :  { %v407_v17 = vld [vmem:[%s4240_s1 + $0x560] sm:$0xff]  ;;  %814 = vmatpush.msra.mxu1 %v343_v16 }
  0x13   :  { %v475_v18 = vld [vmem:[%s4240_s1 + $0x780] sm:$0xff]  ;;  %834 = vmatpush.msra.mxu2 %v407_v17 }
  0x14   :  { %v275_v19 = vld [vmem:[%s4240_s1 + $0x140] sm:$0xff]  ;;  %853 = vmatpush.msra.mxu3 %v475_v18 }
  0x15   :  { %v339_v20 = vld [vmem:[%s4240_s1 + $0x340] sm:$0xff]  ;;  %795 = vmatpush.msra.mxu0 %v275_v19 }
  0x16   :  { %v403_v21 = vld [vmem:[%s4240_s1 + $0x540] sm:$0xff]  ;;  %815 = vmatpush.msra.mxu1 %v339_v20 }
  0x17   :  { %v471_v22 = vld [vmem:[%s4240_s1 + $0x760] sm:$0xff]  ;;  %835 = vmatpush.msra.mxu2 %v403_v21 }
  0x18   :  { %v271_v23 = vld [vmem:[%s4240_s1 + $0x120] sm:$0xff]  ;;  %854 = vmatpush.msra.mxu3 %v471_v22 }
  0x19   :  { %v335_v24 = vld [vmem:[%s4240_s1 + $0x320] sm:$0xff]  ;;  %796 = vmatpush.msra.mxu0 %v271_v23 }
  0x1a   :  { %v399_v25 = vld [vmem:[%s4240_s1 + $0x520] sm:$0xff]  ;;  %816 = vmatpush.msra.mxu1 %v335_v24 }
  0x1b   :  { %v467_v26 = vld [vmem:[%s4240_s1 + $0x740] sm:$0xff]  ;;  %836 = vmatpush.msra.mxu2 %v399_v25 }
  0x1c   :  { %v267_v27 = vld [vmem:[%s4240_s1 + $0x100] sm:$0xff]  ;;  %855 = vmatpush.msra.mxu3 %v467_v26 }
  0x1d   :  { %v331_v28 = vld [vmem:[%s4240_s1 + $0x300] sm:$0xff]  ;;  %797 = vmatpush.msra.mxu0 %v267_v27 }
  0x1e   :  { %v395_v29 = vld [vmem:[%s4240_s1 + $0x500] sm:$0xff]  ;;  %817 = vmatpush.msra.mxu1 %v331_v28 }
  0x1f   :  { %v463_v30 = vld [vmem:[%s4240_s1 + $0x720] sm:$0xff]  ;;  %837 = vmatpush.msra.mxu2 %v395_v29 }
  0x20   :  { %v263_v31 = vld [vmem:[%s4240_s1 + $0xe0] sm:$0xff]  ;;  %856 = vmatpush.msra.mxu3 %v463_v30 }
  0x21   :  { %v327_v32 = vld [vmem:[%s4240_s1 + $0x2e0] sm:$0xff]  ;;  %798 = vmatpush.msra.mxu0 %v263_v31 }
  0x22   :  { %v391_v33 = vld [vmem:[%s4240_s1 + $0x4e0] sm:$0xff]  ;;  %818 = vmatpush.msra.mxu1 %v327_v32 }
  0x23   :  { %v459_v34 = vld [vmem:[%s4240_s1 + $0x700] sm:$0xff]  ;;  %838 = vmatpush.msra.mxu2 %v391_v33 }
  0x24   :  { %v259_v35 = vld [vmem:[%s4240_s1 + $0xc0] sm:$0xff]  ;;  %857 = vmatpush.msra.mxu3 %v459_v34 }
  0x25   :  { %v323_v36 = vld [vmem:[%s4240_s1 + $0x2c0] sm:$0xff]  ;;  %799 = vmatpush.msra.mxu0 %v259_v35 }
  0x26   :  { %v387_v37 = vld [vmem:[%s4240_s1 + $0x4c0] sm:$0xff]  ;;  %819 = vmatpush.msra.mxu1 %v323_v36 }
  0x27   :  { %v455_v38 = vld [vmem:[%s4240_s1 + $0x6e0] sm:$0xff]  ;;  %839 = vmatpush.msra.mxu2 %v387_v37 }
  0x28   :  { %v255_v39 = vld [vmem:[%s4240_s1 + $0xa0] sm:$0xff]  ;;  %858 = vmatpush.msra.mxu3 %v455_v38 }
  0x29   :  { %v319_v40 = vld [vmem:[%s4240_s1 + $0x2a0] sm:$0xff]  ;;  %800 = vmatpush.msra.mxu0 %v255_v39 }
  0x2a   :  { %v383_v41 = vld [vmem:[%s4240_s1 + $0x4a0] sm:$0xff]  ;;  %820 = vmatpush.msra.mxu1 %v319_v40 }
  0x2b   :  { %v451_v42 = vld [vmem:[%s4240_s1 + $0x6c0] sm:$0xff]  ;;  %840 = vmatpush.msra.mxu2 %v383_v41 }
  0x2c   :  { %v251_v43 = vld [vmem:[%s4240_s1 + $0x80] sm:$0xff]  ;;  %859 = vmatpush.msra.mxu3 %v451_v42 }
  0x2d   :  { %v315_v44 = vld [vmem:[%s4240_s1 + $0x280] sm:$0xff]  ;;  %801 = vmatpush.msra.mxu0 %v251_v43 }
  0x2e   :  { %v379_v45 = vld [vmem:[%s4240_s1 + $0x480] sm:$0xff]  ;;  %821 = vmatpush.msra.mxu1 %v315_v44 }
  0x2f   :  { %v447_v46 = vld [vmem:[%s4240_s1 + $0x6a0] sm:$0xff]  ;;  %841 = vmatpush.msra.mxu2 %v379_v45  ;;  %v28_v45 = vld [vmem:[%s4239_s0 + $0x8] sm:$0xff] }
  0x30   :  { %v247_v47 = vld [vmem:[%s4240_s1 + $0x60] sm:$0xff]  ;;  %860 = vmatpush.msra.mxu3 %v447_v46  ;;  %v36_v46 = vld [vmem:[%s4239_s0 + $0x48] sm:$0xff] }
  0x31   :  { %v311_v48 = vld [vmem:[%s4240_s1 + $0x260] sm:$0xff]  ;;  %802 = vmatpush.msra.mxu0 %v247_v47  ;;  %v44_v47 = vld [vmem:[%s4239_s0 + $0x88] sm:$0xff] }
  0x32   :  { %v375_v49 = vld [vmem:[%s4240_s1 + $0x460] sm:$0xff]  ;;  %822 = vmatpush.msra.mxu1 %v311_v48 }
  0x33   :  { %v443_v50 = vld [vmem:[%s4240_s1 + $0x680] sm:$0xff]  ;;  %842 = vmatpush.msra.mxu2 %v375_v49 }
  0x34   :  { %v243_v51 = vld [vmem:[%s4240_s1 + $0x40] sm:$0xff]  ;;  %861 = vmatpush.msra.mxu3 %v443_v50 }
  0x35   :  { %v307_v52 = vld [vmem:[%s4240_s1 + $0x240] sm:$0xff]  ;;  %803 = vmatpush.msra.mxu0 %v243_v51  ;;  %v60_v51 = vld [vmem:[%s4239_s0 + $0x108] sm:$0xff] }
  0x36   :  { %v371_v53 = vld [vmem:[%s4240_s1 + $0x440] sm:$0xff]  ;;  %823 = vmatpush.msra.mxu1 %v307_v52  ;;  %v68_v52 = vld [vmem:[%s4239_s0 + $0x148] sm:$0xff] }
  0x37   :  { %v439_v54 = vld [vmem:[%s4240_s1 + $0x660] sm:$0xff]  ;;  %843 = vmatpush.msra.mxu2 %v371_v53  ;;  %v100_v53 = vmax.f32 %v28_v45, %v36_v46 }
  0x38   :  { %v239_v55 = vld [vmem:[%s4240_s1 + $0x20] sm:$0xff]  ;;  %862 = vmatpush.msra.mxu3 %v439_v54 }
  0x39   :  { %v303_v56 = vld [vmem:[%s4240_s1 + $0x220] sm:$0xff]  ;;  %804 = vmatpush.msra.mxu0 %v239_v55 }
  0x3a   :  { %v367_v57 = vld [vmem:[%s4240_s1 + $0x420] sm:$0xff]  ;;  %824 = vmatpush.msra.mxu1 %v303_v56 }
  0x3b   :  { %v435_v58 = vld [vmem:[%s4240_s1 + $0x640] sm:$0xff]  ;;  %844 = vmatpush.msra.mxu2 %v367_v57 }
  0x3c   :  { %v235_v59 = vld [vmem:[%s4240_s1] sm:$0xff]  ;;  %863 = vmatpush.msra.mxu3 %v435_v58  ;;  %v52_v58 = vld [vmem:[%s4239_s0 + $0xc8] sm:$0xff] }
  0x3d   :  { %v299_v60 = vld [vmem:[%s4240_s1 + $0x200] sm:$0xff]  ;;  %805 = vmatpush.msra.mxu0 %v235_v59  ;;  %v76_v59 = vld [vmem:[%s4239_s0 + $0x188] sm:$0xff] }
  0x3e   :  { %v363_v61 = vld [vmem:[%s4240_s1 + $0x400] sm:$0xff]  ;;  %825 = vmatpush.msra.mxu1 %v299_v60  ;;  %v172_v60 = vmax.f32 %v60_v51, %v68_v52 }
  0x3f   :  { %v431_v62 = vld [vmem:[%s4240_s1 + $0x620] sm:$0xff]  ;;  %845 = vmatpush.msra.mxu2 %v363_v61  ;;  %v29_v61 = vld [vmem:[%s4239_s0 + $0x10] sm:$0xff] }
  0x40   :  { %v551_v63 = vld [vmem:[%s4240_s1 + $0x9e0] sm:$0xff]  ;;  %864 = vmatpush.msra.mxu3 %v431_v62 }
  0x41   :  { %v615_v0 = vld [vmem:[%s4240_s1 + $0xbe0] sm:$0xff]  ;;  %870 = vmatpush.msrb.mxu0 %v551_v63 }
  0x42   :  { %v679_v1 = vld [vmem:[%s4240_s1 + $0xde0] sm:$0xff]  ;;  %890 = vmatpush.msrb.mxu1 %v615_v0  ;;  %v84_v0 = vld [vmem:[%s4239_s0 + $0x1c8] sm:$0xff] }
  0x43   :  { %v427_v2 = vld [vmem:[%s4240_s1 + $0x600] sm:$0xff]  ;;  %910 = vmatpush.msrb.mxu2 %v679_v1  ;;  %v101_v1 = vmax.f32 %v100_v53, %v44_v47 }
  0x44   :  { %v547_v3 = vld [vmem:[%s4240_s1 + $0x9c0] sm:$0xff]  ;;  %865 = vmatpush.msra.mxu3 %v427_v2  ;;  %v37_v2 = vld [vmem:[%s4239_s0 + $0x50] sm:$0xff] }
  0x45   :  { %v611_v4 = vld [vmem:[%s4240_s1 + $0xbc0] sm:$0xff]  ;;  %871 = vmatpush.msrb.mxu0 %v547_v3  ;;  %v45_v3 = vld [vmem:[%s4239_s0 + $0x90] sm:$0xff] }
  0x46   :  { %v675_v5 = vld [vmem:[%s4240_s1 + $0xdc0] sm:$0xff]  ;;  %891 = vmatpush.msrb.mxu1 %v611_v4 }
  0x47   :  { %v743_v6 = vld [vmem:[%s4240_s1 + $0xfe0] sm:$0xff]  ;;  %911 = vmatpush.msrb.mxu2 %v675_v5 }
  0x48   :  { %v543_v7 = vld [vmem:[%s4240_s1 + $0x9a0] sm:$0xff]  ;;  %930 = vmatpush.msrb.mxu3 %v743_v6 }
  0x49   :  { %v607_v8 = vld [vmem:[%s4240_s1 + $0xba0] sm:$0xff]  ;;  %872 = vmatpush.msrb.mxu0 %v543_v7  ;;  %v173_v7 = vmax.f32 %v172_v60, %v76_v59 }
  0x4a   :  { %v671_v9 = vld [vmem:[%s4240_s1 + $0xda0] sm:$0xff]  ;;  %892 = vmatpush.msrb.mxu1 %v607_v8  ;;  %v61_v8 = vld [vmem:[%s4239_s0 + $0x110] sm:$0xff] }
  0x4b   :  { %v739_v10 = vld [vmem:[%s4240_s1 + $0xfc0] sm:$0xff]  ;;  %912 = vmatpush.msrb.mxu2 %v671_v9  ;;  %v69_v9 = vld [vmem:[%s4239_s0 + $0x150] sm:$0xff] }
  0x4c   :  { %v539_v11 = vld [vmem:[%s4240_s1 + $0x980] sm:$0xff]  ;;  %931 = vmatpush.msrb.mxu3 %v739_v10  ;;  %v77_v10 = vld [vmem:[%s4239_s0 + $0x190] sm:$0xff] }
  0x4d   :  { %v603_v12 = vld [vmem:[%s4240_s1 + $0xb80] sm:$0xff]  ;;  %873 = vmatpush.msrb.mxu0 %v539_v11  ;;  %v109_v11 = vmax.f32 %v29_v61, %v37_v2 }
  0x4e   :  { %v667_v13 = vld [vmem:[%s4240_s1 + $0xd80] sm:$0xff]  ;;  %893 = vmatpush.msrb.mxu1 %v603_v12 }
  0x4f   :  { %v735_v14 = vld [vmem:[%s4240_s1 + $0xfa0] sm:$0xff]  ;;  %913 = vmatpush.msrb.mxu2 %v667_v13 }
  0x50   :  { %v535_v15 = vld [vmem:[%s4240_s1 + $0x960] sm:$0xff]  ;;  %932 = vmatpush.msrb.mxu3 %v735_v14  ;;  %v102_v14 = vmax.f32 %v101_v1, %v52_v58 }
  0x51   :  { %v599_v16 = vld [vmem:[%s4240_s1 + $0xb60] sm:$0xff]  ;;  %874 = vmatpush.msrb.mxu0 %v535_v15  ;;  %v53_v15 = vld [vmem:[%s4239_s0 + $0xd0] sm:$0xff] }
  0x52   :  { %v663_v17 = vld [vmem:[%s4240_s1 + $0xd60] sm:$0xff]  ;;  %894 = vmatpush.msrb.mxu1 %v599_v16  ;;  %v181_v16 = vmax.f32 %v61_v8, %v69_v9 }
  0x53   :  { %v731_v18 = vld [vmem:[%s4240_s1 + $0xf80] sm:$0xff]  ;;  %914 = vmatpush.msrb.mxu2 %v663_v17 }
  0x54   :  { %v531_v19 = vld [vmem:[%s4240_s1 + $0x940] sm:$0xff]  ;;  %933 = vmatpush.msrb.mxu3 %v731_v18 }
  0x55   :  { %v595_v20 = vld [vmem:[%s4240_s1 + $0xb40] sm:$0xff]  ;;  %875 = vmatpush.msrb.mxu0 %v531_v19 }
  0x56   :  { %v659_v21 = vld [vmem:[%s4240_s1 + $0xd40] sm:$0xff]  ;;  %895 = vmatpush.msrb.mxu1 %v595_v20  ;;  %v174_v20 = vmax.f32 %v173_v7, %v84_v0 }
  0x57   :  { %v727_v22 = vld [vmem:[%s4240_s1 + $0xf60] sm:$0xff]  ;;  %915 = vmatpush.msrb.mxu2 %v659_v21  ;;  %v85_v21 = vld [vmem:[%s4239_s0 + $0x1d0] sm:$0xff] }
  0x58   :  { %v527_v23 = vld [vmem:[%s4240_s1 + $0x920] sm:$0xff]  ;;  %934 = vmatpush.msrb.mxu3 %v727_v22  ;;  %v110_v22 = vmax.f32 %v109_v11, %v45_v3  ;;  %v33_v3 = vld [vmem:[%s4239_s0 + $0x30] sm:$0xff] }
  0x59   :  { %v591_v24 = vld [vmem:[%s4240_s1 + $0xb20] sm:$0xff]  ;;  %876 = vmatpush.msrb.mxu0 %v527_v23  ;;  %v30_v23 = vld [vmem:[%s4239_s0 + $0x18] sm:$0xff] }
  0x5a   :  { %v655_v25 = vld [vmem:[%s4240_s1 + $0xd20] sm:$0xff]  ;;  %896 = vmatpush.msrb.mxu1 %v591_v24 }
  0x5b   :  { %v723_v26 = vld [vmem:[%s4240_s1 + $0xf40] sm:$0xff]  ;;  %916 = vmatpush.msrb.mxu2 %v655_v25 }
  0x5c   :  { %v523_v27 = vld [vmem:[%s4240_s1 + $0x900] sm:$0xff]  ;;  %935 = vmatpush.msrb.mxu3 %v723_v26  ;;  %v103_v26 = vrot.slane %v102_v14, 4 }
  0x5d   :  { %v587_v28 = vld [vmem:[%s4240_s1 + $0xb00] sm:$0xff]  ;;  %877 = vmatpush.msrb.mxu0 %v523_v27  ;;  %v182_v27 = vmax.f32 %v181_v16, %v77_v10  ;;  %v86_v16 = vld [vmem:[%s4239_s0 + $0x1d8] sm:$0xff] }
  0x5e   :  { %v27_v29 = vld [vmem:[%s4239_s0] sm:$0xff]  ;;  %897 = vmatpush.msrb.mxu1 %v587_v28  ;;  %v38_v28 = vld [vmem:[%s4239_s0 + $0x58] sm:$0xff] }
  0x5f   :  { %v35_v30 = vld [vmem:[%s4239_s0 + $0x40] sm:$0xff] }
  0x60   :  { %v651_v31 = vld [vmem:[%s4240_s1 + $0xd00] sm:$0xff]  ;;  %v91_v35 = vmax.f32 %v27_v29, %v35_v30 }
  0x61   :  { %v719_v32 = vld [vmem:[%s4240_s1 + $0xf20] sm:$0xff]  ;;  %917 = vmatpush.msrb.mxu2 %v651_v31  ;;  %v175_v31 = vrot.slane %v174_v20, 4 }
  0x62   :  { %v43_v33 = vld [vmem:[%s4239_s0 + $0x80] sm:$0xff]  ;;  %936 = vmatpush.msrb.mxu3 %v719_v32  ;;  %v111_v32 = vmax.f32 %v110_v22, %v53_v15  ;;  %v296_v22 = vld [vmem:[%s4240_s1 + $0x1e8] sm:$0xff] }
  0x63   :  { %v59_v34 = vld [vmem:[%s4239_s0 + $0x100] sm:$0xff]  ;;  %v92_v43 = vmax.f32 %v91_v35, %v43_v33  ;;  %v46_v33 = vld [vmem:[%s4239_s0 + $0x98] sm:$0xff]  ;;  %v176_v46 = vmax.f32 %v174_v20, %v175_v31 }
  0x64   :  { %v519_v36 = vld [vmem:[%s4240_s1 + $0x8e0] sm:$0xff]  ;;  %v2332_v35 = vld [vmem:[%s4239_s0 + $0x158] sm:$0xff]  ;;  %v112_v47 = vrot.slane %v111_v32, 4 }
  0x65   :  { %v583_v37 = vld [vmem:[%s4240_s1 + $0xae0] sm:$0xff]  ;;  %878 = vmatpush.msrb.mxu0 %v519_v36  ;;  %v177_v60 = vrot.slane %v176_v46, 2 }
  0x66   :  { %v51_v38 = vld [vmem:[%s4239_s0 + $0xc0] sm:$0xff]  ;;  %898 = vmatpush.msrb.mxu1 %v583_v37  ;;  %v113_v61 = vmax.f32 %v111_v32, %v112_v47 }
  0x67   :  { %v67_v39 = vld [vmem:[%s4239_s0 + $0x140] sm:$0xff]  ;;  %v93_v56 = vmax.f32 %v92_v43, %v51_v38  ;;  %v178_v10 = vmax.f32 %v176_v46, %v177_v60  ;;  %v34_v60 = vld [vmem:[%s4239_s0 + $0x38] sm:$0xff] }
  0x68   :  { %v75_v40 = vld [vmem:[%s4239_s0 + $0x180] sm:$0xff]  ;;  %v163_v44 = vmax.f32 %v59_v34, %v67_v39  ;;  %v2327_v34 = vld [vmem:[%s4239_s0 + $0x118] sm:$0xff]  ;;  %v104_v39 = vmax.f32 %v102_v14, %v103_v26  ;;  %v114_v11 = vrot.slane %v113_v61, 2 }
  0x69   :  { %v647_v41 = vld [vmem:[%s4240_s1 + $0xce0] sm:$0xff]  ;;  %v94_v5 = vrot.slane %v93_v56, 4  ;;  %v179_v20 = vrot.slane %v178_v10, 1 }
  0x6a   :  { %v715_v42 = vld [vmem:[%s4240_s1 + $0xf00] sm:$0xff]  ;;  %v164_v57 = vmax.f32 %v163_v44, %v75_v40  ;;  %918 = vmatpush.msrb.mxu2 %v647_v41  ;;  %v183_v40 = vmax.f32 %v182_v27, %v85_v21  ;;  %v118_v41 = vmax.f32 %v30_v23, %v38_v28  ;;  %v105_v52 = vrot.slane %v104_v39, 2  ;;  %v49_v23 = vld [vmem:[%s4239_s0 + $0xb0] sm:$0xff] }
  0x6b   :  { %v515_v48 = vld [vmem:[%s4240_s1 + $0x8c0] sm:$0xff]  ;;  %937 = vmatpush.msrb.mxu3 %v715_v42  ;;  %v95_v18 = vmax.f32 %v93_v56, %v94_v5  ;;  %v115_v21 = vmax.f32 %v113_v61, %v114_v11  ;;  %v42_v61 = vld [vmem:[%s4239_s0 + $0x78] sm:$0xff] }
  0x6c   :  { %v579_v49 = vld [vmem:[%s4240_s1 + $0xac0] sm:$0xff]  ;;  %879 = vmatpush.msrb.mxu0 %v515_v48  ;;  %v54_v48 = vld [vmem:[%s4239_s0 + $0xd8] sm:$0xff]  ;;  %v184_v53 = vrot.slane %v183_v40, 4  ;;  %v106_v0 = vmax.f32 %v104_v39, %v105_v52  ;;  %v57_v39 = vld [vmem:[%s4239_s0 + $0xf0] sm:$0xff] }
  0x6d   :  { %v83_v50 = vld [vmem:[%s4239_s0 + $0x1c0] sm:$0xff]  ;;  %899 = vmatpush.msrb.mxu1 %v579_v49  ;;  %v96_v29 = vrot.slane %v95_v18, 2  ;;  %v89_v52 = vld [vmem:[%s4239_s0 + $0x1f0] sm:$0xff]  ;;  %v66_v11 = vld [vmem:[%s4239_s0 + $0x138] sm:$0xff] }
  0x6e   :  { %v643_v54 = vld [vmem:[%s4240_s1 + $0xcc0] sm:$0xff]  ;;  %v165_v6 = vmax.f32 %v164_v57, %v83_v50  ;;  %v185_v1 = vmax.f32 %v183_v40, %v184_v53  ;;  %v107_v14 = vrot.slane %v106_v0, 1 }
  0x6f   :  { %v711_v55 = vld [vmem:[%s4240_s1 + $0xee0] sm:$0xff]  ;;  %919 = vmatpush.msrb.mxu2 %v643_v54  ;;  %v97_v44 = vmax.f32 %v95_v18, %v96_v29  ;;  %v119_v54 = vmax.f32 %v118_v41, %v46_v33  ;;  %v360_v29 = vld [vmem:[%s4240_s1 + $0x3e8] sm:$0xff] }
  0x70   :  { %v511_v62 = vld [vmem:[%s4240_s1 + $0x8a0] sm:$0xff]  ;;  %v166_v19 = vrot.slane %v165_v6, 4  ;;  %938 = vmatpush.msrb.mxu3 %v711_v55  ;;  %v190_v55 = vmax.f32 %v2327_v34, %v2332_v35  ;;  %v186_v15 = vrot.slane %v185_v1, 2  ;;  %v108_v27 = vmax.f32 %v106_v0, %v107_v14  ;;  %v352_v0 = vld [vmem:[%s4240_s1 + $0x3a8] sm:$0xff] }
  0x71   :  { %v575_v63 = vld [vmem:[%s4240_s1 + $0xaa0] sm:$0xff]  ;;  %880 = vmatpush.msrb.mxu0 %v511_v62  ;;  %v98_v58 = vrot.slane %v97_v44, 1  ;;  %v78_v62 = vld [vmem:[%s4239_s0 + $0x198] sm:$0xff]  ;;  %v120_v2 = vmax.f32 %v119_v54, %v54_v48  ;;  %v180_v34 = vmax.f32 %v178_v10, %v179_v20  ;;  %v116_v35 = vrot.slane %v115_v21, 1  ;;  %v416_v20 = vld [vmem:[%s4240_s1 + $0x5a8] sm:$0xff] }
  0x72   :  { %v639_v4 = vld [vmem:[%s4240_s1 + $0xca0] sm:$0xff]  ;;  %900 = vmatpush.msrb.mxu1 %v575_v63  ;;  %v167_v30 = vmax.f32 %v165_v6, %v166_v19  ;;  %v191_v18 = vmax.f32 %v190_v55, %v78_v62  ;;  %v187_v28 = vmax.f32 %v185_v1, %v186_v15  ;;  %v284_v1 = vld [vmem:[%s4240_s1 + $0x188] sm:$0xff]  ;;  %v50_v10 = vld [vmem:[%s4239_s0 + $0xb8] sm:$0xff] }
  0x73   :  { %v707_v12 = vld [vmem:[%s4240_s1 + $0xec0] sm:$0xff]  ;;  %920 = vmatpush.msrb.mxu2 %v639_v4  ;;  %v41_v4 = vld [vmem:[%s4239_s0 + $0x70] sm:$0xff]  ;;  %v99_v8 = vmax.f32 %v97_v44, %v98_v58  ;;  %v2443_v47 = vsel %vm773_vm0, %v180_v34, %v108_v27  ;;  %v117_v48 = vmax.f32 %v115_v21, %v116_v35  ;;  %v74_v15 = vld [vmem:[%s4239_s0 + $0x178] sm:$0xff] }
  0x74   :  { %v507_v13 = vld [vmem:[%s4240_s1 + $0x880] sm:$0xff]  ;;  %939 = vmatpush.msrb.mxu3 %v707_v12  ;;  %v168_v45 = vrot.slane %v167_v30, 2  ;;  %v145_v26 = vmax.f32 %v33_v3, %v41_v4  ;;  %v188_v40 = vrot.slane %v187_v28, 1  ;;  %826 = vmatmul.f32.vlgmr.msra.gmra.mxu1 %v2443_v47  ;;  %v348_v21 = vld [vmem:[%s4240_s1 + $0x388] sm:$0xff] }
  0x75   :  { %v571_v17 = vld [vmem:[%s4240_s1 + $0xa80] sm:$0xff]  ;;  %881 = vmatpush.msrb.mxu0 %v507_v13  ;;  %v280_v27 = vld [vmem:[%s4240_s1 + $0x168] sm:$0xff] }
  0x76   :  { %v635_v24 = vld [vmem:[%s4240_s1 + $0xc80] sm:$0xff]  ;;  %901 = vmatpush.msrb.mxu1 %v571_v17  ;;  %v169_v59 = vmax.f32 %v167_v30, %v168_v45  ;;  %v121_v17 = vrot.slane %v120_v2, 4  ;;  %v146_v44 = vmax.f32 %v145_v26, %v49_v23  ;;  %v344_v35 = vld [vmem:[%s4240_s1 + $0x368] sm:$0xff] }
  0x77   :  { %v703_v25 = vld [vmem:[%s4240_s1 + $0xea0] sm:$0xff]  ;;  %921 = vmatpush.msrb.mxu2 %v635_v24  ;;  %v65_v24 = vld [vmem:[%s4239_s0 + $0x130] sm:$0xff] }
  0x78   :  { %v503_v36 = vld [vmem:[%s4240_s1 + $0x860] sm:$0xff]  ;;  %940 = vmatpush.msrb.mxu3 %v703_v25  ;;  %v170_v9 = vrot.slane %v169_v59, 1  ;;  %v73_v25 = vld [vmem:[%s4239_s0 + $0x170] sm:$0xff]  ;;  %v122_v30 = vmax.f32 %v120_v2, %v121_v17  ;;  %v147_v58 = vmax.f32 %v146_v44, %v57_v39  ;;  %v32_v17 = vld [vmem:[%s4239_s0 + $0x28] sm:$0xff] }
  0x79   :  { %v567_v37 = vld [vmem:[%s4240_s1 + $0xa60] sm:$0xff]  ;;  %882 = vmatpush.msrb.mxu0 %v503_v36  ;;  %v217_v45 = vmax.f32 %v65_v24, %v73_v25  ;;  %v58_v24 = vld [vmem:[%s4239_s0 + $0xf8] sm:$0xff]  ;;  %v276_v44 = vld [vmem:[%s4240_s1 + $0x148] sm:$0xff] }
  0x7a   :  { %v631_v38 = vld [vmem:[%s4240_s1 + $0xc60] sm:$0xff]  ;;  %902 = vmatpush.msrb.mxu1 %v567_v37  ;;  %v171_v19 = vmax.f32 %v169_v59, %v170_v9  ;;  %v192_v37 = vmax.f32 %v191_v18, %v86_v16  ;;  %v123_v41 = vrot.slane %v122_v30, 2  ;;  %v154_v16 = vmax.f32 %v34_v60, %v42_v61  ;;  %v40_v18 = vld [vmem:[%s4239_s0 + $0x68] sm:$0xff] }
  0x7b   :  { %v699_v42 = vld [vmem:[%s4240_s1 + $0xe80] sm:$0xff]  ;;  %922 = vmatpush.msrb.mxu2 %v631_v38  ;;  %v292_v38 = vld [vmem:[%s4240_s1 + $0x1c8] sm:$0xff] }
  0x7c   :  { %v499_v43 = vld [vmem:[%s4240_s1 + $0x840] sm:$0xff]  ;;  %941 = vmatpush.msrb.mxu3 %v699_v42  ;;  %v2421_v33 = vsel %vm773_vm0, %v171_v19, %v99_v8  ;;  %v356_v42 = vld [vmem:[%s4240_s1 + $0x3c8] sm:$0xff] }
  0x7d   :  { %v563_v49 = vld [vmem:[%s4240_s1 + $0xa40] sm:$0xff]  ;;  %883 = vmatpush.msrb.mxu0 %v499_v43  ;;  %v81_v43 = vld [vmem:[%s4239_s0 + $0x1b0] sm:$0xff]  ;;  %v64_v61 = vld [vmem:[%s4239_s0 + $0x128] sm:$0xff] }
  0x7e   :  { %v627_v50 = vld [vmem:[%s4240_s1 + $0xc40] sm:$0xff]  ;;  %903 = vmatpush.msrb.mxu1 %v563_v49  ;;  %806 = vmatmul.f32.vlgmr.msra.gmra.mxu0 %v2421_v33  ;;  %v424_v49 = vld [vmem:[%s4240_s1 + $0x5e8] sm:$0xff]  ;;  %v218_v2 = vmax.f32 %v217_v45, %v81_v43 }
  0x7f   :  { %v695_v51 = vld [vmem:[%s4240_s1 + $0xe60] sm:$0xff]  ;;  %923 = vmatpush.msrb.mxu2 %v627_v50  ;;  %v193_v50 = vrot.slane %v192_v37, 4  ;;  %v56_v45 = vld [vmem:[%s4239_s0 + $0xe8] sm:$0xff] }
  0x80   :  { %v495_v56 = vld [vmem:[%s4240_s1 + $0x820] sm:$0xff]  ;;  %942 = vmatpush.msrb.mxu3 %v695_v51  ;;  %v288_v51 = vld [vmem:[%s4240_s1 + $0x1a8] sm:$0xff] }
  0x81   :  { %v559_v57 = vld [vmem:[%s4240_s1 + $0xa20] sm:$0xff]  ;;  %884 = vmatpush.msrb.mxu0 %v495_v56  ;;  %v189_v56 = vmax.f32 %v187_v28, %v188_v40  ;;  %v194_v62 = vmax.f32 %v192_v37, %v193_v50  ;;  %v226_v37 = vmax.f32 %v66_v11, %v74_v15  ;;  %v340_v50 = vld [vmem:[%s4240_s1 + $0x348] sm:$0xff] }
  0x82   :  { %v623_v63 = vld [vmem:[%s4240_s1 + $0xc20] sm:$0xff]  ;;  %904 = vmatpush.msrb.mxu1 %v559_v57  ;;  %v124_v57 = vmax.f32 %v122_v30, %v123_v41  ;;  %v155_v30 = vmax.f32 %v154_v16, %v50_v10 }
  0x83   :  { %v691_v5 = vld [vmem:[%s4240_s1 + $0xe40] sm:$0xff]  ;;  %924 = vmatpush.msrb.mxu2 %v623_v63  ;;  %v420_v63 = vld [vmem:[%s4240_s1 + $0x5c8] sm:$0xff] }
  0x84   :  { %v491_v6 = vld [vmem:[%s4240_s1 + $0x800] sm:$0xff]  ;;  %943 = vmatpush.msrb.mxu3 %v691_v5  ;;  %v2483_v5 = vsel %vm773_vm0, %v189_v56, %v117_v48  ;;  %v156_v43 = vmax.f32 %v155_v30, %v58_v24  ;;  %v476_v30 = vld [vmem:[%s4240_s1 + $0x788] sm:$0xff] }
  0x85   :  { %v555_v7 = vld [vmem:[%s4240_s1 + $0xa00] sm:$0xff]  ;;  %885 = vmatpush.msrb.mxu0 %v491_v6  ;;  %v125_v6 = vrot.slane %v124_v57, 1  ;;  %846 = vmatmul.f32.vlgmr.msra.gmra.mxu2 %v2483_v5 }
  0x86   :  { %v619_v12 = vld [vmem:[%s4240_s1 + $0xc00] sm:$0xff]  ;;  %905 = vmatpush.msrb.mxu1 %v555_v7  ;;  %v148_v7 = vrot.slane %v147_v58, 4 }
  0x87   :  { %v687_v13 = vld [vmem:[%s4240_s1 + $0xe20] sm:$0xff]  ;;  %925 = vmatpush.msrb.mxu2 %v619_v12  ;;  %950 = vmatpush.msra.mxu0 %v296_v22  ;;  %v195_v12 = vrot.slane %v194_v62, 2  ;;  %v126_v19 = vmax.f32 %v124_v57, %v125_v6  ;;  %v157_v57 = vrot.slane %v156_v43, 4  ;;  %v404_v6 = vld [vmem:[%s4240_s1 + $0x548] sm:$0xff] }
  0x88   :  { %v31_v31 = vld [vmem:[%s4239_s0 + $0x20] sm:$0xff]  ;;  %944 = vmatpush.msrb.mxu3 %v687_v13  ;;  %970 = vmatpush.msra.mxu1 %v360_v29  ;;  %v219_v13 = vmax.f32 %v218_v2, %v89_v52  ;;  %v149_v22 = vmax.f32 %v147_v58, %v148_v7  ;;  %v82_v29 = vld [vmem:[%s4239_s0 + $0x1b8] sm:$0xff]  ;;  %v336_v7 = vld [vmem:[%s4240_s1 + $0x328] sm:$0xff] }
  0x89   :  { %v39_v32 = vld [vmem:[%s4239_s0 + $0x60] sm:$0xff]  ;;  %951 = vmatpush.msra.mxu0 %v292_v38  ;;  %990 = vmatpush.msra.mxu2 %v424_v49  ;;  %v196_v25 = vmax.f32 %v194_v62, %v195_v12  ;;  %v136_v38 = vmax.f32 %v32_v17, %v40_v18  ;;  %v227_v49 = vmax.f32 %v226_v37, %v82_v29  ;;  %v72_v62 = vld [vmem:[%s4239_s0 + $0x168] sm:$0xff] }
  0x8a   :  { %v683_v36 = vld [vmem:[%s4240_s1 + $0xe00] sm:$0xff]  ;;  %v127_v55 = vmax.f32 %v31_v31, %v39_v32  ;;  %971 = vmatpush.msra.mxu1 %v356_v42  ;;  %v220_v26 = vrot.slane %v219_v13, 4  ;;  %v48_v31 = vld [vmem:[%s4239_s0 + $0xa8] sm:$0xff]  ;;  %v150_v34 = vrot.slane %v149_v22, 2  ;;  %v90_v42 = vld [vmem:[%s4239_s0 + $0x1f8] sm:$0xff]  ;;  %v208_v17 = vmax.f32 %v64_v61, %v72_v62 }
  0x8b   :  { %v47_v46 = vld [vmem:[%s4239_s0 + $0xa0] sm:$0xff]  ;;  %945 = vmatpush.msrb.mxu3 %v683_v36  ;;  %952 = vmatpush.msra.mxu0 %v288_v51  ;;  %v412_v32 = vld [vmem:[%s4240_s1 + $0x588] sm:$0xff]  ;;  %v197_v39 = vrot.slane %v196_v25, 1  ;;  %v137_v51 = vmax.f32 %v136_v38, %v48_v31  ;;  %v228_v60 = vmax.f32 %v227_v49, %v90_v42 }
  0x8c   :  { %v63_v53 = vld [vmem:[%s4239_s0 + $0x120] sm:$0xff]  ;;  %v128_v4 = vmax.f32 %v127_v55, %v47_v46  ;;  %972 = vmatpush.msra.mxu1 %v352_v0  ;;  %991 = vmatpush.msra.mxu2 %v420_v63  ;;  %v221_v40 = vmax.f32 %v219_v13, %v220_v26  ;;  %v151_v46 = vmax.f32 %v149_v22, %v150_v34  ;;  %v408_v55 = vld [vmem:[%s4240_s1 + $0x568] sm:$0xff] }
  0x8d   :  { %v71_v54 = vld [vmem:[%s4239_s0 + $0x160] sm:$0xff]  ;;  %953 = vmatpush.msra.mxu0 %v284_v1  ;;  %v198_v52 = vmax.f32 %v196_v25, %v197_v39  ;;  %v138_v63 = vmax.f32 %v137_v51, %v56_v45  ;;  %v272_v0 = vld [vmem:[%s4240_s1 + $0x128] sm:$0xff]  ;;  %v229_v11 = vrot.slane %v228_v60, 4 }
  0x8e   :  { %v55_v59 = vld [vmem:[%s4239_s0 + $0xe0] sm:$0xff]  ;;  %v199_v9 = vmax.f32 %v63_v53, %v71_v54  ;;  %973 = vmatpush.msra.mxu1 %v348_v21  ;;  %992 = vmatpush.msra.mxu2 %v416_v20  ;;  %v488_v53 = vld [vmem:[%s4240_s1 + $0x7e8] sm:$0xff]  ;;  %v222_v54 = vrot.slane %v221_v40, 2  ;;  %v152_v58 = vrot.slane %v151_v46, 1 }
  0x8f   :  { %v79_v3 = vld [vmem:[%s4239_s0 + $0x1a0] sm:$0xff]  ;;  %v129_v14 = vmax.f32 %v128_v4, %v55_v59  ;;  %954 = vmatpush.msra.mxu0 %v280_v27  ;;  %v2556_v1 = vsel %vm773_vm0, %v198_v52, %v126_v19  ;;  %v158_v4 = vmax.f32 %v156_v43, %v157_v57  ;;  %v80_v12 = vld [vmem:[%s4239_s0 + $0x1a8] sm:$0xff]  ;;  %v139_v13 = vrot.slane %v138_v63, 4 }
  0x90   :  { %v87_v8 = vld [vmem:[%s4239_s0 + $0x1e0] sm:$0xff]  ;;  %v200_v23 = vmax.f32 %v199_v9, %v79_v3  ;;  %974 = vmatpush.msra.mxu1 %v344_v35  ;;  %993 = vmatpush.msra.mxu2 %v412_v32  ;;  %v223_v2 = vmax.f32 %v221_v40, %v222_v54  ;;  %v153_v9 = vmax.f32 %v151_v46, %v152_v58  ;;  %v400_v18 = vld [vmem:[%s4240_s1 + $0x528] sm:$0xff] }
  0x91   :  { %v130_v28 = vrot.slane %v129_v14, 4  ;;  %955 = vmatpush.msra.mxu0 %v276_v44  ;;  %866 = vmatmul.f32.vlgmr.msra.gmra.mxu3 %v2556_v1  ;;  %v159_v16 = vrot.slane %v158_v4, 2  ;;  %v268_v19 = vld [vmem:[%s4240_s1 + $0x108] sm:$0xff]  ;;  %v230_v22 = vmax.f32 %v228_v60, %v229_v11  ;;  %v140_v24 = vmax.f32 %v138_v63, %v139_v13 }
  0x92   :  { %v201_v36 = vmax.f32 %v200_v23, %v87_v8  ;;  %975 = vmatpush.msra.mxu1 %v340_v50  ;;  %v484_v8 = vld [vmem:[%s4240_s1 + $0x7c8] sm:$0xff]  ;;  %994 = vmatpush.msra.mxu2 %v408_v55 }
  0x93   :  { %v131_v41 = vmax.f32 %v129_v14, %v130_v28  ;;  %1010 = vmatpush.msra.mxu3 %v488_v53  ;;  %v224_v14 = vrot.slane %v223_v2, 1  ;;  %956 = vmatpush.msra.mxu0 %v272_v0  ;;  %v480_v20 = vld [vmem:[%s4240_s1 + $0x7a8] sm:$0xff]  ;;  %v160_v27 = vmax.f32 %v158_v4, %v159_v16  ;;  %v209_v28 = vmax.f32 %v208_v17, %v80_v12 }
  0x94   :  { %v202_v48 = vrot.slane %v201_v36, 4  ;;  %995 = vmatpush.msra.mxu2 %v404_v6  ;;  %v88_v23 = vld [vmem:[%s4239_s0 + $0x1e8] sm:$0xff]  ;;  %976 = vmatpush.msra.mxu1 %v336_v7  ;;  %v231_v34 = vrot.slane %v230_v22, 2  ;;  %v141_v35 = vrot.slane %v140_v24, 2 }
  0x95   :  { %v132_v56 = vrot.slane %v131_v41, 2  ;;  %v332_v25 = vld [vmem:[%s4240_s1 + $0x308] sm:$0xff]  ;;  %1011 = vmatpush.msra.mxu3 %v484_v8  ;;  %v225_v26 = vmax.f32 %v223_v2, %v224_v14  ;;  %957 = vmatpush.msra.mxu0 %v268_v19  ;;  %v161_v38 = vrot.slane %v160_v27, 1  ;;  %v210_v39 = vmax.f32 %v209_v28, %v88_v23 }
  0x96   :  { %v203_v59 = vmax.f32 %v201_v36, %v202_v48  ;;  %v264_v29 = vld [vmem:[%s4240_s1 + $0xe8] sm:$0xff]  ;;  %996 = vmatpush.msra.mxu2 %v400_v18  ;;  %977 = vmatpush.msra.mxu1 %v332_v25  ;;  %v232_v43 = vmax.f32 %v230_v22, %v231_v34  ;;  %v142_v45 = vmax.f32 %v140_v24, %v141_v35 }
  0x97   :  { %v133_v3 = vmax.f32 %v131_v41, %v132_v56  ;;  %v396_v36 = vld [vmem:[%s4240_s1 + $0x508] sm:$0xff]  ;;  %1012 = vmatpush.msra.mxu3 %v480_v20  ;;  %v2596_v37 = vsel %vm773_vm0, %v225_v26, %v153_v9  ;;  %958 = vmatpush.msra.mxu0 %v264_v29  ;;  %v211_v46 = vrot.slane %v210_v39, 4  ;;  %v162_v51 = vmax.f32 %v160_v27, %v161_v38 }
  0x98   :  { %v204_v10 = vrot.slane %v203_v59, 2  ;;  %v328_v40 = vld [vmem:[%s4240_s1 + $0x2e8] sm:$0xff]  ;;  %926 = vmatmul.f32.vlgmr.msrb.gmra.mxu2 %v2596_v37  ;;  %v233_v52 = vrot.slane %v232_v43, 1  ;;  %v143_v60 = vrot.slane %v142_v45, 1 }
  0x99   :  { %v134_v15 = vrot.slane %v133_v3, 1  ;;  %v260_v41 = vld [vmem:[%s4240_s1 + $0xc8] sm:$0xff]  ;;  %1013 = vmatpush.msra.mxu3 %v476_v30  ;;  %997 = vmatpush.msra.mxu2 %v396_v36  ;;  %v212_v55 = vmax.f32 %v210_v39, %v211_v46 }
  0x9a   :  { %v205_v21 = vmax.f32 %v203_v59, %v204_v10  ;;  %v472_v44 = vld [vmem:[%s4240_s1 + $0x768] sm:$0xff]  ;;  %978 = vmatpush.msra.mxu1 %v328_v40  ;;  %959 = vmatpush.msra.mxu0 %v260_v41  ;;  %v234_v58 = vmax.f32 %v232_v43, %v233_v52  ;;  %v144_v10 = vmax.f32 %v142_v45, %v143_v60 }
  0x9b   :  { %v135_v31 = vmax.f32 %v133_v3, %v134_v15  ;;  %v392_v48 = vld [vmem:[%s4240_s1 + $0x4e8] sm:$0xff]  ;;  %1014 = vmatpush.msra.mxu3 %v472_v44  ;;  %v213_v61 = vrot.slane %v212_v55, 2 }
  0x9c   :  { %v206_v32 = vrot.slane %v205_v21, 1  ;;  %v324_v49 = vld [vmem:[%s4240_s1 + $0x2c8] sm:$0xff]  ;;  %998 = vmatpush.msra.mxu2 %v392_v48  ;;  %v2640_v0 = vsel %vm773_vm0, %v234_v58, %v162_v51 }
  0x9d   :  { %v468_v53 = vld [vmem:[%s4240_s1 + $0x748] sm:$0xff]  ;;  %979 = vmatpush.msra.mxu1 %v324_v49  ;;  %946 = vmatmul.f32.vlgmr.msrb.gmra.mxu3 %v2640_v0  ;;  %v214_v4 = vmax.f32 %v212_v55, %v213_v61 }
  0x9e   :  { %v207_v42 = vmax.f32 %v205_v21, %v206_v32  ;;  %v256_v54 = vld [vmem:[%s4240_s1 + $0xa8] sm:$0xff]  ;;  %1015 = vmatpush.msra.mxu3 %v468_v53 }
  0x9f   :  { %v388_v56 = vld [vmem:[%s4240_s1 + $0x4c8] sm:$0xff]  ;;  %960 = vmatpush.msra.mxu0 %v256_v54  ;;  %v215_v11 = vrot.slane %v214_v4, 1 }
  0xa0   :  { %v2615_v50 = vsel %vm773_vm0, %v207_v42, %v135_v31  ;;  %v320_v57 = vld [vmem:[%s4240_s1 + $0x2a8] sm:$0xff]  ;;  %999 = vmatpush.msra.mxu2 %v388_v56 }
  0xa1   :  { %886 = vmatmul.f32.vlgmr.msrb.gmra.mxu0 %v2615_v50  ;;  %v252_v59 = vld [vmem:[%s4240_s1 + $0x88] sm:$0xff]  ;;  %980 = vmatpush.msra.mxu1 %v320_v57  ;;  %v216_v16 = vmax.f32 %v214_v4, %v215_v11 }
  0xa2   :  { %v464_v62 = vld [vmem:[%s4240_s1 + $0x728] sm:$0xff]  ;;  %961 = vmatpush.msra.mxu0 %v252_v59 }
  0xa3   :  { %v384_v63 = vld [vmem:[%s4240_s1 + $0x4a8] sm:$0xff]  ;;  %1016 = vmatpush.msra.mxu3 %v464_v62  ;;  %v2683_v20 = vsel %vm773_vm0, %v216_v16, %v144_v10 }
  0xa4   :  { %v316_v2 = vld [vmem:[%s4240_s1 + $0x288] sm:$0xff]  ;;  %1000 = vmatpush.msra.mxu2 %v384_v63  ;;  %906 = vmatmul.f32.vlgmr.msrb.gmra.mxu1 %v2683_v20 }
  0xa5   :  { %v248_v3 = vld [vmem:[%s4240_s1 + $0x68] sm:$0xff]  ;;  %981 = vmatpush.msra.mxu1 %v316_v2 }
  0xa6   :  { %v460_v6 = vld [vmem:[%s4240_s1 + $0x708] sm:$0xff]  ;;  %962 = vmatpush.msra.mxu0 %v248_v3 }
  0xa7   :  { %v380_v7 = vld [vmem:[%s4240_s1 + $0x488] sm:$0xff]  ;;  %1017 = vmatpush.msra.mxu3 %v460_v6 }
  0xa8   :  { %v312_v8 = vld [vmem:[%s4240_s1 + $0x268] sm:$0xff]  ;;  %1001 = vmatpush.msra.mxu2 %v380_v7 }
  0xa9   :  { %v244_v9 = vld [vmem:[%s4240_s1 + $0x48] sm:$0xff]  ;;  %982 = vmatpush.msra.mxu1 %v312_v8 }
  0xaa   :  { %v456_v12 = vld [vmem:[%s4240_s1 + $0x6e8] sm:$0xff]  ;;  %963 = vmatpush.msra.mxu0 %v244_v9 }
  0xab   :  { %v376_v13 = vld [vmem:[%s4240_s1 + $0x468] sm:$0xff]  ;;  %1018 = vmatpush.msra.mxu3 %v456_v12 }
  0xac   :  { %v308_v14 = vld [vmem:[%s4240_s1 + $0x248] sm:$0xff]  ;;  %1002 = vmatpush.msra.mxu2 %v376_v13 }
  0xad   :  { %v240_v15 = vld [vmem:[%s4240_s1 + $0x28] sm:$0xff]  ;;  %983 = vmatpush.msra.mxu1 %v308_v14 }
  0xae   :  { %v452_v17 = vld [vmem:[%s4240_s1 + $0x6c8] sm:$0xff]  ;;  %964 = vmatpush.msra.mxu0 %v240_v15 }
  0xaf   :  { %v372_v18 = vld [vmem:[%s4240_s1 + $0x448] sm:$0xff]  ;;  %1019 = vmatpush.msra.mxu3 %v452_v17 }
  0xb0   :  { %v304_v19 = vld [vmem:[%s4240_s1 + $0x228] sm:$0xff]  ;;  %1003 = vmatpush.msra.mxu2 %v372_v18 }
  0xb1   :  { %v448_v21 = vld [vmem:[%s4240_s1 + $0x6a8] sm:$0xff]  ;;  %984 = vmatpush.msra.mxu1 %v304_v19 }
  0xb2   :  { %v236_v22 = vld [vmem:[%s4240_s1 + $0x8] sm:$0xff]  ;;  %1020 = vmatpush.msra.mxu3 %v448_v21 }
  0xb3   :  { %v368_v23 = vld [vmem:[%s4240_s1 + $0x428] sm:$0xff]  ;;  %965 = vmatpush.msra.mxu0 %v236_v22 }
  0xb4   :  { %v300_v24 = vld [vmem:[%s4240_s1 + $0x208] sm:$0xff]  ;;  %1004 = vmatpush.msra.mxu2 %v368_v23 }
  0xb5   :  { %v444_v25 = vld [vmem:[%s4240_s1 + $0x688] sm:$0xff]  ;;  %985 = vmatpush.msra.mxu1 %v300_v24 }
  0xb6   :  { %v552_v26 = vld [vmem:[%s4240_s1 + $0x9e8] sm:$0xff]  ;;  %1021 = vmatpush.msra.mxu3 %v444_v25 }
  0xb7   :  { %v364_v27 = vld [vmem:[%s4240_s1 + $0x408] sm:$0xff]  ;;  %1030 = vmatpush.msrb.mxu0 %v552_v26 }
  0xb8   :  { %v616_v28 = vld [vmem:[%s4240_s1 + $0xbe8] sm:$0xff]  ;;  %1005 = vmatpush.msra.mxu2 %v364_v27 }
  0xb9   :  { %v440_v29 = vld [vmem:[%s4240_s1 + $0x668] sm:$0xff]  ;;  %1050 = vmatpush.msrb.mxu1 %v616_v28 }
  0xba   :  { %v680_v30 = vld [vmem:[%s4240_s1 + $0xde8] sm:$0xff]  ;;  %1022 = vmatpush.msra.mxu3 %v440_v29 }
  0xbb   :  { %v548_v31 = vld [vmem:[%s4240_s1 + $0x9c8] sm:$0xff]  ;;  %1070 = vmatpush.msrb.mxu2 %v680_v30 }
  0xbc   :  { %v612_v32 = vld [vmem:[%s4240_s1 + $0xbc8] sm:$0xff]  ;;  %1031 = vmatpush.msrb.mxu0 %v548_v31 }
  0xbd   :  { %v436_v34 = vld [vmem:[%s4240_s1 + $0x648] sm:$0xff]  ;;  %1051 = vmatpush.msrb.mxu1 %v612_v32 }
  0xbe   :  { %v676_v35 = vld [vmem:[%s4240_s1 + $0xdc8] sm:$0xff]  ;;  %1023 = vmatpush.msra.mxu3 %v436_v34 }
  0xbf   :  { %v544_v36 = vld [vmem:[%s4240_s1 + $0x9a8] sm:$0xff]  ;;  %1071 = vmatpush.msrb.mxu2 %v676_v35 }
  0xc0   :  { %v608_v38 = vld [vmem:[%s4240_s1 + $0xba8] sm:$0xff] }
  0xc1   :  { %v432_v39 = vld [vmem:[%s4240_s1 + $0x628] sm:$0xff] }
  0xc2   :  { %v672_v40 = vld [vmem:[%s4240_s1 + $0xda8] sm:$0xff] }
  0xc3   :  { %v540_v41 = vld [vmem:[%s4240_s1 + $0x988] sm:$0xff] }
  0xc4   :  { %v604_v42 = vld [vmem:[%s4240_s1 + $0xb88] sm:$0xff] }
  0xc5   :  { %12 = vsyncpa [#allocation3], 0  ;;  %v428_v43 = vld [vmem:[%s4240_s1 + $0x608] sm:$0xff]  ;;  %1032 = vmatpush.msrb.mxu0 %v544_v36  ;;  %1052 = vmatpush.msrb.mxu1 %v608_v38  ;;  %vm1806_vm1 = vcmask 58368  }
  0xc6   :  { %v668_v44 = vld [vmem:[%s4240_s1 + $0xd88] sm:$0xff]  ;;  %1024 = vmatpush.msra.mxu3 %v432_v39  ;;  %1072 = vmatpush.msrb.mxu2 %v672_v40  ;;  %v297_v39 = vld [vmem:[%s4240_s1 + $0x1f0] sm:$0xff] }
  0xc7   :  { %v744_v45 = vld [vmem:[%s4240_s1 + $0xfe8] sm:$0xff]  ;;  %1033 = vmatpush.msrb.mxu0 %v540_v41  ;;  %1053 = vmatpush.msrb.mxu1 %v604_v42  ;;  %v361_v40 = vld [vmem:[%s4240_s1 + $0x3f0] sm:$0xff] }
  0xc8   :  { %v536_v46 = vld [vmem:[%s4240_s1 + $0x968] sm:$0xff]  ;;  %1025 = vmatpush.msra.mxu3 %v428_v43  ;;  %1073 = vmatpush.msrb.mxu2 %v668_v44  ;;  %v425_v41 = vld [vmem:[%s4240_s1 + $0x5f0] sm:$0xff] }
  0xc9   :  { %v600_v48 = vld [vmem:[%s4240_s1 + $0xb68] sm:$0xff]  ;;  %1034 = vmatpush.msrb.mxu0 %v536_v46  ;;  %986 = vmatmul.f32.vlgmr.msra.gmra.mxu1 %v2443_v47  ;;  %v293_v43 = vld [vmem:[%s4240_s1 + $0x1d0] sm:$0xff] }
  0xca   :  { %v664_v49 = vld [vmem:[%s4240_s1 + $0xd68] sm:$0xff]  ;;  %1090 = vmatpush.msrb.mxu3 %v744_v45  ;;  %1054 = vmatpush.msrb.mxu1 %v600_v48  ;;  %v357_v44 = vld [vmem:[%s4240_s1 + $0x3d0] sm:$0xff] }
  0xcb   :  { %v740_v51 = vld [vmem:[%s4240_s1 + $0xfc8] sm:$0xff]  ;;  %1074 = vmatpush.msrb.mxu2 %v664_v49  ;;  %966 = vmatmul.f32.vlgmr.msra.gmra.mxu0 %v2421_v33  ;;  %v421_v46 = vld [vmem:[%s4240_s1 + $0x5d0] sm:$0xff] }
  0xcc   :  { %v532_v52 = vld [vmem:[%s4240_s1 + $0x948] sm:$0xff]  ;;  %1091 = vmatpush.msrb.mxu3 %v740_v51  ;;  %1006 = vmatmul.f32.vlgmr.msra.gmra.mxu2 %v2483_v5  ;;  %v489_v48 = vld [vmem:[%s4240_s1 + $0x7f0] sm:$0xff] }
  0xcd   :  { %v596_v53 = vld [vmem:[%s4240_s1 + $0xb48] sm:$0xff]  ;;  %1035 = vmatpush.msrb.mxu0 %v532_v52  ;;  %v289_v49 = vld [vmem:[%s4240_s1 + $0x1b0] sm:$0xff]  ;;  %1026 = vmatmul.f32.vlgmr.msra.gmra.mxu3 %v2556_v1 }
  0xce   :  { %v660_v54 = vld [vmem:[%s4240_s1 + $0xd48] sm:$0xff]  ;;  %1055 = vmatpush.msrb.mxu1 %v596_v53  ;;  %v353_v51 = vld [vmem:[%s4240_s1 + $0x3b0] sm:$0xff] }
  0xcf   :  { %v736_v55 = vld [vmem:[%s4240_s1 + $0xfa8] sm:$0xff]  ;;  %1075 = vmatpush.msrb.mxu2 %v660_v54  ;;  %v417_v52 = vld [vmem:[%s4240_s1 + $0x5b0] sm:$0xff] }
  0xd0   :  { %v528_v56 = vld [vmem:[%s4240_s1 + $0x928] sm:$0xff]  ;;  %1092 = vmatpush.msrb.mxu3 %v736_v55  ;;  %v485_v53 = vld [vmem:[%s4240_s1 + $0x7d0] sm:$0xff] }
  0xd1   :  { %v592_v57 = vld [vmem:[%s4240_s1 + $0xb28] sm:$0xff]  ;;  %1036 = vmatpush.msrb.mxu0 %v528_v56  ;;  %v285_v54 = vld [vmem:[%s4240_s1 + $0x190] sm:$0xff] }
  0xd2   :  { %v656_v58 = vld [vmem:[%s4240_s1 + $0xd28] sm:$0xff]  ;;  %1056 = vmatpush.msrb.mxu1 %v592_v57  ;;  %v349_v55 = vld [vmem:[%s4240_s1 + $0x390] sm:$0xff] }
  0xd3   :  { %v732_v59 = vld [vmem:[%s4240_s1 + $0xf88] sm:$0xff]  ;;  %1076 = vmatpush.msrb.mxu2 %v656_v58  ;;  %v413_v56 = vld [vmem:[%s4240_s1 + $0x590] sm:$0xff] }
  0xd4   :  { %v524_v60 = vld [vmem:[%s4240_s1 + $0x908] sm:$0xff]  ;;  %1093 = vmatpush.msrb.mxu3 %v732_v59  ;;  %v481_v57 = vld [vmem:[%s4240_s1 + $0x7b0] sm:$0xff] }
  0xd5   :  { %v588_v61 = vld [vmem:[%s4240_s1 + $0xb08] sm:$0xff]  ;;  %1037 = vmatpush.msrb.mxu0 %v524_v60  ;;  %v281_v58 = vld [vmem:[%s4240_s1 + $0x170] sm:$0xff] }
  0xd6   :  { %v652_v62 = vld [vmem:[%s4240_s1 + $0xd08] sm:$0xff]  ;;  %1057 = vmatpush.msrb.mxu1 %v588_v61  ;;  %v345_v59 = vld [vmem:[%s4240_s1 + $0x370] sm:$0xff] }
  0xd7   :  { %v728_v63 = vld [vmem:[%s4240_s1 + $0xf68] sm:$0xff]  ;;  %1077 = vmatpush.msrb.mxu2 %v652_v62  ;;  %v409_v60 = vld [vmem:[%s4240_s1 + $0x570] sm:$0xff] }
  0xd8   :  { %v520_v2 = vld [vmem:[%s4240_s1 + $0x8e8] sm:$0xff]  ;;  %1094 = vmatpush.msrb.mxu3 %v728_v63  ;;  %v477_v61 = vld [vmem:[%s4240_s1 + $0x790] sm:$0xff] }
  0xd9   :  { %v584_v3 = vld [vmem:[%s4240_s1 + $0xae8] sm:$0xff]  ;;  %1038 = vmatpush.msrb.mxu0 %v520_v2  ;;  %v277_v62 = vld [vmem:[%s4240_s1 + $0x150] sm:$0xff] }
  0xda   :  { %v648_v4 = vld [vmem:[%s4240_s1 + $0xce8] sm:$0xff]  ;;  %1058 = vmatpush.msrb.mxu1 %v584_v3  ;;  %v341_v63 = vld [vmem:[%s4240_s1 + $0x350] sm:$0xff] }
  0xdb   :  { %v724_v6 = vld [vmem:[%s4240_s1 + $0xf48] sm:$0xff]  ;;  %1078 = vmatpush.msrb.mxu2 %v648_v4  ;;  %v405_v2 = vld [vmem:[%s4240_s1 + $0x550] sm:$0xff] }
  0xdc   :  { %v516_v7 = vld [vmem:[%s4240_s1 + $0x8c8] sm:$0xff]  ;;  %1095 = vmatpush.msrb.mxu3 %v724_v6  ;;  %v473_v3 = vld [vmem:[%s4240_s1 + $0x770] sm:$0xff] }
  0xdd   :  { %v580_v8 = vld [vmem:[%s4240_s1 + $0xac8] sm:$0xff]  ;;  %1039 = vmatpush.msrb.mxu0 %v516_v7  ;;  %v273_v4 = vld [vmem:[%s4240_s1 + $0x130] sm:$0xff] }
  0xde   :  { %v644_v9 = vld [vmem:[%s4240_s1 + $0xcc8] sm:$0xff]  ;;  %1059 = vmatpush.msrb.mxu1 %v580_v8  ;;  %v337_v6 = vld [vmem:[%s4240_s1 + $0x330] sm:$0xff] }
  0xdf   :  { %v720_v10 = vld [vmem:[%s4240_s1 + $0xf28] sm:$0xff]  ;;  %1079 = vmatpush.msrb.mxu2 %v644_v9  ;;  %v401_v7 = vld [vmem:[%s4240_s1 + $0x530] sm:$0xff] }
  0xe0   :  { %v512_v11 = vld [vmem:[%s4240_s1 + $0x8a8] sm:$0xff]  ;;  %1096 = vmatpush.msrb.mxu3 %v720_v10  ;;  %v469_v8 = vld [vmem:[%s4240_s1 + $0x750] sm:$0xff] }
  0xe1   :  { %v576_v12 = vld [vmem:[%s4240_s1 + $0xaa8] sm:$0xff]  ;;  %1040 = vmatpush.msrb.mxu0 %v512_v11  ;;  %v269_v9 = vld [vmem:[%s4240_s1 + $0x110] sm:$0xff] }
  0xe2   :  { %v640_v13 = vld [vmem:[%s4240_s1 + $0xca8] sm:$0xff]  ;;  %1060 = vmatpush.msrb.mxu1 %v576_v12  ;;  %v333_v10 = vld [vmem:[%s4240_s1 + $0x310] sm:$0xff] }
  0xe3   :  { %v716_v14 = vld [vmem:[%s4240_s1 + $0xf08] sm:$0xff]  ;;  %1080 = vmatpush.msrb.mxu2 %v640_v13  ;;  %v397_v11 = vld [vmem:[%s4240_s1 + $0x510] sm:$0xff] }
  0xe4   :  { %v508_v15 = vld [vmem:[%s4240_s1 + $0x888] sm:$0xff]  ;;  %1097 = vmatpush.msrb.mxu3 %v716_v14  ;;  %v465_v12 = vld [vmem:[%s4240_s1 + $0x730] sm:$0xff] }
  0xe5   :  { %v572_v16 = vld [vmem:[%s4240_s1 + $0xa88] sm:$0xff]  ;;  %1041 = vmatpush.msrb.mxu0 %v508_v15  ;;  %v265_v13 = vld [vmem:[%s4240_s1 + $0xf0] sm:$0xff] }
  0xe6   :  { %v636_v17 = vld [vmem:[%s4240_s1 + $0xc88] sm:$0xff]  ;;  %1061 = vmatpush.msrb.mxu1 %v572_v16  ;;  %v329_v14 = vld [vmem:[%s4240_s1 + $0x2f0] sm:$0xff] }
  0xe7   :  { %v712_v18 = vld [vmem:[%s4240_s1 + $0xee8] sm:$0xff]  ;;  %1081 = vmatpush.msrb.mxu2 %v636_v17  ;;  %v393_v15 = vld [vmem:[%s4240_s1 + $0x4f0] sm:$0xff] }
  0xe8   :  { %v504_v19 = vld [vmem:[%s4240_s1 + $0x868] sm:$0xff]  ;;  %1098 = vmatpush.msrb.mxu3 %v712_v18  ;;  %v461_v16 = vld [vmem:[%s4240_s1 + $0x710] sm:$0xff] }
  0xe9   :  { %v568_v21 = vld [vmem:[%s4240_s1 + $0xa68] sm:$0xff]  ;;  %1042 = vmatpush.msrb.mxu0 %v504_v19  ;;  %v261_v17 = vld [vmem:[%s4240_s1 + $0xd0] sm:$0xff] }
  0xea   :  { %v632_v22 = vld [vmem:[%s4240_s1 + $0xc68] sm:$0xff]  ;;  %1062 = vmatpush.msrb.mxu1 %v568_v21  ;;  %v325_v18 = vld [vmem:[%s4240_s1 + $0x2d0] sm:$0xff] }
  0xeb   :  { %v708_v23 = vld [vmem:[%s4240_s1 + $0xec8] sm:$0xff]  ;;  %1082 = vmatpush.msrb.mxu2 %v632_v22  ;;  %v389_v19 = vld [vmem:[%s4240_s1 + $0x4d0] sm:$0xff] }
  0xec   :  { %v500_v24 = vld [vmem:[%s4240_s1 + $0x848] sm:$0xff]  ;;  %1099 = vmatpush.msrb.mxu3 %v708_v23  ;;  %v457_v21 = vld [vmem:[%s4240_s1 + $0x6f0] sm:$0xff] }
  0xed   :  { %v564_v25 = vld [vmem:[%s4240_s1 + $0xa48] sm:$0xff]  ;;  %1043 = vmatpush.msrb.mxu0 %v500_v24  ;;  %v257_v22 = vld [vmem:[%s4240_s1 + $0xb0] sm:$0xff] }
  0xee   :  { %v628_v26 = vld [vmem:[%s4240_s1 + $0xc48] sm:$0xff]  ;;  %1063 = vmatpush.msrb.mxu1 %v564_v25  ;;  %v321_v23 = vld [vmem:[%s4240_s1 + $0x2b0] sm:$0xff] }
  0xef   :  { %v704_v27 = vld [vmem:[%s4240_s1 + $0xea8] sm:$0xff]  ;;  %1083 = vmatpush.msrb.mxu2 %v628_v26  ;;  %v385_v24 = vld [vmem:[%s4240_s1 + $0x4b0] sm:$0xff] }
  0xf0   :  { %v496_v28 = vld [vmem:[%s4240_s1 + $0x828] sm:$0xff]  ;;  %1100 = vmatpush.msrb.mxu3 %v704_v27  ;;  %v453_v25 = vld [vmem:[%s4240_s1 + $0x6d0] sm:$0xff] }
  0xf1   :  { %v560_v29 = vld [vmem:[%s4240_s1 + $0xa28] sm:$0xff]  ;;  %1044 = vmatpush.msrb.mxu0 %v496_v28  ;;  %v253_v26 = vld [vmem:[%s4240_s1 + $0x90] sm:$0xff] }
  0xf2   :  { %v624_v30 = vld [vmem:[%s4240_s1 + $0xc28] sm:$0xff]  ;;  %1064 = vmatpush.msrb.mxu1 %v560_v29  ;;  %v317_v27 = vld [vmem:[%s4240_s1 + $0x290] sm:$0xff] }
  0xf3   :  { %v700_v31 = vld [vmem:[%s4240_s1 + $0xe88] sm:$0xff]  ;;  %1084 = vmatpush.msrb.mxu2 %v624_v30  ;;  %v381_v28 = vld [vmem:[%s4240_s1 + $0x490] sm:$0xff] }
  0xf4   :  { %v492_v32 = vld [vmem:[%s4240_s1 + $0x808] sm:$0xff]  ;;  %1101 = vmatpush.msrb.mxu3 %v700_v31  ;;  %v449_v29 = vld [vmem:[%s4240_s1 + $0x6b0] sm:$0xff] }
  0xf5   :  { %v556_v34 = vld [vmem:[%s4240_s1 + $0xa08] sm:$0xff]  ;;  %1045 = vmatpush.msrb.mxu0 %v492_v32  ;;  %v249_v30 = vld [vmem:[%s4240_s1 + $0x70] sm:$0xff] }
  0xf6   :  { %v620_v35 = vld [vmem:[%s4240_s1 + $0xc08] sm:$0xff]  ;;  %1065 = vmatpush.msrb.mxu1 %v556_v34  ;;  %1046 = vmatmul.f32.vlgmr.msrb.gmra.mxu0 %v2615_v50  ;;  %v313_v31 = vld [vmem:[%s4240_s1 + $0x270] sm:$0xff] }
  0xf7   :  { %v696_v36 = vld [vmem:[%s4240_s1 + $0xe68] sm:$0xff]  ;;  %1085 = vmatpush.msrb.mxu2 %v620_v35  ;;  %1110 = vmatpush.msra.mxu0 %v297_v39  ;;  %v377_v32 = vld [vmem:[%s4240_s1 + $0x470] sm:$0xff] }
  0xf8   :  { %v692_v38 = vld [vmem:[%s4240_s1 + $0xe48] sm:$0xff]  ;;  %1102 = vmatpush.msrb.mxu3 %v696_v36  ;;  %1130 = vmatpush.msra.mxu1 %v361_v40  ;;  %v445_v34 = vld [vmem:[%s4240_s1 + $0x690] sm:$0xff] }
  0xf9   :  { %v688_v42 = vld [vmem:[%s4240_s1 + $0xe28] sm:$0xff]  ;;  %1150 = vmatpush.msra.mxu2 %v425_v41  ;;  %1111 = vmatpush.msra.mxu0 %v293_v43  ;;  %v245_v35 = vld [vmem:[%s4240_s1 + $0x50] sm:$0xff] }
  0xfa   :  { %1103 = vmatpush.msrb.mxu3 %v692_v38  ;;  %v684_v45 = vld [vmem:[%s4240_s1 + $0xe08] sm:$0xff]  ;;  %1131 = vmatpush.msra.mxu1 %v357_v44  ;;  %v309_v36 = vld [vmem:[%s4240_s1 + $0x250] sm:$0xff] }
  0xfb   :  { %1151 = vmatpush.msra.mxu2 %v421_v46  ;;  %1112 = vmatpush.msra.mxu0 %v289_v49  ;;  %v373_v38 = vld [vmem:[%s4240_s1 + $0x450] sm:$0xff] }
  0xfc   :  { %1104 = vmatpush.msrb.mxu3 %v688_v42  ;;  %1132 = vmatpush.msra.mxu1 %v353_v51  ;;  %v441_v39 = vld [vmem:[%s4240_s1 + $0x670] sm:$0xff] }
  0xfd   :  { %1152 = vmatpush.msra.mxu2 %v417_v52  ;;  %1113 = vmatpush.msra.mxu0 %v285_v54  ;;  %v241_v40 = vld [vmem:[%s4240_s1 + $0x30] sm:$0xff] }
  0xfe   :  { %1105 = vmatpush.msrb.mxu3 %v684_v45  ;;  %1133 = vmatpush.msra.mxu1 %v349_v55  ;;  %v305_v41 = vld [vmem:[%s4240_s1 + $0x230] sm:$0xff] }
  0xff   :  { %1153 = vmatpush.msra.mxu2 %v413_v56  ;;  %1114 = vmatpush.msra.mxu0 %v281_v58  ;;  %v369_v42 = vld [vmem:[%s4240_s1 + $0x430] sm:$0xff] }
 0x100   :  { %1170 = vmatpush.msra.mxu3 %v489_v48  ;;  %1086 = vmatmul.f32.vlgmr.msrb.gmra.mxu2 %v2596_v37  ;;  %v437_v43 = vld [vmem:[%s4240_s1 + $0x650] sm:$0xff] }
 0x101   :  { %1134 = vmatpush.msra.mxu1 %v345_v59  ;;  %1154 = vmatpush.msra.mxu2 %v409_v60  ;;  %v237_v44 = vld [vmem:[%s4240_s1 + $0x10] sm:$0xff] }
 0x102   :  { %1171 = vmatpush.msra.mxu3 %v485_v53  ;;  %1115 = vmatpush.msra.mxu0 %v277_v62  ;;  %v301_v45 = vld [vmem:[%s4240_s1 + $0x210] sm:$0xff] }
 0x103   :  { %1106 = vmatmul.f32.vlgmr.msrb.gmra.mxu3 %v2640_v0  ;;  %1135 = vmatpush.msra.mxu1 %v341_v63  ;;  %v365_v46 = vld [vmem:[%s4240_s1 + $0x410] sm:$0xff] }
 0x104   :  { %1172 = vmatpush.msra.mxu3 %v481_v57  ;;  %1155 = vmatpush.msra.mxu2 %v405_v2  ;;  %v433_v48 = vld [vmem:[%s4240_s1 + $0x630] sm:$0xff] }
 0x105   :  { %1066 = vmatmul.f32.vlgmr.msrb.gmra.mxu1 %v2683_v20  ;;  %1116 = vmatpush.msra.mxu0 %v273_v4  ;;  %v553_v49 = vld [vmem:[%s4240_s1 + $0x9f0] sm:$0xff] }
 0x106   :  { %1173 = vmatpush.msra.mxu3 %v477_v61  ;;  %1136 = vmatpush.msra.mxu1 %v337_v6  ;;  %v617_v51 = vld [vmem:[%s4240_s1 + $0xbf0] sm:$0xff] }
 0x107   :  { %1156 = vmatpush.msra.mxu2 %v401_v7  ;;  %1117 = vmatpush.msra.mxu0 %v269_v9  ;;  %v681_v52 = vld [vmem:[%s4240_s1 + $0xdf0] sm:$0xff] }
 0x108   :  { %1174 = vmatpush.msra.mxu3 %v473_v3  ;;  %1137 = vmatpush.msra.mxu1 %v333_v10  ;;  %v429_v53 = vld [vmem:[%s4240_s1 + $0x610] sm:$0xff] }
 0x109   :  { %1157 = vmatpush.msra.mxu2 %v397_v11  ;;  %1118 = vmatpush.msra.mxu0 %v265_v13  ;;  %v549_v54 = vld [vmem:[%s4240_s1 + $0x9d0] sm:$0xff] }
 0x10a   :  { %1175 = vmatpush.msra.mxu3 %v469_v8  ;;  %1138 = vmatpush.msra.mxu1 %v329_v14  ;;  %v613_v55 = vld [vmem:[%s4240_s1 + $0xbd0] sm:$0xff] }
 0x10b   :  { %1158 = vmatpush.msra.mxu2 %v393_v15  ;;  %1119 = vmatpush.msra.mxu0 %v261_v17  ;;  %v677_v56 = vld [vmem:[%s4240_s1 + $0xdd0] sm:$0xff] }
 0x10c   :  { %1176 = vmatpush.msra.mxu3 %v465_v12  ;;  %1139 = vmatpush.msra.mxu1 %v325_v18  ;;  %v745_v57 = vld [vmem:[%s4240_s1 + $0xff0] sm:$0xff] }
 0x10d   :  { %1159 = vmatpush.msra.mxu2 %v389_v19  ;;  %1120 = vmatpush.msra.mxu0 %v257_v22  ;;  %v545_v58 = vld [vmem:[%s4240_s1 + $0x9b0] sm:$0xff] }
 0x10e   :  { %1177 = vmatpush.msra.mxu3 %v461_v16  ;;  %1140 = vmatpush.msra.mxu1 %v321_v23  ;;  %v609_v59 = vld [vmem:[%s4240_s1 + $0xbb0] sm:$0xff] }
 0x10f   :  { %1160 = vmatpush.msra.mxu2 %v385_v24  ;;  %1121 = vmatpush.msra.mxu0 %v253_v26  ;;  %v673_v60 = vld [vmem:[%s4240_s1 + $0xdb0] sm:$0xff] }
 0x110   :  { %1178 = vmatpush.msra.mxu3 %v457_v21  ;;  %1141 = vmatpush.msra.mxu1 %v317_v27  ;;  %v741_v61 = vld [vmem:[%s4240_s1 + $0xfd0] sm:$0xff] }
 0x111   :  { %1161 = vmatpush.msra.mxu2 %v381_v28  ;;  %1122 = vmatpush.msra.mxu0 %v249_v30  ;;  %v541_v62 = vld [vmem:[%s4240_s1 + $0x990] sm:$0xff] }
 0x112   :  { %1179 = vmatpush.msra.mxu3 %v453_v25  ;;  %1142 = vmatpush.msra.mxu1 %v313_v31  ;;  %v605_v63 = vld [vmem:[%s4240_s1 + $0xb90] sm:$0xff] }
 0x113   :  { %1162 = vmatpush.msra.mxu2 %v377_v32  ;;  %1123 = vmatpush.msra.mxu0 %v245_v35  ;;  %v669_v2 = vld [vmem:[%s4240_s1 + $0xd90] sm:$0xff] }
 0x114   :  { %1180 = vmatpush.msra.mxu3 %v449_v29  ;;  %1143 = vmatpush.msra.mxu1 %v309_v36  ;;  %v737_v3 = vld [vmem:[%s4240_s1 + $0xfb0] sm:$0xff] }
 0x115   :  { %1163 = vmatpush.msra.mxu2 %v373_v38  ;;  %1124 = vmatpush.msra.mxu0 %v241_v40  ;;  %v537_v4 = vld [vmem:[%s4240_s1 + $0x970] sm:$0xff] }
 0x116   :  { %1181 = vmatpush.msra.mxu3 %v445_v34  ;;  %1144 = vmatpush.msra.mxu1 %v305_v41  ;;  %v601_v6 = vld [vmem:[%s4240_s1 + $0xb70] sm:$0xff] }
 0x117   :  { %1164 = vmatpush.msra.mxu2 %v369_v42  ;;  %1125 = vmatpush.msra.mxu0 %v237_v44  ;;  %v665_v7 = vld [vmem:[%s4240_s1 + $0xd70] sm:$0xff] }
 0x118   :  { %1182 = vmatpush.msra.mxu3 %v441_v39  ;;  %1145 = vmatpush.msra.mxu1 %v301_v45  ;;  %v733_v8 = vld [vmem:[%s4240_s1 + $0xf90] sm:$0xff] }
 0x119   :  { %1165 = vmatpush.msra.mxu2 %v365_v46  ;;  %1190 = vmatpush.msrb.mxu0 %v553_v49  ;;  %v533_v9 = vld [vmem:[%s4240_s1 + $0x950] sm:$0xff] }
 0x11a   :  { %1183 = vmatpush.msra.mxu3 %v437_v43  ;;  %1210 = vmatpush.msrb.mxu1 %v617_v51  ;;  %v597_v10 = vld [vmem:[%s4240_s1 + $0xb50] sm:$0xff] }
 0x11b   :  { %1230 = vmatpush.msrb.mxu2 %v681_v52  ;;  %1191 = vmatpush.msrb.mxu0 %v549_v54  ;;  %v661_v11 = vld [vmem:[%s4240_s1 + $0xd50] sm:$0xff] }
 0x11c   :  { %1184 = vmatpush.msra.mxu3 %v433_v48  ;;  %1211 = vmatpush.msrb.mxu1 %v613_v55  ;;  %v729_v12 = vld [vmem:[%s4240_s1 + $0xf70] sm:$0xff] }
 0x11d   :  { %1231 = vmatpush.msrb.mxu2 %v677_v56  ;;  %1192 = vmatpush.msrb.mxu0 %v545_v58  ;;  %v529_v13 = vld [vmem:[%s4240_s1 + $0x930] sm:$0xff]  ;;  %v298_v58 = vld [vmem:[%s4240_s1 + $0x1f8] sm:$0xff] }
 0x11e   :  { %1185 = vmatpush.msra.mxu3 %v429_v53  ;;  %1212 = vmatpush.msrb.mxu1 %v609_v59  ;;  %v593_v14 = vld [vmem:[%s4240_s1 + $0xb30] sm:$0xff]  ;;  %v362_v59 = vld [vmem:[%s4240_s1 + $0x3f8] sm:$0xff] }
 0x11f   :  { %1232 = vmatpush.msrb.mxu2 %v673_v60  ;;  %1193 = vmatpush.msrb.mxu0 %v541_v62  ;;  %v657_v15 = vld [vmem:[%s4240_s1 + $0xd30] sm:$0xff]  ;;  %v426_v60 = vld [vmem:[%s4240_s1 + $0x5f8] sm:$0xff] }
 0x120   :  { %1250 = vmatpush.msrb.mxu3 %v745_v57  ;;  %1213 = vmatpush.msrb.mxu1 %v605_v63  ;;  %v725_v16 = vld [vmem:[%s4240_s1 + $0xf50] sm:$0xff]  ;;  %v294_v62 = vld [vmem:[%s4240_s1 + $0x1d8] sm:$0xff] }
 0x121   :  { %1233 = vmatpush.msrb.mxu2 %v669_v2  ;;  %1194 = vmatpush.msrb.mxu0 %v537_v4  ;;  %v525_v17 = vld [vmem:[%s4240_s1 + $0x910] sm:$0xff]  ;;  %v358_v63 = vld [vmem:[%s4240_s1 + $0x3d8] sm:$0xff] }
 0x122   :  { %1251 = vmatpush.msrb.mxu3 %v741_v61  ;;  %1214 = vmatpush.msrb.mxu1 %v601_v6  ;;  %v589_v18 = vld [vmem:[%s4240_s1 + $0xb10] sm:$0xff]  ;;  %v422_v2 = vld [vmem:[%s4240_s1 + $0x5d8] sm:$0xff] }
 0x123   :  { %1234 = vmatpush.msrb.mxu2 %v665_v7  ;;  %1195 = vmatpush.msrb.mxu0 %v533_v9  ;;  %v653_v19 = vld [vmem:[%s4240_s1 + $0xd10] sm:$0xff]  ;;  %v290_v4 = vld [vmem:[%s4240_s1 + $0x1b8] sm:$0xff] }
 0x124   :  { %1252 = vmatpush.msrb.mxu3 %v737_v3  ;;  %1215 = vmatpush.msrb.mxu1 %v597_v10  ;;  %v721_v21 = vld [vmem:[%s4240_s1 + $0xf30] sm:$0xff]  ;;  %v490_v3 = vld [vmem:[%s4240_s1 + $0x7f8] sm:$0xff] }
 0x125   :  { %1235 = vmatpush.msrb.mxu2 %v661_v11  ;;  %1196 = vmatpush.msrb.mxu0 %v529_v13  ;;  %v521_v22 = vld [vmem:[%s4240_s1 + $0x8f0] sm:$0xff]  ;;  %v354_v6 = vld [vmem:[%s4240_s1 + $0x3b8] sm:$0xff] }
 0x126   :  { %1253 = vmatpush.msrb.mxu3 %v733_v8  ;;  %1216 = vmatpush.msrb.mxu1 %v593_v14  ;;  %v585_v23 = vld [vmem:[%s4240_s1 + $0xaf0] sm:$0xff]  ;;  %v418_v7 = vld [vmem:[%s4240_s1 + $0x5b8] sm:$0xff] }
 0x127   :  { %1236 = vmatpush.msrb.mxu2 %v657_v15  ;;  %1197 = vmatpush.msrb.mxu0 %v525_v17  ;;  %v649_v24 = vld [vmem:[%s4240_s1 + $0xcf0] sm:$0xff]  ;;  %v486_v8 = vld [vmem:[%s4240_s1 + $0x7d8] sm:$0xff] }
 0x128   :  { %1254 = vmatpush.msrb.mxu3 %v729_v12  ;;  %1217 = vmatpush.msrb.mxu1 %v589_v18  ;;  %v717_v25 = vld [vmem:[%s4240_s1 + $0xf10] sm:$0xff]  ;;  %v286_v9 = vld [vmem:[%s4240_s1 + $0x198] sm:$0xff] }
 0x129   :  { %1237 = vmatpush.msrb.mxu2 %v653_v19  ;;  %v517_v26 = vld [vmem:[%s4240_s1 + $0x8d0] sm:$0xff]  ;;  %1198 = vmatpush.msrb.mxu0 %v521_v22  ;;  %v350_v10 = vld [vmem:[%s4240_s1 + $0x398] sm:$0xff] }
 0x12a   :  { %1255 = vmatpush.msrb.mxu3 %v725_v16  ;;  %v581_v27 = vld [vmem:[%s4240_s1 + $0xad0] sm:$0xff]  ;;  %1218 = vmatpush.msrb.mxu1 %v585_v23  ;;  %v414_v11 = vld [vmem:[%s4240_s1 + $0x598] sm:$0xff] }
 0x12b   :  { %v645_v28 = vld [vmem:[%s4240_s1 + $0xcd0] sm:$0xff]  ;;  %1238 = vmatpush.msrb.mxu2 %v649_v24  ;;  %1199 = vmatpush.msrb.mxu0 %v517_v26  ;;  %v482_v12 = vld [vmem:[%s4240_s1 + $0x7b8] sm:$0xff] }
 0x12c   :  { %1256 = vmatpush.msrb.mxu3 %v721_v21  ;;  %v713_v29 = vld [vmem:[%s4240_s1 + $0xef0] sm:$0xff]  ;;  %1219 = vmatpush.msrb.mxu1 %v581_v27  ;;  %v282_v13 = vld [vmem:[%s4240_s1 + $0x178] sm:$0xff] }
 0x12d   :  { %v513_v30 = vld [vmem:[%s4240_s1 + $0x8b0] sm:$0xff]  ;;  %1239 = vmatpush.msrb.mxu2 %v645_v28  ;;  %1126 = vmatmul.f32.vlgmr.msra.gmra.mxu0 %v2421_v33  ;;  %v346_v14 = vld [vmem:[%s4240_s1 + $0x378] sm:$0xff] }
 0x12e   :  { %1257 = vmatpush.msrb.mxu3 %v717_v25  ;;  %v577_v31 = vld [vmem:[%s4240_s1 + $0xab0] sm:$0xff]  ;;  %1200 = vmatpush.msrb.mxu0 %v513_v30  ;;  %v410_v15 = vld [vmem:[%s4240_s1 + $0x578] sm:$0xff] }
 0x12f   :  { %v641_v32 = vld [vmem:[%s4240_s1 + $0xcb0] sm:$0xff]  ;;  %1220 = vmatpush.msrb.mxu1 %v577_v31  ;;  %1166 = vmatmul.f32.vlgmr.msra.gmra.mxu2 %v2483_v5  ;;  %v478_v16 = vld [vmem:[%s4240_s1 + $0x798] sm:$0xff] }
 0x130   :  { %v709_v34 = vld [vmem:[%s4240_s1 + $0xed0] sm:$0xff]  ;;  %1258 = vmatpush.msrb.mxu3 %v713_v29  ;;  %1240 = vmatpush.msrb.mxu2 %v641_v32  ;;  %v278_v17 = vld [vmem:[%s4240_s1 + $0x158] sm:$0xff] }
 0x131   :  { %v509_v35 = vld [vmem:[%s4240_s1 + $0x890] sm:$0xff]  ;;  %1186 = vmatmul.f32.vlgmr.msra.gmra.mxu3 %v2556_v1  ;;  %1146 = vmatmul.f32.vlgmr.msra.gmra.mxu1 %v2443_v47  ;;  %v342_v18 = vld [vmem:[%s4240_s1 + $0x358] sm:$0xff] }
 0x132   :  { %v573_v36 = vld [vmem:[%s4240_s1 + $0xa90] sm:$0xff]  ;;  %1259 = vmatpush.msrb.mxu3 %v709_v34  ;;  %1201 = vmatpush.msrb.mxu0 %v509_v35  ;;  %v406_v19 = vld [vmem:[%s4240_s1 + $0x558] sm:$0xff] }
 0x133   :  { %v637_v38 = vld [vmem:[%s4240_s1 + $0xc90] sm:$0xff]  ;;  %1221 = vmatpush.msrb.mxu1 %v573_v36  ;;  %v474_v21 = vld [vmem:[%s4240_s1 + $0x778] sm:$0xff] }
 0x134   :  { %v705_v39 = vld [vmem:[%s4240_s1 + $0xeb0] sm:$0xff]  ;;  %1241 = vmatpush.msrb.mxu2 %v637_v38  ;;  %v274_v22 = vld [vmem:[%s4240_s1 + $0x138] sm:$0xff] }
 0x135   :  { %v505_v40 = vld [vmem:[%s4240_s1 + $0x870] sm:$0xff]  ;;  %1260 = vmatpush.msrb.mxu3 %v705_v39  ;;  %v338_v23 = vld [vmem:[%s4240_s1 + $0x338] sm:$0xff] }
 0x136   :  { %v569_v41 = vld [vmem:[%s4240_s1 + $0xa70] sm:$0xff]  ;;  %1202 = vmatpush.msrb.mxu0 %v505_v40  ;;  %v402_v24 = vld [vmem:[%s4240_s1 + $0x538] sm:$0xff] }
 0x137   :  { %v633_v42 = vld [vmem:[%s4240_s1 + $0xc70] sm:$0xff]  ;;  %1222 = vmatpush.msrb.mxu1 %v569_v41  ;;  %v470_v25 = vld [vmem:[%s4240_s1 + $0x758] sm:$0xff] }
 0x138   :  { %v701_v43 = vld [vmem:[%s4240_s1 + $0xe90] sm:$0xff]  ;;  %1242 = vmatpush.msrb.mxu2 %v633_v42  ;;  %v270_v26 = vld [vmem:[%s4240_s1 + $0x118] sm:$0xff] }
 0x139   :  { %v501_v44 = vld [vmem:[%s4240_s1 + $0x850] sm:$0xff]  ;;  %1261 = vmatpush.msrb.mxu3 %v701_v43  ;;  %v334_v27 = vld [vmem:[%s4240_s1 + $0x318] sm:$0xff] }
 0x13a   :  { %v565_v45 = vld [vmem:[%s4240_s1 + $0xa50] sm:$0xff]  ;;  %1203 = vmatpush.msrb.mxu0 %v501_v44  ;;  %v398_v28 = vld [vmem:[%s4240_s1 + $0x518] sm:$0xff] }
 0x13b   :  { %v629_v46 = vld [vmem:[%s4240_s1 + $0xc50] sm:$0xff]  ;;  %1223 = vmatpush.msrb.mxu1 %v565_v45  ;;  %v466_v29 = vld [vmem:[%s4240_s1 + $0x738] sm:$0xff] }
 0x13c   :  { %v697_v48 = vld [vmem:[%s4240_s1 + $0xe70] sm:$0xff]  ;;  %1243 = vmatpush.msrb.mxu2 %v629_v46  ;;  %v266_v30 = vld [vmem:[%s4240_s1 + $0xf8] sm:$0xff] }
 0x13d   :  { %v497_v49 = vld [vmem:[%s4240_s1 + $0x830] sm:$0xff]  ;;  %1262 = vmatpush.msrb.mxu3 %v697_v48  ;;  %v330_v31 = vld [vmem:[%s4240_s1 + $0x2f8] sm:$0xff] }
 0x13e   :  { %v561_v51 = vld [vmem:[%s4240_s1 + $0xa30] sm:$0xff]  ;;  %1204 = vmatpush.msrb.mxu0 %v497_v49  ;;  %v394_v32 = vld [vmem:[%s4240_s1 + $0x4f8] sm:$0xff] }
 0x13f   :  { %v625_v52 = vld [vmem:[%s4240_s1 + $0xc30] sm:$0xff]  ;;  %1224 = vmatpush.msrb.mxu1 %v561_v51  ;;  %v462_v34 = vld [vmem:[%s4240_s1 + $0x718] sm:$0xff] }
 0x140   :  { %v693_v53 = vld [vmem:[%s4240_s1 + $0xe50] sm:$0xff]  ;;  %1244 = vmatpush.msrb.mxu2 %v625_v52  ;;  %v262_v35 = vld [vmem:[%s4240_s1 + $0xd8] sm:$0xff] }
 0x141   :  { %v493_v54 = vld [vmem:[%s4240_s1 + $0x810] sm:$0xff]  ;;  %1263 = vmatpush.msrb.mxu3 %v693_v53  ;;  %v326_v36 = vld [vmem:[%s4240_s1 + $0x2d8] sm:$0xff] }
 0x142   :  { %v557_v55 = vld [vmem:[%s4240_s1 + $0xa10] sm:$0xff]  ;;  %1205 = vmatpush.msrb.mxu0 %v493_v54  ;;  %v390_v38 = vld [vmem:[%s4240_s1 + $0x4d8] sm:$0xff] }
 0x143   :  { %v621_v56 = vld [vmem:[%s4240_s1 + $0xc10] sm:$0xff]  ;;  %1225 = vmatpush.msrb.mxu1 %v557_v55  ;;  %1206 = vmatmul.f32.vlgmr.msrb.gmra.mxu0 %v2615_v50  ;;  %v458_v39 = vld [vmem:[%s4240_s1 + $0x6f8] sm:$0xff] }
 0x144   :  { %v689_v57 = vld [vmem:[%s4240_s1 + $0xe30] sm:$0xff]  ;;  %1245 = vmatpush.msrb.mxu2 %v621_v56  ;;  %1270 = vmatpush.msra.mxu0 %v298_v58  ;;  %v258_v40 = vld [vmem:[%s4240_s1 + $0xb8] sm:$0xff] }
 0x145   :  { %v685_v61 = vld [vmem:[%s4240_s1 + $0xe10] sm:$0xff]  ;;  %1264 = vmatpush.msrb.mxu3 %v689_v57  ;;  %1246 = vmatmul.f32.vlgmr.msrb.gmra.mxu2 %v2596_v37  ;;  %v322_v41 = vld [vmem:[%s4240_s1 + $0x2b8] sm:$0xff] }
 0x146   :  { %1290 = vmatpush.msra.mxu1 %v362_v59  ;;  %1310 = vmatpush.msra.mxu2 %v426_v60  ;;  %v386_v42 = vld [vmem:[%s4240_s1 + $0x4b8] sm:$0xff] }
 0x147   :  { %1265 = vmatpush.msrb.mxu3 %v685_v61  ;;  %1271 = vmatpush.msra.mxu0 %v294_v62  ;;  %v454_v43 = vld [vmem:[%s4240_s1 + $0x6d8] sm:$0xff] }
 0x148   :  { %1266 = vmatmul.f32.vlgmr.msrb.gmra.mxu3 %v2640_v0  ;;  %1291 = vmatpush.msra.mxu1 %v358_v63  ;;  %v254_v44 = vld [vmem:[%s4240_s1 + $0x98] sm:$0xff] }
 0x149   :  { %1311 = vmatpush.msra.mxu2 %v422_v2  ;;  %1330 = vmatpush.msra.mxu3 %v490_v3  ;;  %v318_v45 = vld [vmem:[%s4240_s1 + $0x298] sm:$0xff] }
 0x14a   :  { %1226 = vmatmul.f32.vlgmr.msrb.gmra.mxu1 %v2683_v20  ;;  %1272 = vmatpush.msra.mxu0 %v290_v4  ;;  %v382_v46 = vld [vmem:[%s4240_s1 + $0x498] sm:$0xff] }
 0x14b   :  { %1292 = vmatpush.msra.mxu1 %v354_v6  ;;  %1312 = vmatpush.msra.mxu2 %v418_v7  ;;  %v450_v48 = vld [vmem:[%s4240_s1 + $0x6b8] sm:$0xff] }
 0x14c   :  { %1331 = vmatpush.msra.mxu3 %v486_v8  ;;  %1273 = vmatpush.msra.mxu0 %v286_v9  ;;  %v250_v49 = vld [vmem:[%s4240_s1 + $0x78] sm:$0xff] }
 0x14d   :  { %1293 = vmatpush.msra.mxu1 %v350_v10  ;;  %1313 = vmatpush.msra.mxu2 %v414_v11  ;;  %v314_v51 = vld [vmem:[%s4240_s1 + $0x278] sm:$0xff] }
 0x14e   :  { %1332 = vmatpush.msra.mxu3 %v482_v12  ;;  %1274 = vmatpush.msra.mxu0 %v282_v13  ;;  %v378_v52 = vld [vmem:[%s4240_s1 + $0x478] sm:$0xff] }
 0x14f   :  { %1294 = vmatpush.msra.mxu1 %v346_v14  ;;  %1314 = vmatpush.msra.mxu2 %v410_v15  ;;  %v446_v53 = vld [vmem:[%s4240_s1 + $0x698] sm:$0xff] }
 0x150   :  { %1333 = vmatpush.msra.mxu3 %v478_v16  ;;  %1275 = vmatpush.msra.mxu0 %v278_v17  ;;  %v246_v54 = vld [vmem:[%s4240_s1 + $0x58] sm:$0xff] }
 0x151   :  { %1295 = vmatpush.msra.mxu1 %v342_v18  ;;  %1315 = vmatpush.msra.mxu2 %v406_v19  ;;  %v310_v55 = vld [vmem:[%s4240_s1 + $0x258] sm:$0xff] }
 0x152   :  { %1334 = vmatpush.msra.mxu3 %v474_v21  ;;  %1276 = vmatpush.msra.mxu0 %v274_v22  ;;  %v374_v56 = vld [vmem:[%s4240_s1 + $0x458] sm:$0xff] }
 0x153   :  { %1296 = vmatpush.msra.mxu1 %v338_v23  ;;  %1316 = vmatpush.msra.mxu2 %v402_v24  ;;  %v442_v57 = vld [vmem:[%s4240_s1 + $0x678] sm:$0xff] }
 0x154   :  { %1335 = vmatpush.msra.mxu3 %v470_v25  ;;  %1277 = vmatpush.msra.mxu0 %v270_v26  ;;  %v242_v58 = vld [vmem:[%s4240_s1 + $0x38] sm:$0xff] }
 0x155   :  { %1297 = vmatpush.msra.mxu1 %v334_v27  ;;  %1317 = vmatpush.msra.mxu2 %v398_v28  ;;  %v306_v59 = vld [vmem:[%s4240_s1 + $0x238] sm:$0xff] }
 0x156   :  { %1336 = vmatpush.msra.mxu3 %v466_v29  ;;  %1278 = vmatpush.msra.mxu0 %v266_v30  ;;  %v370_v60 = vld [vmem:[%s4240_s1 + $0x438] sm:$0xff] }
 0x157   :  { %1298 = vmatpush.msra.mxu1 %v330_v31  ;;  %1318 = vmatpush.msra.mxu2 %v394_v32  ;;  %v438_v61 = vld [vmem:[%s4240_s1 + $0x658] sm:$0xff] }
 0x158   :  { %1337 = vmatpush.msra.mxu3 %v462_v34  ;;  %1279 = vmatpush.msra.mxu0 %v262_v35  ;;  %v238_v62 = vld [vmem:[%s4240_s1 + $0x18] sm:$0xff] }
 0x159   :  { %1299 = vmatpush.msra.mxu1 %v326_v36  ;;  %1319 = vmatpush.msra.mxu2 %v390_v38  ;;  %v302_v63 = vld [vmem:[%s4240_s1 + $0x218] sm:$0xff]  ;;  %v3584_v36 = vpop.f32.mrf.mxu0 }
 0x15a   :  { %1338 = vmatpush.msra.mxu3 %v458_v39  ;;  %1280 = vmatpush.msra.mxu0 %v258_v40  ;;  %v366_v2 = vld [vmem:[%s4240_s1 + $0x418] sm:$0xff] }
 0x15b   :  { %1300 = vmatpush.msra.mxu1 %v322_v41  ;;  %1320 = vmatpush.msra.mxu2 %v386_v42  ;;  %v434_v3 = vld [vmem:[%s4240_s1 + $0x638] sm:$0xff] }
 0x15c   :  { %1339 = vmatpush.msra.mxu3 %v454_v43  ;;  %1281 = vmatpush.msra.mxu0 %v254_v44  ;;  %v554_v4 = vld [vmem:[%s4240_s1 + $0x9f8] sm:$0xff] }
 0x15d   :  { %1301 = vmatpush.msra.mxu1 %v318_v45  ;;  %1321 = vmatpush.msra.mxu2 %v382_v46  ;;  %v618_v6 = vld [vmem:[%s4240_s1 + $0xbf8] sm:$0xff]  ;;  %v3610_v46 = vpop.f32.mrf.mxu1 }
 0x15e   :  { %1340 = vmatpush.msra.mxu3 %v450_v48  ;;  %1282 = vmatpush.msra.mxu0 %v250_v49  ;;  %v682_v7 = vld [vmem:[%s4240_s1 + $0xdf8] sm:$0xff] }
 0x15f   :  { %1302 = vmatpush.msra.mxu1 %v314_v51  ;;  %1322 = vmatpush.msra.mxu2 %v378_v52  ;;  %v430_v8 = vld [vmem:[%s4240_s1 + $0x618] sm:$0xff] }
 0x160   :  { %1341 = vmatpush.msra.mxu3 %v446_v53  ;;  %1283 = vmatpush.msra.mxu0 %v246_v54  ;;  %v550_v9 = vld [vmem:[%s4240_s1 + $0x9d8] sm:$0xff] }
 0x161   :  { %1303 = vmatpush.msra.mxu1 %v310_v55  ;;  %1323 = vmatpush.msra.mxu2 %v374_v56  ;;  %v614_v10 = vld [vmem:[%s4240_s1 + $0xbd8] sm:$0xff] }
 0x162   :  { %1342 = vmatpush.msra.mxu3 %v442_v57  ;;  %1284 = vmatpush.msra.mxu0 %v242_v58  ;;  %v678_v11 = vld [vmem:[%s4240_s1 + $0xdd8] sm:$0xff]  ;;  %v3636_v57 = vpop.f32.mrf.mxu2 }
 0x163   :  { %1304 = vmatpush.msra.mxu1 %v306_v59  ;;  %1324 = vmatpush.msra.mxu2 %v370_v60  ;;  %v746_v12 = vld [vmem:[%s4240_s1 + $0xff8] sm:$0xff] }
 0x164   :  { %1343 = vmatpush.msra.mxu3 %v438_v61  ;;  %1285 = vmatpush.msra.mxu0 %v238_v62  ;;  %v546_v13 = vld [vmem:[%s4240_s1 + $0x9b8] sm:$0xff]  ;;  %v3647_v61 = vpop.f32.mrf.mxu0 }
 0x165   :  { %1305 = vmatpush.msra.mxu1 %v302_v63  ;;  %1325 = vmatpush.msra.mxu2 %v366_v2  ;;  %v610_v14 = vld [vmem:[%s4240_s1 + $0xbb8] sm:$0xff] }
 0x166   :  { %1344 = vmatpush.msra.mxu3 %v434_v3  ;;  %1350 = vmatpush.msrb.mxu0 %v554_v4  ;;  %v674_v15 = vld [vmem:[%s4240_s1 + $0xdb8] sm:$0xff]  ;;  %v3661_v4 = vpop.f32.mrf.mxu3 }
 0x167   :  { %1370 = vmatpush.msrb.mxu1 %v618_v6  ;;  %1390 = vmatpush.msrb.mxu2 %v682_v7  ;;  %v742_v16 = vld [vmem:[%s4240_s1 + $0xfd8] sm:$0xff]  ;;  %v3667_v6 = vld [vmem:[%s4241_s2] sm:$0xf] }
 0x168   :  { %1345 = vmatpush.msra.mxu3 %v430_v8  ;;  %1351 = vmatpush.msrb.mxu0 %v550_v9  ;;  %v542_v17 = vld [vmem:[%s4240_s1 + $0x998] sm:$0xff]  ;;  %v3675_v9 = vpop.f32.mrf.mxu1 }
 0x169   :  { %1371 = vmatpush.msrb.mxu1 %v614_v10  ;;  %1391 = vmatpush.msrb.mxu2 %v678_v11  ;;  %v606_v18 = vld [vmem:[%s4240_s1 + $0xb98] sm:$0xff] }
 0x16a   :  { %1410 = vmatpush.msrb.mxu3 %v746_v12  ;;  %1352 = vmatpush.msrb.mxu0 %v546_v13  ;;  %v670_v19 = vld [vmem:[%s4240_s1 + $0xd98] sm:$0xff]  ;;  %v749_v12 = vperm.slane %v3667_v6, 0 }
 0x16b   :  { %1372 = vmatpush.msrb.mxu1 %v610_v14  ;;  %1392 = vmatpush.msrb.mxu2 %v674_v15  ;;  %v738_v21 = vld [vmem:[%s4240_s1 + $0xfb8] sm:$0xff]  ;;  %v750_v15 = vperm.slane %v3667_v6, 1 }
 0x16c   :  { %v538_v22 = vld [vmem:[%s4240_s1 + $0x978] sm:$0xff]  ;;  %1411 = vmatpush.msrb.mxu3 %v742_v16  ;;  %1353 = vmatpush.msrb.mxu0 %v542_v17  ;;  %v3702_v16 = vpop.f32.mrf.mxu2 }
 0x16d   :  { %v602_v23 = vld [vmem:[%s4240_s1 + $0xb78] sm:$0xff]  ;;  %1373 = vmatpush.msrb.mxu1 %v606_v18  ;;  %1393 = vmatpush.msrb.mxu2 %v670_v19  ;;  %v967_v19 = vpop.f32.mrf.mxu0 }
 0x16e   :  { %v666_v24 = vld [vmem:[%s4240_s1 + $0xd78] sm:$0xff]  ;;  %1412 = vmatpush.msrb.mxu3 %v738_v21  ;;  %1354 = vmatpush.msrb.mxu0 %v538_v22  ;;  %v808_v22 = vadd.f32 %v3584_v36, %v749_v12 }
 0x16f   :  { %v734_v25 = vld [vmem:[%s4240_s1 + $0xf98] sm:$0xff]  ;;  %1374 = vmatpush.msrb.mxu1 %v602_v23  ;;  %1394 = vmatpush.msrb.mxu2 %v666_v24  ;;  %v1496_v23 = vld [vmem:[%s4242_s3 + $0x1f0] sm:$0xff] }
 0x170   :  { %v534_v26 = vld [vmem:[%s4240_s1 + $0x958] sm:$0xff]  ;;  %1413 = vmatpush.msrb.mxu3 %v734_v25  ;;  %1326 = vmatmul.f32.vlgmr.msra.gmra.mxu2 %v2483_v5  ;;  %v968_v25 = vadd.f32 %v967_v19, %v750_v15 }
 0x171   :  { %v598_v27 = vld [vmem:[%s4240_s1 + $0xb58] sm:$0xff]  ;;  %1355 = vmatpush.msrb.mxu0 %v534_v26  ;;  %1346 = vmatmul.f32.vlgmr.msra.gmra.mxu3 %v2556_v1  ;;  %v3724_v26 = vpop.f32.mrf.mxu3 }
 0x172   :  { %v662_v28 = vld [vmem:[%s4240_s1 + $0xd58] sm:$0xff]  ;;  %1375 = vmatpush.msrb.mxu1 %v598_v27  ;;  %1286 = vmatmul.f32.vlgmr.msra.gmra.mxu0 %v2421_v33  ;;  %v1462_v27 = vld [vmem:[%s4242_s3 + $0xe0] sm:$0xff] }
 0x173   :  { %v730_v29 = vld [vmem:[%s4240_s1 + $0xf78] sm:$0xff]  ;;  %1395 = vmatpush.msrb.mxu2 %v662_v28  ;;  %1306 = vmatmul.f32.vlgmr.msra.gmra.mxu1 %v2443_v47  ;;  %v1464_v47 = vld [vmem:[%s4242_s3 + $0xf0] sm:$0xff]  ;;  %v987_v28 = vpop.f32.mrf.mxu1 }
 0x174   :  { %v530_v30 = vld [vmem:[%s4240_s1 + $0x938] sm:$0xff]  ;;  %1414 = vmatpush.msrb.mxu3 %v730_v29  ;;  %v1494_v29 = vld [vmem:[%s4242_s3 + $0x1e0] sm:$0xff]  ;;  %v1007_v36 = vpop.f32.mrf.mxu2 }
 0x175   :  { %v594_v31 = vld [vmem:[%s4240_s1 + $0xb38] sm:$0xff]  ;;  %1356 = vmatpush.msrb.mxu0 %v530_v30  ;;  %v1528_v30 = vld [vmem:[%s4242_s3 + $0x2f0] sm:$0xff] }
 0x176   :  { %v658_v32 = vld [vmem:[%s4240_s1 + $0xd38] sm:$0xff]  ;;  %1376 = vmatpush.msrb.mxu1 %v594_v31  ;;  %v828_v31 = vadd.f32 %v3610_v46, %v808_v22  ;;  %v1520_v46 = vld [vmem:[%s4242_s3 + $0x2b0] sm:$0xff] }
 0x177   :  { %v726_v34 = vld [vmem:[%s4240_s1 + $0xf58] sm:$0xff]  ;;  %1396 = vmatpush.msrb.mxu2 %v658_v32  ;;  %v1492_v32 = vld [vmem:[%s4242_s3 + $0x1d0] sm:$0xff] }
 0x178   :  { %v526_v35 = vld [vmem:[%s4240_s1 + $0x918] sm:$0xff]  ;;  %1415 = vmatpush.msrb.mxu3 %v726_v34  ;;  %v988_v34 = vadd.f32 %v987_v28, %v968_v25  ;;  %v1504_v22 = vld [vmem:[%s4242_s3 + $0x230] sm:$0xff]  ;;  %v1466_v28 = vld [vmem:[%s4242_s3 + $0x100] sm:$0xff] }
 0x179   :  { %v590_v38 = vld [vmem:[%s4240_s1 + $0xb18] sm:$0xff]  ;;  %1357 = vmatpush.msrb.mxu0 %v526_v35  ;;  %v1526_v35 = vld [vmem:[%s4242_s3 + $0x2e0] sm:$0xff]  ;;  %v1468_v25 = vld [vmem:[%s4242_s3 + $0x110] sm:$0xff] }
 0x17a   :  { %v654_v39 = vld [vmem:[%s4240_s1 + $0xd18] sm:$0xff]  ;;  %1377 = vmatpush.msrb.mxu1 %v590_v38  ;;  %v1524_v38 = vld [vmem:[%s4242_s3 + $0x2d0] sm:$0xff] }
 0x17b   :  { %v722_v40 = vld [vmem:[%s4240_s1 + $0xf38] sm:$0xff]  ;;  %1397 = vmatpush.msrb.mxu2 %v654_v39  ;;  %v848_v39 = vadd.f32 %v3636_v57, %v828_v31  ;;  %v1516_v57 = vld [vmem:[%s4242_s3 + $0x290] sm:$0xff] }
 0x17c   :  { %v522_v41 = vld [vmem:[%s4240_s1 + $0x8f8] sm:$0xff]  ;;  %1416 = vmatpush.msrb.mxu3 %v722_v40  ;;  %v1456_v40 = vld [vmem:[%s4242_s3 + $0xb0] sm:$0xff] }
 0x17d   :  { %v586_v42 = vld [vmem:[%s4240_s1 + $0xaf8] sm:$0xff]  ;;  %1358 = vmatpush.msrb.mxu0 %v522_v41  ;;  %v1008_v41 = vadd.f32 %v1007_v36, %v988_v34  ;;  %v1463_v34 = vld [vmem:[%s4242_s3 + $0xe8] sm:$0xff] }
 0x17e   :  { %v650_v43 = vld [vmem:[%s4240_s1 + $0xcf8] sm:$0xff]  ;;  %1378 = vmatpush.msrb.mxu1 %v586_v42  ;;  %v1522_v42 = vld [vmem:[%s4242_s3 + $0x2c0] sm:$0xff] }
 0x17f   :  { %v718_v44 = vld [vmem:[%s4240_s1 + $0xf18] sm:$0xff]  ;;  %1398 = vmatpush.msrb.mxu2 %v650_v43  ;;  %v1027_v43 = vpop.f32.mrf.mxu3 }
 0x180   :  { %v518_v45 = vld [vmem:[%s4240_s1 + $0x8d8] sm:$0xff]  ;;  %1417 = vmatpush.msrb.mxu3 %v718_v44  ;;  %v1454_v44 = vld [vmem:[%s4242_s3 + $0xa0] sm:$0xff] }
 0x181   :  { %v582_v48 = vld [vmem:[%s4240_s1 + $0xad8] sm:$0xff]  ;;  %1359 = vmatpush.msrb.mxu0 %v518_v45  ;;  %v1486_v45 = vld [vmem:[%s4242_s3 + $0x1a0] sm:$0xff] }
 0x182   :  { %v646_v49 = vld [vmem:[%s4240_s1 + $0xcd8] sm:$0xff]  ;;  %1379 = vmatpush.msrb.mxu1 %v582_v48  ;;  %v868_v48 = vadd.f32 %v3661_v4, %v848_v39  ;;  %v1512_v4 = vld [vmem:[%s4242_s3 + $0x270] sm:$0xff]  ;;  %v1459_v39 = vld [vmem:[%s4242_s3 + $0xc8] sm:$0xff] }
 0x183   :  { %v714_v51 = vld [vmem:[%s4240_s1 + $0xef8] sm:$0xff]  ;;  %1399 = vmatpush.msrb.mxu2 %v646_v49  ;;  %v1452_v49 = vld [vmem:[%s4242_s3 + $0x90] sm:$0xff]  ;;  %v1087_v12 = vpop.f32.mrf.mxu2 }
 0x184   :  { %v514_v52 = vld [vmem:[%s4240_s1 + $0x8b8] sm:$0xff]  ;;  %1418 = vmatpush.msrb.mxu3 %v714_v51  ;;  %v1028_v51 = vadd.f32 %v1027_v43, %v1008_v41  ;;  %v1491_v41 = vld [vmem:[%s4242_s3 + $0x1c8] sm:$0xff] }
 0x185   :  { %v578_v53 = vld [vmem:[%s4240_s1 + $0xab8] sm:$0xff]  ;;  %1360 = vmatpush.msrb.mxu0 %v514_v52  ;;  %v1484_v52 = vld [vmem:[%s4242_s3 + $0x190] sm:$0xff] }
 0x186   :  { %v642_v54 = vld [vmem:[%s4240_s1 + $0xcb8] sm:$0xff]  ;;  %1380 = vmatpush.msrb.mxu1 %v578_v53  ;;  %v1518_v53 = vld [vmem:[%s4242_s3 + $0x2a0] sm:$0xff] }
 0x187   :  { %v710_v55 = vld [vmem:[%s4240_s1 + $0xed8] sm:$0xff]  ;;  %1400 = vmatpush.msrb.mxu2 %v642_v54  ;;  %v1047_v54 = vpop.f32.mrf.mxu0  ;;  %v1107_v19 = vpop.f32.mrf.mxu3 }
 0x188   :  { %v510_v56 = vld [vmem:[%s4240_s1 + $0x898] sm:$0xff]  ;;  %1419 = vmatpush.msrb.mxu3 %v710_v55  ;;  %v1450_v55 = vld [vmem:[%s4242_s3 + $0x80] sm:$0xff] }
 0x189   :  { %v574_v58 = vld [vmem:[%s4240_s1 + $0xa98] sm:$0xff]  ;;  %1361 = vmatpush.msrb.mxu0 %v510_v56  ;;  %v1482_v56 = vld [vmem:[%s4242_s3 + $0x180] sm:$0xff] }
 0x18a   :  { %v638_v59 = vld [vmem:[%s4240_s1 + $0xc98] sm:$0xff]  ;;  %1381 = vmatpush.msrb.mxu1 %v574_v58  ;;  %v888_v58 = vadd.f32 %v3647_v61, %v868_v48  ;;  %v1446_v61 = vld [vmem:[%s4242_s3 + $0x60] sm:$0xff]  ;;  %v1560_v48 = vld [vmem:[%s4242_s3 + $0x3f0] sm:$0xff] }
 0x18b   :  { %v706_v60 = vld [vmem:[%s4240_s1 + $0xeb8] sm:$0xff]  ;;  %1401 = vmatpush.msrb.mxu2 %v638_v59  ;;  %v1448_v59 = vld [vmem:[%s4242_s3 + $0x70] sm:$0xff] }
 0x18c   :  { %v506_v62 = vld [vmem:[%s4240_s1 + $0x878] sm:$0xff]  ;;  %1420 = vmatpush.msrb.mxu3 %v706_v60  ;;  %v1048_v60 = vadd.f32 %v1047_v54, %v1028_v51  ;;  %v1519_v54 = vld [vmem:[%s4242_s3 + $0x2a8] sm:$0xff] }
 0x18d   :  { %v570_v63 = vld [vmem:[%s4240_s1 + $0xa78] sm:$0xff]  ;;  %1362 = vmatpush.msrb.mxu0 %v506_v62  ;;  %v1480_v62 = vld [vmem:[%s4242_s3 + $0x170] sm:$0xff] }
 0x18e   :  { %v634_v2 = vld [vmem:[%s4240_s1 + $0xc78] sm:$0xff]  ;;  %1382 = vmatpush.msrb.mxu1 %v570_v63  ;;  %v1514_v63 = vld [vmem:[%s4242_s3 + $0x280] sm:$0xff] }
 0x18f   :  { %v702_v3 = vld [vmem:[%s4240_s1 + $0xe98] sm:$0xff]  ;;  %1402 = vmatpush.msrb.mxu2 %v634_v2  ;;  %v1067_v2 = vpop.f32.mrf.mxu1 }
 0x190   :  { %v502_v7 = vld [vmem:[%s4240_s1 + $0x858] sm:$0xff]  ;;  %1421 = vmatpush.msrb.mxu3 %v702_v3  ;;  %v1478_v3 = vld [vmem:[%s4242_s3 + $0x160] sm:$0xff] }
 0x191   :  { %v566_v8 = vld [vmem:[%s4240_s1 + $0xa58] sm:$0xff]  ;;  %1363 = vmatpush.msrb.mxu0 %v502_v7  ;;  %v908_v7 = vadd.f32 %v3675_v9, %v888_v58  ;;  %v1442_v9 = vld [vmem:[%s4242_s3 + $0x40] sm:$0xff] }
 0x192   :  { %v630_v5 = vld [vmem:[%s4240_s1 + $0xc58] sm:$0xff]  ;;  %1383 = vmatpush.msrb.mxu1 %v566_v8  ;;  %v1444_v8 = vld [vmem:[%s4242_s3 + $0x50] sm:$0xff] }
 0x193   :  { %v698_v10 = vld [vmem:[%s4240_s1 + $0xe78] sm:$0xff]  ;;  %1403 = vmatpush.msrb.mxu2 %v630_v5  ;;  %v1068_v5 = vadd.f32 %v1067_v2, %v1048_v60  ;;  %v1447_v60 = vld [vmem:[%s4242_s3 + $0x68] sm:$0xff] }
 0x194   :  { %v498_v11 = vld [vmem:[%s4240_s1 + $0x838] sm:$0xff]  ;;  %1422 = vmatpush.msrb.mxu3 %v698_v10  ;;  %v1476_v10 = vld [vmem:[%s4242_s3 + $0x150] sm:$0xff]  ;;  %v1479_v2 = vld [vmem:[%s4242_s3 + $0x168] sm:$0xff] }
 0x195   :  { %v562_v13 = vld [vmem:[%s4240_s1 + $0xa38] sm:$0xff]  ;;  %1364 = vmatpush.msrb.mxu0 %v498_v11  ;;  %v1510_v11 = vld [vmem:[%s4242_s3 + $0x260] sm:$0xff]  ;;  %v1088_v15 = vadd.f32 %v1087_v12, %v1068_v5  ;;  %v1511_v12 = vld [vmem:[%s4242_s3 + $0x268] sm:$0xff] }
 0x196   :  { %v626_v14 = vld [vmem:[%s4240_s1 + $0xc38] sm:$0xff]  ;;  %1384 = vmatpush.msrb.mxu1 %v562_v13  ;;  %v1474_v13 = vld [vmem:[%s4242_s3 + $0x140] sm:$0xff] }
 0x197   :  { %v694_v33 = vld [vmem:[%s4240_s1 + $0xe58] sm:$0xff]  ;;  %1404 = vmatpush.msrb.mxu2 %v626_v14  ;;  %v1508_v14 = vld [vmem:[%s4242_s3 + $0x250] sm:$0xff] }
 0x198   :  { %v494_v1 = vld [vmem:[%s4240_s1 + $0x818] sm:$0xff]  ;;  %1423 = vmatpush.msrb.mxu3 %v694_v33  ;;  %v928_v33 = vadd.f32 %v3702_v16, %v908_v7  ;;  %v1438_v16 = vld [vmem:[%s4242_s3 + $0x20] sm:$0xff] }
 0x199   :  { %v558_v17 = vld [vmem:[%s4240_s1 + $0xa18] sm:$0xff]  ;;  %1365 = vmatpush.msrb.mxu0 %v494_v1  ;;  %v1440_v1 = vld [vmem:[%s4242_s3 + $0x30] sm:$0xff] }
 0x19a   :  { %v622_v18 = vld [vmem:[%s4240_s1 + $0xc18] sm:$0xff]  ;;  %1385 = vmatpush.msrb.mxu1 %v558_v17  ;;  %1366 = vmatmul.f32.vlgmr.msrb.gmra.mxu0 %v2615_v50  ;;  %v1458_v50 = vld [vmem:[%s4242_s3 + $0xc0] sm:$0xff]  ;;  %v1472_v17 = vld [vmem:[%s4242_s3 + $0x130] sm:$0xff] }
 0x19b   :  { %v690_v21 = vld [vmem:[%s4240_s1 + $0xe38] sm:$0xff]  ;;  %1405 = vmatpush.msrb.mxu2 %v622_v18  ;;  %1568 = vmatpush.msra.mxu0 %v1464_v47  ;;  %v1506_v18 = vld [vmem:[%s4242_s3 + $0x240] sm:$0xff]  ;;  %v3854_v47 = vadd.f32 %v3724_v26, %v928_v33  ;;  %v1552_v33 = vld [vmem:[%s4242_s3 + $0x3b0] sm:$0xff] }
 0x19c   :  { %v686_v24 = vld [vmem:[%s4240_s1 + $0xe18] sm:$0xff]  ;;  %1424 = vmatpush.msrb.mxu3 %v690_v21  ;;  %1406 = vmatmul.f32.vlgmr.msrb.gmra.mxu2 %v2596_v37  ;;  %v1460_v37 = vld [vmem:[%s4242_s3 + $0xd0] sm:$0xff]  ;;  %v1470_v21 = vld [vmem:[%s4242_s3 + $0x120] sm:$0xff]  ;;  %s1828_s1 = sshll.u32 %s4246_s7, 4  ;;  %s1829_s1 = int_to_ptr.hbm [resolvable:$true] %s1828_s1 }
 0x19d   :  { %1588 = vmatpush.msra.mxu1 %v1496_v23  ;;  %1569 = vmatpush.msra.mxu0 %v1462_v27  ;;  %v1436_v23 = vld [vmem:[%s4242_s3 + $0x10] sm:$0xff]  ;;  %v1502_v27 = vld [vmem:[%s4242_s3 + $0x220] sm:$0xff]  ;;  %v1461_v36 = vld [vmem:[%s4242_s3 + $0xd8] sm:$0xff] }
 0x19e   :  { %1425 = vmatpush.msrb.mxu3 %v686_v24  ;;  %1608 = vmatpush.msra.mxu2 %v1528_v30  ;;  %v3859_v24 = vadd.f32 %v1107_v19, %v1088_v15  ;;  %v1434_v26 = vld [vmem:[%s4242_s3] sm:$0xff]  ;;  %v1465_v30 = vld [vmem:[%s4242_s3 + $0xf8] sm:$0xff] }
 0x19f   :  { %1426 = vmatmul.f32.vlgmr.msrb.gmra.mxu3 %v2640_v0  ;;  %1589 = vmatpush.msra.mxu1 %v1494_v29  ;;  %v1490_v0 = vld [vmem:[%s4242_s3 + $0x1c0] sm:$0xff]  ;;  %v1430_v29 = vmax.f32 %v3854_v47, 0.0  ;;  %v1489_v43 = vld [vmem:[%s4242_s3 + $0x1b8] sm:$0xff]  ;;  %v1540_v47 = vld [vmem:[%s4242_s3 + $0x350] sm:$0xff] }
 0x1a0   :  { %1386 = vmatmul.f32.vlgmr.msrb.gmra.mxu1 %v2683_v20  ;;  %1570 = vmatpush.msra.mxu0 %v1460_v37  ;;  %v1488_v20 = vld [vmem:[%s4242_s3 + $0x1b0] sm:$0xff]  ;;  %v1431_v31 = vmax.f32 %v3859_v24, 0.0  ;;  %v1497_v37 = vld [vmem:[%s4242_s3 + $0x1f8] sm:$0xff]  ;;  %v1550_v19 = vld [vmem:[%s4242_s3 + $0x3a0] sm:$0xff] }
 0x1a1   :  { %1590 = vmatpush.msra.mxu1 %v1492_v32  ;;  %1609 = vmatpush.msra.mxu2 %v1526_v35  ;;  %v1500_v32 = vld [vmem:[%s4242_s3 + $0x210] sm:$0xff]  ;;  %v1495_v35 = vld [vmem:[%s4242_s3 + $0x1e8] sm:$0xff]  ;;  %v1521_v51 = vld [vmem:[%s4242_s3 + $0x2b8] sm:$0xff] }
 0x1a2   :  { %1571 = vmatpush.msra.mxu0 %v1458_v50  ;;  %v1498_v50 = vld [vmem:[%s4242_s3 + $0x200] sm:$0xff]  ;;  %1628 = vmatpush.msra.mxu3 %v1560_v48  ;;  %v1481_v58 = vld [vmem:[%s4242_s3 + $0x178] sm:$0xff] }
 0x1a3   :  { %1591 = vmatpush.msra.mxu1 %v1490_v0  ;;  %1610 = vmatpush.msra.mxu2 %v1524_v38  ;;  %v1529_v0 = vld [vmem:[%s4242_s3 + $0x2f8] sm:$0xff]  ;;  %v1538_v24 = vld [vmem:[%s4242_s3 + $0x340] sm:$0xff] }
 0x1a4   :  { %1572 = vmatpush.msra.mxu0 %v1456_v40  ;;  %v1493_v38 = vld [vmem:[%s4242_s3 + $0x1d8] sm:$0xff]  ;;  %v1527_v40 = vld [vmem:[%s4242_s3 + $0x2e8] sm:$0xff]  ;;  %v1534_v48 = vld [vmem:[%s4242_s3 + $0x320] sm:$0xff] }
 0x1a5   :  { %1592 = vmatpush.msra.mxu1 %v1488_v20  ;;  %1611 = vmatpush.msra.mxu2 %v1522_v42  ;;  %v1457_v20 = vld [vmem:[%s4242_s3 + $0xb8] sm:$0xff] }
 0x1a6   :  { %1573 = vmatpush.msra.mxu0 %v1454_v44  ;;  %v1525_v42 = vld [vmem:[%s4242_s3 + $0x2d8] sm:$0xff]  ;;  %v1455_v44 = vld [vmem:[%s4242_s3 + $0xa8] sm:$0xff] }
 0x1a7   :  { %1593 = vmatpush.msra.mxu1 %v1486_v45  ;;  %1612 = vmatpush.msra.mxu2 %v1520_v46  ;;  %v1523_v45 = vld [vmem:[%s4242_s3 + $0x2c8] sm:$0xff]  ;;  %v1513_v7 = vld [vmem:[%s4242_s3 + $0x278] sm:$0xff] }
 0x1a8   :  { %1574 = vmatpush.msra.mxu0 %v1452_v49  ;;  %v1487_v46 = vld [vmem:[%s4242_s3 + $0x1a8] sm:$0xff]  ;;  %v1453_v49 = vld [vmem:[%s4242_s3 + $0x98] sm:$0xff] }
 0x1a9   :  { %1594 = vmatpush.msra.mxu1 %v1484_v52  ;;  %1613 = vmatpush.msra.mxu2 %v1518_v53  ;;  %v1485_v52 = vld [vmem:[%s4242_s3 + $0x198] sm:$0xff]  ;;  %v1451_v53 = vld [vmem:[%s4242_s3 + $0x88] sm:$0xff] }
 0x1aa   :  { %1575 = vmatpush.msra.mxu0 %v1450_v55  ;;  %v1483_v55 = vld [vmem:[%s4242_s3 + $0x188] sm:$0xff] }
 0x1ab   :  { %1595 = vmatpush.msra.mxu1 %v1482_v56  ;;  %1614 = vmatpush.msra.mxu2 %v1516_v57  ;;  %v1449_v56 = vld [vmem:[%s4242_s3 + $0x78] sm:$0xff] }
 0x1ac   :  { %1576 = vmatpush.msra.mxu0 %v1448_v59  ;;  %v1517_v57 = vld [vmem:[%s4242_s3 + $0x298] sm:$0xff]  ;;  %v751_v59 = vperm.slane %v3667_v6, 2 }
 0x1ad   :  { %1596 = vmatpush.msra.mxu1 %v1480_v62  ;;  %1615 = vmatpush.msra.mxu2 %v1514_v63  ;;  %v1515_v62 = vld [vmem:[%s4242_s3 + $0x288] sm:$0xff]  ;;  %v1558_v63 = vld [vmem:[%s4242_s3 + $0x3e0] sm:$0xff] }
 0x1ae   :  { %1577 = vmatpush.msra.mxu0 %v1446_v61  ;;  %v1556_v61 = vld [vmem:[%s4242_s3 + $0x3d0] sm:$0xff]  ;;  %1629 = vmatpush.msra.mxu3 %v1558_v63  ;;  %v1541_v63 = vld [vmem:[%s4242_s3 + $0x358] sm:$0xff] }
 0x1af   :  { %1597 = vmatpush.msra.mxu1 %v1478_v3  ;;  %1616 = vmatpush.msra.mxu2 %v1512_v4  ;;  %v1445_v3 = vld [vmem:[%s4242_s3 + $0x58] sm:$0xff]  ;;  %v1127_v4 = vpop.f32.mrf.mxu0 }
 0x1b0   :  { %1578 = vmatpush.msra.mxu0 %v1444_v8  ;;  %v1477_v8 = vld [vmem:[%s4242_s3 + $0x158] sm:$0xff]  ;;  %v1128_v5 = vadd.f32 %v1127_v4, %v751_v59  ;;  %1630 = vmatpush.msra.mxu3 %v1556_v61  ;;  %v1547_v59 = vld [vmem:[%s4242_s3 + $0x388] sm:$0xff] }
 0x1b1   :  { %1598 = vmatpush.msra.mxu1 %v1476_v10  ;;  %1617 = vmatpush.msra.mxu2 %v1510_v11  ;;  %v1554_v10 = vld [vmem:[%s4242_s3 + $0x3c0] sm:$0xff]  ;;  %v1443_v11 = vld [vmem:[%s4242_s3 + $0x48] sm:$0xff]  ;;  %v1537_v61 = vld [vmem:[%s4242_s3 + $0x338] sm:$0xff] }
 0x1b2   :  { %1579 = vmatpush.msra.mxu0 %v1442_v9  ;;  %v1475_v9 = vld [vmem:[%s4242_s3 + $0x148] sm:$0xff]  ;;  %1631 = vmatpush.msra.mxu3 %v1554_v10  ;;  %v1533_v4 = vld [vmem:[%s4242_s3 + $0x318] sm:$0xff] }
 0x1b3   :  { %1599 = vmatpush.msra.mxu1 %v1474_v13  ;;  %1618 = vmatpush.msra.mxu2 %v1508_v14  ;;  %v1147_v13 = vpop.f32.mrf.mxu1  ;;  %v1167_v14 = vpop.f32.mrf.mxu2 }
 0x1b4   :  { %1580 = vmatpush.msra.mxu0 %v1440_v1  ;;  %v1441_v1 = vld [vmem:[%s4242_s3 + $0x38] sm:$0xff]  ;;  %v1148_v15 = vadd.f32 %v1147_v13, %v1128_v5  ;;  %1632 = vmatpush.msra.mxu3 %v1552_v33 }
 0x1b5   :  { %1600 = vmatpush.msra.mxu1 %v1472_v17  ;;  %1619 = vmatpush.msra.mxu2 %v1506_v18  ;;  %v1509_v17 = vld [vmem:[%s4242_s3 + $0x258] sm:$0xff] }
 0x1b6   :  { %1581 = vmatpush.msra.mxu0 %v1438_v16  ;;  %v1473_v18 = vld [vmem:[%s4242_s3 + $0x138] sm:$0xff]  ;;  %v1439_v16 = vld [vmem:[%s4242_s3 + $0x28] sm:$0xff]  ;;  %1633 = vmatpush.msra.mxu3 %v1550_v19 }
 0x1b7   :  { %1601 = vmatpush.msra.mxu1 %v1470_v21  ;;  %1620 = vmatpush.msra.mxu2 %v1504_v22  ;;  %v1168_v21 = vadd.f32 %v1167_v14, %v1148_v15  ;;  %v1187_v22 = vpop.f32.mrf.mxu3 }
 0x1b8   :  { %1582 = vmatpush.msra.mxu0 %v1436_v23  ;;  %v1507_v23 = vld [vmem:[%s4242_s3 + $0x248] sm:$0xff] }
 0x1b9   :  { %1602 = vmatpush.msra.mxu1 %v1468_v25  ;;  %1621 = vmatpush.msra.mxu2 %v1502_v27  ;;  %v1471_v25 = vld [vmem:[%s4242_s3 + $0x128] sm:$0xff]  ;;  %v1548_v27 = vld [vmem:[%s4242_s3 + $0x390] sm:$0xff] }
 0x1ba   :  { %1583 = vmatpush.msra.mxu0 %v1434_v26  ;;  %v1437_v26 = vld [vmem:[%s4242_s3 + $0x18] sm:$0xff]  ;;  %1634 = vmatpush.msra.mxu3 %v1548_v27 }
 0x1bb   :  { %1603 = vmatpush.msra.mxu1 %v1466_v28  ;;  %1584 = vmatmul.f32.vlgmr.msra.gmra.mxu0 %v1430_v29  ;;  %v1188_v28 = vadd.f32 %v1187_v22, %v1168_v21  ;;  %v1761_v27 = vld [vmem:[%s4244_s5 + $0xf8] sm:$0xff] }
 0x1bc   :  { %1604 = vmatmul.f32.vlgmr.msra.gmra.mxu1 %v1431_v31  ;;  %1648 = vmatpush.msrb.mxu0 %v1465_v30  ;;  %v1505_v30 = vld [vmem:[%s4242_s3 + $0x238] sm:$0xff] }
 0x1bd   :  { %1668 = vmatpush.msrb.mxu1 %v1497_v37  ;;  %1622 = vmatpush.msra.mxu2 %v1500_v32  ;;  %v1469_v37 = vld [vmem:[%s4242_s3 + $0x118] sm:$0xff]  ;;  %v1546_v32 = vld [vmem:[%s4242_s3 + $0x380] sm:$0xff] }
 0x1be   :  { %1649 = vmatpush.msrb.mxu0 %v1463_v34  ;;  %v1435_v34 = vld [vmem:[%s4242_s3 + $0x8] sm:$0xff]  ;;  %1635 = vmatpush.msra.mxu3 %v1546_v32  ;;  %v1758_v32 = vld [vmem:[%s4244_s5 + $0xe0] sm:$0xff] }
 0x1bf   :  { %1669 = vmatpush.msrb.mxu1 %v1495_v35  ;;  %1623 = vmatpush.msra.mxu2 %v1498_v50  ;;  %v1503_v50 = vld [vmem:[%s4242_s3 + $0x228] sm:$0xff] }
 0x1c0   :  { %1650 = vmatpush.msrb.mxu0 %v1461_v36  ;;  %v1207_v35 = vpop.f32.mrf.mxu0  ;;  %v1467_v36 = vld [vmem:[%s4242_s3 + $0x108] sm:$0xff] }
 0x1c1   :  { %1688 = vmatpush.msrb.mxu2 %v1529_v0  ;;  %1670 = vmatpush.msrb.mxu1 %v1493_v38  ;;  %v1208_v0 = vadd.f32 %v1207_v35, %v1188_v28  ;;  %v1501_v38 = vld [vmem:[%s4242_s3 + $0x218] sm:$0xff]  ;;  %v1760_v28 = vld [vmem:[%s4244_s5 + $0xf0] sm:$0xff] }
 0x1c2   :  { %1651 = vmatpush.msrb.mxu0 %v1459_v39  ;;  %v1757_v35 = vld [vmem:[%s4244_s5 + $0xd8] sm:$0xff] }
 0x1c3   :  { %1689 = vmatpush.msrb.mxu2 %v1527_v40  ;;  %1671 = vmatpush.msrb.mxu1 %v1491_v41  ;;  %v1544_v41 = vld [vmem:[%s4242_s3 + $0x370] sm:$0xff] }
 0x1c4   :  { %1652 = vmatpush.msrb.mxu0 %v1457_v20  ;;  %1636 = vmatpush.msra.mxu3 %v1544_v41  ;;  %v1737_v41 = vld [vmem:[%s4244_s5 + $0x38] sm:$0xff] }
 0x1c5   :  { %1690 = vmatpush.msrb.mxu2 %v1525_v42  ;;  %1672 = vmatpush.msrb.mxu1 %v1489_v43  ;;  %v1499_v42 = vld [vmem:[%s4242_s3 + $0x208] sm:$0xff]  ;;  %v1542_v43 = vld [vmem:[%s4242_s3 + $0x360] sm:$0xff] }
 0x1c6   :  { %1653 = vmatpush.msrb.mxu0 %v1455_v44  ;;  %1637 = vmatpush.msra.mxu3 %v1542_v43  ;;  %v1735_v43 = vld [vmem:[%s4244_s5 + $0x28] sm:$0xff] }
 0x1c7   :  { %1691 = vmatpush.msrb.mxu2 %v1523_v45  ;;  %1673 = vmatpush.msrb.mxu1 %v1487_v46  ;;  %v1227_v39 = vpop.f32.mrf.mxu1  ;;  %v1536_v46 = vld [vmem:[%s4242_s3 + $0x330] sm:$0xff] }
 0x1c8   :  { %1654 = vmatpush.msrb.mxu0 %v1453_v49  ;;  %v1247_v40 = vpop.f32.mrf.mxu2  ;;  %v1228_v20 = vadd.f32 %v1227_v39, %v1208_v0  ;;  %1638 = vmatpush.msra.mxu3 %v1540_v47  ;;  %v1532_v49 = vld [vmem:[%s4242_s3 + $0x310] sm:$0xff]  ;;  %v1739_v0 = vld [vmem:[%s4244_s5 + $0x48] sm:$0xff]  ;;  %v1738_v39 = vld [vmem:[%s4244_s5 + $0x40] sm:$0xff] }
 0x1c9   :  { %1692 = vmatpush.msrb.mxu2 %v1521_v51  ;;  %1674 = vmatpush.msrb.mxu1 %v1485_v52  ;;  %v1530_v51 = vld [vmem:[%s4242_s3 + $0x300] sm:$0xff]  ;;  %v1561_v52 = vld [vmem:[%s4242_s3 + $0x3f8] sm:$0xff]  ;;  %v1732_v47 = vld [vmem:[%s4244_s5 + $0x10] sm:$0xff] }
 0x1ca   :  { %1655 = vmatpush.msrb.mxu0 %v1451_v53  ;;  %v1248_v44 = vadd.f32 %v1247_v40, %v1228_v20  ;;  %1639 = vmatpush.msra.mxu3 %v1538_v24  ;;  %v1559_v53 = vld [vmem:[%s4242_s3 + $0x3e8] sm:$0xff]  ;;  %v1754_v40 = vld [vmem:[%s4244_s5 + $0xc0] sm:$0xff]  ;;  %v1753_v20 = vld [vmem:[%s4244_s5 + $0xb8] sm:$0xff] }
 0x1cb   :  { %1693 = vmatpush.msrb.mxu2 %v1519_v54  ;;  %1675 = vmatpush.msrb.mxu1 %v1483_v55  ;;  %v1267_v45 = vpop.f32.mrf.mxu3  ;;  %v1557_v54 = vld [vmem:[%s4242_s3 + $0x3d8] sm:$0xff]  ;;  %v1555_v55 = vld [vmem:[%s4242_s3 + $0x3c8] sm:$0xff] }
 0x1cc   :  { %1656 = vmatpush.msrb.mxu0 %v1449_v56  ;;  %1640 = vmatpush.msra.mxu3 %v1536_v46  ;;  %v1553_v56 = vld [vmem:[%s4242_s3 + $0x3b8] sm:$0xff]  ;;  %v1731_v24 = vld [vmem:[%s4244_s5 + $0x8] sm:$0xff]  ;;  %v1730_v46 = vld [vmem:[%s4244_s5] sm:$0xff] }
 0x1cd   :  { %1694 = vmatpush.msrb.mxu2 %v1517_v57  ;;  %1676 = vmatpush.msrb.mxu1 %v1481_v58  ;;  %v1551_v57 = vld [vmem:[%s4242_s3 + $0x3a8] sm:$0xff]  ;;  %v1549_v58 = vld [vmem:[%s4242_s3 + $0x398] sm:$0xff] }
 0x1ce   :  { %1657 = vmatpush.msrb.mxu0 %v1447_v60  ;;  %1641 = vmatpush.msra.mxu3 %v1534_v48  ;;  %v1545_v60 = vld [vmem:[%s4242_s3 + $0x378] sm:$0xff]  ;;  %v1750_v48 = vld [vmem:[%s4244_s5 + $0xa0] sm:$0xff] }
 0x1cf   :  { %1695 = vmatpush.msrb.mxu2 %v1515_v62  ;;  %1677 = vmatpush.msrb.mxu1 %v1479_v2  ;;  %v1543_v62 = vld [vmem:[%s4242_s3 + $0x368] sm:$0xff] }
 0x1d0   :  { %1658 = vmatpush.msrb.mxu0 %v1445_v3  ;;  %1642 = vmatpush.msra.mxu3 %v1532_v49  ;;  %v1539_v2 = vld [vmem:[%s4242_s3 + $0x348] sm:$0xff]  ;;  %v1749_v49 = vld [vmem:[%s4244_s5 + $0x98] sm:$0xff] }
 0x1d1   :  { %1696 = vmatpush.msrb.mxu2 %v1513_v7  ;;  %1678 = vmatpush.msrb.mxu1 %v1477_v8  ;;  %v1535_v3 = vld [vmem:[%s4242_s3 + $0x328] sm:$0xff]  ;;  %v752_v8 = vperm.slane %v3667_v6, 3  ;;  %v1745_v6 = vld [vmem:[%s4244_s5 + $0x78] sm:$0xff] }
 0x1d2   :  { %1659 = vmatpush.msrb.mxu0 %v1443_v11  ;;  %1643 = vmatpush.msra.mxu3 %v1530_v51  ;;  %v1531_v7 = vld [vmem:[%s4242_s3 + $0x308] sm:$0xff]  ;;  %v1748_v51 = vld [vmem:[%s4244_s5 + $0x90] sm:$0xff] }
 0x1d3   :  { %1697 = vmatpush.msrb.mxu2 %v1511_v12  ;;  %1679 = vmatpush.msrb.mxu1 %v1475_v9 }
 0x1d4   :  { %1660 = vmatpush.msrb.mxu0 %v1441_v1  ;;  %1708 = vmatpush.msrb.mxu3 %v1561_v52  ;;  %v1747_v52 = vld [vmem:[%s4244_s5 + $0x88] sm:$0xff] }
 0x1d5   :  { %1698 = vmatpush.msrb.mxu2 %v1509_v17  ;;  %1680 = vmatpush.msrb.mxu1 %v1473_v18 }
 0x1d6   :  { %1661 = vmatpush.msrb.mxu0 %v1439_v16  ;;  %1709 = vmatpush.msrb.mxu3 %v1559_v53  ;;  %v1746_v53 = vld [vmem:[%s4244_s5 + $0x80] sm:$0xff] }
 0x1d7   :  { %1699 = vmatpush.msrb.mxu2 %v1507_v23  ;;  %1681 = vmatpush.msrb.mxu1 %v1471_v25  ;;  %v1744_v25 = vld [vmem:[%s4244_s5 + $0x70] sm:$0xff] }
 0x1d8   :  { %1662 = vmatpush.msrb.mxu0 %v1437_v26  ;;  %1710 = vmatpush.msrb.mxu3 %v1557_v54  ;;  %v1743_v26 = vld [vmem:[%s4244_s5 + $0x68] sm:$0xff]  ;;  %v1562_v54 = vld [vmem:[%s4243_s4] sm:$0x3] }
 0x1d9   :  { %1700 = vmatpush.msrb.mxu2 %v1505_v30  ;;  %1682 = vmatpush.msrb.mxu1 %v1469_v37  ;;  %v1759_v30 = vld [vmem:[%s4244_s5 + $0xe8] sm:$0xff]  ;;  %v1742_v37 = vld [vmem:[%s4244_s5 + $0x60] sm:$0xff] }
 0x1da   :  { %1663 = vmatpush.msrb.mxu0 %v1435_v34  ;;  %1711 = vmatpush.msrb.mxu3 %v1555_v55  ;;  %v1741_v34 = vld [vmem:[%s4244_s5 + $0x58] sm:$0xff]  ;;  %v1564_v55 = vperm.slane %v1562_v54, 0 }
 0x1db   :  { %1701 = vmatpush.msrb.mxu2 %v1503_v50  ;;  %1683 = vmatpush.msrb.mxu1 %v1467_v36  ;;  %v1740_v50 = vld [vmem:[%s4244_s5 + $0x50] sm:$0xff] }
 0x1dc   :  { %1664 = vmatmul.f32.vlgmr.msrb.gmra.mxu0 %v1430_v29  ;;  %1684 = vmatmul.f32.vlgmr.msrb.gmra.mxu1 %v1431_v31  ;;  %v1268_v29 = vadd.f32 %v1267_v45, %v1248_v44  ;;  %v1756_v36 = vld [vmem:[%s4244_s5 + $0xd0] sm:$0xff]  ;;  %v1734_v44 = vld [vmem:[%s4244_s5 + $0x20] sm:$0xff]  ;;  %v1733_v45 = vld [vmem:[%s4244_s5 + $0x18] sm:$0xff] }
 0x1dd   :  { %1702 = vmatpush.msrb.mxu2 %v1501_v38  ;;  %1712 = vmatpush.msrb.mxu3 %v1553_v56  ;;  %v1755_v38 = vld [vmem:[%s4244_s5 + $0xc8] sm:$0xff] }
 0x1de   :  { %v1432_v31 = vmax.f32 %v1268_v29, 0.0  ;;  %1766 = vmatpush.msra.mxu0 %v1745_v6  ;;  %1786 = vmatpush.msra.mxu1 %v1761_v27  ;;  %v1752_v29 = vld [vmem:[%s4244_s5 + $0xb0] sm:$0xff] }
 0x1df   :  { %1703 = vmatpush.msrb.mxu2 %v1499_v42  ;;  %1713 = vmatpush.msrb.mxu3 %v1551_v57  ;;  %v1736_v42 = vld [vmem:[%s4244_s5 + $0x30] sm:$0xff] }
 0x1e0   :  { %1624 = vmatmul.f32.vlgmr.msra.gmra.mxu2 %v1432_v31  ;;  %1767 = vmatpush.msra.mxu0 %v1744_v25 }
 0x1e1   :  { %1714 = vmatpush.msrb.mxu3 %v1549_v58  ;;  %1787 = vmatpush.msra.mxu1 %v1760_v28 }
 0x1e2   :  { %1768 = vmatpush.msra.mxu0 %v1743_v26 }
 0x1e3   :  { %1715 = vmatpush.msrb.mxu3 %v1547_v59  ;;  %1788 = vmatpush.msra.mxu1 %v1759_v30 }
 0x1e4   :  { %1769 = vmatpush.msra.mxu0 %v1742_v37 }
 0x1e5   :  { %1716 = vmatpush.msrb.mxu3 %v1545_v60  ;;  %1789 = vmatpush.msra.mxu1 %v1758_v32 }
 0x1e6   :  { %1770 = vmatpush.msra.mxu0 %v1741_v34 }
 0x1e7   :  { %1717 = vmatpush.msrb.mxu3 %v1543_v62  ;;  %1790 = vmatpush.msra.mxu1 %v1757_v35  ;;  %v1565_v62 = vperm.slane %v1562_v54, 1 }
 0x1e8   :  { %1704 = vmatmul.f32.vlgmr.msrb.gmra.mxu2 %v1432_v31  ;;  %1771 = vmatpush.msra.mxu0 %v1740_v50  ;;  %v1751_v31 = vld [vmem:[%s4244_s5 + $0xa8] sm:$0xff] }
 0x1e9   :  { %1718 = vmatpush.msrb.mxu3 %v1541_v63  ;;  %1791 = vmatpush.msra.mxu1 %v1756_v36 }
 0x1ea   :  { %1772 = vmatpush.msra.mxu0 %v1739_v0 }
 0x1eb   :  { %1719 = vmatpush.msrb.mxu3 %v1539_v2  ;;  %1792 = vmatpush.msra.mxu1 %v1755_v38 }
 0x1ec   :  { %1773 = vmatpush.msra.mxu0 %v1738_v39 }
 0x1ed   :  { %1720 = vmatpush.msrb.mxu3 %v1537_v61  ;;  %1793 = vmatpush.msra.mxu1 %v1754_v40 }
 0x1ee   :  { %1774 = vmatpush.msra.mxu0 %v1737_v41 }
 0x1ef   :  { %1721 = vmatpush.msrb.mxu3 %v1535_v3  ;;  %v1287_v5 = vpop.f32.mrf.mxu0  ;;  %1794 = vmatpush.msra.mxu1 %v1753_v20 }
 0x1f0   :  { %v1288_v10 = vadd.f32 %v1287_v5, %v752_v8  ;;  %v1307_v11 = vpop.f32.mrf.mxu1  ;;  %1775 = vmatpush.msra.mxu0 %v1736_v42 }
 0x1f1   :  { %1722 = vmatpush.msrb.mxu3 %v1533_v4  ;;  %1795 = vmatpush.msra.mxu1 %v1752_v29 }
 0x1f2   :  { %v1308_v9 = vadd.f32 %v1307_v11, %v1288_v10  ;;  %1776 = vmatpush.msra.mxu0 %v1735_v43 }
 0x1f3   :  { %1723 = vmatpush.msrb.mxu3 %v1531_v7  ;;  %v1327_v12 = vpop.f32.mrf.mxu2  ;;  %1796 = vmatpush.msra.mxu1 %v1751_v31 }
 0x1f4   :  { %v1328_v13 = vadd.f32 %v1327_v12, %v1308_v9  ;;  %v1347_v14 = vpop.f32.mrf.mxu3  ;;  %1777 = vmatpush.msra.mxu0 %v1734_v44 }
 0x1f5   :  { %1797 = vmatpush.msra.mxu1 %v1750_v48 }
 0x1f6   :  { %v1348_v33 = vadd.f32 %v1347_v14, %v1328_v13  ;;  %1778 = vmatpush.msra.mxu0 %v1733_v45  ;;  %v1838_v14 = vld [vmem:[%s4245_s6] ss:$0 sm:$0xff]  ;;  %s1869_s6 = smov [#allocation2]  }
 0x1f7   :  { %1798 = vmatpush.msra.mxu1 %v1749_v49  ;;  %s1826_s26 = sshll.u32 %s1869_s6, 4  ;;  %s1827_s26 = int_to_ptr.vmem [resolvable:$true] %s1826_s26 }
 0x1f8   :  { %1779 = vmatpush.msra.mxu0 %v1732_v47 }
 0x1f9   :  { %1799 = vmatpush.msra.mxu1 %v1748_v51 }
 0x1fa   :  { %1780 = vmatpush.msra.mxu0 %v1731_v24 }
 0x1fb   :  { %1800 = vmatpush.msra.mxu1 %v1747_v52 }
 0x1fc   :  { %1781 = vmatpush.msra.mxu0 %v1730_v46 }
 0x1fd   :  { %1801 = vmatpush.msra.mxu1 %v1746_v53 }
 0x217   :  { %v1367_v1 = vpop.f32.mrf.mxu0 }
 0x218   :  { %v1368_v15 = vadd.f32 %v1367_v1, %v1348_v33 }
 0x21d   :  { %v1387_v17 = vpop.f32.mrf.mxu1 }
 0x21e   :  { %v1388_v18 = vadd.f32 %v1387_v17, %v1368_v15 }
 0x21f   :  { %v1407_v19 = vpop.f32.mrf.mxu2 }
 0x220   :  { %v1408_v16 = vadd.f32 %v1407_v19, %v1388_v18 }
 0x222   :  { %v1427_v21 = vpop.f32.mrf.mxu3 }
 0x223   :  { %v1428_v22 = vadd.f32 %v1427_v21, %v1408_v16 }
 0x225   :  { %v1433_v23 = vmax.f32 %v1428_v22, 0.0 }
 0x227   :  { %1644 = vmatmul.f32.vlgmr.msra.gmra.mxu3 %v1433_v23 }
 0x22f   :  { %1724 = vmatmul.f32.vlgmr.msrb.gmra.mxu3 %v1433_v23 }
 0x238   :  { %v1585_v56 = vpop.f32.mrf.mxu0 }
 0x239   :  { %v1586_v57 = vadd.f32 %v1585_v56, %v1564_v55  ;;  %v1605_v59 = vpop.f32.mrf.mxu1 }
 0x23b   :  { %v1606_v60 = vadd.f32 %v1605_v59, %v1586_v57 }
 0x259   :  { %v1665_v63 = vpop.f32.mrf.mxu0  ;;  %v1685_v8 = vpop.f32.mrf.mxu1 }
 0x25a   :  { %v1666_v3 = vadd.f32 %v1665_v63, %v1565_v62 }
 0x25c   :  { %v1686_v10 = vadd.f32 %v1685_v8, %v1666_v3 }
 0x263   :  { %v1625_v58 = vpop.f32.mrf.mxu2 }
 0x264   :  { %v1626_v2 = vadd.f32 %v1625_v58, %v1606_v60 }
 0x26b   :  { %v1705_v5 = vpop.f32.mrf.mxu2 }
 0x26c   :  { %v1706_v11 = vadd.f32 %v1705_v5, %v1686_v10 }
 0x2aa   :  { %v1645_v61 = vpop.f32.mrf.mxu3 }
 0x2ab   :  { %v1646_v4 = vadd.f32 %v1645_v61, %v1626_v2 }
 0x2ad   :  { %v1728_v7 = vmax.f32 %v1646_v4, 0.0 }
 0x2af   :  { %1782 = vmatmul.f32.vlgmr.msra.gmra.mxu0 %v1728_v7 }
 0x2b2   :  { %v1725_v12 = vpop.f32.mrf.mxu3 }
 0x2b3   :  { %v1726_v9 = vadd.f32 %v1725_v12, %v1706_v11 }
 0x2b5   :  { %v1729_v13 = vmax.f32 %v1726_v9, 0.0 }
 0x2b7   :  { %1802 = vmatmul.f32.vlgmr.msra.gmra.mxu1 %v1729_v13 }
 0x32c   :  { %v1783_v33 = vpop.f32.mrf.mxu0 }
 0x32d   :  { %v1784_v1 = vadd.f32 %v1838_v14, %v1783_v33 }
 0x334   :  { %v1803_v15 = vpop.f32.mrf.mxu1 }
 0x335   :  { %v1804_v17 = vadd.f32 %v1803_v15, %v1784_v1 }
 0x337   :  { %v1807_v18 = vsel %vm1806_vm1, %v1804_v17, -inf }
 0x338   :  { %1808 = vmax.xlane.f32.xlu0 %v1807_v18 }
 0x3ab   :  { %v1809_v19 = vpop.xlane.xlu0 %1808 }
 0x3ac   :  { %v1810_v16 = vsub.f32 %v1804_v17, %v1809_v19 }
 0x3ae   :  { %v1811_v21 = vmul.f32 1.442695, %v1810_v16 }
 0x3b0   :  { %1839 = vpow2.f32 %v1811_v21 }
 0x3b6   :  { %v1840_v22 = vpop.eup %1839 }
 0x3b7   :  { %v1813_v23 = vsel %vm1806_vm1, %v1840_v22, 0.0 }
 0x3b8   :  { %1814 = vadd.xlane.f32.xlu0 %v1813_v23 }
 0x42b   :  { %v1815_v6 = vpop.xlane.xlu0 %1814 }
 0x42c   :  { %1841 = vlog2.f32 %v1815_v6 }
 0x432   :  { %v1842_v25 = vpop.eup %1841 }
 0x433   :  { %v1817_v27 = vmul.f32 0.6931472, %v1842_v25 }
 0x435   :  { %v1818_v26 = vadd.f32 %v1817_v27, %v1809_v19 }
 0x437   :  { %v1819_v28 = vsub.f32 %v1804_v17, %v1818_v26 }
 0x439   :  { %1820 = vst.msk [vmem:[#allocation2] sm:$0x3] %vm1806_vm1, %v1819_v28 }
 0x43a   :  { %1831 = dma.vmem_to_hbm [thread:$0]  %s1827_s26, 32, %s1829_s1, [#allocation3]  }
 0x43b   :  { %1867 = dma.done.wait [#allocation3], 32  }
 0x43c   :  { %1868 = vsyncadd [#allocation3], 4294967264 }
 0x43d   :  { %1836 = vsyncpa [#allocation3], 1 }

</bundles_post_ra>
